<compile_context>
chip_gen: v7x
topology: tpu7x:2x2x1
jax: 0.10.0
libtpu: 0.0.40
codegen_flags: <defaults>
</compile_context>

<pallas_src>
import jax
import jax.numpy as jnp
from jax import lax
from jax.experimental import pallas as pl
from jax.experimental.pallas import tpu as pltpu

_EPS = 1e-5  # torch.nn.LayerNorm default eps


def _layernorm(x, g, b):
    mu = jnp.mean(x, axis=-1, keepdims=True)
    var = jnp.mean((x - mu) ** 2, axis=-1, keepdims=True)
    return (x - mu) * lax.rsqrt(var + _EPS) * g + b


def _relu(x):
    return jnp.maximum(x, 0.0)


def _bf16(x):
    return x.astype(jnp.bfloat16)


# ---------------------------------------------------------------------------
# Fused all-layers kernel. Grid = (num_layers,), one step per layer.
#   msg_rows = [w1c, b1, g1, be1, b2, g2, be2]                (7, D) f32
#   pos_rows = [bp1, gp, bep, wp2_row, bp2_bcast]             (5, P) f32
#   upd_rows = [bu1, gu1, beu1, bu2, gu2, beu2]               (6, D) f32
# ---------------------------------------------------------------------------
def _egnn_fused_kernel(
    # resident graph constants / initial state
    s_src_ref, s_dst_ref, s_dstT_ref, h0_ref, pos0_ref, inv_deg_ref,
    # per-layer streamed weights (leading layer axis squeezed away)
    w1a_ref, w1b_ref, w2_ref, wp1_ref, wu1a_ref, wu1b_ref, wu2_ref,
    msg_rows_ref, pos_rows_ref, upd_rows_ref,
    # output
    pos_out_ref,
    # scratch: h / pos state, VMEM-resident across layers
    h_ref, pos_ref,
):
    layer = pl.program_id(0)

    @pl.when(layer == 0)
    def _init():
        h_ref[...] = h0_ref[...]
        pos_ref[...] = pos0_ref[...]

    mrows = msg_rows_ref[...]                       # (7, D)
    w1c, b1, g1, be1, b2, g2, be2 = [mrows[i:i + 1] for i in range(7)]
    prows = pos_rows_ref[...]                       # (5, P)
    bp1, gp, bep, wp2_row = [prows[i:i + 1] for i in range(4)]
    bp2 = prows[4:5, :1]                            # (1, 1)
    urows = upd_rows_ref[...]                       # (6, D)
    bu1, gu1, beu1, bu2, gu2, beu2 = [urows[i:i + 1] for i in range(6)]

    h = h_ref[...]                                  # (N, D) f32
    pos = pos_ref[...]                              # (N, 3) f32
    h_bf = _bf16(h)

    # First message linear folded into the gather; b1 folded into the
    # per-node precompute (exact for real edges, padded rows are discarded).
    hwa = jnp.dot(h_bf, w1a_ref[...], preferred_element_type=jnp.float32) + b1
    hwb = jnp.dot(h_bf, w1b_ref[...], preferred_element_type=jnp.float32)

    s_src = s_src_ref[...]                          # (E_pad, N) f32 one-hot
    s_dst = s_dst_ref[...]                          # (E_pad, N) f32 one-hot

    # --- geometry (exact f32 gathers) --------------------------------------
    pos_i = jnp.dot(s_dst, pos, preferred_element_type=jnp.float32)   # (E,3)
    pos_j = jnp.dot(s_src, pos, preferred_element_type=jnp.float32)   # (E,3)
    pos_diff = pos_i - pos_j
    dist = jnp.sqrt(jnp.sum(pos_diff * pos_diff, axis=-1, keepdims=True))

    # --- message MLP --------------------------------------------------------
    x = (jnp.dot(s_dst, hwa, preferred_element_type=jnp.float32)
         + jnp.dot(s_src, hwb, preferred_element_type=jnp.float32)
         + dist * w1c)                              # (E, D)
    x = _relu(_layernorm(x, g1, be1))
    x = jnp.dot(_bf16(x), w2_ref[...], preferred_element_type=jnp.float32) + b2
    msg = _relu(_layernorm(x, g2, be2))             # (E, D)

    # --- position MLP; final (P -> 1) projection on the VPU -----------------
    y = jnp.dot(_bf16(msg), wp1_ref[...], preferred_element_type=jnp.float32) + bp1
    y = _relu(_layernorm(y, gp, bep))               # (E, P)
    scale = jnp.sum(y * wp2_row, axis=-1, keepdims=True) + bp2          # (E,1)
    pos_msg = pos_diff * scale                      # (E, 3)

    # --- scatter via the pre-transposed one-hot (no in-kernel transpose) ----
    s_dstT = s_dstT_ref[...]                        # (N, E_pad) f32
    msg_aggr = jnp.dot(s_dstT, msg, preferred_element_type=jnp.float32)     # sum
    pos_aggr = (jnp.dot(s_dstT, pos_msg, preferred_element_type=jnp.float32)
                * inv_deg_ref[...])                                          # mean

    # --- node update MLP + residual -----------------------------------------
    xu = (jnp.dot(h_bf, wu1a_ref[...], preferred_element_type=jnp.float32)
          + jnp.dot(_bf16(msg_aggr), wu1b_ref[...],
                    preferred_element_type=jnp.float32)
          + bu1)
    xu = _relu(_layernorm(xu, gu1, beu1))
    xu = jnp.dot(_bf16(xu), wu2_ref[...], preferred_element_type=jnp.float32) + bu2
    h_upd = _relu(_layernorm(xu, gu2, beu2))

    h_new = h + h_upd                               # residual=True
    pos_new = pos + pos_aggr

    h_ref[...] = h_new
    pos_ref[...] = pos_new
    # Output block has a constant index map (resident); writing it every step
    # is ~0.75 KB and keeps the final HBM writeback valid regardless of when
    # Pallas chooses to write back.
    pos_out_ref[...] = pos_new


def _resident(shape):
    zeros = (0,) * len(shape)
    return pl.BlockSpec(shape, lambda l, z=zeros: z)


def _per_layer(shape):
    zeros = (0,) * len(shape)
    return pl.BlockSpec((None,) + shape, lambda l, z=zeros: (l,) + z)


def _vmem_budget_bytes(N, E_pad, D, P):
    resident = 3 * E_pad * N * 4 + N * D * 4 + 2 * N * 3 * 4 + N * 4
    per_layer_w = 7 * D * D * 2 + D * P * 2 + (7 + 6) * D * 4 + 5 * P * 4
    weights = 2 * per_layer_w                      # double-buffered over layers
    scratch = N * D * 4 + N * 3 * 4
    temps = 8 * E_pad * max(D, 128) * 4            # per-edge intermediates headroom
    total = resident + weights + scratch + temps
    # Generous 2x safety margin, floor of 8 MiB; still far under v7x's 64 MiB.
    return int(min(max(2 * total, 8 * 1024 * 1024), 96 * 1024 * 1024))


def egnn_model(h, pos, s_src, s_dst, s_dstT, inv_deg, params):
    """EGNNModel.forward (all layers fused into one pallas_call); returns pos."""
    E_pad, N = s_src.shape
    D = h.shape[1]
    L, _, P = params["wp1"].shape

    grid_spec = pltpu.PrefetchScalarGridSpec(
        num_scalar_prefetch=0,
        grid=(L,),
        in_specs=[
            _resident((E_pad, N)),     # s_src  (gather of source nodes)
            _resident((E_pad, N)),     # s_dst  (gather of dest nodes)
            _resident((N, E_pad)),     # s_dstT (scatter to dest nodes)
            _resident((N, D)),         # h0
            _resident((N, 3)),         # pos0
            _resident((N, 1)),         # inv_deg
            _per_layer((D, D)),        # w1a
            _per_layer((D, D)),        # w1b
            _per_layer((D, D)),        # w2
            _per_layer((D, P)),        # wp1
            _per_layer((D, D)),        # wu1a
            _per_layer((D, D)),        # wu1b
            _per_layer((D, D)),        # wu2
            _per_layer((7, D)),        # msg_rows
            _per_layer((5, P)),        # pos_rows
            _per_layer((6, D)),        # upd_rows
        ],
        out_specs=pl.BlockSpec((N, 3), lambda l: (0, 0)),
        scratch_shapes=[
            pltpu.VMEM((N, D), jnp.float32),   # h state across layers
            pltpu.VMEM((N, 3), jnp.float32),   # pos state across layers
        ],
    )

    flops = 2 * L * (
        2 * N * D * D            # per-layer h @ W1a / W1b precompute
        + 2 * E_pad * N * D      # feature gathers (fused first message linear)
        + 2 * E_pad * N * 3      # position gathers
        + E_pad * D * D          # message linear 2
        + E_pad * D * P          # position linear 1
        + E_pad * P              # position linear 2 (VPU reduce)
        + E_pad * N * D          # message scatter
        + E_pad * N * 3          # position scatter
        + 3 * N * D * D          # node-update MLP
    )
    weight_bytes_per_layer = (7 * D * D * 2 + D * P * 2
                              + (7 + 6) * D * 4 + 5 * P * 4)
    bytes_accessed = (3 * E_pad * N * 4 + N * D * 4 + 2 * N * 3 * 4 + N * 4
                      + L * weight_bytes_per_layer)
    cost = pl.CostEstimate(flops=int(flops),
                           transcendentals=int(L * (4 * E_pad + 2 * N)),
                           bytes_accessed=int(bytes_accessed))

    pos_out = pl.pallas_call(
        _egnn_fused_kernel,
        out_shape=jax.ShapeDtypeStruct((N, 3), jnp.float32),
        grid_spec=grid_spec,
        compiler_params=pltpu.CompilerParams(
            # Layers depend on each other -> sequential axis.
            dimension_semantics=("arbitrary",),
            vmem_limit_bytes=_vmem_budget_bytes(N, E_pad, D, P),
        ),
        cost_estimate=cost,
    )(s_src, s_dst, s_dstT, h, pos, inv_deg,
      params["w1a"], params["w1b"], params["w2"], params["wp1"],
      params["wu1a"], params["wu1b"], params["wu2"],
      params["msg_rows"], params["pos_rows"], params["upd_rows"])
    return pos_out


# ---------------------------------------------------------------------------
# Graph constants (computed once, reused by every layer).
# ---------------------------------------------------------------------------
def build_graph_constants(src, dst, num_nodes, edge_align=256):
    """One-hot gather/scatter matrices (f32, exact) + 1/deg for mean aggregation.

    E is padded to a multiple of `edge_align` (256 fills the MXU M dim on
    v6e/v7x and is a multiple of 128 for v5e); padded rows/columns are all
    zero so they contribute nothing.
    """
    E = src.shape[0]
    E_pad = ((E + edge_align - 1) // edge_align) * edge_align
    rows = jnp.arange(E)
    s_src = jnp.zeros((E_pad, num_nodes), jnp.float32).at[rows, src].set(1.0)
    s_dst = jnp.zeros((E_pad, num_nodes), jnp.float32).at[rows, dst].set(1.0)
    s_dstT = jnp.zeros((num_nodes, E_pad), jnp.float32).at[dst, rows].set(1.0)
    deg = jnp.zeros((num_nodes,), jnp.float32).at[dst].add(1.0)
    inv_deg = (1.0 / jnp.maximum(deg, 1.0)).reshape(num_nodes, 1)
    return s_src, s_dst, s_dstT, inv_deg


# ---------------------------------------------------------------------------
# Parameter init (torch.nn.Linear default U(-1/sqrt(fan_in), .), LN gamma=1,
# beta=0).  PyTorch Linear weight is (out, in); we store the transpose so the
# kernel computes x @ W.  MXU weights in bf16; biases / LN rows / one-hots f32.
# ---------------------------------------------------------------------------
def _linear_params(key, fan_in, fan_out):
    kw, kb = jax.random.split(key)
    bound = 1.0 / float(fan_in) ** 0.5
    w = jax.random.uniform(kw, (fan_in, fan_out), jnp.float32, -bound, bound)
    b = jax.random.uniform(kb, (1, fan_out), jnp.float32, -bound, bound)
    return w, b


def init_layer_params(key, emb_dim, proj_dim):
    D, P = emb_dim, proj_dim
    keys = jax.random.split(key, 6)
    ones = lambda n: jnp.ones((1, n), jnp.float32)
    zeros = lambda n: jnp.zeros((1, n), jnp.float32)

    w1, b1 = _linear_params(keys[0], 2 * D + 1, D)   # mlp_msg layer 1
    w2, b2 = _linear_params(keys[1], D, D)           # mlp_msg layer 2
    wp1, bp1 = _linear_params(keys[2], D, P)         # mlp_pos layer 1
    wp2, bp2 = _linear_params(keys[3], P, 1)         # mlp_pos layer 2
    wu1, bu1 = _linear_params(keys[4], 2 * D, D)     # mlp_upd layer 1
    wu2, bu2 = _linear_params(keys[5], D, D)         # mlp_upd layer 2

    msg_rows = jnp.concatenate(
        [w1[2 * D:2 * D + 1], b1, ones(D), zeros(D), b2, ones(D), zeros(D)],
        axis=0)                                       # (7, D)
    pos_rows = jnp.concatenate(
        [bp1, ones(P), zeros(P), wp2.reshape(1, P),
         bp2 * jnp.ones((1, P), jnp.float32)], axis=0)  # (5, P)
    upd_rows = jnp.concatenate(
        [bu1, ones(D), zeros(D), bu2, ones(D), zeros(D)], axis=0)  # (6, D)

    return dict(
        w1a=_bf16(w1[:D]), w1b=_bf16(w1[D:2 * D]), w2=_bf16(w2), wp1=_bf16(wp1),
        wu1a=_bf16(wu1[:D]), wu1b=_bf16(wu1[D:]), wu2=_bf16(wu2),
        msg_rows=msg_rows, pos_rows=pos_rows, upd_rows=upd_rows)


def init_model_params(key, num_layers, emb_dim, proj_dim):
    per_layer = [init_layer_params(k, emb_dim, proj_dim)
                 for k in jax.random.split(key, num_layers)]
    # Stack along a leading layer axis; the kernel grid streams one slice/layer.
    return {name: jnp.stack([p[name] for p in per_layer])
            for name in per_layer[0]}


if __name__ == "__main__":
    key = jax.random.PRNGKey(0)
    # nodes, edges, emb_dim (lane-dense 128), proj_dim, layers
    N, E, D, P, L = 64, 200, 128, 16, 3

    k_pos, k_src, k_dst, k_params = jax.random.split(key, 4)
    pos = jax.random.normal(k_pos, (N, 3), jnp.float32)
    src = jax.random.randint(k_src, (E,), 0, N)
    dst = jax.random.randint(k_dst, (E,), 0, N)
    h = jnp.ones((N, D), jnp.float32)                # batch.x is None path

    s_src, s_dst, s_dstT, inv_deg = build_graph_constants(src, dst, N)
    params = init_model_params(k_params, L, D, P)

    fwd = jax.jit(egnn_model)
    out_pos = fwd(h, pos, s_src, s_dst, s_dstT, inv_deg, params)
    out_pos = jax.block_until_ready(out_pos)

    assert out_pos.shape == (N, 3) and out_pos.dtype == jnp.float32
    assert bool(jnp.all(jnp.isfinite(out_pos)))
    print("KERNEL_OK")
</pallas_src>

<mosaic_0001>
module attributes {stable_mosaic.version = 11 : i64} {
  func.func @_egnn_fused_kernel(%arg0: i32, %arg1: memref<256x64xf32, #tpu.memory_space<vmem>>, %arg2: memref<256x64xf32, #tpu.memory_space<vmem>>, %arg3: memref<64x256xf32, #tpu.memory_space<vmem>>, %arg4: memref<64x128xf32, #tpu.memory_space<vmem>>, %arg5: memref<64x3xf32, #tpu.memory_space<vmem>>, %arg6: memref<64x1xf32, #tpu.memory_space<vmem>>, %arg7: memref<1x128x128xbf16, #tpu.memory_space<vmem>>, %arg8: memref<1x128x128xbf16, #tpu.memory_space<vmem>>, %arg9: memref<1x128x128xbf16, #tpu.memory_space<vmem>>, %arg10: memref<1x128x16xbf16, #tpu.memory_space<vmem>>, %arg11: memref<1x128x128xbf16, #tpu.memory_space<vmem>>, %arg12: memref<1x128x128xbf16, #tpu.memory_space<vmem>>, %arg13: memref<1x128x128xbf16, #tpu.memory_space<vmem>>, %arg14: memref<1x7x128xf32, #tpu.memory_space<vmem>>, %arg15: memref<1x5x16xf32, #tpu.memory_space<vmem>>, %arg16: memref<1x6x128xf32, #tpu.memory_space<vmem>>, %arg17: memref<64x3xf32, #tpu.memory_space<vmem>>, %arg18: memref<64x128xf32, #tpu.memory_space<vmem>>, %arg19: memref<64x3xf32, #tpu.memory_space<vmem>>) attributes {dimension_semantics = [#tpu.dimension_semantics<arbitrary>], iteration_bounds = array<i64: 3>, scalar_prefetch = 0 : i64, scratch_operands = 2 : i64, tpu.core_type = #tpu.core_type<tc>, window_params = [{pipeline_mode = #tpu.pipeline_mode<synchronous>, transform_indices = @transform_0, window_bounds = array<i64: 256, 64>}, {pipeline_mode = #tpu.pipeline_mode<synchronous>, transform_indices = @transform_1, window_bounds = array<i64: 256, 64>}, {pipeline_mode = #tpu.pipeline_mode<synchronous>, transform_indices = @transform_2, window_bounds = array<i64: 64, 256>}, {pipeline_mode = #tpu.pipeline_mode<synchronous>, transform_indices = @transform_3, window_bounds = array<i64: 64, 128>}, {pipeline_mode = #tpu.pipeline_mode<synchronous>, transform_indices = @transform_4, window_bounds = array<i64: 64, 3>}, {pipeline_mode = #tpu.pipeline_mode<synchronous>, transform_indices = @transform_5, window_bounds = array<i64: 64, 1>}, {transform_indices = @transform_6, window_bounds = array<i64: 1, 128, 128>}, {transform_indices = @transform_7, window_bounds = array<i64: 1, 128, 128>}, {transform_indices = @transform_8, window_bounds = array<i64: 1, 128, 128>}, {transform_indices = @transform_9, window_bounds = array<i64: 1, 128, 16>}, {transform_indices = @transform_10, window_bounds = array<i64: 1, 128, 128>}, {transform_indices = @transform_11, window_bounds = array<i64: 1, 128, 128>}, {transform_indices = @transform_12, window_bounds = array<i64: 1, 128, 128>}, {transform_indices = @transform_13, window_bounds = array<i64: 1, 7, 128>}, {transform_indices = @transform_14, window_bounds = array<i64: 1, 5, 16>}, {transform_indices = @transform_15, window_bounds = array<i64: 1, 6, 128>}, {pipeline_mode = #tpu.pipeline_mode<synchronous>, transform_indices = @transform_16, window_bounds = array<i64: 64, 3>}]} {
    %c0_i32 = arith.constant 0 : i32
    %0 = arith.cmpi eq, %arg0, %c0_i32 : i32
    %1 = arith.extui %0 : i1 to i32
    %c0_i32_0 = arith.constant 0 : i32
    %2 = arith.cmpi ne, %1, %c0_i32_0 : i32
    scf.if %2 {
      %c0_92 = arith.constant 0 : index
      %c0_93 = arith.constant 0 : index
      %221 = vector.load %arg4[%c0_92, %c0_93] : memref<64x128xf32, #tpu.memory_space<vmem>>, vector<64x128xf32>
      %c0_94 = arith.constant 0 : index
      %c0_95 = arith.constant 0 : index
      %222 = vector.load %arg18[%c0_94, %c0_95] : memref<64x128xf32, #tpu.memory_space<vmem>>, vector<64x128xf32>
      tpu.vector_store %arg18[%c0_94, %c0_95], %221 {strides = array<i32>} : memref<64x128xf32, #tpu.memory_space<vmem>>, vector<64x128xf32>,
      %c0_96 = arith.constant 0 : index
      %c0_97 = arith.constant 0 : index
      %223 = vector.load %arg5[%c0_96, %c0_97] : memref<64x3xf32, #tpu.memory_space<vmem>>, vector<64x3xf32>
      %c0_98 = arith.constant 0 : index
      %c0_99 = arith.constant 0 : index
      %224 = vector.load %arg19[%c0_98, %c0_99] : memref<64x3xf32, #tpu.memory_space<vmem>>, vector<64x3xf32>
      tpu.vector_store %arg19[%c0_98, %c0_99], %223 {strides = array<i32>} : memref<64x3xf32, #tpu.memory_space<vmem>>, vector<64x3xf32>,
    } else {
    }
    %c0 = arith.constant 0 : index
    %c0_1 = arith.constant 0 : index
    %c0_2 = arith.constant 0 : index
    %3 = vector.load %arg14[%c0, %c0_1, %c0_2] : memref<1x7x128xf32, #tpu.memory_space<vmem>>, vector<1x7x128xf32>
    %4 = vector.shape_cast %3 : vector<1x7x128xf32> to vector<7x128xf32>
    %5 = vector.extract_strided_slice %4 {offsets = [0, 0], sizes = [1, 128], strides = [1, 1]} : vector<7x128xf32> to vector<1x128xf32>
    %6 = vector.extract_strided_slice %4 {offsets = [1, 0], sizes = [1, 128], strides = [1, 1]} : vector<7x128xf32> to vector<1x128xf32>
    %7 = vector.extract_strided_slice %4 {offsets = [2, 0], sizes = [1, 128], strides = [1, 1]} : vector<7x128xf32> to vector<1x128xf32>
    %8 = vector.extract_strided_slice %4 {offsets = [3, 0], sizes = [1, 128], strides = [1, 1]} : vector<7x128xf32> to vector<1x128xf32>
    %9 = vector.extract_strided_slice %4 {offsets = [4, 0], sizes = [1, 128], strides = [1, 1]} : vector<7x128xf32> to vector<1x128xf32>
    %10 = vector.extract_strided_slice %4 {offsets = [5, 0], sizes = [1, 128], strides = [1, 1]} : vector<7x128xf32> to vector<1x128xf32>
    %11 = vector.extract_strided_slice %4 {offsets = [6, 0], sizes = [1, 128], strides = [1, 1]} : vector<7x128xf32> to vector<1x128xf32>
    %c0_3 = arith.constant 0 : index
    %c0_4 = arith.constant 0 : index
    %c0_5 = arith.constant 0 : index
    %12 = vector.load %arg15[%c0_3, %c0_4, %c0_5] : memref<1x5x16xf32, #tpu.memory_space<vmem>>, vector<1x5x16xf32>
    %13 = vector.shape_cast %12 : vector<1x5x16xf32> to vector<5x16xf32>
    %14 = vector.extract_strided_slice %13 {offsets = [0, 0], sizes = [1, 16], strides = [1, 1]} : vector<5x16xf32> to vector<1x16xf32>
    %15 = vector.extract_strided_slice %13 {offsets = [1, 0], sizes = [1, 16], strides = [1, 1]} : vector<5x16xf32> to vector<1x16xf32>
    %16 = vector.extract_strided_slice %13 {offsets = [2, 0], sizes = [1, 16], strides = [1, 1]} : vector<5x16xf32> to vector<1x16xf32>
    %17 = vector.extract_strided_slice %13 {offsets = [3, 0], sizes = [1, 16], strides = [1, 1]} : vector<5x16xf32> to vector<1x16xf32>
    %18 = vector.extract_strided_slice %13 {offsets = [4, 0], sizes = [1, 1], strides = [1, 1]} : vector<5x16xf32> to vector<1x1xf32>
    %c0_6 = arith.constant 0 : index
    %c0_7 = arith.constant 0 : index
    %c0_8 = arith.constant 0 : index
    %19 = vector.load %arg16[%c0_6, %c0_7, %c0_8] : memref<1x6x128xf32, #tpu.memory_space<vmem>>, vector<1x6x128xf32>
    %20 = vector.shape_cast %19 : vector<1x6x128xf32> to vector<6x128xf32>
    %21 = vector.extract_strided_slice %20 {offsets = [0, 0], sizes = [1, 128], strides = [1, 1]} : vector<6x128xf32> to vector<1x128xf32>
    %22 = vector.extract_strided_slice %20 {offsets = [1, 0], sizes = [1, 128], strides = [1, 1]} : vector<6x128xf32> to vector<1x128xf32>
    %23 = vector.extract_strided_slice %20 {offsets = [2, 0], sizes = [1, 128], strides = [1, 1]} : vector<6x128xf32> to vector<1x128xf32>
    %24 = vector.extract_strided_slice %20 {offsets = [3, 0], sizes = [1, 128], strides = [1, 1]} : vector<6x128xf32> to vector<1x128xf32>
    %25 = vector.extract_strided_slice %20 {offsets = [4, 0], sizes = [1, 128], strides = [1, 1]} : vector<6x128xf32> to vector<1x128xf32>
    %26 = vector.extract_strided_slice %20 {offsets = [5, 0], sizes = [1, 128], strides = [1, 1]} : vector<6x128xf32> to vector<1x128xf32>
    %c0_9 = arith.constant 0 : index
    %c0_10 = arith.constant 0 : index
    %27 = vector.load %arg18[%c0_9, %c0_10] : memref<64x128xf32, #tpu.memory_space<vmem>>, vector<64x128xf32>
    %c0_11 = arith.constant 0 : index
    %c0_12 = arith.constant 0 : index
    %28 = vector.load %arg19[%c0_11, %c0_12] : memref<64x3xf32, #tpu.memory_space<vmem>>, vector<64x3xf32>
    %29 = arith.truncf %27 : vector<64x128xf32> to vector<64x128xbf16>
    %c0_13 = arith.constant 0 : index
    %c0_14 = arith.constant 0 : index
    %c0_15 = arith.constant 0 : index
    %30 = vector.load %arg7[%c0_13, %c0_14, %c0_15] : memref<1x128x128xbf16, #tpu.memory_space<vmem>>, vector<1x128x128xbf16>
    %31 = vector.shape_cast %30 : vector<1x128x128xbf16> to vector<128x128xbf16>
    %cst = arith.constant dense<0.000000e+00> : vector<64x128xf32>
    %32 = tpu.matmul %29, %31, %cst {dimension_numbers = #tpu.dot_dimension_numbers<[1], [0], [0], [1], [0, 0, 1, 1], [], []>} : vector<64x128xbf16>, vector<128x128xbf16>, vector<64x128xf32> -> vector<64x128xf32>
    %33 = vector.broadcast %6 : vector<1x128xf32> to vector<64x128xf32>
    %34 = arith.addf %32, %33 : vector<64x128xf32>
    %c0_16 = arith.constant 0 : index
    %c0_17 = arith.constant 0 : index
    %c0_18 = arith.constant 0 : index
    %35 = vector.load %arg8[%c0_16, %c0_17, %c0_18] : memref<1x128x128xbf16, #tpu.memory_space<vmem>>, vector<1x128x128xbf16>
    %36 = vector.shape_cast %35 : vector<1x128x128xbf16> to vector<128x128xbf16>
    %cst_19 = arith.constant dense<0.000000e+00> : vector<64x128xf32>
    %37 = tpu.matmul %29, %36, %cst_19 {dimension_numbers = #tpu.dot_dimension_numbers<[1], [0], [0], [1], [0, 0, 1, 1], [], []>} : vector<64x128xbf16>, vector<128x128xbf16>, vector<64x128xf32> -> vector<64x128xf32>
    %c0_20 = arith.constant 0 : index
    %c0_21 = arith.constant 0 : index
    %38 = vector.load %arg1[%c0_20, %c0_21] : memref<256x64xf32, #tpu.memory_space<vmem>>, vector<256x64xf32>
    %c0_22 = arith.constant 0 : index
    %c0_23 = arith.constant 0 : index
    %39 = vector.load %arg2[%c0_22, %c0_23] : memref<256x64xf32, #tpu.memory_space<vmem>>, vector<256x64xf32>
    %cst_24 = arith.constant dense<0.000000e+00> : vector<256x3xf32>
    %40 = tpu.matmul %39, %28, %cst_24 {dimension_numbers = #tpu.dot_dimension_numbers<[1], [0], [0], [1], [0, 0, 1, 1], [], []>} : vector<256x64xf32>, vector<64x3xf32>, vector<256x3xf32> -> vector<256x3xf32>
    %cst_25 = arith.constant dense<0.000000e+00> : vector<256x3xf32>
    %41 = tpu.matmul %38, %28, %cst_25 {dimension_numbers = #tpu.dot_dimension_numbers<[1], [0], [0], [1], [0, 0, 1, 1], [], []>} : vector<256x64xf32>, vector<64x3xf32>, vector<256x3xf32> -> vector<256x3xf32>
    %42 = arith.subf %40, %41 : vector<256x3xf32>
    %43 = arith.mulf %42, %42 : vector<256x3xf32>
    %cst_26 = arith.constant dense<0.000000e+00> : vector<256xf32>
    %44 = vector.multi_reduction <add>, %43, %cst_26 [1] : vector<256x3xf32> to vector<256xf32>
    %45 = vector.shape_cast %44 : vector<256xf32> to vector<256x1xf32>
    %46 = math.sqrt %45 : vector<256x1xf32>
    %cst_27 = arith.constant dense<0.000000e+00> : vector<256x128xf32>
    %47 = tpu.matmul %39, %34, %cst_27 {dimension_numbers = #tpu.dot_dimension_numbers<[1], [0], [0], [1], [0, 0, 1, 1], [], []>} : vector<256x64xf32>, vector<64x128xf32>, vector<256x128xf32> -> vector<256x128xf32>
    %cst_28 = arith.constant dense<0.000000e+00> : vector<256x128xf32>
    %48 = tpu.matmul %38, %37, %cst_28 {dimension_numbers = #tpu.dot_dimension_numbers<[1], [0], [0], [1], [0, 0, 1, 1], [], []>} : vector<256x64xf32>, vector<64x128xf32>, vector<256x128xf32> -> vector<256x128xf32>
    %49 = arith.addf %47, %48 : vector<256x128xf32>
    %50 = vector.broadcast %46 : vector<256x1xf32> to vector<256x128xf32>
    %51 = vector.broadcast %5 : vector<1x128xf32> to vector<256x128xf32>
    %52 = arith.mulf %50, %51 : vector<256x128xf32>
    %53 = arith.addf %49, %52 : vector<256x128xf32>
    %cst_29 = arith.constant dense<0.000000e+00> : vector<256xf32>
    %54 = vector.multi_reduction <add>, %53, %cst_29 [1] : vector<256x128xf32> to vector<256xf32>
    %55 = vector.shape_cast %54 : vector<256xf32> to vector<256x1xf32>
    %cst_30 = arith.constant 1.280000e+02 : f32
    %56 = vector.broadcast %cst_30 : f32 to vector<256x1xf32>
    %57 = arith.divf %55, %56 : vector<256x1xf32>
    %58 = vector.broadcast %57 : vector<256x1xf32> to vector<256x128xf32>
    %59 = arith.subf %53, %58 : vector<256x128xf32>
    %60 = arith.mulf %59, %59 : vector<256x128xf32>
    %cst_31 = arith.constant dense<0.000000e+00> : vector<256xf32>
    %61 = vector.multi_reduction <add>, %60, %cst_31 [1] : vector<256x128xf32> to vector<256xf32>
    %62 = vector.shape_cast %61 : vector<256xf32> to vector<256x1xf32>
    %cst_32 = arith.constant 1.280000e+02 : f32
    %63 = vector.broadcast %cst_32 : f32 to vector<256x1xf32>
    %64 = arith.divf %62, %63 : vector<256x1xf32>
    %65 = vector.broadcast %57 : vector<256x1xf32> to vector<256x128xf32>
    %66 = arith.subf %53, %65 : vector<256x128xf32>
    %cst_33 = arith.constant 9.99999974E-6 : f32
    %67 = vector.broadcast %cst_33 : f32 to vector<256x1xf32>
    %68 = arith.addf %64, %67 : vector<256x1xf32>
    %69 = math.rsqrt %68 : vector<256x1xf32>
    %70 = vector.broadcast %69 : vector<256x1xf32> to vector<256x128xf32>
    %71 = arith.mulf %66, %70 : vector<256x128xf32>
    %72 = vector.broadcast %7 : vector<1x128xf32> to vector<256x128xf32>
    %73 = arith.mulf %71, %72 : vector<256x128xf32>
    %74 = vector.broadcast %8 : vector<1x128xf32> to vector<256x128xf32>
    %75 = arith.addf %73, %74 : vector<256x128xf32>
    %cst_34 = arith.constant 0.000000e+00 : f32
    %76 = vector.broadcast %cst_34 : f32 to vector<256x128xf32>
    %77 = arith.maximumf %75, %76 : vector<256x128xf32>
    %78 = arith.truncf %77 : vector<256x128xf32> to vector<256x128xbf16>
    %c0_35 = arith.constant 0 : index
    %c0_36 = arith.constant 0 : index
    %c0_37 = arith.constant 0 : index
    %79 = vector.load %arg9[%c0_35, %c0_36, %c0_37] : memref<1x128x128xbf16, #tpu.memory_space<vmem>>, vector<1x128x128xbf16>
    %80 = vector.shape_cast %79 : vector<1x128x128xbf16> to vector<128x128xbf16>
    %cst_38 = arith.constant dense<0.000000e+00> : vector<256x128xf32>
    %81 = tpu.matmul %78, %80, %cst_38 {dimension_numbers = #tpu.dot_dimension_numbers<[1], [0], [0], [1], [0, 0, 1, 1], [], []>} : vector<256x128xbf16>, vector<128x128xbf16>, vector<256x128xf32> -> vector<256x128xf32>
    %82 = vector.broadcast %9 : vector<1x128xf32> to vector<256x128xf32>
    %83 = arith.addf %81, %82 : vector<256x128xf32>
    %cst_39 = arith.constant dense<0.000000e+00> : vector<256xf32>
    %84 = vector.multi_reduction <add>, %83, %cst_39 [1] : vector<256x128xf32> to vector<256xf32>
    %85 = vector.shape_cast %84 : vector<256xf32> to vector<256x1xf32>
    %cst_40 = arith.constant 1.280000e+02 : f32
    %86 = vector.broadcast %cst_40 : f32 to vector<256x1xf32>
    %87 = arith.divf %85, %86 : vector<256x1xf32>
    %88 = vector.broadcast %87 : vector<256x1xf32> to vector<256x128xf32>
    %89 = arith.subf %83, %88 : vector<256x128xf32>
    %90 = arith.mulf %89, %89 : vector<256x128xf32>
    %cst_41 = arith.constant dense<0.000000e+00> : vector<256xf32>
    %91 = vector.multi_reduction <add>, %90, %cst_41 [1] : vector<256x128xf32> to vector<256xf32>
    %92 = vector.shape_cast %91 : vector<256xf32> to vector<256x1xf32>
    %cst_42 = arith.constant 1.280000e+02 : f32
    %93 = vector.broadcast %cst_42 : f32 to vector<256x1xf32>
    %94 = arith.divf %92, %93 : vector<256x1xf32>
    %95 = vector.broadcast %87 : vector<256x1xf32> to vector<256x128xf32>
    %96 = arith.subf %83, %95 : vector<256x128xf32>
    %cst_43 = arith.constant 9.99999974E-6 : f32
    %97 = vector.broadcast %cst_43 : f32 to vector<256x1xf32>
    %98 = arith.addf %94, %97 : vector<256x1xf32>
    %99 = math.rsqrt %98 : vector<256x1xf32>
    %100 = vector.broadcast %99 : vector<256x1xf32> to vector<256x128xf32>
    %101 = arith.mulf %96, %100 : vector<256x128xf32>
    %102 = vector.broadcast %10 : vector<1x128xf32> to vector<256x128xf32>
    %103 = arith.mulf %101, %102 : vector<256x128xf32>
    %104 = vector.broadcast %11 : vector<1x128xf32> to vector<256x128xf32>
    %105 = arith.addf %103, %104 : vector<256x128xf32>
    %cst_44 = arith.constant 0.000000e+00 : f32
    %106 = vector.broadcast %cst_44 : f32 to vector<256x128xf32>
    %107 = arith.maximumf %105, %106 : vector<256x128xf32>
    %108 = arith.truncf %107 : vector<256x128xf32> to vector<256x128xbf16>
    %c0_45 = arith.constant 0 : index
    %c0_46 = arith.constant 0 : index
    %c0_47 = arith.constant 0 : index
    %109 = vector.load %arg10[%c0_45, %c0_46, %c0_47] : memref<1x128x16xbf16, #tpu.memory_space<vmem>>, vector<1x128x16xbf16>
    %110 = vector.shape_cast %109 : vector<1x128x16xbf16> to vector<128x16xbf16>
    %cst_48 = arith.constant dense<0.000000e+00> : vector<256x16xf32>
    %111 = tpu.matmul %108, %110, %cst_48 {dimension_numbers = #tpu.dot_dimension_numbers<[1], [0], [0], [1], [0, 0, 1, 1], [], []>} : vector<256x128xbf16>, vector<128x16xbf16>, vector<256x16xf32> -> vector<256x16xf32>
    %112 = vector.broadcast %14 : vector<1x16xf32> to vector<256x16xf32>
    %113 = arith.addf %111, %112 : vector<256x16xf32>
    %cst_49 = arith.constant dense<0.000000e+00> : vector<256xf32>
    %114 = vector.multi_reduction <add>, %113, %cst_49 [1] : vector<256x16xf32> to vector<256xf32>
    %115 = vector.shape_cast %114 : vector<256xf32> to vector<256x1xf32>
    %cst_50 = arith.constant 1.600000e+01 : f32
    %116 = vector.broadcast %cst_50 : f32 to vector<256x1xf32>
    %117 = arith.divf %115, %116 : vector<256x1xf32>
    %118 = vector.broadcast %117 : vector<256x1xf32> to vector<256x16xf32>
    %119 = arith.subf %113, %118 : vector<256x16xf32>
    %120 = arith.mulf %119, %119 : vector<256x16xf32>
    %cst_51 = arith.constant dense<0.000000e+00> : vector<256xf32>
    %121 = vector.multi_reduction <add>, %120, %cst_51 [1] : vector<256x16xf32> to vector<256xf32>
    %122 = vector.shape_cast %121 : vector<256xf32> to vector<256x1xf32>
    %cst_52 = arith.constant 1.600000e+01 : f32
    %123 = vector.broadcast %cst_52 : f32 to vector<256x1xf32>
    %124 = arith.divf %122, %123 : vector<256x1xf32>
    %125 = vector.broadcast %117 : vector<256x1xf32> to vector<256x16xf32>
    %126 = arith.subf %113, %125 : vector<256x16xf32>
    %cst_53 = arith.constant 9.99999974E-6 : f32
    %127 = vector.broadcast %cst_53 : f32 to vector<256x1xf32>
    %128 = arith.addf %124, %127 : vector<256x1xf32>
    %129 = math.rsqrt %128 : vector<256x1xf32>
    %130 = vector.broadcast %129 : vector<256x1xf32> to vector<256x16xf32>
    %131 = arith.mulf %126, %130 : vector<256x16xf32>
    %132 = vector.broadcast %15 : vector<1x16xf32> to vector<256x16xf32>
    %133 = arith.mulf %131, %132 : vector<256x16xf32>
    %134 = vector.broadcast %16 : vector<1x16xf32> to vector<256x16xf32>
    %135 = arith.addf %133, %134 : vector<256x16xf32>
    %cst_54 = arith.constant 0.000000e+00 : f32
    %136 = vector.broadcast %cst_54 : f32 to vector<256x16xf32>
    %137 = arith.maximumf %135, %136 : vector<256x16xf32>
    %138 = vector.broadcast %17 : vector<1x16xf32> to vector<256x16xf32>
    %139 = arith.mulf %137, %138 : vector<256x16xf32>
    %cst_55 = arith.constant dense<0.000000e+00> : vector<256xf32>
    %140 = vector.multi_reduction <add>, %139, %cst_55 [1] : vector<256x16xf32> to vector<256xf32>
    %141 = vector.shape_cast %140 : vector<256xf32> to vector<256x1xf32>
    %142 = vector.broadcast %18 : vector<1x1xf32> to vector<256x1xf32>
    %143 = arith.addf %141, %142 : vector<256x1xf32>
    %144 = vector.broadcast %143 : vector<256x1xf32> to vector<256x3xf32>
    %145 = arith.mulf %42, %144 : vector<256x3xf32>
    %c0_56 = arith.constant 0 : index
    %c0_57 = arith.constant 0 : index
    %146 = vector.load %arg3[%c0_56, %c0_57] : memref<64x256xf32, #tpu.memory_space<vmem>>, vector<64x256xf32>
    %cst_58 = arith.constant dense<0.000000e+00> : vector<64x128xf32>
    %147 = tpu.matmul %146, %107, %cst_58 {dimension_numbers = #tpu.dot_dimension_numbers<[1], [0], [0], [1], [0, 0, 1, 1], [], []>} : vector<64x256xf32>, vector<256x128xf32>, vector<64x128xf32> -> vector<64x128xf32>
    %cst_59 = arith.constant dense<0.000000e+00> : vector<64x3xf32>
    %148 = tpu.matmul %146, %145, %cst_59 {dimension_numbers = #tpu.dot_dimension_numbers<[1], [0], [0], [1], [0, 0, 1, 1], [], []>} : vector<64x256xf32>, vector<256x3xf32>, vector<64x3xf32> -> vector<64x3xf32>
    %c0_60 = arith.constant 0 : index
    %c0_61 = arith.constant 0 : index
    %149 = vector.load %arg6[%c0_60, %c0_61] : memref<64x1xf32, #tpu.memory_space<vmem>>, vector<64x1xf32>
    %150 = vector.broadcast %149 : vector<64x1xf32> to vector<64x3xf32>
    %151 = arith.mulf %148, %150 : vector<64x3xf32>
    %c0_62 = arith.constant 0 : index
    %c0_63 = arith.constant 0 : index
    %c0_64 = arith.constant 0 : index
    %152 = vector.load %arg11[%c0_62, %c0_63, %c0_64] : memref<1x128x128xbf16, #tpu.memory_space<vmem>>, vector<1x128x128xbf16>
    %153 = vector.shape_cast %152 : vector<1x128x128xbf16> to vector<128x128xbf16>
    %cst_65 = arith.constant dense<0.000000e+00> : vector<64x128xf32>
    %154 = tpu.matmul %29, %153, %cst_65 {dimension_numbers = #tpu.dot_dimension_numbers<[1], [0], [0], [1], [0, 0, 1, 1], [], []>} : vector<64x128xbf16>, vector<128x128xbf16>, vector<64x128xf32> -> vector<64x128xf32>
    %155 = arith.truncf %147 : vector<64x128xf32> to vector<64x128xbf16>
    %c0_66 = arith.constant 0 : index
    %c0_67 = arith.constant 0 : index
    %c0_68 = arith.constant 0 : index
    %156 = vector.load %arg12[%c0_66, %c0_67, %c0_68] : memref<1x128x128xbf16, #tpu.memory_space<vmem>>, vector<1x128x128xbf16>
    %157 = vector.shape_cast %156 : vector<1x128x128xbf16> to vector<128x128xbf16>
    %cst_69 = arith.constant dense<0.000000e+00> : vector<64x128xf32>
    %158 = tpu.matmul %155, %157, %cst_69 {dimension_numbers = #tpu.dot_dimension_numbers<[1], [0], [0], [1], [0, 0, 1, 1], [], []>} : vector<64x128xbf16>, vector<128x128xbf16>, vector<64x128xf32> -> vector<64x128xf32>
    %159 = arith.addf %154, %158 : vector<64x128xf32>
    %160 = vector.broadcast %21 : vector<1x128xf32> to vector<64x128xf32>
    %161 = arith.addf %159, %160 : vector<64x128xf32>
    %cst_70 = arith.constant dense<0.000000e+00> : vector<64xf32>
    %162 = vector.multi_reduction <add>, %161, %cst_70 [1] : vector<64x128xf32> to vector<64xf32>
    %163 = vector.shape_cast %162 : vector<64xf32> to vector<64x1xf32>
    %cst_71 = arith.constant 1.280000e+02 : f32
    %164 = vector.broadcast %cst_71 : f32 to vector<64x1xf32>
    %165 = arith.divf %163, %164 : vector<64x1xf32>
    %166 = vector.broadcast %165 : vector<64x1xf32> to vector<64x128xf32>
    %167 = arith.subf %161, %166 : vector<64x128xf32>
    %168 = arith.mulf %167, %167 : vector<64x128xf32>
    %cst_72 = arith.constant dense<0.000000e+00> : vector<64xf32>
    %169 = vector.multi_reduction <add>, %168, %cst_72 [1] : vector<64x128xf32> to vector<64xf32>
    %170 = vector.shape_cast %169 : vector<64xf32> to vector<64x1xf32>
    %cst_73 = arith.constant 1.280000e+02 : f32
    %171 = vector.broadcast %cst_73 : f32 to vector<64x1xf32>
    %172 = arith.divf %170, %171 : vector<64x1xf32>
    %173 = vector.broadcast %165 : vector<64x1xf32> to vector<64x128xf32>
    %174 = arith.subf %161, %173 : vector<64x128xf32>
    %cst_74 = arith.constant 9.99999974E-6 : f32
    %175 = vector.broadcast %cst_74 : f32 to vector<64x1xf32>
    %176 = arith.addf %172, %175 : vector<64x1xf32>
    %177 = math.rsqrt %176 : vector<64x1xf32>
    %178 = vector.broadcast %177 : vector<64x1xf32> to vector<64x128xf32>
    %179 = arith.mulf %174, %178 : vector<64x128xf32>
    %180 = vector.broadcast %22 : vector<1x128xf32> to vector<64x128xf32>
    %181 = arith.mulf %179, %180 : vector<64x128xf32>
    %182 = vector.broadcast %23 : vector<1x128xf32> to vector<64x128xf32>
    %183 = arith.addf %181, %182 : vector<64x128xf32>
    %cst_75 = arith.constant 0.000000e+00 : f32
    %184 = vector.broadcast %cst_75 : f32 to vector<64x128xf32>
    %185 = arith.maximumf %183, %184 : vector<64x128xf32>
    %186 = arith.truncf %185 : vector<64x128xf32> to vector<64x128xbf16>
    %c0_76 = arith.constant 0 : index
    %c0_77 = arith.constant 0 : index
    %c0_78 = arith.constant 0 : index
    %187 = vector.load %arg13[%c0_76, %c0_77, %c0_78] : memref<1x128x128xbf16, #tpu.memory_space<vmem>>, vector<1x128x128xbf16>
    %188 = vector.shape_cast %187 : vector<1x128x128xbf16> to vector<128x128xbf16>
    %cst_79 = arith.constant dense<0.000000e+00> : vector<64x128xf32>
    %189 = tpu.matmul %186, %188, %cst_79 {dimension_numbers = #tpu.dot_dimension_numbers<[1], [0], [0], [1], [0, 0, 1, 1], [], []>} : vector<64x128xbf16>, vector<128x128xbf16>, vector<64x128xf32> -> vector<64x128xf32>
    %190 = vector.broadcast %24 : vector<1x128xf32> to vector<64x128xf32>
    %191 = arith.addf %189, %190 : vector<64x128xf32>
    %cst_80 = arith.constant dense<0.000000e+00> : vector<64xf32>
    %192 = vector.multi_reduction <add>, %191, %cst_80 [1] : vector<64x128xf32> to vector<64xf32>
    %193 = vector.shape_cast %192 : vector<64xf32> to vector<64x1xf32>
    %cst_81 = arith.constant 1.280000e+02 : f32
    %194 = vector.broadcast %cst_81 : f32 to vector<64x1xf32>
    %195 = arith.divf %193, %194 : vector<64x1xf32>
    %196 = vector.broadcast %195 : vector<64x1xf32> to vector<64x128xf32>
    %197 = arith.subf %191, %196 : vector<64x128xf32>
    %198 = arith.mulf %197, %197 : vector<64x128xf32>
    %cst_82 = arith.constant dense<0.000000e+00> : vector<64xf32>
    %199 = vector.multi_reduction <add>, %198, %cst_82 [1] : vector<64x128xf32> to vector<64xf32>
    %200 = vector.shape_cast %199 : vector<64xf32> to vector<64x1xf32>
    %cst_83 = arith.constant 1.280000e+02 : f32
    %201 = vector.broadcast %cst_83 : f32 to vector<64x1xf32>
    %202 = arith.divf %200, %201 : vector<64x1xf32>
    %203 = vector.broadcast %195 : vector<64x1xf32> to vector<64x128xf32>
    %204 = arith.subf %191, %203 : vector<64x128xf32>
    %cst_84 = arith.constant 9.99999974E-6 : f32
    %205 = vector.broadcast %cst_84 : f32 to vector<64x1xf32>
    %206 = arith.addf %202, %205 : vector<64x1xf32>
    %207 = math.rsqrt %206 : vector<64x1xf32>
    %208 = vector.broadcast %207 : vector<64x1xf32> to vector<64x128xf32>
    %209 = arith.mulf %204, %208 : vector<64x128xf32>
    %210 = vector.broadcast %25 : vector<1x128xf32> to vector<64x128xf32>
    %211 = arith.mulf %209, %210 : vector<64x128xf32>
    %212 = vector.broadcast %26 : vector<1x128xf32> to vector<64x128xf32>
    %213 = arith.addf %211, %212 : vector<64x128xf32>
    %cst_85 = arith.constant 0.000000e+00 : f32
    %214 = vector.broadcast %cst_85 : f32 to vector<64x128xf32>
    %215 = arith.maximumf %213, %214 : vector<64x128xf32>
    %216 = arith.addf %27, %215 : vector<64x128xf32>
    %217 = arith.addf %28, %151 : vector<64x3xf32>
    %c0_86 = arith.constant 0 : index
    %c0_87 = arith.constant 0 : index
    %218 = vector.load %arg18[%c0_86, %c0_87] : memref<64x128xf32, #tpu.memory_space<vmem>>, vector<64x128xf32>
    tpu.vector_store %arg18[%c0_86, %c0_87], %216 {strides = array<i32>} : memref<64x128xf32, #tpu.memory_space<vmem>>, vector<64x128xf32>,
    %c0_88 = arith.constant 0 : index
    %c0_89 = arith.constant 0 : index
    %219 = vector.load %arg19[%c0_88, %c0_89] : memref<64x3xf32, #tpu.memory_space<vmem>>, vector<64x3xf32>
    tpu.vector_store %arg19[%c0_88, %c0_89], %217 {strides = array<i32>} : memref<64x3xf32, #tpu.memory_space<vmem>>, vector<64x3xf32>,
    %c0_90 = arith.constant 0 : index
    %c0_91 = arith.constant 0 : index
    %220 = vector.load %arg17[%c0_90, %c0_91] : memref<64x3xf32, #tpu.memory_space<vmem>>, vector<64x3xf32>
    tpu.vector_store %arg17[%c0_90, %c0_91], %217 {strides = array<i32>} : memref<64x3xf32, #tpu.memory_space<vmem>>, vector<64x3xf32>,
    return
  }
  func.func @transform_0(%arg0: i32) -> (i32, i32) {
    %c0_i32 = arith.constant 0 : i32
    %c0_i32_0 = arith.constant 0 : i32
    %c0_i32_1 = arith.constant 0 : i32
    return %c0_i32, %c0_i32_0 : i32, i32
  }
  func.func @transform_1(%arg0: i32) -> (i32, i32) {
    %c0_i32 = arith.constant 0 : i32
    %c0_i32_0 = arith.constant 0 : i32
    %c0_i32_1 = arith.constant 0 : i32
    return %c0_i32, %c0_i32_0 : i32, i32
  }
  func.func @transform_2(%arg0: i32) -> (i32, i32) {
    %c0_i32 = arith.constant 0 : i32
    %c0_i32_0 = arith.constant 0 : i32
    %c0_i32_1 = arith.constant 0 : i32
    return %c0_i32, %c0_i32_0 : i32, i32
  }
  func.func @transform_3(%arg0: i32) -> (i32, i32) {
    %c0_i32 = arith.constant 0 : i32
    %c0_i32_0 = arith.constant 0 : i32
    %c0_i32_1 = arith.constant 0 : i32
    return %c0_i32, %c0_i32_0 : i32, i32
  }
  func.func @transform_4(%arg0: i32) -> (i32, i32) {
    %c0_i32 = arith.constant 0 : i32
    %c0_i32_0 = arith.constant 0 : i32
    %c0_i32_1 = arith.constant 0 : i32
    return %c0_i32, %c0_i32_0 : i32, i32
  }
  func.func @transform_5(%arg0: i32) -> (i32, i32) {
    %c0_i32 = arith.constant 0 : i32
    %c0_i32_0 = arith.constant 0 : i32
    %c0_i32_1 = arith.constant 0 : i32
    return %c0_i32, %c0_i32_0 : i32, i32
  }
  func.func @transform_6(%arg0: i32) -> (i32, i32, i32) {
    %c0_i32 = arith.constant 0 : i32
    %c0_i32_0 = arith.constant 0 : i32
    %c0_i32_1 = arith.constant 0 : i32
    return %arg0, %c0_i32, %c0_i32_0 : i32, i32, i32
  }
  func.func @transform_7(%arg0: i32) -> (i32, i32, i32) {
    %c0_i32 = arith.constant 0 : i32
    %c0_i32_0 = arith.constant 0 : i32
    %c0_i32_1 = arith.constant 0 : i32
    return %arg0, %c0_i32, %c0_i32_0 : i32, i32, i32
  }
  func.func @transform_8(%arg0: i32) -> (i32, i32, i32) {
    %c0_i32 = arith.constant 0 : i32
    %c0_i32_0 = arith.constant 0 : i32
    %c0_i32_1 = arith.constant 0 : i32
    return %arg0, %c0_i32, %c0_i32_0 : i32, i32, i32
  }
  func.func @transform_9(%arg0: i32) -> (i32, i32, i32) {
    %c0_i32 = arith.constant 0 : i32
    %c0_i32_0 = arith.constant 0 : i32
    %c0_i32_1 = arith.constant 0 : i32
    return %arg0, %c0_i32, %c0_i32_0 : i32, i32, i32
  }
  func.func @transform_10(%arg0: i32) -> (i32, i32, i32) {
    %c0_i32 = arith.constant 0 : i32
    %c0_i32_0 = arith.constant 0 : i32
    %c0_i32_1 = arith.constant 0 : i32
    return %arg0, %c0_i32, %c0_i32_0 : i32, i32, i32
  }
  func.func @transform_11(%arg0: i32) -> (i32, i32, i32) {
    %c0_i32 = arith.constant 0 : i32
    %c0_i32_0 = arith.constant 0 : i32
    %c0_i32_1 = arith.constant 0 : i32
    return %arg0, %c0_i32, %c0_i32_0 : i32, i32, i32
  }
  func.func @transform_12(%arg0: i32) -> (i32, i32, i32) {
    %c0_i32 = arith.constant 0 : i32
    %c0_i32_0 = arith.constant 0 : i32
    %c0_i32_1 = arith.constant 0 : i32
    return %arg0, %c0_i32, %c0_i32_0 : i32, i32, i32
  }
  func.func @transform_13(%arg0: i32) -> (i32, i32, i32) {
    %c0_i32 = arith.constant 0 : i32
    %c0_i32_0 = arith.constant 0 : i32
    %c0_i32_1 = arith.constant 0 : i32
    return %arg0, %c0_i32, %c0_i32_0 : i32, i32, i32
  }
  func.func @transform_14(%arg0: i32) -> (i32, i32, i32) {
    %c0_i32 = arith.constant 0 : i32
    %c0_i32_0 = arith.constant 0 : i32
    %c0_i32_1 = arith.constant 0 : i32
    return %arg0, %c0_i32, %c0_i32_0 : i32, i32, i32
  }
  func.func @transform_15(%arg0: i32) -> (i32, i32, i32) {
    %c0_i32 = arith.constant 0 : i32
    %c0_i32_0 = arith.constant 0 : i32
    %c0_i32_1 = arith.constant 0 : i32
    return %arg0, %c0_i32, %c0_i32_0 : i32, i32, i32
  }
  func.func @transform_16(%arg0: i32) -> (i32, i32) {
    %c0_i32 = arith.constant 0 : i32
    %c0_i32_0 = arith.constant 0 : i32
    %c0_i32_1 = arith.constant 0 : i32
    return %c0_i32, %c0_i32_0 : i32, i32
  }
}

</mosaic_0001>

<bundles_post_ra>
// kernel: egnn_model.1
= control target key start
LH: loop header
LB: loop body
LE: loop exit
PB: predicated region body
PF: predicated region fallthrough
CT: control target
= control target key end

     0   :  { %s11252_s0 = inlined_call_operand.vmem [shape: f32[256,64], index: 0, kind: input, shape index: {}]   ;;  %s11253_s1 = inlined_call_operand.vmem [shape: f32[256,64], index: 1, kind: input, shape index: {}]   ;;  %s11254_s2 = inlined_call_operand.hbm [shape: f32[64,256], index: 2, kind: input, shape index: {}]   ;;  %s11255_s3 = inlined_call_operand.hbm [shape: f32[64,128], index: 3, kind: input, shape index: {}]   ;;  %s11256_s4 = inlined_call_operand.vmem [shape: f32[64,3], index: 4, kind: input, shape index: {}]   ;;  %s11257_s5 = inlined_call_operand.vmem [shape: f32[64,1], index: 5, kind: input, shape index: {}]   ;;  %s11258_s6 = inlined_call_operand.vmem [shape: bf16[3,128,128], index: 6, kind: input, shape index: {}]   ;;  %s11259_s7 = inlined_call_operand.vmem [shape: bf16[3,128,128], index: 7, kind: input, shape index: {}]   ;;  %s11260_s8 = inlined_call_operand.vmem [shape: bf16[3,128,128], index: 8, kind: input, shape index: {}]   ;;  %s11261_s9 = inlined_call_operand.vmem [shape: bf16[3,128,16], index: 9, kind: input, shape index: {}]   ;;  %s11262_s10 = inlined_call_operand.vmem [shape: bf16[3,128,128], index: 10, kind: input, shape index: {}]   ;;  %s11263_s11 = inlined_call_operand.vmem [shape: bf16[3,128,128], index: 11, kind: input, shape index: {}]   ;;  %s11264_s12 = inlined_call_operand.vmem [shape: bf16[3,128,128], index: 12, kind: input, shape index: {}]   ;;  %s11265_s13 = inlined_call_operand.vmem [shape: f32[3,7,128], index: 13, kind: input, shape index: {}]   ;;  %s11266_s14 = inlined_call_operand.vmem [shape: f32[3,5,16], index: 14, kind: input, shape index: {}]   ;;  %s11267_s15 = inlined_call_operand.hbm [shape: f32[3,6,128], index: 15, kind: input, shape index: {}]   ;;  %s11268_s16 = inlined_call_operand.vmem [shape: f32[64,3], index: 16, kind: output, shape index: {}]  }
   0x1   :  { %11331 = sst [smem:[#allocation63_spill]] %s11252_s0 }
   0x2   :  { %11332 = sst [smem:[#allocation64_spill]] %s11253_s1 }
   0x3   :  { %11333 = sst [smem:[#allocation65_spill]] %s11254_s2 }
   0x4   :  { %11334 = sst [smem:[#allocation66_spill]] %s11255_s3 }
   0x5   :  { %11335 = sst [smem:[#allocation67_spill]] %s11256_s4 }
   0x6   :  { %11336 = sst [smem:[#allocation68_spill]] %s11257_s5 }
   0x7   :  { %11337 = sst [smem:[#allocation69_spill]] %s11258_s6 }
   0x8   :  { %11338 = sst [smem:[#allocation70_spill]] %s11259_s7 }
   0x9   :  { %11339 = sst [smem:[#allocation71_spill]] %s11260_s8 }
   0xa   :  { %11340 = sst [smem:[#allocation72_spill]] %s11261_s9 }
   0xb   :  { %11341 = sst [smem:[#allocation73_spill]] %s11266_s14 }
   0xc   :  { %11342 = sst [smem:[#allocation74_spill]] %s11268_s16 }
   0xd   :  { %21 = vsyncpa [#allocation5], 0 }
   0xe   :  { %22 = vsyncpa [#allocation7], 0  ;;  %s8004_s21 = smov 0   ;;  %s8006_s22 = smov 0  }
   0xf   :  { %s8008_s23 = smov 0   ;;  %s8010_s24 = smov 0  }
  0x10 LB: > { %s8023_s25 = sadd.s32 4294967295, %s7909_s24   ;;  %p408_p0 = scmp.ne.s32.totalorder %s7901_s22, %s7897_s21  ;;  %s7909_s24 = sphi %s8010_s24, %s11479_s24   ;;  %s7905_s23 = sphi %s8008_s23, %s11478_s23   ;;  %s7901_s22 = sphi %s8006_s22, %s11477_s22   ;;  %s7897_s21 = sphi %s8004_s21, %s11476_s21  }
  0x11   : > { %p11272_p1 = scmp.eq.s32.totalorder %s8023_s25, 0  ;;  %p6083_p2 = scmp.ge.s32.totalorder %s7909_s24, 1 }
  0x12   : > { %p440_p3 = scmp.lt.s32.totalorder %s7909_s24, 4  ;;  %s7911_s28 = smov [#allocation4]  }
  0x13   : > { %p8032_p5 = por %p11272_p1, %p408_p0  ;;  %s458_s29 = sshll.u32 %s7911_s28, 4  ;;  %s459_s29 = int_to_ptr.vmem [resolvable:$true] %s458_s29 }
  0x14   : > { %p8036_p6 = pnand %p6083_p2, %p440_p3  ;;  %s7912_s0 = smov [#allocation6]  }
  0x15   : > { %s11343_s26 = scalar_select %p8032_p5, 1, 0 }
  0x16   : > { %s11344_s27 = scalar_select %p8036_p6, 1, 0 }
  0x17   : > { %p7341_p7 = pneg %p8036_p6  ;;  %s471_s17 = sshll.u32 %s7912_s0, 4  ;;  %s8048_s17 = int_to_ptr.vmem [resolvable:$true] %s471_s17 }
  0x18   : > { %s11346_s2 = sld [smem:[#allocation65_spill]] }
  0x19   : > { %p8044_p8 = pnand %p7341_p7, %p11272_p1 }
  0x1b   : > { %p7783_p10 = pneg %p8044_p8 }
  0x1e   : > { %s7781_s20 = scalar_lea.hbm %s11346_s2, 2048 }
  0x1f   : > { %p7782_p9 = scmp.ne.s32.totalorder %s11346_s2, %s7781_s20  ;;  %p7788_p13 = scmp.lt.u32.totalorder %s7781_s20, %s11346_s2 }
  0x21   : > { %p7784_p11 = pnand %p7783_p10, %p7782_p9 }
  0x23   : > { %p7785_p12 = pneg %p7784_p11 }
  0x25   : > { %p7790_p0 = pnand %p7788_p13, %p7785_p12 }
  0x27   : > { %7793 = shalt.err (!%p7790_p0)
}
  0x28   : > { %s7794_s0 = scalar_lea.vmem %s459_s29, 2048  ;;  %p7802_p4 = scmp.lt.s32.totalorder %s459_s29, %s459_s29 }
  0x29   : > { %p7795_p2 = scmp.ne.s32.totalorder %s459_s29, %s7794_s0  ;;  %p7803_p1 = scmp.lt.s32.totalorder %s7794_s0, %s7794_s0 }
  0x2b   : > { %p7797_p3 = pnand %p7795_p2, %p7783_p10  ;;  %p7804_p5 = por %p7803_p1, %p7802_p4 }
  0x2d   : > { %p7798_p7 = pneg %p7797_p3 }
  0x2f   : > { %p7805_p6 = pnand %p7804_p5, %p7798_p7 }
  0x31   : > { %7808 = shalt.err (!%p7805_p6)
}
  0x32   : > { %s7913_s18 = smov 256   ;;  %s7914_s19 = smov 16  }
  0x33   : > { %7344 = dma.hbm_to_vmem [thread:$0]  (!%p8044_p8), %s11346_s2, 2048, %s459_s29, [#allocation5], %s7913_s18, %s7913_s18, %s7914_s19  }
  0x34   : > { %s11347_s3 = sld [smem:[#allocation66_spill]] }
  0x3a   : > { %s7809_s28 = scalar_lea.hbm %s11347_s3, 1024 }
  0x3b   : > { %p7810_p9 = scmp.ne.s32.totalorder %s11347_s3, %s7809_s28  ;;  %p7816_p5 = scmp.lt.u32.totalorder %s7809_s28, %s11347_s3 }
  0x3d   : > { %p7812_p1 = pnand %p7810_p9, %p7783_p10 }
  0x3f   : > { %p7813_p4 = pneg %p7812_p1 }
  0x41   : > { %p7818_p6 = pnand %p7816_p5, %p7813_p4 }
  0x43   : > { %7821 = shalt.err (!%p7818_p6)
}
  0x44   : > { %s7822_s29 = scalar_lea.vmem %s8048_s17, 1024  ;;  %p7830_p0 = scmp.lt.s32.totalorder %s8048_s17, %s8048_s17 }
  0x45   : > { %p7823_p11 = scmp.ne.s32.totalorder %s8048_s17, %s7822_s29  ;;  %p7831_p2 = scmp.lt.s32.totalorder %s7822_s29, %s7822_s29 }
  0x47   : > { %p7825_p12 = pnand %p7823_p11, %p7783_p10  ;;  %p7832_p3 = por %p7831_p2, %p7830_p0 }
  0x49   : > { %p7826_p13 = pneg %p7825_p12 }
  0x4b   : > { %p7833_p7 = pnand %p7832_p3, %p7826_p13 }
  0x4d   : > { %7836 = shalt.err (!%p7833_p7)
}
  0x4e   : > { %s7915_s1 = smov 128   ;;  %s7916_s4 = smov 8  }
  0x4f   : > { %7347 = dma.hbm_to_vmem [thread:$0]  (!%p8044_p8), %s11347_s3, 1024, %s8048_s17, [#allocation7], %s7915_s1, %s7915_s1, %s7916_s4  }
  0x50   : > { %s8098_s19 = sadd.s32 1, %s7909_s24   ;;  %s395_s16 = sadd.s32 1, %s7905_s23 }
  0x51   : > { %s392_s5 = ssub.s32 %s7909_s24, %s8098_s19  ;;  %p402_p9 = scmp.ne.s32.totalorder %s7905_s23, %s7901_s22 }
  0x52   : > { %p393_p10 = scmp.eq.s32.totalorder %s392_s5, 0  ;;  %p403_p1 = scmp.eq.s32.totalorder %s7909_s24, 0 }
  0x53   : > { %p7354_p5 = scmp.lt.s32.totalorder %s7909_s24, 3  ;;  %s561_s21 = sand.u32 1, %s7909_s24  }
  0x54   : > { %s8107_s20 = scalar_select %p393_p10, %s7905_s23, %s395_s16  }
  0x55   : > { %p404_p4 = por %p403_p1, %p402_p9  ;;  %s563_s28 = sand.u32 1, %s7905_s23  }
  0x56   : > { %s6087_s0 = sshll.u32 %s563_s28, 3  ;;  %s6088_s30 = sshll.u32 %s7909_s24, 7 }
  0x57   : > { %s8116_s17 = scalar_lea.hbm %s11267_s15, %s6088_s30  ;;  %s565_s1 = scalar_lea.vmem [#allocation8], %s6087_s0 }
  0x58   : > { %s572_s4 = sshll.u32 %s565_s1, 4  ;;  %p8120_p8 = pnand %p7354_p5, %p404_p4  ;;  %s8118_s4 = int_to_ptr.vmem [resolvable:$true] %s572_s4 }
  0x59   : > { %s562_s24 = scalar_lea.sflag [#allocation5], %s561_s21  ;;  %s7837_s18 = scalar_lea.hbm %s8116_s17, 128 }
  0x5a   : > { %p7838_p6 = scmp.ne.s32.totalorder %s8116_s17, %s7837_s18  ;;  %p7839_p11 = pneg %p8120_p8 }
  0x5b   : > { %s7842_s16 = scalar_lea.hbm %s11267_s15, 384  ;;  %p7843_p0 = scmp.lt.u32.totalorder %s8116_s17, %s11267_s15 }
  0x5c   : > { %p7840_p12 = pnand %p7839_p11, %p7838_p6  ;;  %p7844_p2 = scmp.lt.u32.totalorder %s7842_s16, %s7837_s18 }
  0x5d   : > { %p7846_p7 = scmp.lt.u32.totalorder %s7837_s18, %s8116_s17 }
  0x5e   : > { %p7841_p13 = pneg %p7840_p12  ;;  %p7845_p3 = por %p7844_p2, %p7843_p0 }
  0x60   : > { %p7847_p10 = por %p7846_p7, %p7845_p3 }
  0x62   : > { %p7848_p9 = pnand %p7847_p10, %p7841_p13 }
  0x64   : > { %7851 = shalt.err (!%p7848_p9)
}
  0x65   : > { %s7852_s21 = scalar_lea.vmem %s8118_s4, 128  ;;  %s7917_s30 = smov [#allocation8]  }
  0x66   : > { %p7853_p1 = scmp.ne.s32.totalorder %s8118_s4, %s7852_s21  ;;  %s7857_s29 = sshll.u32 %s7917_s30, 4  ;;  %s7858_s29 = int_to_ptr.vmem [resolvable:$false] %s7857_s29 }
  0x67   : > { %s7859_s1 = scalar_lea.vmem %s7858_s29, 256  ;;  %p7860_p6 = scmp.lt.s32.totalorder %s8118_s4, %s7858_s29 }
  0x68   : > { %p7855_p4 = pnand %p7853_p1, %p7839_p11  ;;  %p7861_p12 = scmp.lt.s32.totalorder %s7859_s1, %s7852_s21 }
  0x6a   : > { %p7856_p5 = pneg %p7855_p4  ;;  %p7862_p0 = por %p7861_p12, %p7860_p6 }
  0x6c   : > { %p7863_p2 = pnand %p7862_p0, %p7856_p5 }
  0x6e   : > { %7866 = shalt.err (!%p7863_p2)
}
  0x6f   : > { %7351 = dma.hbm_to_vmem [thread:$0]  (!%p8120_p8), %s8116_s17, 128, %s8118_s4, %s562_s24  }
  0x70   : > { %p11349_p13 = scmp.ne.s32.totalorder %s11344_s27, 0 }
  0x72   : > { %581 = sbr.rel (%p11349_p13) target bundleno = 3149 (0xc4d), region = 84 }
  0x79   : > { %p11350_p11 = scmp.eq.s32.totalorder %s8023_s25, 0 }
  0x7b   : > { %7884 = dma.done.wait (%p11350_p11), [#allocation5], 2048   ;;  %p11351_p3 = pmov %p11350_p11 }
  0x7d   : > { %7886 = vsyncadd (%p11351_p3), [#allocation5], 4294965248  ;;  %p11352_p7 = pmov %p11351_p3 }
  0x7e   : > { %p11353_p10 = pmov %p11351_p3 }
  0x7f   : > { %7888 = dma.done.wait (%p11352_p7), [#allocation7], 1024  }
  0x80   : > { %7890 = vsyncadd (%p11353_p10), [#allocation7], 4294966272  ;;  %s591_s14 = sand.u32 1, %s8023_s25   ;;  %s593_s17 = sand.u32 1, %s7901_s22  }
  0x81   : > { %s8161_s4 = sshll.u32 %s593_s17, 3  ;;  %s592_s27 = scalar_lea.sflag [#allocation5], %s591_s14 }
  0x82   : > { %p11354_p8 = scmp.ne.s32.totalorder %s11343_s26, 0 }
  0x84   : > { %7892 = dma.done.wait (%p11354_p8), %s592_s27, 128  }
  0x85   : > { %7894 = vsyncadd (%p11354_p8), %s592_s27, 4294967168  ;;  %p682_p9 = scmp.lt.s32.totalorder %s8023_s25, 2  ;;  %s11355_s6 = sld [smem:[#allocation69_spill]] }
  0x86   : > { %s11356_s7 = sld [smem:[#allocation70_spill]]  ;;  %s11357_s8 = sld [smem:[#allocation71_spill]] }
  0x87   : > { %s683_s18 = scalar_select %p682_p9, %s8023_s25, 2 }
  0x88   : > { %s11358_s9 = sld [smem:[#allocation72_spill]]  ;;  %s11359_s3 = sld [smem:[#allocation73_spill]] }
  0x89   : > { %s6296_s2 = sshll.u32 %s683_s18, 6  ;;  %s6107_s5 = sshll.u32 %s683_s18, 3 }
  0x8a   : > { %s8193_s16 = scalar_lea.vmem %s11262_s10, %s6296_s2  ;;  %s8198_s21 = scalar_lea.vmem %s11263_s11, %s6296_s2 }
  0x8b   : > { %s8173_s0 = scalar_lea.vmem %s11355_s6, %s6296_s2  ;;  %s8203_s1 = scalar_lea.vmem %s11264_s12, %s6296_s2 }
  0x8c   : > { %s8178_s29 = scalar_lea.vmem %s11356_s7, %s6296_s2  ;;  %s8183_s26 = scalar_lea.vmem %s11357_s8, %s6296_s2 }
  0x8d   : > { %s8208_s17 = scalar_lea.vmem %s11265_s13, %s6107_s5  ;;  %p11360_p1 = scmp.ne.s32.totalorder %s8023_s25, 0 }
  0x8e   : > { %s8188_s24 = scalar_lea.vmem %s11358_s9, %s6296_s2  ;;  %s8213_s18 = scalar_lea.vmem %s11359_s3, %s6107_s5  ;;  %v730_v0 = vld [vmem:[#allocation6] sm:$0xff] (!%p11360_p1)  ;;  %v731_v1 = vld [vmem:[#allocation6 + $0x8] sm:$0xff] (!%p11360_p1)  ;;  %v732_v2 = vld [vmem:[#allocation6 + $0x10] sm:$0xff] (!%p11360_p1)  ;;  %vm754_vm0 = vcmask (!%p11360_p1), 23552  }
  0x8f   : > { %729 = sbr.rel (%p11360_p1) target bundleno = 154 (0x9a), region = 100  ;;  %738 = vst [vmem:[#allocation2] sm:$0xff] (!%p11360_p1), %v730_v0  ;;  %739 = vst [vmem:[#allocation2 + $0x8] sm:$0xff] (!%p11360_p1), %v731_v1  ;;  %v733_v3 = vld [vmem:[#allocation6 + $0x18] sm:$0xff] (!%p11360_p1)  ;;  %v734_v4 = vld [vmem:[#allocation6 + $0x20] sm:$0xff] (!%p11360_p1)  ;;  %s11361_s8 = sld [smem:[#allocation67_spill]] (!%p11360_p1) }
  0x90   : > { %740 = vst [vmem:[#allocation2 + $0x10] sm:$0xff] (!%p11360_p1), %v732_v2  ;;  %v735_v5 = vld [vmem:[#allocation6 + $0x28] sm:$0xff] (!%p11360_p1)  ;;  %741 = vst [vmem:[#allocation2 + $0x18] sm:$0xff] (!%p11360_p1), %v733_v3  ;;  %v736_v6 = vld [vmem:[#allocation6 + $0x30] sm:$0xff] (!%p11360_p1) }
  0x91   : > { %742 = vst [vmem:[#allocation2 + $0x20] sm:$0xff] (!%p11360_p1), %v734_v4  ;;  %743 = vst [vmem:[#allocation2 + $0x28] sm:$0xff] (!%p11360_p1), %v735_v5  ;;  %v737_v7 = vld [vmem:[#allocation6 + $0x38] sm:$0xff] (!%p11360_p1) }
  0x92   : > { %744 = vst [vmem:[#allocation2 + $0x30] sm:$0xff] (!%p11360_p1), %v736_v6  ;;  %745 = vst [vmem:[#allocation2 + $0x38] sm:$0xff] (!%p11360_p1), %v737_v7 }
  0x95   : > { %v746_v8 = vld [vmem:[%s11361_s8] sm:$0xff] (!%p11360_p1)  ;;  %v747_v9 = vld [vmem:[%s11361_s8 + $0x8] sm:$0xff] (!%p11360_p1)  ;;  %v748_v10 = vld [vmem:[%s11361_s8 + $0x10] sm:$0xff] (!%p11360_p1) }
  0x96   : > { %755 = vst.msk [vmem:[#allocation3] sm:$0xff] %vm754_vm0, %v746_v8  ;;  %v749_v11 = vld [vmem:[%s11361_s8 + $0x18] sm:$0xff]  ;;  %756 = vst.msk [vmem:[#allocation3 + $0x8] sm:$0xff] %vm754_vm0, %v747_v9  ;;  %v750_v12 = vld [vmem:[%s11361_s8 + $0x20] sm:$0xff] }
  0x97   : > { %757 = vst.msk [vmem:[#allocation3 + $0x10] sm:$0xff] %vm754_vm0, %v748_v10  ;;  %758 = vst.msk [vmem:[#allocation3 + $0x18] sm:$0xff] %vm754_vm0, %v749_v11  ;;  %v751_v13 = vld [vmem:[%s11361_s8 + $0x28] sm:$0xff]  ;;  %v752_v14 = vld [vmem:[%s11361_s8 + $0x30] sm:$0xff] }
  0x98   : > { %759 = vst.msk [vmem:[#allocation3 + $0x20] sm:$0xff] %vm754_vm0, %v750_v12  ;;  %760 = vst.msk [vmem:[#allocation3 + $0x28] sm:$0xff] %vm754_vm0, %v751_v13  ;;  %v753_v15 = vld [vmem:[%s11361_s8 + $0x38] sm:$0xff] }
  0x99   : > { %761 = vst.msk [vmem:[#allocation3 + $0x30] sm:$0xff] %vm754_vm0, %v752_v14  ;;  %762 = vst.msk [vmem:[#allocation3 + $0x38] sm:$0xff] %vm754_vm0, %v753_v15 }
  0x9a PF: > { %v7398_v16 = vld [vmem:[%s8178_s29] sm:$0xff]   ;;  %v7399_v17 = vld [vmem:[%s8178_s29 + $0x8] sm:$0xff]   ;;  %v7400_v18 = vld [vmem:[%s8178_s29 + $0x10] sm:$0xff]   ;;  %s11366_s28 = sld [smem:[#allocation64_spill]]  ;;  %vm1112_vm1 = vcmask 523264   ;;  %vm1819_vm2 = vcmask 23552  }
  0x9b   : > { %6707 = vmatprep.subr.bf16.mxu1 %v7398_v16  ;;  %v7401_v19 = vld [vmem:[%s8178_s29 + $0x18] sm:$0xff]   ;;  %v766_v20 = vld [vmem:[#allocation2] sm:$0xff]  ;;  %v767_v21 = vld [vmem:[#allocation2 + $0x8] sm:$0xff]  ;;  %s11473_s2 = sld [smem:[#allocation74_spill]] }
  0x9c   : > { %6708 = vmatpush3.bf16.msra.mxu1 %v7398_v16  ;;  %v8253_v22 = vpack.c.bf16 %v767_v21, %v766_v20  ;;  %v7406_v23 = vld [vmem:[%s8173_s0] sm:$0xff]   ;;  %v7407_v24 = vld [vmem:[%s8173_s0 + $0x8] sm:$0xff]   ;;  %v7408_v26 = vld [vmem:[%s8173_s0 + $0x10] sm:$0xff]  }
  0x9d   : > { %6709 = vmatprep.subr.bf16.mxu1 %v7399_v17  ;;  %v7402_v25 = vld [vmem:[%s8178_s29 + $0x20] sm:$0xff]   ;;  %6683 = vmatprep.subr.bf16.mxu0 %v7406_v23  ;;  %v7403_v27 = vld [vmem:[%s8178_s29 + $0x28] sm:$0xff]   ;;  %v7409_v28 = vld [vmem:[%s8173_s0 + $0x18] sm:$0xff]  }
  0x9e   : > { %11362 = vst [vmem:[#allocation12_spill] sm:$0xff] %v8253_v22  ;;  %6723 = vmatprep.mubr.bf16.mxu1 %v8253_v22  ;;  %6684 = vmatpush3.bf16.msra.mxu0 %v7406_v23  ;;  %v7404_v29 = vld [vmem:[%s8178_s29 + $0x30] sm:$0xff]   ;;  %v7410_v30 = vld [vmem:[%s8173_s0 + $0x20] sm:$0xff]   ;;  %v7405_v31 = vld [vmem:[%s8178_s29 + $0x38] sm:$0xff]   ;;  %s11372_s29 = sld [smem:[#allocation63_spill]] }
  0x9f   : > { %6699 = vmatprep.mubr.bf16.mxu0 %v8253_v22  ;;  %6685 = vmatprep.subr.bf16.mxu0 %v7407_v24  ;;  %v7411_v34 = vld [vmem:[%s8173_s0 + $0x28] sm:$0xff]   ;;  %v768_v35 = vld [vmem:[#allocation2 + $0x10] sm:$0xff]  ;;  %v769_v36 = vld [vmem:[#allocation2 + $0x18] sm:$0xff] }
  0xa0   : > { %6710 = vmatpush3.bf16.msra.mxu1 %v7399_v17  ;;  %v770_v37 = vld [vmem:[#allocation2 + $0x20] sm:$0xff]  ;;  %v771_v38 = vld [vmem:[#allocation2 + $0x28] sm:$0xff]  ;;  %v776_v40 = vld [vmem:[#allocation3 + $0x10] sm:$0xff]  ;;  %v8267_v42 = vpack.c.bf16 %v769_v36, %v768_v35 }
  0xa1   : > { %6711 = vmatprep.subr.bf16.mxu1 %v7400_v18  ;;  %v774_v32 = vld [vmem:[#allocation3] sm:$0xff]  ;;  %v775_v33 = vld [vmem:[#allocation3 + $0x8] sm:$0xff]  ;;  %v777_v41 = vld [vmem:[#allocation3 + $0x18] sm:$0xff]  ;;  %v8270_v44 = vpack.c.bf16 %v771_v38, %v770_v37 }
  0xa2   : > { %6686 = vmatpush3.bf16.msra.mxu0 %v7407_v24  ;;  %v7155_v39 = vpack.c.bf16 %v775_v33, %v774_v32  ;;  %11363 = vst [vmem:[#allocation13_spill] sm:$0xff] %v8267_v42  ;;  %v7412_v43 = vld [vmem:[%s8173_s0 + $0x30] sm:$0xff]   ;;  %v7159_v45 = vpack.c.bf16 %v777_v41, %v776_v40  ;;  %v778_v46 = vld [vmem:[#allocation3 + $0x20] sm:$0xff]  ;;  %v779_v47 = vld [vmem:[#allocation3 + $0x28] sm:$0xff] }
  0xa3   : > { %6687 = vmatprep.subr.bf16.mxu0 %v7408_v26  ;;  %11364 = vst [vmem:[#allocation14_spill] sm:$0xff] %v8270_v44  ;;  %v7413_v48 = vld [vmem:[%s8173_s0 + $0x38] sm:$0xff]   ;;  %v772_v49 = vld [vmem:[#allocation2 + $0x30] sm:$0xff]  ;;  %v7163_v51 = vpack.c.bf16 %v779_v47, %v778_v46  ;;  %v1104_v56 = vld [vmem:[%s11366_s28 + $0xc0] sm:$0xff] }
  0xa4   : > { %6712 = vmatpush3.bf16.msra.mxu1 %v7400_v18  ;;  %v773_v50 = vld [vmem:[#allocation2 + $0x38] sm:$0xff]  ;;  %v780_v52 = vld [vmem:[#allocation3 + $0x30] sm:$0xff]  ;;  %v1105_v57 = vld [vmem:[%s11366_s28 + $0xc8] sm:$0xff] }
  0xa5   : > { %6713 = vmatprep.subr.bf16.mxu1 %v7401_v19  ;;  %v781_v53 = vld [vmem:[#allocation3 + $0x38] sm:$0xff]  ;;  %v8275_v54 = vpack.c.bf16 %v773_v50, %v772_v49  ;;  %v1106_v58 = vld [vmem:[%s11366_s28 + $0xd0] sm:$0xff]  ;;  %v8293_v59 = vld [vmem:[%s11366_s28] sm:$0xff] }
  0xa6   : > { %6688 = vmatpush3.bf16.msra.mxu0 %v7408_v26  ;;  %v7167_v55 = vpack.c.bf16 %v781_v53, %v780_v52  ;;  %v8298_v60 = vld [vmem:[%s11366_s28 + $0xd8] sm:$0xff]  ;;  %v8304_v61 = vld [vmem:[%s11366_s28 + $0xe0] sm:$0xff]  ;;  %v8311_v62 = vld [vmem:[%s11366_s28 + $0xe8] sm:$0xff] }
  0xa7   : > { %6689 = vmatprep.subr.bf16.mxu0 %v7409_v28  ;;  %11365 = vst [vmem:[#allocation15_spill] sm:$0xff] %v8275_v54  ;;  %11367 = vst [vmem:[#allocation16_spill] sm:$0xff] %v8298_v60  ;;  %v8320_v63 = vld [vmem:[%s11366_s28 + $0xf0] sm:$0xff]  ;;  %v8327_v0 = vld [vmem:[%s11366_s28 + $0x8] sm:$0xff] }
  0xa8   : > { %6714 = vmatpush3.bf16.msra.mxu1 %v7401_v19  ;;  %11368 = vst [vmem:[#allocation17_spill] sm:$0xff] %v8304_v61  ;;  %11369 = vst [vmem:[#allocation18_spill] sm:$0xff] %v8311_v62  ;;  %v8332_v1 = vld [vmem:[%s11366_s28 + $0x10] sm:$0xff]  ;;  %v8337_v2 = vld [vmem:[%s11366_s28 + $0xf8] sm:$0xff] }
  0xa9   : > { %6715 = vmatprep.subr.bf16.mxu1 %v7402_v25  ;;  %11370 = vst [vmem:[#allocation19_spill] sm:$0xff] %v8320_v63  ;;  %11371 = vst [vmem:[#allocation20_spill] sm:$0xff] %v8337_v2  ;;  %v8344_v3 = vld [vmem:[%s11372_s29] sm:$0xff]  ;;  %v8351_v4 = vld [vmem:[%s11366_s28 + $0x18] sm:$0xff] }
  0xaa   : > { %6690 = vmatpush3.bf16.msra.mxu0 %v7409_v28  ;;  %v8358_v5 = vld [vmem:[%s11366_s28 + $0x20] sm:$0xff]  ;;  %v8363_v6 = vld [vmem:[%s11372_s29 + $0x8] sm:$0xff]  ;;  %v8372_v7 = vld [vmem:[%s11372_s29 + $0x10] sm:$0xff] }
  0xab   : > { %6691 = vmatprep.subr.bf16.mxu0 %v7410_v30  ;;  %v8379_v8 = vld [vmem:[%s11366_s28 + $0x28] sm:$0xff]  ;;  %v8386_v9 = vld [vmem:[%s11366_s28 + $0x30] sm:$0xff]  ;;  %v8391_v10 = vld [vmem:[%s11372_s29 + $0x18] sm:$0xff] }
  0xac   : > { %6716 = vmatpush3.bf16.msra.mxu1 %v7402_v25  ;;  %v8400_v11 = vld [vmem:[%s11372_s29 + $0x20] sm:$0xff]  ;;  %v8411_v12 = vld [vmem:[%s11366_s28 + $0x38] sm:$0xff]  ;;  %v8425_v14 = vld [vmem:[%s11372_s29 + $0x28] sm:$0xff] }
  0xad   : > { %6717 = vmatprep.subr.bf16.mxu1 %v7403_v27  ;;  %v8418_v13 = vld [vmem:[%s11366_s28 + $0x40] sm:$0xff]  ;;  %v8430_v15 = vld [vmem:[%s11372_s29 + $0x30] sm:$0xff]  ;;  %v8439_v16 = vld [vmem:[%s11366_s28 + $0x48] sm:$0xff] }
  0xae   : > { %6692 = vmatpush3.bf16.msra.mxu0 %v7410_v30  ;;  %v8446_v17 = vld [vmem:[%s11366_s28 + $0x50] sm:$0xff]  ;;  %v8453_v18 = vld [vmem:[%s11372_s29 + $0x38] sm:$0xff]  ;;  %v8458_v19 = vld [vmem:[%s11372_s29 + $0x40] sm:$0xff] }
  0xaf   : > { %6693 = vmatprep.subr.bf16.mxu0 %v7411_v34  ;;  %v8467_v20 = vld [vmem:[%s11366_s28 + $0x58] sm:$0xff]  ;;  %v8474_v21 = vld [vmem:[%s11366_s28 + $0x60] sm:$0xff]  ;;  %v8481_v23 = vld [vmem:[%s11372_s29 + $0x48] sm:$0xff] }
  0xb0   : > { %6718 = vmatpush3.bf16.msra.mxu1 %v7403_v27  ;;  %v8486_v24 = vld [vmem:[%s11372_s29 + $0x50] sm:$0xff]  ;;  %v8495_v25 = vld [vmem:[%s11366_s28 + $0x68] sm:$0xff]  ;;  %v8509_v27 = vld [vmem:[%s11372_s29 + $0x58] sm:$0xff] }
  0xb1   : > { %6719 = vmatprep.subr.bf16.mxu1 %v7404_v29  ;;  %11373 = vst [vmem:[#allocation21_spill] sm:$0xff] %v8495_v25  ;;  %v8502_v26 = vld [vmem:[%s11366_s28 + $0x70] sm:$0xff]  ;;  %v8514_v28 = vld [vmem:[%s11372_s29 + $0x60] sm:$0xff]  ;;  %v8551_v33 = vld [vmem:[%s11366_s28 + $0x88] sm:$0xff] }
  0xb2   : > { %6694 = vmatpush3.bf16.msra.mxu0 %v7411_v34  ;;  %11374 = vst [vmem:[#allocation22_spill] sm:$0xff] %v8502_v26  ;;  %v8530_v30 = vld [vmem:[%s11366_s28 + $0x80] sm:$0xff]  ;;  %v8542_v32 = vld [vmem:[%s11372_s29 + $0x70] sm:$0xff]  ;;  %11377 = vst [vmem:[#allocation25_spill] sm:$0xff] %v8551_v33 }
  0xb3   : > { %6695 = vmatprep.subr.bf16.mxu0 %v7412_v43  ;;  %11376 = vst [vmem:[#allocation24_spill] sm:$0xff] %v8530_v30  ;;  %v8558_v34 = vld [vmem:[%s11366_s28 + $0x90] sm:$0xff]  ;;  %v8565_v35 = vld [vmem:[%s11372_s29 + $0x78] sm:$0xff]  ;;  %v8570_v36 = vld [vmem:[%s11372_s29 + $0x80] sm:$0xff] }
  0xb4   : > { %6720 = vmatpush3.bf16.msra.mxu1 %v7404_v29  ;;  %v8523_v29 = vld [vmem:[%s11366_s28 + $0x78] sm:$0xff]  ;;  %11378 = vst [vmem:[#allocation26_spill] sm:$0xff] %v8558_v34  ;;  %v8586_v38 = vld [vmem:[%s11366_s28 + $0xa0] sm:$0xff]  ;;  %v8598_v40 = vld [vmem:[%s11372_s29 + $0x90] sm:$0xff] }
  0xb5   : > { %6721 = vmatprep.subr.bf16.mxu1 %v7405_v31  ;;  %11375 = vst [vmem:[#allocation23_spill] sm:$0xff] %v8523_v29  ;;  %v8579_v37 = vld [vmem:[%s11366_s28 + $0x98] sm:$0xff]  ;;  %11380 = vst [vmem:[#allocation28_spill] sm:$0xff] %v8586_v38  ;;  %v8607_v41 = vld [vmem:[%s11366_s28 + $0xa8] sm:$0xff] }
  0xb6   : > { %6696 = vmatpush3.bf16.msra.mxu0 %v7412_v43  ;;  %11379 = vst [vmem:[#allocation27_spill] sm:$0xff] %v8579_v37  ;;  %11381 = vst [vmem:[#allocation29_spill] sm:$0xff] %v8607_v41  ;;  %v8614_v43 = vld [vmem:[%s11366_s28 + $0xb0] sm:$0xff]  ;;  %v8626_v46 = vld [vmem:[%s11372_s29 + $0xa0] sm:$0xff] }
  0xb7   : > { %6697 = vmatprep.subr.bf16.mxu0 %v7413_v48  ;;  %11382 = vst [vmem:[#allocation30_spill] sm:$0xff] %v8614_v43  ;;  %v8635_v47 = vld [vmem:[%s11366_s28 + $0xb8] sm:$0xff]  ;;  %v8649_v49 = vld [vmem:[%s11372_s29 + $0xb0] sm:$0xff]  ;;  %v8676_v52 = vld [vmem:[%s11372_s29 + $0xc8] sm:$0xff] }
  0xb8   : > { %6722 = vmatpush3.bf16.msra.mxu1 %v7405_v31  ;;  %v8537_v31 = vld [vmem:[%s11372_s29 + $0x68] sm:$0xff]  ;;  %11383 = vst [vmem:[#allocation31_spill] sm:$0xff] %v8635_v47  ;;  %v8662_v50 = vld [vmem:[%s11372_s29 + $0xb8] sm:$0xff]  ;;  %v8681_v53 = vld [vmem:[%s11372_s29 + $0xd0] sm:$0xff] }
  0xb9   : > { %7283 = vmatprep.subr.bf16.mxu1 %v7155_v39  ;;  %v8726_v22 = vld [vmem:[%s8208_s17] sm:$0x7f] }
  0xba   : > { %6698 = vmatpush3.bf16.msra.mxu0 %v7413_v48  ;;  %v8644_v48 = vld [vmem:[%s11372_s29 + $0xa8] sm:$0xff]  ;;  %11385 = vst [vmem:[#allocation33_spill] sm:$0xff] %v8726_v22 }
  0xbb   : > { %6724 = vmatmul.mubr.bf16.vlgmr.msra.gmra.mrb[0].mxu1 %v8267_v42  ;;  %7156 = vmatprep.subr.bf16.mxu0 %v7155_v39 }
  0xbc   : > { %6727 = vmatprep.mubr.bf16.mxu1 %v8270_v44  ;;  %7287 = vmatpush3.bf16.msra.mxu1 %v7155_v39 }
  0xbd   : > { %7284 = vmatprep.subr.bf16.mxu1 %v7159_v45  ;;  %6700 = vmatmul.mubr.bf16.vlgmr.msra.gmra.mrb[0].mxu0 %v8267_v42 }
  0xbe   : > { %7158 = vmatpush3.bf16.msra.mxu0 %v7155_v39  ;;  %6703 = vmatprep.mubr.bf16.mxu0 %v8270_v44 }
  0xbf   : > { %7160 = vmatprep.subr.bf16.mxu0 %v7159_v45 }
  0xc0   : > { %7288 = vmatpush3.bf16.msra.mxu1 %v7159_v45 }
  0xc1   : > { %7285 = vmatprep.subr.bf16.mxu1 %v7163_v51 }
  0xc2   : > { %7162 = vmatpush3.bf16.msra.mxu0 %v7159_v45 }
  0xc3   : > { %6728 = vmatmul.mubr.bf16.gmra.mrb[4].mxu1 %v8275_v54  ;;  %7164 = vmatprep.subr.bf16.mxu0 %v7163_v51 }
  0xc4   : > { %7289 = vmatpush3.bf16.msra.mxu1 %v7163_v51  ;;  %6783 = vmatprep.mubr.msk.f32.mxu1 %vm1112_vm1, %v1104_v56  ;;  %v8695_v56 = vld [vmem:[%s11372_s29 + $0xe0] sm:$0xff] }
  0xc5   : > { %7286 = vmatprep.subr.bf16.mxu1 %v7167_v55  ;;  %6704 = vmatmul.mubr.bf16.gmra.mrb[4].mxu0 %v8275_v54  ;;  %v802_v54 = vlaneseq }
  0xc6   : > { %7166 = vmatpush3.bf16.msra.mxu0 %v7163_v51  ;;  %6747 = vmatprep.mubr.msk.f32.mxu0 %vm1112_vm1, %v8293_v59 }
  0xc7   : > { %7168 = vmatprep.subr.bf16.mxu0 %v7167_v55  ;;  %v8722_v44 = vshrl.u32 %v802_v54, 7 }
  0xc8   : > { %7290 = vmatpush3.bf16.msra.mxu1 %v7167_v55 }
  0xc9   : > { %7172 = vmatprep.subr.bf16.mxu1 %v7155_v39  ;;  %11384 = vst [vmem:[#allocation32_spill] sm:$0xff] %v8722_v44  ;;  %v3750_v42 = vsub.s32 6, %v8722_v44 }
  0xca   : > { %7170 = vmatpush3.bf16.msra.mxu0 %v7167_v55 }
  0xcb   : > { %6784 = vmatmul.mubr.msk.f32.vlgmr.msra.gmra.mrb[8].mxu1 %vm1112_vm1, %v1105_v57  ;;  %v8704_v57 = vld [vmem:[%s11372_s29 + $0xe8] sm:$0xff] }
  0xcc   : > { %7174 = vmatpush3.bf16.msra.mxu1 %v7155_v39  ;;  %6786 = vmatprep.mubr.msk.f32.mxu1 %vm1112_vm1, %v1106_v58  ;;  %v8593_v39 = vld [vmem:[%s11372_s29 + $0x88] sm:$0xff]  ;;  %v8709_v58 = vld [vmem:[%s11372_s29 + $0xf0] sm:$0xff] }
  0xcd   : > { %7176 = vmatprep.subr.bf16.mxu1 %v7159_v45  ;;  %6748 = vmatmul.mubr.msk.f32.vlgmr.msra.gmra.mrb[8].mxu0 %vm1112_vm1, %v8327_v0 }
  0xce   : > { %6750 = vmatprep.mubr.msk.f32.mxu0 %vm1112_vm1, %v8332_v1 }
  0xcf   : > { %6787 = vmatmul.mubr.msk.f32.gmra.mrb[10].mxu1 %vm1112_vm1, %v8298_v60 }
  0xd0   : > { %7178 = vmatpush3.bf16.msra.mxu1 %v7159_v45  ;;  %6789 = vmatprep.mubr.msk.f32.mxu1 %vm1112_vm1, %v8304_v61  ;;  %v8621_v45 = vld [vmem:[%s11372_s29 + $0x98] sm:$0xff] }
  0xd1   : > { %7180 = vmatprep.subr.bf16.mxu1 %v7163_v51  ;;  %6751 = vmatmul.mubr.msk.f32.gmra.mrb[10].mxu0 %vm1112_vm1, %v8351_v4 }
  0xd2   : > { %6753 = vmatprep.mubr.msk.f32.mxu0 %vm1112_vm1, %v8358_v5 }
  0xd3   : > { %6790 = vmatmul.mubr.msk.f32.gmra.mrb[12].mxu1 %vm1112_vm1, %v8311_v62  ;;  %v8733_v62 = vrot.slane %v8726_v22, %v3750_v42 }
  0xd4   : > { %7182 = vmatpush3.bf16.msra.mxu1 %v7163_v51  ;;  %6792 = vmatprep.mubr.msk.f32.mxu1 %vm1112_vm1, %v8320_v63  ;;  %v8667_v51 = vld [vmem:[%s11372_s29 + $0xc0] sm:$0xff] }
  0xd5   : > { %7184 = vmatprep.subr.bf16.mxu1 %v7167_v55  ;;  %6754 = vmatmul.mubr.msk.f32.gmra.mrb[12].mxu0 %vm1112_vm1, %v8379_v8  ;;  %v764_v63 = vld [vmem:[%s8213_s18] sm:$0x1f]  ;;  %11387 = vst [vmem:[#allocation35_spill] sm:$0xff] %v8733_v62 }
  0xd6   : > { %6756 = vmatprep.mubr.msk.f32.mxu0 %vm1112_vm1, %v8386_v9 }
  0xd7   : > { %6793 = vmatmul.mubr.msk.f32.gmra.mrb[14].mxu1 %vm1112_vm1, %v8337_v2  ;;  %v8729_v2 = vsub.s32 1, %v8722_v44 }
  0xd8   : > { %7186 = vmatpush3.bf16.msra.mxu1 %v7167_v55  ;;  %6811 = vmatprep.mubr.msk.f32.mxu1 %vm1112_vm1, %v8344_v3  ;;  %v8690_v55 = vld [vmem:[%s11372_s29 + $0xd8] sm:$0xff] }
  0xd9   : > { %6757 = vmatmul.mubr.msk.f32.gmra.mrb[14].mxu0 %vm1112_vm1, %v8411_v12  ;;  %11386 = vst [vmem:[#allocation34_spill] sm:$0xff] %v8729_v2  ;;  %v8736_v61 = vrot.slane %v764_v63, %v8729_v2  ;;  %v805_v44 = vrot.slane %v8726_v22, %v8729_v2 }
  0xda   : > { %6759 = vmatprep.mubr.msk.f32.mxu0 %vm1112_vm1, %v8418_v13 }
  0xdb   : > { %6812 = vmatmul.mubr.msk.f32.vlgmr.msra.gmra.mrb[16].mxu1 %vm1112_vm1, %v8363_v6  ;;  %11388 = vst [vmem:[#allocation36_spill] sm:$0xff] %v8736_v61 }
  0xdc   : > { %6814 = vmatprep.mubr.msk.f32.mxu1 %vm1112_vm1, %v8372_v7 }
  0xdd   : > { %6760 = vmatmul.mubr.msk.f32.gmra.mrb[16].mxu0 %vm1112_vm1, %v8439_v16 }
  0xde   : > { %6762 = vmatprep.mubr.msk.f32.mxu0 %vm1112_vm1, %v8446_v17 }
  0xdf   : > { %6815 = vmatmul.mubr.msk.f32.gmra.mrb[18].mxu1 %vm1112_vm1, %v8391_v10 }
  0xe0   : > { %6817 = vmatprep.mubr.msk.f32.mxu1 %vm1112_vm1, %v8400_v11 }
  0xe1   : > { %6763 = vmatmul.mubr.msk.f32.gmra.mrb[18].mxu0 %vm1112_vm1, %v8467_v20 }
  0xe2   : > { %6765 = vmatprep.mubr.msk.f32.mxu0 %vm1112_vm1, %v8474_v21 }
  0xe3   : > { %6818 = vmatmul.mubr.msk.f32.gmra.mrb[20].mxu1 %vm1112_vm1, %v8425_v14 }
  0xe4   : > { %6820 = vmatprep.mubr.msk.f32.mxu1 %vm1112_vm1, %v8430_v15 }
  0xe5   : > { %6766 = vmatmul.mubr.msk.f32.gmra.mrb[20].mxu0 %vm1112_vm1, %v8495_v25 }
  0xe6   : > { %6768 = vmatprep.mubr.msk.f32.mxu0 %vm1112_vm1, %v8502_v26 }
  0xe7   : > { %6821 = vmatmul.mubr.msk.f32.gmra.mrb[22].mxu1 %vm1112_vm1, %v8453_v18 }
  0xe8   : > { %6823 = vmatprep.mubr.msk.f32.mxu1 %vm1112_vm1, %v8458_v19 }
  0xe9   : > { %6769 = vmatmul.mubr.msk.f32.gmra.mrb[22].mxu0 %vm1112_vm1, %v8523_v29 }
  0xea   : > { %6771 = vmatprep.mubr.msk.f32.mxu0 %vm1112_vm1, %v8530_v30 }
  0xeb   : > { %6824 = vmatmul.mubr.msk.f32.gmra.mrb[24].mxu1 %vm1112_vm1, %v8481_v23 }
  0xec   : > { %6826 = vmatprep.mubr.msk.f32.mxu1 %vm1112_vm1, %v8486_v24 }
  0xed   : > { %6772 = vmatmul.mubr.msk.f32.gmra.mrb[24].mxu0 %vm1112_vm1, %v8551_v33 }
  0xee   : > { %6774 = vmatprep.mubr.msk.f32.mxu0 %vm1112_vm1, %v8558_v34 }
  0xef   : > { %6827 = vmatmul.mubr.msk.f32.gmra.mrb[26].mxu1 %vm1112_vm1, %v8509_v27 }
  0xf0   : > { %6829 = vmatprep.mubr.msk.f32.mxu1 %vm1112_vm1, %v8514_v28 }
  0xf1   : > { %6775 = vmatmul.mubr.msk.f32.gmra.mrb[26].mxu0 %vm1112_vm1, %v8579_v37 }
  0xf2   : > { %6777 = vmatprep.mubr.msk.f32.mxu0 %vm1112_vm1, %v8586_v38 }
  0xf3   : > { %6830 = vmatmul.mubr.msk.f32.gmra.mrb[28].mxu1 %vm1112_vm1, %v8537_v31 }
  0xf4   : > { %6832 = vmatprep.mubr.msk.f32.mxu1 %vm1112_vm1, %v8542_v32 }
  0xf5   : > { %6778 = vmatmul.mubr.msk.f32.gmra.mrb[28].mxu0 %vm1112_vm1, %v8607_v41 }
  0xf6   : > { %6780 = vmatprep.mubr.msk.f32.mxu0 %vm1112_vm1, %v8614_v43 }
  0xf7   : > { %6833 = vmatmul.mubr.msk.f32.gmra.mrb[30].mxu1 %vm1112_vm1, %v8565_v35 }
  0xf8   : > { %6835 = vmatprep.mubr.msk.f32.mxu1 %vm1112_vm1, %v8570_v36 }
  0xf9   : > { %6781 = vmatmul.mubr.msk.f32.gmra.mrb[30].mxu0 %vm1112_vm1, %v8635_v47 }
  0xfa   : > { %6875 = vmatprep.mubr.msk.f32.mxu0 %vm1112_vm1, %v8344_v3  ;;  %v8718_v3 = vld [vmem:[%s11372_s29 + $0xf8] sm:$0xff] }
  0xfb   : > { %6836 = vmatmul.mubr.msk.f32.gmra.mrb[32].mxu1 %vm1112_vm1, %v8593_v39 }
  0xfc   : > { %6838 = vmatprep.mubr.msk.f32.mxu1 %vm1112_vm1, %v8598_v40 }
  0xff   : > { %6839 = vmatmul.mubr.msk.f32.gmra.mrb[34].mxu1 %vm1112_vm1, %v8621_v45 }
 0x100   : > { %6841 = vmatprep.mubr.msk.f32.mxu1 %vm1112_vm1, %v8626_v46 }
 0x103   : > { %6842 = vmatmul.mubr.msk.f32.gmra.mrb[36].mxu1 %vm1112_vm1, %v8644_v48 }
 0x104   : > { %6844 = vmatprep.mubr.msk.f32.mxu1 %vm1112_vm1, %v8649_v49 }
 0x107   : > { %6845 = vmatmul.mubr.msk.f32.gmra.mrb[38].mxu1 %vm1112_vm1, %v8662_v50 }
 0x108   : > { %6847 = vmatprep.mubr.msk.f32.mxu1 %vm1112_vm1, %v8667_v51 }
 0x10b   : > { %6848 = vmatmul.mubr.msk.f32.gmra.mrb[40].mxu1 %vm1112_vm1, %v8676_v52 }
 0x10c   : > { %6850 = vmatprep.mubr.msk.f32.mxu1 %vm1112_vm1, %v8681_v53 }
 0x10f   : > { %6851 = vmatmul.mubr.msk.f32.gmra.mrb[42].mxu1 %vm1112_vm1, %v8690_v55 }
 0x110   : > { %6853 = vmatprep.mubr.msk.f32.mxu1 %vm1112_vm1, %v8695_v56 }
 0x113   : > { %6854 = vmatmul.mubr.msk.f32.gmra.mrb[44].mxu1 %vm1112_vm1, %v8704_v57 }
 0x114   : > { %6856 = vmatprep.mubr.msk.f32.mxu1 %vm1112_vm1, %v8709_v58 }
 0x117   : > { %6857 = vmatmul.mubr.msk.f32.gmra.mrb[46].mxu1 %vm1112_vm1, %v8718_v3 }
 0x18e   : > { %v6725_v60 = vpop.f32.mrb[0].mxu1 }
 0x18f   : > { %v1017_v47 = vpop.f32.mrb[1].mxu1 }
 0x190   : > { %v6726_v43 = vpop.f32.mrb[2].mxu1  ;;  %v6701_v42 = vpop.f32.mrb[0].mxu0 }
 0x191   : > { %v7191_v41 = vpack.c.bf16 %v6726_v43, %v6725_v60  ;;  %v1020_v54 = vpop.f32.mrb[3].mxu1  ;;  %v897_v63 = vadd.f32 %v6701_v42, %v805_v44  ;;  %v888_v61 = vpop.f32.mrb[1].mxu0 }
 0x192   : > { %v7187_v38 = vpack.c.bf16 %v1020_v54, %v1017_v47  ;;  %v889_v26 = vadd.f32 %v888_v61, %v805_v44  ;;  %v6702_v60 = vpop.f32.mrb[2].mxu0 }
 0x193   : > { %v900_v43 = vadd.f32 %v6702_v60, %v805_v44  ;;  %v891_v47 = vpop.f32.mrb[3].mxu0 }
 0x194   : > { %7188 = vmatprep.subr.bf16.mxu0 %v7187_v38 }
 0x195   : > { %7190 = vmatpush3.bf16.msra.mxu0 %v7187_v38  ;;  %v892_v38 = vadd.f32 %v891_v47, %v805_v44  ;;  %v7207_v54 = vpack.c.bf16 %v900_v43, %v897_v63 }
 0x196   : > { %v6729_v37 = vpop.f32.mrb[4].mxu1  ;;  %7192 = vmatprep.subr.bf16.mxu0 %v7191_v41 }
 0x197   : > { %v1033_v34 = vpop.f32.mrb[5].mxu1  ;;  %v7203_v25 = vpack.c.bf16 %v892_v38, %v889_v26 }
 0x198   : > { %v6730_v33 = vpop.f32.mrb[6].mxu1 }
 0x199   : > { %v7199_v62 = vpack.c.bf16 %v6730_v33, %v6729_v37  ;;  %v1036_v30 = vpop.f32.mrb[7].mxu1  ;;  %7194 = vmatpush3.bf16.msra.mxu0 %v7191_v41  ;;  %v6705_v33 = vpop.f32.mrb[4].mxu0 }
 0x19a   : > { %v7195_v29 = vpack.c.bf16 %v1036_v30, %v1033_v34  ;;  %v913_v37 = vadd.f32 %v6705_v33, %v805_v44  ;;  %v904_v41 = vpop.f32.mrb[5].mxu0 }
 0x19b   : > { %v905_v61 = vadd.f32 %v904_v41, %v805_v44  ;;  %v6706_v34 = vpop.f32.mrb[6].mxu0 }
 0x19c   : > { %7196 = vmatprep.subr.bf16.mxu0 %v7195_v29  ;;  %v916_v60 = vadd.f32 %v6706_v34, %v805_v44 }
 0x19d   : > { %7198 = vmatpush3.bf16.msra.mxu0 %v7195_v29  ;;  %v907_v29 = vpop.f32.mrb[7].mxu0 }
 0x19e   : > { %7200 = vmatprep.subr.bf16.mxu0 %v7199_v62  ;;  %v8740_v2 = vpop.f32.mrb[8].mxu1  ;;  %v908_v26 = vadd.f32 %v907_v29, %v805_v44 }
 0x19f   : > { %v8742_v22 = vpop.f32.mrb[9].mxu1 }
 0x1a0   : > { %v7211_v43 = vpack.c.bf16 %v908_v26, %v905_v61  ;;  %v6749_v38 = vpop.f32.mrb[8].mxu0 }
 0x1a1   : > { %7202 = vmatpush3.bf16.msra.mxu0 %v7199_v62  ;;  %v7215_v62 = vpack.c.bf16 %v916_v60, %v913_v37  ;;  %v1275_v44 = vpop.f32.mrb[9].mxu0 }
 0x1a2   : > { %7204 = vmatprep.subr.bf16.mxu0 %v7203_v25  ;;  %v8744_v30 = vpop.f32.mrb[10].mxu1 }
 0x1a3   : > { %v8746_v42 = vpop.f32.mrb[11].mxu1 }
 0x1a4   : > { %6876 = vmatmul.mubr.msk.f32.vlgmr.msra.gmra.mrb[32].mxu0 %vm1112_vm1, %v8363_v6 }
 0x1a5   : > { %6878 = vmatprep.mubr.msk.f32.mxu0 %vm1112_vm1, %v8372_v7  ;;  %7206 = vmatpush3.bf16.msra.mxu0 %v7203_v25  ;;  %v6752_v25 = vpop.f32.mrb[10].mxu0 }
 0x1a6   : > { %v8752_v63 = vpop.f32.mrb[12].mxu1  ;;  %7208 = vmatprep.subr.bf16.mxu0 %v7207_v54  ;;  %v1285_v33 = vpop.f32.mrb[11].mxu0 }
 0x1a7   : > { %v8754_v47 = vpop.f32.mrb[13].mxu1 }
 0x1a8   : > { %6879 = vmatmul.mubr.msk.f32.gmra.mrb[34].mxu0 %vm1112_vm1, %v8391_v10  ;;  %v6755_v41 = vpop.f32.mrb[12].mxu0 }
 0x1a9   : > { %6881 = vmatprep.mubr.msk.f32.mxu0 %vm1112_vm1, %v8400_v11  ;;  %7210 = vmatpush3.bf16.msra.mxu0 %v7207_v54 }
 0x1aa   : > { %v8760_v6 = vpop.f32.mrb[14].mxu1  ;;  %7212 = vmatprep.subr.bf16.mxu0 %v7211_v43 }
 0x1ab   : > { %v8762_v7 = vpop.f32.mrb[15].mxu1 }
 0x1ac   : > { %6882 = vmatmul.mubr.msk.f32.gmra.mrb[36].mxu0 %vm1112_vm1, %v8425_v14  ;;  %v1295_v14 = vpop.f32.mrb[13].mxu0 }
 0x1ad   : > { %6884 = vmatprep.mubr.msk.f32.mxu0 %vm1112_vm1, %v8430_v15  ;;  %7214 = vmatpush3.bf16.msra.mxu0 %v7211_v43  ;;  %v6758_v26 = vpop.f32.mrb[14].mxu0 }
 0x1ae   : > { %v6813_v10 = vpop.f32.mrb[16].mxu1  ;;  %7216 = vmatprep.subr.bf16.mxu0 %v7215_v62  ;;  %v1305_v43 = vpop.f32.mrb[15].mxu0 }
 0x1af   : > { %v8768_v37 = vsub.f32 %v6749_v38, %v6813_v10  ;;  %v1596_v11 = vpop.f32.mrb[17].mxu1 }
 0x1b0   : > { %6885 = vmatmul.mubr.msk.f32.gmra.mrb[38].mxu0 %vm1112_vm1, %v8453_v18  ;;  %v8772_v54 = vsub.f32 %v1275_v44, %v1596_v11  ;;  %v6761_v11 = vpop.f32.mrb[16].mxu0 }
 0x1b1   : > { %6887 = vmatprep.mubr.msk.f32.mxu0 %vm1112_vm1, %v8458_v19  ;;  %7218 = vmatpush3.bf16.msra.mxu0 %v7215_v62  ;;  %v1788_v34 = vmul.f32 %v8768_v37, %v8768_v37 }
 0x1b2   : > { %v6816_v15 = vpop.f32.mrb[18].mxu1  ;;  %v1787_v61 = vmul.f32 %v8772_v54, %v8772_v54 }
 0x1b3   : > { %v8780_v60 = vsub.f32 %v6752_v25, %v6816_v15  ;;  %v1606_v29 = vpop.f32.mrb[19].mxu1  ;;  %v1823_v44 = vsel %vm1819_vm2, %v1788_v34, 0.0  ;;  %v1315_v34 = vpop.f32.mrb[17].mxu0 }
 0x1b4   : > { %6888 = vmatmul.mubr.msk.f32.gmra.mrb[40].mxu0 %vm1112_vm1, %v8481_v23  ;;  %v8784_v18 = vsub.f32 %v1285_v33, %v1606_v29  ;;  %v1820_v19 = vsel %vm1819_vm2, %v1787_v61, 0.0 }
 0x1b5   : > { %11389 = vst [vmem:[#allocation37_spill] sm:$0xff] %v8780_v60  ;;  %6890 = vmatprep.mubr.msk.f32.mxu0 %vm1112_vm1, %v8486_v24  ;;  %1821 = vadd.xlane.f32.xlu0 %v1820_v19  ;;  %v1790_v62 = vmul.f32 %v8780_v60, %v8780_v60 }
 0x1b6   : > { %11390 = vst [vmem:[#allocation38_spill] sm:$0xff] %v8784_v18  ;;  %v6819_v38 = vpop.f32.mrb[20].mxu1  ;;  %v1789_v25 = vmul.f32 %v8784_v18, %v8784_v18 }
 0x1b7   : > { %v1829_v23 = vsel %vm1819_vm2, %v1790_v62, 0.0  ;;  %v8795_v33 = vsub.f32 %v6755_v41, %v6819_v38  ;;  %v1616_v10 = vpop.f32.mrb[21].mxu1  ;;  %v6764_v62 = vpop.f32.mrb[18].mxu0 }
 0x1b8   : > { %6891 = vmatmul.mubr.msk.f32.gmra.mrb[42].mxu0 %vm1112_vm1, %v8509_v27  ;;  %1830 = vadd.xlane.f32.xlu1 %v1829_v23  ;;  %v8799_v24 = vsub.f32 %v1295_v14, %v1616_v10  ;;  %v1826_v15 = vsel %vm1819_vm2, %v1789_v25, 0.0 }
 0x1b9   : > { %11391 = vst [vmem:[#allocation39_spill] sm:$0xff] %v8795_v33  ;;  %6893 = vmatprep.mubr.msk.f32.mxu0 %vm1112_vm1, %v8514_v28  ;;  %1824 = vadd.xlane.f32.xlu0 %v1823_v44  ;;  %v1792_v61 = vmul.f32 %v8795_v33, %v8795_v33  ;;  %v1325_v44 = vpop.f32.mrb[19].mxu0 }
 0x1ba   : > { %11392 = vst [vmem:[#allocation40_spill] sm:$0xff] %v8799_v24  ;;  %v6822_v41 = vpop.f32.mrb[22].mxu1  ;;  %v1791_v29 = vmul.f32 %v8799_v24, %v8799_v24 }
 0x1bb   : > { %v8808_v19 = vsub.f32 %v6758_v26, %v6822_v41  ;;  %v1626_v27 = vpop.f32.mrb[23].mxu1  ;;  %v1835_v38 = vsel %vm1819_vm2, %v1792_v61, 0.0 }
 0x1bc   : > { %6894 = vmatmul.mubr.msk.f32.gmra.mrb[44].mxu0 %vm1112_vm1, %v8537_v31  ;;  %1827 = vadd.xlane.f32.xlu1 %v1826_v15  ;;  %v8812_v14 = vsub.f32 %v1305_v43, %v1626_v27  ;;  %v1832_v28 = vsel %vm1819_vm2, %v1791_v29, 0.0  ;;  %v6767_v15 = vpop.f32.mrb[20].mxu0 }
 0x1bd   : > { %11393 = vst [vmem:[#allocation41_spill] sm:$0xff] %v8808_v19  ;;  %6896 = vmatprep.mubr.msk.f32.mxu0 %vm1112_vm1, %v8542_v32  ;;  %1833 = vadd.xlane.f32.xlu0 %v1832_v28  ;;  %v1794_v26 = vmul.f32 %v8808_v19, %v8808_v19  ;;  %v1335_v41 = vpop.f32.mrb[21].mxu0 }
 0x1be   : > { %11394 = vst [vmem:[#allocation42_spill] sm:$0xff] %v8812_v14  ;;  %v6825_v25 = vpop.f32.mrb[24].mxu1  ;;  %v1793_v31 = vmul.f32 %v8812_v14, %v8812_v14 }
 0x1bf   : > { %v8822_v23 = vsub.f32 %v6761_v11, %v6825_v25  ;;  %v1636_v43 = vpop.f32.mrb[25].mxu1  ;;  %v1841_v61 = vsel %vm1819_vm2, %v1794_v26, 0.0 }
 0x1c0   : > { %6897 = vmatmul.mubr.msk.f32.gmra.mrb[46].mxu0 %vm1112_vm1, %v8565_v35  ;;  %1836 = vadd.xlane.f32.xlu1 %v1835_v38  ;;  %v8826_v10 = vsub.f32 %v1315_v34, %v1636_v43  ;;  %v1838_v32 = vsel %vm1819_vm2, %v1793_v31, 0.0  ;;  %v6770_v38 = vpop.f32.mrb[22].mxu0 }
 0x1c1   : > { %11395 = vst [vmem:[#allocation43_spill] sm:$0xff] %v8822_v23  ;;  %6899 = vmatprep.mubr.msk.f32.mxu0 %vm1112_vm1, %v8570_v36  ;;  %1839 = vadd.xlane.f32.xlu0 %v1838_v32  ;;  %v1796_v11 = vmul.f32 %v8822_v23, %v8822_v23  ;;  %v1345_v25 = vpop.f32.mrb[23].mxu0 }
 0x1c2   : > { %11396 = vst [vmem:[#allocation44_spill] sm:$0xff] %v8826_v10  ;;  %v6828_v29 = vpop.f32.mrb[26].mxu1  ;;  %v1795_v35 = vmul.f32 %v8826_v10, %v8826_v10 }
 0x1c3   : > { %v8836_v27 = vsub.f32 %v6764_v62, %v6828_v29  ;;  %v1646_v34 = vpop.f32.mrb[27].mxu1  ;;  %v1847_v26 = vsel %vm1819_vm2, %v1796_v11, 0.0 }
 0x1c4   : > { %6900 = vmatmul.mubr.msk.f32.gmra.mrb[48].mxu0 %vm1112_vm1, %v8593_v39  ;;  %1842 = vadd.xlane.f32.xlu1 %v1841_v61  ;;  %v8840_v28 = vsub.f32 %v1325_v44, %v1646_v34  ;;  %v1844_v36 = vsel %vm1819_vm2, %v1795_v35, 0.0  ;;  %v6773_v61 = vpop.f32.mrb[24].mxu0 }
 0x1c5   : > { %11397 = vst [vmem:[#allocation45_spill] sm:$0xff] %v8836_v27  ;;  %6902 = vmatprep.mubr.msk.f32.mxu0 %vm1112_vm1, %v8598_v40  ;;  %1845 = vadd.xlane.f32.xlu0 %v1844_v36  ;;  %v1798_v62 = vmul.f32 %v8836_v27, %v8836_v27  ;;  %v1355_v29 = vpop.f32.mrb[25].mxu0 }
 0x1c6   : > { %11398 = vst [vmem:[#allocation46_spill] sm:$0xff] %v8840_v28  ;;  %v6831_v31 = vpop.f32.mrb[28].mxu1  ;;  %v1797_v39 = vmul.f32 %v8840_v28, %v8840_v28 }
 0x1c7   : > { %v8850_v43 = vsub.f32 %v6767_v15, %v6831_v31  ;;  %v1656_v44 = vpop.f32.mrb[29].mxu1  ;;  %v1853_v11 = vsel %vm1819_vm2, %v1798_v62, 0.0 }
 0x1c8   : > { %6903 = vmatmul.mubr.msk.f32.gmra.mrb[50].mxu0 %vm1112_vm1, %v8621_v45  ;;  %1848 = vadd.xlane.f32.xlu1 %v1847_v26  ;;  %v8854_v32 = vsub.f32 %v1335_v41, %v1656_v44  ;;  %v1850_v40 = vsel %vm1819_vm2, %v1797_v39, 0.0  ;;  %v6776_v26 = vpop.f32.mrb[26].mxu0 }
 0x1c9   : > { %11399 = vst [vmem:[#allocation47_spill] sm:$0xff] %v8850_v43  ;;  %6905 = vmatprep.mubr.msk.f32.mxu0 %vm1112_vm1, %v8626_v46  ;;  %1851 = vadd.xlane.f32.xlu0 %v1850_v40  ;;  %v1800_v15 = vmul.f32 %v8850_v43, %v8850_v43  ;;  %v1365_v31 = vpop.f32.mrb[27].mxu0 }
 0x1ca   : > { %11400 = vst [vmem:[#allocation48_spill] sm:$0xff] %v8854_v32  ;;  %v6834_v35 = vpop.f32.mrb[30].mxu1  ;;  %v1799_v45 = vmul.f32 %v8854_v32, %v8854_v32 }
 0x1cb   : > { %v8864_v34 = vsub.f32 %v6770_v38, %v6834_v35  ;;  %v1666_v41 = vpop.f32.mrb[31].mxu1  ;;  %v1859_v62 = vsel %vm1819_vm2, %v1800_v15, 0.0 }
 0x1cc   : > { %6906 = vmatmul.mubr.msk.f32.gmra.mrb[52].mxu0 %vm1112_vm1, %v8644_v48  ;;  %1854 = vadd.xlane.f32.xlu1 %v1853_v11  ;;  %v8868_v36 = vsub.f32 %v1345_v25, %v1666_v41  ;;  %v1856_v46 = vsel %vm1819_vm2, %v1799_v45, 0.0  ;;  %v6779_v11 = vpop.f32.mrb[28].mxu0 }
 0x1cd   : > { %11401 = vst [vmem:[#allocation49_spill] sm:$0xff] %v8864_v34  ;;  %6908 = vmatprep.mubr.msk.f32.mxu0 %vm1112_vm1, %v8649_v49  ;;  %1857 = vadd.xlane.f32.xlu0 %v1856_v46  ;;  %v1802_v38 = vmul.f32 %v8864_v34, %v8864_v34  ;;  %v1375_v35 = vpop.f32.mrb[29].mxu0 }
 0x1ce   : > { %11402 = vst [vmem:[#allocation50_spill] sm:$0xff] %v8868_v36  ;;  %v6837_v39 = vpop.f32.mrb[32].mxu1  ;;  %v1801_v48 = vmul.f32 %v8868_v36, %v8868_v36 }
 0x1cf   : > { %v8878_v44 = vsub.f32 %v6773_v61, %v6837_v39  ;;  %v1676_v25 = vpop.f32.mrb[33].mxu1  ;;  %v1865_v15 = vsel %vm1819_vm2, %v1802_v38, 0.0 }
 0x1d0   : > { %6909 = vmatmul.mubr.msk.f32.gmra.mrb[54].mxu0 %vm1112_vm1, %v8662_v50  ;;  %1860 = vadd.xlane.f32.xlu1 %v1859_v62  ;;  %v8882_v40 = vsub.f32 %v1355_v29, %v1676_v25  ;;  %v1862_v49 = vsel %vm1819_vm2, %v1801_v48, 0.0  ;;  %v6782_v62 = vpop.f32.mrb[30].mxu0 }
 0x1d1   : > { %6911 = vmatprep.mubr.msk.f32.mxu0 %vm1112_vm1, %v8667_v51  ;;  %1863 = vadd.xlane.f32.xlu0 %v1862_v49  ;;  %v1804_v61 = vmul.f32 %v8878_v44, %v8878_v44  ;;  %v1385_v39 = vpop.f32.mrb[31].mxu0 }
 0x1d2   : > { %v6840_v45 = vpop.f32.mrb[34].mxu1  ;;  %v1803_v50 = vmul.f32 %v8882_v40, %v8882_v40 }
 0x1d3   : > { %v8892_v41 = vsub.f32 %v6776_v26, %v6840_v45  ;;  %v1686_v29 = vpop.f32.mrb[35].mxu1  ;;  %v1871_v38 = vsel %vm1819_vm2, %v1804_v61, 0.0 }
 0x1d4   : > { %6912 = vmatmul.mubr.msk.f32.gmra.mrb[56].mxu0 %vm1112_vm1, %v8676_v52  ;;  %1866 = vadd.xlane.f32.xlu1 %v1865_v15  ;;  %v8896_v46 = vsub.f32 %v1365_v31, %v1686_v29  ;;  %v1868_v51 = vsel %vm1819_vm2, %v1803_v50, 0.0 }
 0x1d5   : > { %6914 = vmatprep.mubr.msk.f32.mxu0 %vm1112_vm1, %v8681_v53  ;;  %1869 = vadd.xlane.f32.xlu0 %v1868_v51  ;;  %v1806_v26 = vmul.f32 %v8892_v41, %v8892_v41 }
 0x1d6   : > { %v6843_v48 = vpop.f32.mrb[36].mxu1  ;;  %v1805_v52 = vmul.f32 %v8896_v46, %v8896_v46 }
 0x1d7   : > { %v8906_v25 = vsub.f32 %v6779_v11, %v6843_v48  ;;  %v1696_v31 = vpop.f32.mrb[37].mxu1  ;;  %v1877_v15 = vsel %vm1819_vm2, %v1806_v26, 0.0 }
 0x1d8   : > { %6915 = vmatmul.mubr.msk.f32.gmra.mrb[58].mxu0 %vm1112_vm1, %v8690_v55  ;;  %1872 = vadd.xlane.f32.xlu1 %v1871_v38  ;;  %v8910_v49 = vsub.f32 %v1375_v35, %v1696_v31  ;;  %v1874_v53 = vsel %vm1819_vm2, %v1805_v52, 0.0 }
 0x1d9   : > { %11403 = vst [vmem:[#allocation51_spill] sm:$0xff] %v8906_v25  ;;  %6917 = vmatprep.mubr.msk.f32.mxu0 %vm1112_vm1, %v8695_v56  ;;  %1875 = vadd.xlane.f32.xlu0 %v1874_v53  ;;  %v1808_v61 = vmul.f32 %v8906_v25, %v8906_v25 }
 0x1da   : > { %11404 = vst [vmem:[#allocation52_spill] sm:$0xff] %v8910_v49  ;;  %v6846_v11 = vpop.f32.mrb[38].mxu1  ;;  %v1807_v45 = vmul.f32 %v8910_v49, %v8910_v49 }
 0x1db   : > { %v8920_v50 = vsub.f32 %v6782_v62, %v6846_v11  ;;  %v1706_v55 = vpop.f32.mrb[39].mxu1  ;;  %v1883_v29 = vsel %vm1819_vm2, %v1808_v61, 0.0 }
 0x1dc   : > { %6918 = vmatmul.mubr.msk.f32.gmra.mrb[60].mxu0 %vm1112_vm1, %v8704_v57  ;;  %1878 = vadd.xlane.f32.xlu1 %v1877_v15  ;;  %v8924_v35 = vsub.f32 %v1385_v39, %v1706_v55  ;;  %v1880_v56 = vsel %vm1819_vm2, %v1807_v45, 0.0 }
 0x1dd   : > { %11405 = vst [vmem:[#allocation53_spill] sm:$0xff] %v8920_v50  ;;  %6920 = vmatprep.mubr.msk.f32.mxu0 %vm1112_vm1, %v8709_v58  ;;  %1881 = vadd.xlane.f32.xlu0 %v1880_v56  ;;  %v1810_v51 = vmul.f32 %v8920_v50, %v8920_v50 }
 0x1de   : > { %11406 = vst [vmem:[#allocation54_spill] sm:$0xff] %v8924_v35  ;;  %v6849_v62 = vpop.f32.mrb[40].mxu1  ;;  %v1809_v38 = vmul.f32 %v8924_v35, %v8924_v35 }
 0x1df   : > { %v8935_v57 = vsub.f32 %v8740_v2, %v6849_v62  ;;  %v1716_v26 = vpop.f32.mrb[41].mxu1  ;;  %v1889_v48 = vsel %vm1819_vm2, %v1810_v51, 0.0 }
 0x1e0   : > { %6921 = vmatmul.mubr.msk.f32.gmra.mrb[62].mxu0 %vm1112_vm1, %v8718_v3  ;;  %1884 = vadd.xlane.f32.xlu1 %v1883_v29  ;;  %v8940_v58 = vsub.f32 %v8742_v22, %v1716_v26  ;;  %v1886_v39 = vsel %vm1819_vm2, %v1809_v38, 0.0  ;;  %v11419_v26 = vld [vmem:[#allocation25_spill] sm:$0xff] }
 0x1e1   : > { %11407 = vst [vmem:[#allocation55_spill] sm:$0xff] %v8935_v57  ;;  %6939 = vmatprep.mubr.msk.f32.mxu0 %vm1112_vm1, %v8293_v59  ;;  %1887 = vadd.xlane.f32.xlu0 %v1886_v39  ;;  %v1812_v2 = vmul.f32 %v8935_v57, %v8935_v57  ;;  %v11423_v39 = vld [vmem:[#allocation29_spill] sm:$0xff] }
 0x1e2   : > { %11408 = vst [vmem:[#allocation56_spill] sm:$0xff] %v8940_v58  ;;  %v6852_v52 = vpop.f32.mrb[42].mxu1  ;;  %v1811_v31 = vmul.f32 %v8940_v58, %v8940_v58 }
 0x1e3   : > { %v8951_v3 = vsub.f32 %v8744_v30, %v6852_v52  ;;  %v1726_v22 = vpop.f32.mrb[43].mxu1  ;;  %v1895_v15 = vsel %vm1819_vm2, %v1812_v2, 0.0  ;;  %v11425_v2 = vld [vmem:[#allocation31_spill] sm:$0xff]  ;;  %v7742_v52 = vld [vmem:[%s11366_s28 + $0xc0] sm:$0xff] }
 0x1e4   : > { %6940 = vmatmul.mubr.msk.f32.vlgmr.msra.gmra.mrb[32].mxu0 %vm1112_vm1, %v8327_v0  ;;  %1890 = vadd.xlane.f32.xlu1 %v1889_v48  ;;  %v8956_v59 = vsub.f32 %v8746_v42, %v1726_v22  ;;  %v1892_v53 = vsel %vm1819_vm2, %v1811_v31, 0.0  ;;  %v11424_v48 = vld [vmem:[#allocation30_spill] sm:$0xff]  ;;  %v7743_v31 = vld [vmem:[%s11366_s28 + $0xc8] sm:$0xff]  ;;  %v7744_v22 = vld [vmem:[%s11366_s28 + $0xd0] sm:$0xff] }
 0x1e5   : > { %11409 = vst [vmem:[#allocation57_spill] sm:$0xff] %v8951_v3  ;;  %6942 = vmatprep.mubr.msk.f32.mxu0 %vm1112_vm1, %v8332_v1  ;;  %1893 = vadd.xlane.f32.xlu0 %v1892_v53  ;;  %v1814_v30 = vmul.f32 %v8951_v3, %v8951_v3  ;;  %v11426_v53 = vld [vmem:[#allocation16_spill] sm:$0xff] }
 0x1e6   : > { %11410 = vst [vmem:[#allocation58_spill] sm:$0xff] %v8956_v59  ;;  %v6855_v61 = vpop.f32.mrb[44].mxu1  ;;  %v1813_v11 = vmul.f32 %v8956_v59, %v8956_v59 }
 0x1e7   : > { %v8967_v0 = vsub.f32 %v8752_v63, %v6855_v61  ;;  %v1736_v42 = vpop.f32.mrb[45].mxu1  ;;  %v1901_v55 = vsel %vm1819_vm2, %v1814_v30, 0.0  ;;  %v11428_v30 = vld [vmem:[#allocation18_spill] sm:$0xff]  ;;  %v11429_v61 = vld [vmem:[#allocation19_spill] sm:$0xff] }
 0x1e8   : > { %6943 = vmatmul.mubr.msk.f32.gmra.mrb[34].mxu0 %vm1112_vm1, %v8351_v4  ;;  %1896 = vadd.xlane.f32.xlu1 %v1895_v15  ;;  %v8972_v1 = vsub.f32 %v8754_v47, %v1736_v42  ;;  %v1898_v45 = vsel %vm1819_vm2, %v1813_v11, 0.0  ;;  %v11427_v15 = vld [vmem:[#allocation17_spill] sm:$0xff]  ;;  %v11430_v11 = vld [vmem:[#allocation20_spill] sm:$0xff] }
 0x1e9   : > { %11411 = vst [vmem:[#allocation59_spill] sm:$0xff] %v8967_v0  ;;  %6945 = vmatprep.mubr.msk.f32.mxu0 %vm1112_vm1, %v8358_v5  ;;  %1899 = vadd.xlane.f32.xlu0 %v1898_v45  ;;  %v1816_v63 = vmul.f32 %v8967_v0, %v8967_v0 }
 0x1ea   : > { %11412 = vst [vmem:[#allocation60_spill] sm:$0xff] %v8972_v1  ;;  %v6858_v56 = vpop.f32.mrb[46].mxu1  ;;  %v1815_v29 = vmul.f32 %v8972_v1, %v8972_v1 }
 0x1eb   : > { %v8983_v4 = vsub.f32 %v8760_v6, %v6858_v56  ;;  %v1746_v47 = vpop.f32.mrb[47].mxu1  ;;  %v1907_v62 = vsel %vm1819_vm2, %v1816_v63, 0.0 }
 0x1ec   : > { %6946 = vmatmul.mubr.msk.f32.gmra.mrb[36].mxu0 %vm1112_vm1, %v8379_v8  ;;  %1902 = vadd.xlane.f32.xlu1 %v1901_v55  ;;  %v8988_v5 = vsub.f32 %v8762_v7, %v1746_v47  ;;  %v1904_v51 = vsel %vm1819_vm2, %v1815_v29, 0.0  ;;  %v11417_v7 = vld [vmem:[#allocation23_spill] sm:$0xff] }
 0x1ed   : > { %11413 = vst [vmem:[#allocation61_spill] sm:$0xff] %v8983_v4  ;;  %6948 = vmatprep.mubr.msk.f32.mxu0 %vm1112_vm1, %v8386_v9  ;;  %1905 = vadd.xlane.f32.xlu0 %v1904_v51  ;;  %v1818_v6 = vmul.f32 %v8983_v4, %v8983_v4 }
 0x1ee   : > { %11414 = vst [vmem:[#allocation62_spill] sm:$0xff] %v8988_v5  ;;  %v1817_v38 = vmul.f32 %v8988_v5, %v8988_v5 }
 0x1ef   : > { %v1913_v9 = vsel %vm1819_vm2, %v1818_v6, 0.0 }
 0x1f0   : > { %6949 = vmatmul.mubr.msk.f32.gmra.mrb[38].mxu0 %vm1112_vm1, %v8411_v12  ;;  %1908 = vadd.xlane.f32.xlu1 %v1907_v62  ;;  %v1910_v8 = vsel %vm1819_vm2, %v1817_v38, 0.0  ;;  %v11415_v12 = vld [vmem:[#allocation21_spill] sm:$0xff] }
 0x1f1   : > { %6951 = vmatprep.mubr.msk.f32.mxu0 %vm1112_vm1, %v8418_v13  ;;  %1911 = vadd.xlane.f32.xlu0 %v1910_v8  ;;  %v11416_v13 = vld [vmem:[#allocation22_spill] sm:$0xff] }
 0x1f4   : > { %6952 = vmatmul.mubr.msk.f32.gmra.mrb[40].mxu0 %vm1112_vm1, %v8439_v16  ;;  %1914 = vadd.xlane.f32.xlu1 %v1913_v9  ;;  %v11418_v16 = vld [vmem:[#allocation24_spill] sm:$0xff] }
 0x1f5   : > { %6954 = vmatprep.mubr.msk.f32.mxu0 %vm1112_vm1, %v8446_v17  ;;  %v11420_v17 = vld [vmem:[#allocation26_spill] sm:$0xff] }
 0x1f8   : > { %6955 = vmatmul.mubr.msk.f32.gmra.mrb[42].mxu0 %vm1112_vm1, %v8467_v20  ;;  %v11421_v20 = vld [vmem:[#allocation27_spill] sm:$0xff] }
 0x1f9   : > { %6957 = vmatprep.mubr.msk.f32.mxu0 %vm1112_vm1, %v8474_v21  ;;  %v11422_v21 = vld [vmem:[#allocation28_spill] sm:$0xff] }
 0x1fc   : > { %6958 = vmatmul.mubr.msk.f32.gmra.mrb[44].mxu0 %vm1112_vm1, %v11415_v12 }
 0x1fd   : > { %6960 = vmatprep.mubr.msk.f32.mxu0 %vm1112_vm1, %v11416_v13 }
 0x200   : > { %6961 = vmatmul.mubr.msk.f32.gmra.mrb[46].mxu0 %vm1112_vm1, %v11417_v7  ;;  %v11431_v7 = vld [vmem:[#allocation32_spill] sm:$0xff] }
 0x201   : > { %6963 = vmatprep.mubr.msk.f32.mxu0 %vm1112_vm1, %v11418_v16  ;;  %v9087_v16 = vsub.s32 0, %v11431_v7 }
 0x204   : > { %6964 = vmatmul.mubr.msk.f32.gmra.mrb[48].mxu0 %vm1112_vm1, %v11419_v26 }
 0x205   : > { %6966 = vmatprep.mubr.msk.f32.mxu0 %vm1112_vm1, %v11420_v17 }
 0x208   : > { %6967 = vmatmul.mubr.msk.f32.gmra.mrb[50].mxu0 %vm1112_vm1, %v11421_v20 }
 0x209   : > { %6969 = vmatprep.mubr.msk.f32.mxu0 %vm1112_vm1, %v11422_v21 }
 0x20c   : > { %6970 = vmatmul.mubr.msk.f32.gmra.mrb[52].mxu0 %vm1112_vm1, %v11423_v39 }
 0x20d   : > { %6972 = vmatprep.mubr.msk.f32.mxu0 %vm1112_vm1, %v11424_v48  ;;  %v11432_v48 = vld [vmem:[#allocation33_spill] sm:$0xff] }
 0x210   : > { %6973 = vmatmul.mubr.msk.f32.gmra.mrb[54].mxu0 %vm1112_vm1, %v11425_v2  ;;  %v9097_v2 = vrot.slane %v11432_v48, %v9087_v16 }
 0x211   : > { %6975 = vmatprep.mubr.msk.f32.mxu0 %vm1112_vm1, %v7742_v52 }
 0x214   : > { %6976 = vmatmul.mubr.msk.f32.gmra.mrb[56].mxu0 %vm1112_vm1, %v7743_v31 }
 0x215   : > { %6978 = vmatprep.mubr.msk.f32.mxu0 %vm1112_vm1, %v7744_v22 }
 0x218   : > { %6979 = vmatmul.mubr.msk.f32.gmra.mrb[58].mxu0 %vm1112_vm1, %v11426_v53 }
 0x219   : > { %6981 = vmatprep.mubr.msk.f32.mxu0 %vm1112_vm1, %v11427_v15 }
 0x21c   : > { %6982 = vmatmul.mubr.msk.f32.gmra.mrb[60].mxu0 %vm1112_vm1, %v11428_v30 }
 0x21d   : > { %6984 = vmatprep.mubr.msk.f32.mxu0 %vm1112_vm1, %v11429_v61 }
 0x220   : > { %6985 = vmatmul.mubr.msk.f32.gmra.mrb[62].mxu0 %vm1112_vm1, %v11430_v11 }
 0x242   : > { %v1822_v45 = vpop.xlane.xlu0 %1821 }
 0x243   : > { %7454 = vrsqrt.f32 %v1822_v45  ;;  %vm1918_vm3 = vcmp.eq.f32.partialorder %v1822_v45, inf  ;;  %vm1920_vm4 = vcmp.eq.f32.partialorder %v1822_v45, 0.0  ;;  %v1921_v52 = vand.u32 2147483648, %v1822_v45 }
 0x245   : > { %v9056_v42 = vpop.xlane.xlu1 %1830 }
 0x246   : > { %v9060_v63 = vpop.xlane.xlu0 %1824  ;;  %7456 = vrsqrt.f32 %v9056_v42  ;;  %vm1939_vm5 = vcmp.eq.f32.partialorder %v9056_v42, inf  ;;  %vm1941_vm6 = vcmp.eq.f32.partialorder %v9056_v42, 0.0  ;;  %v1942_v53 = vand.u32 2147483648, %v9056_v42 }
 0x247   : > { %7458 = vrsqrt.f32 %v9060_v63  ;;  %vm1925_vm7 = vcmp.eq.f32.partialorder %v9060_v63, inf  ;;  %vm1927_vm8 = vcmp.eq.f32.partialorder %v9060_v63, 0.0 }
 0x249   : > { %v9058_v55 = vpop.xlane.xlu1 %1827 }
 0x24a   : > { %v9064_v29 = vpop.xlane.xlu0 %1833  ;;  %7460 = vrsqrt.f32 %v9058_v55  ;;  %vm1932_vm9 = vcmp.eq.f32.partialorder %v9058_v55, inf  ;;  %vm1934_vm10 = vcmp.eq.f32.partialorder %v9058_v55, 0.0 }
 0x24b   : > { %7462 = vrsqrt.f32 %v9064_v29  ;;  %vm1946_vm11 = vcmp.eq.f32.partialorder %v9064_v29, inf  ;;  %vm1948_vm12 = vcmp.eq.f32.partialorder %v9064_v29, 0.0 }
 0x24d   : > { %v9062_v56 = vpop.xlane.xlu1 %1836  ;;  %v7455_v13 = vpop.eup %7454 }
 0x24e   : > { %v9068_v51 = vpop.xlane.xlu0 %1839  ;;  %7464 = vrsqrt.f32 %v9062_v56  ;;  %v1917_v39 = vmul.f32 %v7455_v13, %v1822_v45  ;;  %v1928_v13 = vand.u32 2147483648, %v9060_v63  ;;  %vm1953_vm13 = vcmp.eq.f32.partialorder %v9062_v56, inf }
 0x24f   : > { %7466 = vrsqrt.f32 %v9068_v51  ;;  %vm1955_vm14 = vcmp.eq.f32.partialorder %v9062_v56, 0.0  ;;  %v1956_v0 = vand.u32 2147483648, %v9062_v56  ;;  %vm1960_vm15 = vcmp.eq.f32.partialorder %v9068_v51, inf }
 0x250   : > { %v7457_v26 = vpop.eup %7456  ;;  %v1919_v30 = vsel %vm1918_vm3, %v1822_v45, %v1917_v39  ;;  %v1949_v39 = vand.u32 2147483648, %v9064_v29  ;;  %vm1962_vm0 = vcmp.eq.f32.partialorder %v9068_v51, 0.0  ;;  %v1963_v45 = vand.u32 2147483648, %v9068_v51 }
 0x251   : > { %v9066_v47 = vpop.xlane.xlu1 %1842  ;;  %v7459_v20 = vpop.eup %7458  ;;  %v1938_v22 = vmul.f32 %v7457_v26, %v9056_v42  ;;  %v1935_v26 = vand.u32 2147483648, %v9058_v55  ;;  %v1922_v36 = vsel %vm1920_vm4, %v1921_v52, %v1919_v30 }
 0x252   : > { %v9072_v6 = vpop.xlane.xlu0 %1845  ;;  %7468 = vrsqrt.f32 %v9066_v47  ;;  %v1924_v31 = vmul.f32 %v7459_v20, %v9060_v63  ;;  %vm1967_vm1 = vcmp.eq.f32.partialorder %v9066_v47, inf  ;;  %vm1969_vm3 = vcmp.eq.f32.partialorder %v9066_v47, 0.0 }
 0x253   : > { %7470 = vrsqrt.f32 %v9072_v6  ;;  %v1940_v34 = vsel %vm1939_vm5, %v9056_v42, %v1938_v22  ;;  %vm1974_vm4 = vcmp.eq.f32.partialorder %v9072_v6, inf  ;;  %vm1976_vm5 = vcmp.eq.f32.partialorder %v9072_v6, 0.0 }
 0x254   : > { %v7461_v15 = vpop.eup %7460  ;;  %v1926_v48 = vsel %vm1925_vm7, %v9060_v63, %v1924_v31  ;;  %v2594_v31 = vmul.f32 %v9097_v2, %v1922_v36  ;;  %v1943_v22 = vsel %vm1941_vm6, %v1942_v53, %v1940_v34  ;;  %v1970_v34 = vand.u32 2147483648, %v9066_v47 }
 0x255   : > { %v9070_v62 = vpop.xlane.xlu1 %1848  ;;  %v7463_v61 = vpop.eup %7462  ;;  %v1931_v5 = vmul.f32 %v7461_v15, %v9058_v55  ;;  %v1929_v52 = vsel %vm1927_vm8, %v1928_v13, %v1926_v48 }
 0x256   : > { %v9076_v8 = vpop.xlane.xlu0 %1851  ;;  %7472 = vrsqrt.f32 %v9070_v62  ;;  %v1945_v4 = vmul.f32 %v7463_v61, %v9064_v29  ;;  %vm1981_vm6 = vcmp.eq.f32.partialorder %v9070_v62, inf  ;;  %vm1983_vm7 = vcmp.eq.f32.partialorder %v9070_v62, 0.0 }
 0x257   : > { %7474 = vrsqrt.f32 %v9076_v8  ;;  %v1933_v30 = vsel %vm1932_vm9, %v9058_v55, %v1931_v5  ;;  %v2597_v5 = vmul.f32 %v9097_v2, %v1943_v22  ;;  %vm1988_vm8 = vcmp.eq.f32.partialorder %v9076_v8, inf }
 0x258   : > { %v7465_v32 = vpop.eup %7464  ;;  %v1947_v36 = vsel %vm1946_vm11, %v9064_v29, %v1945_v4  ;;  %v1936_v4 = vsel %vm1934_vm10, %v1935_v26, %v1933_v30  ;;  %vm1990_vm10 = vcmp.eq.f32.partialorder %v9076_v8, 0.0 }
 0x259   : > { %v9074_v38 = vpop.xlane.xlu1 %1854  ;;  %v7467_v1 = vpop.eup %7466  ;;  %v1952_v61 = vmul.f32 %v7465_v32, %v9062_v56  ;;  %v2595_v32 = vmul.f32 %v9097_v2, %v1929_v52  ;;  %v1950_v22 = vsel %vm1948_vm12, %v1949_v39, %v1947_v36 }
 0x25a   : > { %v9083_v12 = vpop.xlane.xlu0 %1857  ;;  %7476 = vrsqrt.f32 %v9074_v38  ;;  %v1959_v42 = vmul.f32 %v7467_v1, %v9068_v51  ;;  %v1977_v1 = vand.u32 2147483648, %v9072_v6  ;;  %vm1995_vm9 = vcmp.eq.f32.partialorder %v9074_v38, inf }
 0x25b   : > { %7478 = vrsqrt.f32 %v9083_v12  ;;  %v1954_v52 = vsel %vm1953_vm13, %v9062_v56, %v1952_v61  ;;  %vm1997_vm11 = vcmp.eq.f32.partialorder %v9074_v38, 0.0  ;;  %vm2002_vm12 = vcmp.eq.f32.partialorder %v9083_v12, inf }
 0x25c   : > { %v7469_v43 = vpop.eup %7468  ;;  %v1961_v30 = vsel %vm1960_vm15, %v9068_v51, %v1959_v42  ;;  %v1957_v36 = vsel %vm1955_vm14, %v1956_v0, %v1954_v52  ;;  %v2598_v42 = vmul.f32 %v9097_v2, %v1950_v22  ;;  %v1998_v22 = vand.u32 2147483648, %v9074_v38 }
 0x25d   : > { %v9080_v9 = vpop.xlane.xlu1 %1860  ;;  %v7471_v53 = vpop.eup %7470  ;;  %v1966_v27 = vmul.f32 %v7469_v43, %v9066_v47  ;;  %v2596_v43 = vmul.f32 %v9097_v2, %v1936_v4  ;;  %v1964_v59 = vsel %vm1962_vm0, %v1963_v45, %v1961_v30  ;;  %vm2004_vm13 = vcmp.eq.f32.partialorder %v9083_v12, 0.0 }
 0x25e   : > { %v9093_v21 = vpop.xlane.xlu0 %1863  ;;  %7480 = vrsqrt.f32 %v9080_v9  ;;  %v1973_v29 = vmul.f32 %v7471_v53, %v9072_v6  ;;  %v2600_v30 = vmul.f32 %v9097_v2, %v1964_v59  ;;  %vm2009_vm14 = vcmp.eq.f32.partialorder %v9080_v9, inf }
 0x25f   : > { %7482 = vrsqrt.f32 %v9093_v21  ;;  %vm2011_vm15 = vcmp.eq.f32.partialorder %v9080_v9, 0.0  ;;  %vm2016_vm0 = vcmp.eq.f32.partialorder %v9093_v21, inf }
 0x260   : > { %v7473_v55 = vpop.eup %7472  ;;  %v1975_v51 = vsel %vm1974_vm4, %v9072_v6, %v1973_v29 }
 0x261   : > { %v9091_v17 = vpop.xlane.xlu1 %1866  ;;  %v1980_v56 = vmul.f32 %v7473_v55, %v9070_v62 }
 0x262   : > { %v9115_v20 = vpop.xlane.xlu0 %1869  ;;  %7484 = vrsqrt.f32 %v9091_v17  ;;  %vm2025_vm4 = vcmp.eq.f32.partialorder %v9091_v17, 0.0 }
 0x263   : > { %7486 = vrsqrt.f32 %v9115_v20  ;;  %v1982_v45 = vsel %vm1981_vm6, %v9070_v62, %v1980_v56  ;;  %vm2032_vm6 = vcmp.eq.f32.partialorder %v9115_v20, 0.0 }
 0x265   : > { %v9108_v11 = vpop.xlane.xlu1 %1872 }
 0x266   : > { %v9148_v63 = vpop.xlane.xlu0 %1875  ;;  %7488 = vrsqrt.f32 %v9108_v11 }
 0x267   : > { %7490 = vrsqrt.f32 %v9148_v63 }
 0x269   : > { %v9140_v15 = vpop.xlane.xlu1 %1878 }
 0x26a   : > { %v9189_v39 = vpop.xlane.xlu0 %1881  ;;  %7492 = vrsqrt.f32 %v9140_v15 }
 0x26b   : > { %7494 = vrsqrt.f32 %v9189_v39 }
 0x26d   : > { %v9182_v61 = vpop.xlane.xlu1 %1884 }
 0x26e   : > { %v9233_v59 = vpop.xlane.xlu0 %1887  ;;  %7496 = vrsqrt.f32 %v9182_v61 }
 0x2b7   : > { %v6941_v13 = vpop.f32.mrb[32].mxu0 }
 0x2b8   : > { %v9165_v48 = vadd.f32 %v6941_v13, %v2595_v32  ;;  %v2431_v28 = vpop.f32.mrb[33].mxu0  ;;  %v1984_v32 = vand.u32 2147483648, %v9070_v62  ;;  %v7475_v13 = vpop.eup %7474 }
 0x2b9   : > { %v9174_v26 = vadd.f32 %v2594_v31, %v2431_v28  ;;  %v1968_v28 = vsel %vm1967_vm1, %v9066_v47, %v1966_v27  ;;  %v7477_v0 = vpop.eup %7476  ;;  %v2599_v27 = vmul.f32 %v9097_v2, %v1957_v36  ;;  %v9224_v36 = vpop.xlane.xlu1 %1890  ;;  %vm2018_vm1 = vcmp.eq.f32.partialorder %v9093_v21, 0.0 }
 0x2ba   : > { %2660 = vadd.xlane.f32.xlu1 %v9165_v48  ;;  %v1971_v55 = vsel %vm1969_vm3, %v1970_v34, %v1968_v28  ;;  %v1994_v10 = vmul.f32 %v7477_v0, %v9074_v38  ;;  %v1978_v28 = vsel %vm1976_vm5, %v1977_v1, %v1975_v51  ;;  %v1985_v1 = vsel %vm1983_vm7, %v1984_v32, %v1982_v45 }
 0x2bb   : > { %2658 = vadd.xlane.f32.xlu0 %v9174_v26  ;;  %v6944_v31 = vpop.f32.mrb[34].mxu0  ;;  %v2601_v56 = vmul.f32 %v9097_v2, %v1971_v55  ;;  %vm2023_vm3 = vcmp.eq.f32.partialorder %v9091_v17, inf  ;;  %vm2030_vm5 = vcmp.eq.f32.partialorder %v9115_v20, inf  ;;  %vm2037_vm7 = vcmp.eq.f32.partialorder %v9108_v11, inf }
 0x2bc   : > { %v9197_v53 = vadd.f32 %v6944_v31, %v2597_v5  ;;  %v2441_v4 = vpop.f32.mrb[35].mxu0  ;;  %v7479_v31 = vpop.eup %7478  ;;  %v1996_v0 = vsel %vm1995_vm9, %v9074_v38, %v1994_v10  ;;  %v11433_v10 = vand.u32 2147483648, %v9076_v8  ;;  %7498 = vrsqrt.f32 %v9224_v36 }
 0x2bd   : > { %v9205_v52 = vadd.f32 %v2596_v43, %v2441_v4  ;;  %v1987_v43 = vmul.f32 %v7475_v13, %v9076_v8  ;;  %v7481_v47 = vpop.eup %7480  ;;  %v2012_v13 = vand.u32 2147483648, %v9080_v9  ;;  %7500 = vrsqrt.f32 %v9233_v59 }
 0x2be   : > { %2664 = vadd.xlane.f32.xlu1 %v9197_v53  ;;  %v7483_v51 = vpop.eup %7482  ;;  %v2008_v62 = vmul.f32 %v7481_v47, %v9080_v9  ;;  %v9278_v47 = vpop.xlane.xlu0 %1893  ;;  %vm2044_vm9 = vcmp.eq.f32.partialorder %v9148_v63, inf }
 0x2bf   : > { %2662 = vadd.xlane.f32.xlu0 %v9205_v52  ;;  %v6947_v5 = vpop.f32.mrb[36].mxu0  ;;  %v7485_v32 = vpop.eup %7484 }
 0x2c0   : > { %v9226_v29 = vadd.f32 %v6947_v5, %v2599_v27  ;;  %v2451_v4 = vpop.f32.mrb[37].mxu0  ;;  %v2001_v27 = vmul.f32 %v7479_v31, %v9083_v12  ;;  %v9268_v31 = vpop.xlane.xlu1 %1896  ;;  %v2010_v57 = vsel %vm2009_vm14, %v9080_v9, %v2008_v62  ;;  %v2022_v3 = vmul.f32 %v7485_v32, %v9091_v17 }
 0x2c1   : > { %v9235_v34 = vadd.f32 %v2598_v42, %v2451_v4  ;;  %v1989_v42 = vsel %vm1988_vm8, %v9076_v8, %v1987_v43  ;;  %v2602_v4 = vmul.f32 %v9097_v2, %v1978_v28  ;;  %v2026_v43 = vand.u32 2147483648, %v9091_v17  ;;  %v7487_v8 = vpop.eup %7486 }
 0x2c2   : > { %2668 = vadd.xlane.f32.xlu1 %v9226_v29  ;;  %v2603_v28 = vmul.f32 %v9097_v2, %v1985_v1  ;;  %v2003_v1 = vsel %vm2002_vm12, %v9083_v12, %v2001_v27  ;;  %v7489_v38 = vpop.eup %7488  ;;  %v2033_v27 = vand.u32 2147483648, %v9115_v20  ;;  %vm2039_vm8 = vcmp.eq.f32.partialorder %v9108_v11, 0.0 }
 0x2c3   : > { %2666 = vadd.xlane.f32.xlu0 %v9235_v34  ;;  %v6950_v6 = vpop.f32.mrb[38].mxu0  ;;  %v2024_v58 = vsel %vm2023_vm3, %v9091_v17, %v2022_v3  ;;  %v11435_v3 = vand.u32 2147483648, %v9093_v21  ;;  %7502 = vrsqrt.f32 %v9268_v31  ;;  %vm2053_vm12 = vcmp.eq.f32.partialorder %v9140_v15, 0.0 }
 0x2c4   : > { %v9255_v5 = vadd.f32 %v6950_v6, %v2601_v56  ;;  %v2461_v55 = vpop.f32.mrb[39].mxu0  ;;  %v1999_v6 = vsel %vm1997_vm11, %v1998_v22, %v1996_v0  ;;  %vm2051_vm11 = vcmp.eq.f32.partialorder %v9140_v15, inf  ;;  %7504 = vrsqrt.f32 %v9278_v47 }
 0x2c5   : > { %v9262_v45 = vadd.f32 %v2600_v30, %v2461_v55  ;;  %v1992_v30 = vsel %vm1990_vm10, %v11433_v10, %v1989_v42  ;;  %v2015_v55 = vmul.f32 %v7483_v51, %v9093_v21  ;;  %v2605_v51 = vmul.f32 %v9097_v2, %v1999_v6 }
 0x2c6   : > { %2672 = vadd.xlane.f32.xlu1 %v9255_v5  ;;  %v2604_v0 = vmul.f32 %v9097_v2, %v1992_v30  ;;  %v2013_v30 = vsel %vm2011_vm15, %v2012_v13, %v2010_v57  ;;  %v2029_v6 = vmul.f32 %v7487_v8, %v9115_v20  ;;  %v2036_v57 = vmul.f32 %v7489_v38, %v9108_v11  ;;  %v9324_v13 = vpop.xlane.xlu0 %1899 }
 0x2c7   : > { %2670 = vadd.xlane.f32.xlu0 %v9262_v45  ;;  %v6953_v56 = vpop.f32.mrb[40].mxu0  ;;  %vm2046_vm10 = vcmp.eq.f32.partialorder %v9148_v63, 0.0  ;;  %v2047_v8 = vand.u32 2147483648, %v9148_v63  ;;  %vm2060_vm14 = vcmp.eq.f32.partialorder %v9189_v39, 0.0  ;;  %vm2065_vm15 = vcmp.eq.f32.partialorder %v9182_v61, inf }
 0x2c8   : > { %v9287_v42 = vadd.f32 %v6953_v56, %v2603_v28  ;;  %v2471_v10 = vpop.f32.mrb[41].mxu0  ;;  %v11434_v28 = vand.u32 2147483648, %v9083_v12  ;;  %v2017_v56 = vsel %vm2016_vm0, %v9093_v21, %v2015_v55  ;;  %v7491_v12 = vpop.eup %7490  ;;  %vm2067_vm0 = vcmp.eq.f32.partialorder %v9182_v61, 0.0 }
 0x2c9   : > { %v9294_v22 = vadd.f32 %v2602_v4, %v2471_v10  ;;  %v2040_v4 = vand.u32 2147483648, %v9108_v11  ;;  %v7493_v9 = vpop.eup %7492  ;;  %v2020_v38 = vsel %vm2018_vm1, %v11435_v3, %v2017_v56  ;;  %v2038_v3 = vsel %vm2037_vm7, %v9108_v11, %v2036_v57 }
 0x2ca   : > { %2676 = vadd.xlane.f32.xlu1 %v9287_v42  ;;  %v2006_v62 = vsel %vm2004_vm13, %v11434_v28, %v2003_v1  ;;  %v9316_v1 = vpop.xlane.xlu1 %1902  ;;  %v7495_v23 = vpop.eup %7494  ;;  %v2050_v14 = vmul.f32 %v7493_v9, %v9140_v15  ;;  %vm2058_vm13 = vcmp.eq.f32.partialorder %v9189_v39, inf  ;;  %vm2072_vm1 = vcmp.eq.f32.partialorder %v9233_v59, inf }
 0x2cb   : > { %2674 = vadd.xlane.f32.xlu0 %v9294_v22  ;;  %v6956_v32 = vpop.f32.mrb[42].mxu0  ;;  %v7497_v17 = vpop.eup %7496  ;;  %7506 = vrsqrt.f32 %v9316_v1  ;;  %vm2079_vm3 = vcmp.eq.f32.partialorder %v9224_v36, inf  ;;  %vm2086_vm7 = vcmp.eq.f32.partialorder %v9278_v47, inf }
 0x2cc   : > { %v9318_v10 = vadd.f32 %v6956_v32, %v2605_v51  ;;  %v2481_v28 = vpop.f32.mrb[43].mxu0  ;;  %v2607_v51 = vmul.f32 %v9097_v2, %v2013_v30  ;;  %v2606_v32 = vmul.f32 %v9097_v2, %v2006_v62  ;;  %v2031_v30 = vsel %vm2030_vm5, %v9115_v20, %v2029_v6  ;;  %v9368_v9 = vpop.xlane.xlu0 %1905 }
 0x2cd   : > { %v9326_v55 = vadd.f32 %v2604_v0, %v2481_v28  ;;  %v2027_v28 = vsel %vm2025_vm4, %v2026_v43, %v2024_v58  ;;  %v2043_v62 = vmul.f32 %v7491_v12, %v9148_v63  ;;  %v2054_v43 = vand.u32 2147483648, %v9140_v15  ;;  %v7499_v19 = vpop.eup %7498 }
 0x2ce   : > { %2680 = vadd.xlane.f32.xlu1 %v9318_v10  ;;  %v9359_v6 = vpop.xlane.xlu1 %1908  ;;  %v2609_v12 = vmul.f32 %v9097_v2, %v2027_v28  ;;  %v2034_v57 = vsel %vm2032_vm6, %v2033_v27, %v2031_v30  ;;  %7508 = vrsqrt.f32 %v9324_v13  ;;  %v2052_v30 = vsel %vm2051_vm11, %v9140_v15, %v2050_v14 }
 0x2cf   : > { %2678 = vadd.xlane.f32.xlu0 %v9326_v55  ;;  %v6959_v0 = vpop.f32.mrb[44].mxu0  ;;  %v2045_v28 = vsel %vm2044_vm9, %v9148_v63, %v2043_v62  ;;  %v2068_v14 = vand.u32 2147483648, %v9182_v61  ;;  %7510 = vrsqrt.f32 %v9359_v6  ;;  %v2078_v15 = vmul.f32 %v7499_v19, %v9224_v36 }
 0x2d0   : > { %v9348_v21 = vadd.f32 %v6959_v0, %v2607_v51  ;;  %v2491_v56 = vpop.f32.mrb[45].mxu0  ;;  %v2608_v51 = vmul.f32 %v9097_v2, %v2020_v38  ;;  %v2041_v0 = vsel %vm2039_vm8, %v2040_v4, %v2038_v3  ;;  %v2057_v38 = vmul.f32 %v7495_v23, %v9189_v39  ;;  %v7501_v4 = vpop.eup %7500 }
 0x2d1   : > { %v9354_v58 = vadd.f32 %v2606_v32, %v2491_v56  ;;  %v2064_v56 = vmul.f32 %v7497_v17, %v9182_v61  ;;  %v2061_v23 = vand.u32 2147483648, %v9189_v39  ;;  %v2611_v62 = vmul.f32 %v9097_v2, %v2041_v0  ;;  %v9412_v63 = vpop.xlane.xlu0 %1911 }
 0x2d2   : > { %2684 = vadd.xlane.f32.xlu1 %v9348_v21  ;;  %v2610_v3 = vmul.f32 %v9097_v2, %v2034_v57  ;;  %7512 = vrsqrt.f32 %v9368_v9  ;;  %v9404_v57 = vpop.xlane.xlu1 %1914  ;;  %vm2074_vm4 = vcmp.eq.f32.partialorder %v9233_v59, 0.0  ;;  %vm2081_vm5 = vcmp.eq.f32.partialorder %v9224_v36, 0.0 }
 0x2d3   : > { %2682 = vadd.xlane.f32.xlu0 %v9354_v58  ;;  %v6962_v32 = vpop.f32.mrb[46].mxu0  ;;  %v2066_v35 = vsel %vm2065_vm15, %v9182_v61, %v2064_v56  ;;  %v2082_v19 = vand.u32 2147483648, %v9224_v36  ;;  %v2075_v56 = vand.u32 2147483648, %v9233_v59  ;;  %7514 = vrsqrt.f32 %v9404_v57 }
 0x2d4   : > { %v9378_v20 = vadd.f32 %v6962_v32, %v2609_v12  ;;  %v2501_v27 = vpop.f32.mrb[47].mxu0  ;;  %v2055_v12 = vsel %vm2053_vm12, %v2054_v43, %v2052_v30  ;;  %v2059_v32 = vsel %vm2058_vm13, %v9189_v39, %v2057_v38  ;;  %v7503_v43 = vpop.eup %7502  ;;  %7516 = vrsqrt.f32 %v9412_v63 }
 0x2d5   : > { %v9384_v11 = vadd.f32 %v2608_v51, %v2501_v27  ;;  %v2048_v51 = vsel %vm2046_vm10, %v2047_v8, %v2045_v28  ;;  %v2071_v28 = vmul.f32 %v7501_v4, %v9233_v59  ;;  %v7505_v38 = vpop.eup %7504  ;;  %v2613_v30 = vmul.f32 %v9097_v2, %v2055_v12 }
 0x2d6   : > { %2688 = vadd.xlane.f32.xlu1 %v9378_v20  ;;  %v2612_v4 = vmul.f32 %v9097_v2, %v2048_v51  ;;  %v2080_v24 = vsel %vm2079_vm3, %v9224_v36, %v2078_v15  ;;  %v2092_v25 = vmul.f32 %v7503_v43, %v9268_v31  ;;  %v7507_v50 = vpop.eup %7506  ;;  %vm2093_vm6 = vcmp.eq.f32.partialorder %v9268_v31, inf }
 0x2d7   : > { %2686 = vadd.xlane.f32.xlu0 %v9384_v11  ;;  %v6965_v17 = vpop.f32.mrb[48].mxu0  ;;  %v2085_v61 = vmul.f32 %v7505_v38, %v9278_v47  ;;  %vm2088_vm8 = vcmp.eq.f32.partialorder %v9278_v47, 0.0  ;;  %v2083_v15 = vsel %vm2081_vm5, %v2082_v19, %v2080_v24  ;;  %vm2095_vm9 = vcmp.eq.f32.partialorder %v9268_v31, 0.0 }
 0x2d8   : > { %v9406_v0 = vadd.f32 %v6965_v17, %v2611_v62  ;;  %v2511_v27 = vpop.f32.mrb[49].mxu0  ;;  %v2062_v17 = vsel %vm2060_vm14, %v2061_v23, %v2059_v32  ;;  %v7509_v39 = vpop.eup %7508  ;;  %v2096_v43 = vand.u32 2147483648, %v9268_v31  ;;  %vm2107_vm10 = vcmp.eq.f32.partialorder %v9316_v1, inf }
 0x2d9   : > { %v9414_v8 = vadd.f32 %v2610_v3, %v2511_v27  ;;  %v2069_v3 = vsel %vm2067_vm0, %v2068_v14, %v2066_v35  ;;  %v2073_v35 = vsel %vm2072_vm1, %v9233_v59, %v2071_v28  ;;  %v2089_v14 = vand.u32 2147483648, %v9278_v47 }
 0x2da   : > { %2692 = vadd.xlane.f32.xlu1 %v9406_v0  ;;  %v2615_v23 = vmul.f32 %v9097_v2, %v2069_v3  ;;  %v2614_v32 = vmul.f32 %v9097_v2, %v2062_v17  ;;  %v7511_v3 = vpop.eup %7510  ;;  %v2087_v24 = vsel %vm2086_vm7, %v9278_v47, %v2085_v61  ;;  %v2099_v36 = vmul.f32 %v7509_v39, %v9324_v13 }
 0x2db   : > { %2690 = vadd.xlane.f32.xlu0 %v9414_v8  ;;  %v6968_v62 = vpop.f32.mrb[50].mxu0  ;;  %v2617_v59 = vmul.f32 %v9097_v2, %v2083_v15  ;;  %vm2100_vm11 = vcmp.eq.f32.partialorder %v9324_v13, inf  ;;  %vm2102_vm12 = vcmp.eq.f32.partialorder %v9324_v13, 0.0  ;;  %vm2109_vm13 = vcmp.eq.f32.partialorder %v9316_v1, 0.0 }
 0x2dc   : > { %v9432_v12 = vadd.f32 %v6968_v62, %v2613_v30  ;;  %v2521_v27 = vpop.f32.mrb[51].mxu0  ;;  %v2076_v30 = vsel %vm2074_vm4, %v2075_v56, %v2073_v35  ;;  %v2094_v62 = vsel %vm2093_vm6, %v9268_v31, %v2092_v25  ;;  %v7513_v19 = vpop.eup %7512  ;;  %v2103_v25 = vand.u32 2147483648, %v9324_v13 }
 0x2dd   : > { %v9438_v49 = vadd.f32 %v2612_v4, %v2521_v27  ;;  %v2106_v4 = vmul.f32 %v7507_v50, %v9316_v1  ;;  %v2616_v56 = vmul.f32 %v9097_v2, %v2076_v30  ;;  %v2097_v27 = vsel %vm2095_vm9, %v2096_v43, %v2094_v62  ;;  %v7515_v15 = vpop.eup %7514 }
 0x2de   : > { %2696 = vadd.xlane.f32.xlu1 %v9432_v12  ;;  %v2110_v35 = vand.u32 2147483648, %v9316_v1  ;;  %v2101_v31 = vsel %vm2100_vm11, %v9324_v13, %v2099_v36  ;;  %vm2121_vm14 = vcmp.eq.f32.partialorder %v9359_v6, inf  ;;  %v2113_v43 = vmul.f32 %v7513_v19, %v9368_v9  ;;  %v7517_v30 = vpop.eup %7516 }
 0x2df   : > { %2694 = vadd.xlane.f32.xlu0 %v9438_v49  ;;  %v6971_v51 = vpop.f32.mrb[52].mxu0  ;;  %v2619_v47 = vmul.f32 %v9097_v2, %v2097_v27  ;;  %vm2114_vm15 = vcmp.eq.f32.partialorder %v9368_v9, inf  ;;  %vm2116_vm0 = vcmp.eq.f32.partialorder %v9368_v9, 0.0  ;;  %vm2123_vm1 = vcmp.eq.f32.partialorder %v9359_v6, 0.0 }
 0x2e0   : > { %v9456_v28 = vadd.f32 %v6971_v51, %v2615_v23  ;;  %v2531_v38 = vpop.f32.mrb[53].mxu0  ;;  %v2090_v23 = vsel %vm2088_vm8, %v2089_v14, %v2087_v24  ;;  %v2108_v51 = vsel %vm2107_vm10, %v9316_v1, %v2106_v4  ;;  %v2117_v14 = vand.u32 2147483648, %v9368_v9 }
 0x2e1   : > { %v9464_v17 = vadd.f32 %v2614_v32, %v2531_v38  ;;  %v2120_v32 = vmul.f32 %v7511_v3, %v9359_v6  ;;  %v2618_v4 = vmul.f32 %v9097_v2, %v2090_v23  ;;  %v2111_v3 = vsel %vm2109_vm13, %v2110_v35, %v2108_v51 }
 0x2e2   : > { %2700 = vadd.xlane.f32.xlu1 %v9456_v28  ;;  %v2124_v24 = vand.u32 2147483648, %v9359_v6  ;;  %v2115_v1 = vsel %vm2114_vm15, %v9368_v9, %v2113_v43  ;;  %vm2135_vm3 = vcmp.eq.f32.partialorder %v9404_v57, inf  ;;  %v2127_v35 = vmul.f32 %v7517_v30, %v9412_v63 }
 0x2e3   : > { %2698 = vadd.xlane.f32.xlu0 %v9464_v17  ;;  %v6974_v50 = vpop.f32.mrb[54].mxu0  ;;  %vm2128_vm4 = vcmp.eq.f32.partialorder %v9412_v63, inf  ;;  %v2138_v51 = vand.u32 2147483648, %v9404_v57  ;;  %v2118_v43 = vsel %vm2116_vm0, %v2117_v14, %v2115_v1  ;;  %vm2137_vm5 = vcmp.eq.f32.partialorder %v9404_v57, 0.0 }
 0x2e4   : > { %v9482_v61 = vadd.f32 %v6974_v50, %v2617_v59  ;;  %v2541_v39 = vpop.f32.mrb[55].mxu0  ;;  %v2104_v59 = vsel %vm2102_vm12, %v2103_v25, %v2101_v31  ;;  %v2122_v50 = vsel %vm2121_vm14, %v9359_v6, %v2120_v32  ;;  %v2131_v32 = vand.u32 2147483648, %v9412_v63 }
 0x2e5   : > { %v9490_v38 = vadd.f32 %v2616_v56, %v2541_v39  ;;  %v2134_v56 = vmul.f32 %v7515_v15, %v9404_v57  ;;  %v2621_v39 = vmul.f32 %v9097_v2, %v2111_v3  ;;  %v2620_v25 = vmul.f32 %v9097_v2, %v2104_v59 }
 0x2e6   : > { %2704 = vadd.xlane.f32.xlu1 %v9482_v61  ;;  %v2125_v23 = vsel %vm2123_vm1, %v2124_v24, %v2122_v50  ;;  %vm2130_vm6 = vcmp.eq.f32.partialorder %v9412_v63, 0.0  ;;  %v2622_v9 = vmul.f32 %v9097_v2, %v2118_v43  ;;  %vm4061_vm7 = vcmask 130048  }
 0x2e7   : > { %2702 = vadd.xlane.f32.xlu0 %v9490_v38  ;;  %v6977_v62 = vpop.f32.mrb[56].mxu0  ;;  %v2136_v30 = vsel %vm2135_vm3, %v9404_v57, %v2134_v56  ;;  %v2623_v6 = vmul.f32 %v9097_v2, %v2125_v23 }
 0x2e8   : > { %v9508_v36 = vadd.f32 %v6977_v62, %v2619_v47  ;;  %v2551_v19 = vpop.f32.mrb[57].mxu0  ;;  %v2129_v62 = vsel %vm2128_vm4, %v9412_v63, %v2127_v35  ;;  %v2139_v14 = vsel %vm2137_vm5, %v2138_v51, %v2136_v30 }
 0x2e9   : > { %v9516_v27 = vadd.f32 %v2618_v4, %v2551_v19  ;;  %v2132_v24 = vsel %vm2130_vm6, %v2131_v32, %v2129_v62  ;;  %v2625_v63 = vmul.f32 %v9097_v2, %v2139_v14 }
 0x2ea   : > { %2708 = vadd.xlane.f32.xlu1 %v9508_v36  ;;  %v2624_v50 = vmul.f32 %v9097_v2, %v2132_v24 }
 0x2eb   : > { %2706 = vadd.xlane.f32.xlu0 %v9516_v27  ;;  %v6980_v13 = vpop.f32.mrb[58].mxu0 }
 0x2ec   : > { %v9530_v15 = vadd.f32 %v6980_v13, %v2621_v39  ;;  %v2561_v31 = vpop.f32.mrb[59].mxu0  ;;  %v7414_v39 = vld [vmem:[%s8183_s26] sm:$0xff]  }
 0x2ed   : > { %v9536_v47 = vadd.f32 %v2620_v25, %v2561_v31  ;;  %6987 = vmatprep.subr.bf16.mxu1 %v7414_v39 }
 0x2ee   : > { %2712 = vadd.xlane.f32.xlu1 %v9530_v15  ;;  %6988 = vmatpush3.bf16.msra.mxu1 %v7414_v39 }
 0x2ef   : > { %2710 = vadd.xlane.f32.xlu0 %v9536_v47  ;;  %v6983_v4 = vpop.f32.mrb[60].mxu0 }
 0x2f0   : > { %v9544_v3 = vadd.f32 %v6983_v4, %v2623_v6  ;;  %v2571_v57 = vpop.f32.mrb[61].mxu0 }
 0x2f1   : > { %v9546_v19 = vadd.f32 %v2622_v9, %v2571_v57 }
 0x2f2   : > { %2716 = vadd.xlane.f32.xlu1 %v9544_v3 }
 0x2f3   : > { %2714 = vadd.xlane.f32.xlu0 %v9546_v19  ;;  %v6986_v59 = vpop.f32.mrb[62].mxu0 }
 0x2f4   : > { %v9552_v56 = vadd.f32 %v6986_v59, %v2625_v63  ;;  %v2581_v1 = vpop.f32.mrb[63].mxu0 }
 0x2f5   : > { %v9554_v35 = vadd.f32 %v2624_v50, %v2581_v1 }
 0x2f6   : > { %2720 = vadd.xlane.f32.xlu1 %v9552_v56 }
 0x2f7   : > { %2718 = vadd.xlane.f32.xlu0 %v9554_v35 }
 0x347   : > { %v2661_v13 = vpop.xlane.xlu1 %2660 }
 0x348   : > { %v2724_v25 = vmul.f32 0.0078125, %v2661_v13  ;;  %v2659_v23 = vpop.xlane.xlu0 %2658 }
 0x349   : > { %v2723_v51 = vmul.f32 0.0078125, %v2659_v23 }
 0x34a   : > { %v9560_v32 = vsub.f32 %v9165_v48, %v2724_v25 }
 0x34b   : > { %v2665_v2 = vpop.xlane.xlu1 %2664  ;;  %v9563_v31 = vsub.f32 %v9174_v26, %v2723_v51 }
 0x34c   : > { %v2726_v43 = vmul.f32 0.0078125, %v2665_v2  ;;  %v2663_v30 = vpop.xlane.xlu0 %2662  ;;  %v2788_v62 = vmul.f32 %v9560_v32, %v9560_v32 }
 0x34d   : > { %v2725_v6 = vmul.f32 0.0078125, %v2663_v30  ;;  %v2787_v4 = vmul.f32 %v9563_v31, %v9563_v31 }
 0x34e   : > { %2821 = vadd.xlane.f32.xlu1 %v2788_v62  ;;  %v9570_v9 = vsub.f32 %v9197_v53, %v2726_v43 }
 0x34f   : > { %v2669_v14 = vpop.xlane.xlu1 %2668  ;;  %2819 = vadd.xlane.f32.xlu0 %v2787_v4  ;;  %v9573_v48 = vsub.f32 %v9205_v52, %v2725_v6 }
 0x350   : > { %v2728_v26 = vmul.f32 0.0078125, %v2669_v14  ;;  %v2667_v57 = vpop.xlane.xlu0 %2666  ;;  %v2790_v24 = vmul.f32 %v9570_v9, %v9570_v9 }
 0x351   : > { %v2727_v63 = vmul.f32 0.0078125, %v2667_v57  ;;  %v2789_v59 = vmul.f32 %v9573_v48, %v9573_v48 }
 0x352   : > { %2825 = vadd.xlane.f32.xlu1 %v2790_v24  ;;  %v9580_v50 = vsub.f32 %v9226_v29, %v2728_v26  ;;  %v7415_v24 = vld [vmem:[%s8183_s26 + $0x8] sm:$0xff]  }
 0x353   : > { %v2673_v53 = vpop.xlane.xlu1 %2672  ;;  %2823 = vadd.xlane.f32.xlu0 %v2789_v59  ;;  %v9583_v1 = vsub.f32 %v9235_v34, %v2727_v63  ;;  %6989 = vmatprep.subr.bf16.mxu1 %v7415_v24 }
 0x354   : > { %v2730_v52 = vmul.f32 0.0078125, %v2673_v53  ;;  %v2671_v39 = vpop.xlane.xlu0 %2670  ;;  %v2792_v13 = vmul.f32 %v9580_v50, %v9580_v50  ;;  %6990 = vmatpush3.bf16.msra.mxu1 %v7415_v24 }
 0x355   : > { %v2729_v25 = vmul.f32 0.0078125, %v2671_v39  ;;  %v2791_v23 = vmul.f32 %v9583_v1, %v9583_v1 }
 0x356   : > { %2829 = vadd.xlane.f32.xlu1 %v2792_v13  ;;  %v9590_v51 = vsub.f32 %v9255_v5, %v2730_v52 }
 0x357   : > { %v2677_v29 = vpop.xlane.xlu1 %2676  ;;  %2827 = vadd.xlane.f32.xlu0 %v2791_v23  ;;  %v9593_v2 = vsub.f32 %v9262_v45, %v2729_v25  ;;  %v7416_v25 = vld [vmem:[%s8183_s26 + $0x10] sm:$0xff]  }
 0x358   : > { %v2732_v34 = vmul.f32 0.0078125, %v2677_v29  ;;  %v2675_v43 = vpop.xlane.xlu0 %2674  ;;  %v2794_v30 = vmul.f32 %v9590_v51, %v9590_v51  ;;  %6991 = vmatprep.subr.bf16.mxu1 %v7416_v25 }
 0x359   : > { %v2731_v62 = vmul.f32 0.0078125, %v2675_v43  ;;  %v2793_v6 = vmul.f32 %v9593_v2, %v9593_v2  ;;  %6992 = vmatpush3.bf16.msra.mxu1 %v7416_v25 }
 0x35a   : > { %2833 = vadd.xlane.f32.xlu1 %v2794_v30  ;;  %v9600_v4 = vsub.f32 %v9287_v42, %v2732_v34 }
 0x35b   : > { %v2681_v5 = vpop.xlane.xlu1 %2680  ;;  %2831 = vadd.xlane.f32.xlu0 %v2793_v6  ;;  %v9603_v14 = vsub.f32 %v9294_v22, %v2731_v62  ;;  %v7417_v6 = vld [vmem:[%s8183_s26 + $0x18] sm:$0xff]  }
 0x35c   : > { %v2734_v45 = vmul.f32 0.0078125, %v2681_v5  ;;  %v2679_v26 = vpop.xlane.xlu0 %2678  ;;  %v2796_v57 = vmul.f32 %v9600_v4, %v9600_v4  ;;  %6993 = vmatprep.subr.bf16.mxu1 %v7417_v6 }
 0x35d   : > { %v2733_v63 = vmul.f32 0.0078125, %v2679_v26  ;;  %v2795_v59 = vmul.f32 %v9603_v14, %v9603_v14  ;;  %6994 = vmatpush3.bf16.msra.mxu1 %v7417_v6 }
 0x35e   : > { %2837 = vadd.xlane.f32.xlu1 %v2796_v57  ;;  %v9611_v42 = vsub.f32 %v9318_v10, %v2734_v45 }
 0x35f   : > { %v2685_v53 = vpop.xlane.xlu1 %2684  ;;  %2835 = vadd.xlane.f32.xlu0 %v2795_v59  ;;  %v9614_v22 = vsub.f32 %v9326_v55, %v2733_v63  ;;  %v7418_v59 = vld [vmem:[%s8183_s26 + $0x20] sm:$0xff]  }
 0x360   : > { %v2736_v52 = vmul.f32 0.0078125, %v2685_v53  ;;  %v2683_v39 = vpop.xlane.xlu0 %2682  ;;  %v2798_v13 = vmul.f32 %v9611_v42, %v9611_v42  ;;  %6995 = vmatprep.subr.bf16.mxu1 %v7418_v59 }
 0x361   : > { %v2735_v23 = vmul.f32 0.0078125, %v2683_v39  ;;  %v2797_v29 = vmul.f32 %v9614_v22, %v9614_v22  ;;  %6996 = vmatpush3.bf16.msra.mxu1 %v7418_v59 }
 0x362   : > { %2841 = vadd.xlane.f32.xlu1 %v2798_v13  ;;  %v9622_v10 = vsub.f32 %v9348_v21, %v2736_v52 }
 0x363   : > { %v2689_v34 = vpop.xlane.xlu1 %2688  ;;  %2839 = vadd.xlane.f32.xlu0 %v2797_v29  ;;  %v9625_v55 = vsub.f32 %v9354_v58, %v2735_v23  ;;  %v7419_v29 = vld [vmem:[%s8183_s26 + $0x28] sm:$0xff]  }
 0x364   : > { %v2738_v43 = vmul.f32 0.0078125, %v2689_v34  ;;  %v2687_v30 = vpop.xlane.xlu0 %2686  ;;  %v2800_v62 = vmul.f32 %v9622_v10, %v9622_v10  ;;  %6997 = vmatprep.subr.bf16.mxu1 %v7419_v29 }
 0x365   : > { %v2737_v5 = vmul.f32 0.0078125, %v2687_v30  ;;  %v2799_v45 = vmul.f32 %v9625_v55, %v9625_v55  ;;  %6998 = vmatpush3.bf16.msra.mxu1 %v7419_v29 }
 0x366   : > { %2845 = vadd.xlane.f32.xlu1 %v2800_v62  ;;  %v9633_v21 = vsub.f32 %v9378_v20, %v2738_v43 }
 0x367   : > { %v2693_v26 = vpop.xlane.xlu1 %2692  ;;  %2843 = vadd.xlane.f32.xlu0 %v2799_v45  ;;  %v9636_v58 = vsub.f32 %v9384_v11, %v2737_v5  ;;  %v7420_v45 = vld [vmem:[%s8183_s26 + $0x30] sm:$0xff]  }
 0x368   : > { %v2740_v57 = vmul.f32 0.0078125, %v2693_v26  ;;  %v2691_v24 = vpop.xlane.xlu0 %2690  ;;  %v2802_v63 = vmul.f32 %v9633_v21, %v9633_v21  ;;  %6999 = vmatprep.subr.bf16.mxu1 %v7420_v45 }
 0x369   : > { %v2739_v53 = vmul.f32 0.0078125, %v2691_v24  ;;  %v2801_v52 = vmul.f32 %v9636_v58, %v9636_v58  ;;  %7000 = vmatpush3.bf16.msra.mxu1 %v7420_v45 }
 0x36a   : > { %2849 = vadd.xlane.f32.xlu1 %v2802_v63  ;;  %v9644_v20 = vsub.f32 %v9406_v0, %v2740_v57 }
 0x36b   : > { %v2697_v39 = vpop.xlane.xlu1 %2696  ;;  %2847 = vadd.xlane.f32.xlu0 %v2801_v52  ;;  %v9647_v11 = vsub.f32 %v9414_v8, %v2739_v53  ;;  %v7421_v52 = vld [vmem:[%s8183_s26 + $0x38] sm:$0xff]  }
 0x36c   : > { %v2742_v13 = vmul.f32 0.0078125, %v2697_v39  ;;  %v2695_v25 = vpop.xlane.xlu0 %2694  ;;  %v2804_v23 = vmul.f32 %v9644_v20, %v9644_v20  ;;  %7001 = vmatprep.subr.bf16.mxu1 %v7421_v52 }
 0x36d   : > { %v2741_v34 = vmul.f32 0.0078125, %v2695_v25  ;;  %v2803_v43 = vmul.f32 %v9647_v11, %v9647_v11  ;;  %7002 = vmatpush3.bf16.msra.mxu1 %v7421_v52 }
 0x36e   : > { %2853 = vadd.xlane.f32.xlu1 %v2804_v23  ;;  %v9655_v0 = vsub.f32 %v9432_v12, %v2742_v13 }
 0x36f   : > { %v2701_v30 = vpop.xlane.xlu1 %2700  ;;  %2851 = vadd.xlane.f32.xlu0 %v2803_v43  ;;  %v9658_v8 = vsub.f32 %v9438_v49, %v2741_v34 }
 0x370   : > { %v2744_v62 = vmul.f32 0.0078125, %v2701_v30  ;;  %v2699_v6 = vpop.xlane.xlu0 %2698  ;;  %v2806_v5 = vmul.f32 %v9655_v0, %v9655_v0 }
 0x371   : > { %v2743_v26 = vmul.f32 0.0078125, %v2699_v6  ;;  %v2805_v57 = vmul.f32 %v9658_v8, %v9658_v8 }
 0x372   : > { %2857 = vadd.xlane.f32.xlu1 %v2806_v5  ;;  %v9666_v12 = vsub.f32 %v9456_v28, %v2744_v62 }
 0x373   : > { %v2705_v24 = vpop.xlane.xlu1 %2704  ;;  %2855 = vadd.xlane.f32.xlu0 %v2805_v57  ;;  %v9669_v49 = vsub.f32 %v9464_v17, %v2743_v26 }
 0x374   : > { %v2746_v63 = vmul.f32 0.0078125, %v2705_v24  ;;  %v2703_v59 = vpop.xlane.xlu0 %2702  ;;  %v2808_v53 = vmul.f32 %v9666_v12, %v9666_v12 }
 0x375   : > { %v2745_v39 = vmul.f32 0.0078125, %v2703_v59  ;;  %v2807_v13 = vmul.f32 %v9669_v49, %v9669_v49 }
 0x376   : > { %2861 = vadd.xlane.f32.xlu1 %v2808_v53  ;;  %v9677_v28 = vsub.f32 %v9482_v61, %v2746_v63 }
 0x377   : > { %v2709_v25 = vpop.xlane.xlu1 %2708  ;;  %2859 = vadd.xlane.f32.xlu0 %v2807_v13  ;;  %v9680_v17 = vsub.f32 %v9490_v38, %v2745_v39 }
 0x378   : > { %v2748_v23 = vmul.f32 0.0078125, %v2709_v25  ;;  %v2707_v29 = vpop.xlane.xlu0 %2706  ;;  %v2810_v34 = vmul.f32 %v9677_v28, %v9677_v28 }
 0x379   : > { %v2747_v43 = vmul.f32 0.0078125, %v2707_v29  ;;  %v2809_v30 = vmul.f32 %v9680_v17, %v9680_v17 }
 0x37a   : > { %2865 = vadd.xlane.f32.xlu1 %v2810_v34  ;;  %v9687_v61 = vsub.f32 %v9508_v36, %v2748_v23 }
 0x37b   : > { %v2713_v62 = vpop.xlane.xlu1 %2712  ;;  %2863 = vadd.xlane.f32.xlu0 %v2809_v30  ;;  %v9690_v6 = vsub.f32 %v9516_v27, %v2747_v43 }
 0x37c   : > { %v2750_v38 = vmul.f32 0.0078125, %v2713_v62  ;;  %v2711_v5 = vpop.xlane.xlu0 %2710  ;;  %v2812_v45 = vmul.f32 %v9687_v61, %v9687_v61 }
 0x37d   : > { %v2749_v26 = vmul.f32 0.0078125, %v2711_v5  ;;  %v2811_v57 = vmul.f32 %v9690_v6, %v9690_v6 }
 0x37e   : > { %2869 = vadd.xlane.f32.xlu1 %v2812_v45  ;;  %v9697_v24 = vsub.f32 %v9530_v15, %v2750_v38 }
 0x37f   : > { %v2717_v36 = vpop.xlane.xlu1 %2716  ;;  %2867 = vadd.xlane.f32.xlu0 %v2811_v57  ;;  %v9700_v63 = vsub.f32 %v9536_v47, %v2749_v26 }
 0x380   : > { %v2752_v27 = vmul.f32 0.0078125, %v2717_v36  ;;  %v2715_v59 = vpop.xlane.xlu0 %2714  ;;  %v2814_v53 = vmul.f32 %v9697_v24, %v9697_v24 }
 0x381   : > { %v2751_v52 = vmul.f32 0.0078125, %v2715_v59  ;;  %v2813_v39 = vmul.f32 %v9700_v63, %v9700_v63 }
 0x382   : > { %2873 = vadd.xlane.f32.xlu1 %v2814_v53  ;;  %v9707_v13 = vsub.f32 %v9544_v3, %v2752_v27 }
 0x383   : > { %v2721_v15 = vpop.xlane.xlu1 %2720  ;;  %2871 = vadd.xlane.f32.xlu0 %v2813_v39  ;;  %v9710_v25 = vsub.f32 %v9546_v19, %v2751_v52 }
 0x384   : > { %v2754_v47 = vmul.f32 0.0078125, %v2721_v15  ;;  %v2719_v23 = vpop.xlane.xlu0 %2718  ;;  %v2816_v29 = vmul.f32 %v9707_v13, %v9707_v13 }
 0x385   : > { %v2753_v34 = vmul.f32 0.0078125, %v2719_v23  ;;  %v2815_v43 = vmul.f32 %v9710_v25, %v9710_v25  ;;  %v9727_v23 = vsub.s32 2, %v11431_v7 }
 0x386   : > { %2877 = vadd.xlane.f32.xlu1 %v2816_v29  ;;  %v9717_v30 = vsub.f32 %v9552_v56, %v2754_v47 }
 0x387   : > { %2875 = vadd.xlane.f32.xlu0 %v2815_v43  ;;  %v9720_v3 = vsub.f32 %v9554_v35, %v2753_v34  ;;  %v9730_v43 = vsub.s32 3, %v11431_v7 }
 0x388   : > { %v2818_v19 = vmul.f32 %v9717_v30, %v9717_v30 }
 0x389   : > { %v2817_v62 = vmul.f32 %v9720_v3, %v9720_v3 }
 0x38a   : > { %2881 = vadd.xlane.f32.xlu1 %v2818_v19 }
 0x38b   : > { %2879 = vadd.xlane.f32.xlu0 %v2817_v62 }
 0x3db   : > { %v2822_v38 = vpop.xlane.xlu1 %2821 }
 0x3dc   : > { %v2884_v5 = vmul.f32 0.0078125, %v2822_v38  ;;  %v2820_v45 = vpop.xlane.xlu0 %2819 }
 0x3dd   : > { %v2883_v26 = vmul.f32 0.0078125, %v2820_v45  ;;  %v9733_v45 = vld [vmem:[%s8208_s17] sm:$0x7f] }
 0x3de   : > { %v2916_v57 = vadd.f32 1e-05, %v2884_v5 }
 0x3df   : > { %v2915_v36 = vadd.f32 1e-05, %v2883_v26  ;;  %v2826_v56 = vpop.xlane.xlu1 %2825  ;;  %v9737_v26 = vrot.slane %v9733_v45, %v9727_v23 }
 0x3e0   : > { %7518 = vrsqrt.f32 %v2916_v57  ;;  %v2886_v27 = vmul.f32 0.0078125, %v2826_v56  ;;  %v2824_v59 = vpop.xlane.xlu0 %2823 }
 0x3e1   : > { %7520 = vrsqrt.f32 %v2915_v36  ;;  %v2885_v35 = vmul.f32 0.0078125, %v2824_v59  ;;  %v9741_v59 = vrot.slane %v9733_v45, %v9730_v43 }
 0x3e2   : > { %v2918_v53 = vadd.f32 1e-05, %v2886_v27 }
 0x3e3   : > { %v2917_v52 = vadd.f32 1e-05, %v2885_v35  ;;  %v2830_v39 = vpop.xlane.xlu1 %2829 }
 0x3e4   : > { %7522 = vrsqrt.f32 %v2918_v53  ;;  %v2888_v15 = vmul.f32 0.0078125, %v2830_v39  ;;  %v2828_v47 = vpop.xlane.xlu0 %2827 }
 0x3e5   : > { %7524 = vrsqrt.f32 %v2917_v52  ;;  %v2887_v29 = vmul.f32 0.0078125, %v2828_v47 }
 0x3e6   : > { %v2920_v34 = vadd.f32 1e-05, %v2888_v15 }
 0x3e7   : > { %v2919_v19 = vadd.f32 1e-05, %v2887_v29  ;;  %v2834_v62 = vpop.xlane.xlu1 %2833 }
 0x3e8   : > { %7526 = vrsqrt.f32 %v2920_v34  ;;  %v2890_v38 = vmul.f32 0.0078125, %v2834_v62  ;;  %v2832_v5 = vpop.xlane.xlu0 %2831 }
 0x3e9   : > { %7528 = vrsqrt.f32 %v2919_v19  ;;  %v2889_v57 = vmul.f32 0.0078125, %v2832_v5 }
 0x3ea   : > { %v7519_v36 = vpop.eup %7518  ;;  %v2922_v56 = vadd.f32 1e-05, %v2890_v38 }
 0x3eb   : > { %v7521_v27 = vpop.eup %7520  ;;  %v2921_v35 = vadd.f32 1e-05, %v2889_v57  ;;  %v2838_v53 = vpop.xlane.xlu1 %2837  ;;  %v2980_v52 = vmul.f32 %v7519_v36, %v9560_v32 }
 0x3ec   : > { %7530 = vrsqrt.f32 %v2922_v56  ;;  %v2892_v39 = vmul.f32 0.0078125, %v2838_v53  ;;  %v2836_v15 = vpop.xlane.xlu0 %2835  ;;  %v2979_v47 = vmul.f32 %v7521_v27, %v9563_v31 }
 0x3ed   : > { %7532 = vrsqrt.f32 %v2921_v35  ;;  %v2891_v29 = vmul.f32 0.0078125, %v2836_v15  ;;  %v3016_v34 = vmul.f32 %v9737_v26, %v2980_v52 }
 0x3ee   : > { %v7523_v19 = vpop.eup %7522  ;;  %v2924_v62 = vadd.f32 1e-05, %v2892_v39  ;;  %v3015_v38 = vmul.f32 %v9737_v26, %v2979_v47 }
 0x3ef   : > { %v7525_v5 = vpop.eup %7524  ;;  %v2982_v33 = vmul.f32 %v7523_v19, %v9570_v9  ;;  %v2923_v57 = vadd.f32 1e-05, %v2891_v29  ;;  %v2842_v18 = vpop.xlane.xlu1 %2841  ;;  %v3052_v32 = vadd.f32 %v9741_v59, %v3016_v34 }
 0x3f0   : > { %v2981_v36 = vmul.f32 %v7525_v5, %v9573_v48  ;;  %7534 = vrsqrt.f32 %v2924_v62  ;;  %v2894_v56 = vmul.f32 0.0078125, %v2842_v18  ;;  %v2840_v31 = vpop.xlane.xlu0 %2839  ;;  %v3051_v27 = vadd.f32 %v9741_v59, %v3015_v38 }
 0x3f1   : > { %v3018_v35 = vmul.f32 %v9737_v26, %v2982_v33  ;;  %7536 = vrsqrt.f32 %v2923_v57  ;;  %v2893_v53 = vmul.f32 0.0078125, %v2840_v31  ;;  %v3084_v52 = vmax.f32 %v3052_v32, 0.0 }
 0x3f2   : > { %v7527_v39 = vpop.eup %7526  ;;  %v3017_v15 = vmul.f32 %v9737_v26, %v2981_v36  ;;  %v2926_v9 = vadd.f32 1e-05, %v2894_v56  ;;  %v3083_v47 = vmax.f32 %v3051_v27, 0.0 }
 0x3f3   : > { %v7529_v29 = vpop.eup %7528  ;;  %v2925_v19 = vadd.f32 1e-05, %v2893_v53  ;;  %v2846_v34 = vpop.xlane.xlu1 %2845  ;;  %v3054_v48 = vadd.f32 %v9741_v59, %v3018_v35  ;;  %v2984_v18 = vmul.f32 %v7527_v39, %v9580_v50 }
 0x3f4   : > { %7538 = vrsqrt.f32 %v2926_v9  ;;  %v2896_v62 = vmul.f32 0.0078125, %v2846_v34  ;;  %v2844_v38 = vpop.xlane.xlu0 %2843  ;;  %v3115_v5 = vpack.c.bf16 %v3084_v52, %v3083_v47  ;;  %v3053_v33 = vadd.f32 %v9741_v59, %v3017_v15 }
 0x3f5   : > { %7540 = vrsqrt.f32 %v2925_v19  ;;  %v2895_v57 = vmul.f32 0.0078125, %v2844_v38  ;;  %v3086_v32 = vmax.f32 %v3054_v48, 0.0  ;;  %v2983_v36 = vmul.f32 %v7529_v29, %v9583_v1 }
 0x3f6   : > { %v7531_v56 = vpop.eup %7530  ;;  %v2928_v31 = vadd.f32 1e-05, %v2896_v62  ;;  %7003 = vmatprep.mubr.bf16.mxu1 %v3115_v5  ;;  %v3085_v27 = vmax.f32 %v3053_v33, 0.0  ;;  %v3020_v53 = vmul.f32 %v9737_v26, %v2984_v18 }
 0x3f7   : > { %v7533_v35 = vpop.eup %7532  ;;  %v2927_v60 = vadd.f32 1e-05, %v2895_v57  ;;  %v2850_v50 = vpop.xlane.xlu1 %2849  ;;  %v3019_v39 = vmul.f32 %v9737_v26, %v2983_v36  ;;  %v2986_v52 = vmul.f32 %v7531_v56, %v9590_v51 }
 0x3f8   : > { %7542 = vrsqrt.f32 %v2928_v31  ;;  %v2898_v15 = vmul.f32 0.0078125, %v2850_v50  ;;  %v2848_v9 = vpop.xlane.xlu0 %2847  ;;  %v3116_v47 = vpack.c.bf16 %v3086_v32, %v3085_v27  ;;  %v3056_v19 = vadd.f32 %v9741_v59, %v3020_v53 }
 0x3f9   : > { %7544 = vrsqrt.f32 %v2927_v60  ;;  %v2897_v1 = vmul.f32 0.0078125, %v2848_v9  ;;  %v3055_v29 = vadd.f32 %v9741_v59, %v3019_v39  ;;  %v2985_v34 = vmul.f32 %v7533_v35, %v9593_v2 }
 0x3fa   : > { %v7535_v48 = vpop.eup %7534  ;;  %v2930_v18 = vadd.f32 1e-05, %v2898_v15  ;;  %7004 = vmatmul.mubr.bf16.vlgmr.msra.gmra.mrb[48].mxu1 %v3116_v47  ;;  %v3088_v62 = vmax.f32 %v3056_v19, 0.0  ;;  %v3022_v38 = vmul.f32 %v9737_v26, %v2986_v52 }
 0x3fb   : > { %v7537_v5 = vpop.eup %7536  ;;  %v2929_v51 = vadd.f32 1e-05, %v2897_v1  ;;  %v2854_v33 = vpop.xlane.xlu1 %2853  ;;  %v3087_v57 = vmax.f32 %v3055_v29, 0.0  ;;  %v3021_v32 = vmul.f32 %v9737_v26, %v2985_v34  ;;  %v2988_v36 = vmul.f32 %v7535_v48, %v9600_v4 }
 0x3fc   : > { %7546 = vrsqrt.f32 %v2930_v18  ;;  %v2900_v60 = vmul.f32 0.0078125, %v2854_v33  ;;  %v2852_v56 = vpop.xlane.xlu0 %2851  ;;  %v3058_v31 = vadd.f32 %v9741_v59, %v3022_v38  ;;  %v2987_v2 = vmul.f32 %v7537_v5, %v9603_v14 }
 0x3fd   : > { %7548 = vrsqrt.f32 %v2929_v51  ;;  %v2899_v27 = vmul.f32 0.0078125, %v2852_v56  ;;  %v3117_v53 = vpack.c.bf16 %v3088_v62, %v3087_v57  ;;  %v3057_v35 = vadd.f32 %v9741_v59, %v3021_v32 }
 0x3fe   : > { %v7539_v50 = vpop.eup %7538  ;;  %v2932_v39 = vadd.f32 1e-05, %v2900_v60  ;;  %v3090_v52 = vmax.f32 %v3058_v31, 0.0  ;;  %v3023_v15 = vmul.f32 %v9737_v26, %v2987_v2  ;;  %v3024_v9 = vmul.f32 %v9737_v26, %v2988_v36 }
 0x3ff   : > { %v7541_v4 = vpop.eup %7540  ;;  %v2931_v47 = vadd.f32 1e-05, %v2899_v27  ;;  %7007 = vmatprep.mubr.bf16.mxu1 %v3117_v53  ;;  %v2858_v19 = vpop.xlane.xlu1 %2857  ;;  %v3089_v1 = vmax.f32 %v3057_v35, 0.0  ;;  %v2990_v29 = vmul.f32 %v7539_v50, %v9611_v42 }
 0x400   : > { %7550 = vrsqrt.f32 %v2932_v39  ;;  %v2902_v14 = vmul.f32 0.0078125, %v2858_v19  ;;  %v2856_v34 = vpop.xlane.xlu0 %2855  ;;  %v3059_v48 = vadd.f32 %v9741_v59, %v3023_v15  ;;  %v3060_v18 = vadd.f32 %v9741_v59, %v3024_v9 }
 0x401   : > { %7552 = vrsqrt.f32 %v2931_v47  ;;  %v2901_v62 = vmul.f32 0.0078125, %v2856_v34  ;;  %v3118_v38 = vpack.c.bf16 %v3090_v52, %v3089_v1  ;;  %v2989_v5 = vmul.f32 %v7541_v4, %v9614_v22 }
 0x402   : > { %v7543_v51 = vpop.eup %7542  ;;  %v2934_v33 = vadd.f32 1e-05, %v2902_v14  ;;  %v3091_v57 = vmax.f32 %v3059_v48, 0.0  ;;  %v3092_v32 = vmax.f32 %v3060_v18, 0.0  ;;  %v3026_v36 = vmul.f32 %v9737_v26, %v2990_v29 }
 0x403   : > { %v7545_v60 = vpop.eup %7544  ;;  %v2933_v42 = vadd.f32 1e-05, %v2901_v62  ;;  %7008 = vmatmul.mubr.bf16.gmra.mrb[52].mxu1 %v3118_v38  ;;  %v2862_v56 = vpop.xlane.xlu1 %2861  ;;  %v3025_v31 = vmul.f32 %v9737_v26, %v2989_v5  ;;  %v2992_v2 = vmul.f32 %v7543_v51, %v9622_v10 }
 0x404   : > { %7554 = vrsqrt.f32 %v2934_v33  ;;  %v2904_v27 = vmul.f32 0.0078125, %v2862_v56  ;;  %v2860_v53 = vpop.xlane.xlu0 %2859  ;;  %v3119_v35 = vpack.c.bf16 %v3092_v32, %v3091_v57  ;;  %v3062_v22 = vadd.f32 %v9741_v59, %v3026_v36 }
 0x405   : > { %7556 = vrsqrt.f32 %v2933_v42  ;;  %v2903_v50 = vmul.f32 0.0078125, %v2860_v53  ;;  %v3061_v39 = vadd.f32 %v9741_v59, %v3025_v31  ;;  %v2991_v52 = vmul.f32 %v7545_v60, %v9625_v55 }
 0x406   : > { %v7547_v15 = vpop.eup %7546  ;;  %v2936_v9 = vadd.f32 1e-05, %v2904_v27  ;;  %7011 = vmatprep.mubr.bf16.mxu1 %v3119_v35  ;;  %v3094_v4 = vmax.f32 %v3062_v22, 0.0  ;;  %v3028_v47 = vmul.f32 %v9737_v26, %v2992_v2 }
 0x407   : > { %v7549_v19 = vpop.eup %7548  ;;  %v2935_v10 = vadd.f32 1e-05, %v2903_v50  ;;  %v2866_v1 = vpop.xlane.xlu1 %2865  ;;  %v3093_v29 = vmax.f32 %v3061_v39, 0.0  ;;  %v3027_v14 = vmul.f32 %v9737_v26, %v2991_v52  ;;  %v2994_v34 = vmul.f32 %v7547_v15, %v9633_v21 }
 0x408   : > { %7558 = vrsqrt.f32 %v2936_v9  ;;  %v2906_v48 = vmul.f32 0.0078125, %v2866_v1  ;;  %v2864_v18 = vpop.xlane.xlu0 %2863  ;;  %v3064_v62 = vadd.f32 %v9741_v59, %v3028_v47  ;;  %v2993_v55 = vmul.f32 %v7549_v19, %v9636_v58 }
 0x409   : > { %7560 = vrsqrt.f32 %v2935_v10  ;;  %v2905_v38 = vmul.f32 0.0078125, %v2864_v18  ;;  %v3120_v5 = vpack.c.bf16 %v3094_v4, %v3093_v29  ;;  %v3063_v51 = vadd.f32 %v9741_v59, %v3027_v14 }
 0x40a   : > { %v7551_v33 = vpop.eup %7550  ;;  %v2938_v57 = vadd.f32 1e-05, %v2906_v48  ;;  %v3096_v32 = vmax.f32 %v3064_v62, 0.0  ;;  %v3029_v36 = vmul.f32 %v9737_v26, %v2993_v55  ;;  %v3030_v60 = vmul.f32 %v9737_v26, %v2994_v34 }
 0x40b   : > { %v7553_v21 = vpop.eup %7552  ;;  %v2937_v42 = vadd.f32 1e-05, %v2905_v38  ;;  %7012 = vmatmul.mubr.bf16.gmra.mrb[56].mxu1 %v3120_v5  ;;  %v2870_v56 = vpop.xlane.xlu1 %2869  ;;  %v3095_v31 = vmax.f32 %v3063_v51, 0.0  ;;  %v2996_v2 = vmul.f32 %v7551_v33, %v9644_v20 }
 0x40c   : > { %7562 = vrsqrt.f32 %v2938_v57  ;;  %v2908_v58 = vmul.f32 0.0078125, %v2870_v56  ;;  %v2868_v27 = vpop.xlane.xlu0 %2867  ;;  %v3065_v53 = vadd.f32 %v9741_v59, %v3029_v36  ;;  %v3066_v35 = vadd.f32 %v9741_v59, %v3030_v60 }
 0x40d   : > { %7564 = vrsqrt.f32 %v2937_v42  ;;  %v2907_v22 = vmul.f32 0.0078125, %v2868_v27  ;;  %v3121_v50 = vpack.c.bf16 %v3096_v32, %v3095_v31  ;;  %v2995_v39 = vmul.f32 %v7553_v21, %v9647_v11 }
 0x40e   : > { %v7555_v52 = vpop.eup %7554  ;;  %v2940_v15 = vadd.f32 1e-05, %v2908_v58  ;;  %v3097_v9 = vmax.f32 %v3065_v53, 0.0  ;;  %v3098_v4 = vmax.f32 %v3066_v35, 0.0  ;;  %v3032_v47 = vmul.f32 %v9737_v26, %v2996_v2 }
 0x40f   : > { %v7557_v19 = vpop.eup %7556  ;;  %v2939_v20 = vadd.f32 1e-05, %v2907_v22  ;;  %7015 = vmatprep.mubr.bf16.mxu1 %v3121_v50  ;;  %v2874_v10 = vpop.xlane.xlu1 %2873  ;;  %v3031_v1 = vmul.f32 %v9737_v26, %v2995_v39  ;;  %v2998_v29 = vmul.f32 %v7555_v52, %v9655_v0 }
 0x410   : > { %7566 = vrsqrt.f32 %v2940_v15  ;;  %v2910_v14 = vmul.f32 0.0078125, %v2874_v10  ;;  %v2872_v34 = vpop.xlane.xlu0 %2871  ;;  %v3122_v48 = vpack.c.bf16 %v3098_v4, %v3097_v9  ;;  %v3068_v11 = vadd.f32 %v9741_v59, %v3032_v47 }
 0x411   : > { %7568 = vrsqrt.f32 %v2939_v20  ;;  %v2909_v18 = vmul.f32 0.0078125, %v2872_v34  ;;  %v3067_v62 = vadd.f32 %v9741_v59, %v3031_v1  ;;  %v2997_v55 = vmul.f32 %v7557_v19, %v9658_v8 }
 0x412   : > { %v7559_v38 = vpop.eup %7558  ;;  %v2942_v5 = vadd.f32 1e-05, %v2910_v14  ;;  %v3100_v51 = vmax.f32 %v3068_v11, 0.0  ;;  %v3034_v33 = vmul.f32 %v9737_v26, %v2998_v29 }
 0x413   : > { %v7561_v57 = vpop.eup %7560  ;;  %v2941_v32 = vadd.f32 1e-05, %v2909_v18  ;;  %7016 = vmatmul.mubr.bf16.gmra.mrb[60].mxu1 %v3122_v48  ;;  %v2878_v0 = vpop.xlane.xlu1 %2877  ;;  %v3099_v36 = vmax.f32 %v3067_v62, 0.0  ;;  %v3033_v60 = vmul.f32 %v9737_v26, %v2997_v55  ;;  %v3000_v21 = vmul.f32 %v7559_v38, %v9666_v12 }
 0x414   : > { %7570 = vrsqrt.f32 %v2942_v5  ;;  %v2912_v42 = vmul.f32 0.0078125, %v2878_v0  ;;  %v2876_v56 = vpop.xlane.xlu0 %2875  ;;  %v3070_v31 = vadd.f32 %v9741_v59, %v3034_v33  ;;  %v2999_v8 = vmul.f32 %v7561_v57, %v9669_v49 }
 0x415   : > { %7572 = vrsqrt.f32 %v2941_v32  ;;  %v2911_v2 = vmul.f32 0.0078125, %v2876_v56  ;;  %v3123_v58 = vpack.c.bf16 %v3100_v51, %v3099_v36  ;;  %v3069_v27 = vadd.f32 %v9741_v59, %v3033_v60 }
 0x416   : > { %v7563_v53 = vpop.eup %7562  ;;  %v2944_v35 = vadd.f32 1e-05, %v2912_v42  ;;  %v3102_v22 = vmax.f32 %v3070_v31, 0.0  ;;  %v3035_v50 = vmul.f32 %v9737_v26, %v2999_v8  ;;  %v3036_v39 = vmul.f32 %v9737_v26, %v3000_v21 }
 0x417   : > { %v7565_v12 = vpop.eup %7564  ;;  %v2943_v52 = vadd.f32 1e-05, %v2911_v2  ;;  %7019 = vmatprep.mubr.bf16.mxu1 %v3123_v58  ;;  %v2882_v15 = vpop.xlane.xlu1 %2881  ;;  %v3101_v9 = vmax.f32 %v3069_v27, 0.0  ;;  %v3002_v4 = vmul.f32 %v7563_v53, %v9677_v28 }
 0x418   : > { %7574 = vrsqrt.f32 %v2944_v35  ;;  %v2914_v49 = vmul.f32 0.0078125, %v2882_v15  ;;  %v2880_v47 = vpop.xlane.xlu0 %2879  ;;  %v3071_v19 = vadd.f32 %v9741_v59, %v3035_v50  ;;  %v3072_v20 = vadd.f32 %v9741_v59, %v3036_v39 }
 0x419   : > { %7576 = vrsqrt.f32 %v2943_v52  ;;  %v2913_v10 = vmul.f32 0.0078125, %v2880_v47  ;;  %v3124_v1 = vpack.c.bf16 %v3102_v22, %v3101_v9  ;;  %v3001_v29 = vmul.f32 %v7565_v12, %v9680_v17 }
 0x41a   : > { %v7567_v14 = vpop.eup %7566  ;;  %v2946_v34 = vadd.f32 1e-05, %v2914_v49  ;;  %v3103_v48 = vmax.f32 %v3071_v19, 0.0  ;;  %v3104_v11 = vmax.f32 %v3072_v20, 0.0  ;;  %v3038_v18 = vmul.f32 %v9737_v26, %v3002_v4 }
 0x41b   : > { %v7569_v62 = vpop.eup %7568  ;;  %v2945_v28 = vadd.f32 1e-05, %v2913_v10  ;;  %7020 = vmatmul.mubr.bf16.gmra.mrb[64].mxu1 %v3124_v1  ;;  %v3037_v55 = vmul.f32 %v9737_v26, %v3001_v29  ;;  %v3004_v38 = vmul.f32 %v7567_v14, %v9687_v61 }
 0x41c   : > { %7578 = vrsqrt.f32 %v2946_v34  ;;  %v3125_v5 = vpack.c.bf16 %v3104_v11, %v3103_v48  ;;  %v3074_v51 = vadd.f32 %v9741_v59, %v3038_v18  ;;  %v3003_v33 = vmul.f32 %v7569_v62, %v9690_v6 }
 0x41d   : > { %7580 = vrsqrt.f32 %v2945_v28  ;;  %v3073_v17 = vadd.f32 %v9741_v59, %v3037_v55  ;;  %v3040_v57 = vmul.f32 %v9737_v26, %v3004_v38  ;;  %v9840_v28 = vsub.s32 4, %v11431_v7 }
 0x41e   : > { %v7571_v32 = vpop.eup %7570  ;;  %7023 = vmatprep.mubr.bf16.mxu1 %v3125_v5  ;;  %v3106_v0 = vmax.f32 %v3074_v51, 0.0  ;;  %v3039_v36 = vmul.f32 %v9737_v26, %v3003_v33 }
 0x41f   : > { %v7573_v60 = vpop.eup %7572  ;;  %v3105_v21 = vmax.f32 %v3073_v17, 0.0  ;;  %v3076_v61 = vadd.f32 %v9741_v59, %v3040_v57  ;;  %v3006_v42 = vmul.f32 %v7571_v32, %v9697_v24 }
 0x420   : > { %v3075_v56 = vadd.f32 %v9741_v59, %v3039_v36  ;;  %v3005_v6 = vmul.f32 %v7573_v60, %v9700_v63 }
 0x421   : > { %v3126_v31 = vpack.c.bf16 %v3106_v0, %v3105_v21  ;;  %v3108_v8 = vmax.f32 %v3076_v61, 0.0  ;;  %v3042_v2 = vmul.f32 %v9737_v26, %v3006_v42 }
 0x422   : > { %v7575_v58 = vpop.eup %7574  ;;  %v3107_v27 = vmax.f32 %v3075_v56, 0.0  ;;  %v3041_v53 = vmul.f32 %v9737_v26, %v3005_v6 }
 0x423   : > { %v7577_v35 = vpop.eup %7576  ;;  %7024 = vmatmul.mubr.bf16.gmra.mrb[68].mxu1 %v3126_v31  ;;  %v3078_v22 = vadd.f32 %v9741_v59, %v3042_v2  ;;  %v3008_v50 = vmul.f32 %v7575_v58, %v9707_v13 }
 0x424   : > { %v3127_v39 = vpack.c.bf16 %v3108_v8, %v3107_v27  ;;  %v3077_v24 = vadd.f32 %v9741_v59, %v3041_v53  ;;  %v3007_v12 = vmul.f32 %v7577_v35, %v9710_v25 }
 0x425   : > { %v3110_v63 = vmax.f32 %v3078_v22, 0.0  ;;  %v3044_v52 = vmul.f32 %v9737_v26, %v3008_v50 }
 0x426   : > { %v7579_v15 = vpop.eup %7578  ;;  %7027 = vmatprep.mubr.bf16.mxu1 %v3127_v39  ;;  %v3109_v9 = vmax.f32 %v3077_v24, 0.0  ;;  %v3043_v4 = vmul.f32 %v9737_v26, %v3007_v12 }
 0x427   : > { %v7581_v49 = vpop.eup %7580  ;;  %v3080_v47 = vadd.f32 %v9741_v59, %v3044_v52  ;;  %v3010_v19 = vmul.f32 %v7579_v15, %v9717_v30 }
 0x428   : > { %v3128_v20 = vpack.c.bf16 %v3110_v63, %v3109_v9  ;;  %v3079_v13 = vadd.f32 %v9741_v59, %v3043_v4  ;;  %v3009_v10 = vmul.f32 %v7581_v49, %v9720_v3  ;;  %v9844_v3 = vrot.slane %v9733_v45, %v9840_v28 }
 0x429   : > { %v3112_v1 = vmax.f32 %v3080_v47, 0.0  ;;  %v3046_v25 = vmul.f32 %v9737_v26, %v3010_v19 }
 0x42a   : > { %v3111_v29 = vmax.f32 %v3079_v13, 0.0  ;;  %v3045_v14 = vmul.f32 %v9737_v26, %v3009_v10 }
 0x42b   : > { %7028 = vmatmul.mubr.bf16.gmra.mrb[72].mxu1 %v3128_v20  ;;  %v3082_v34 = vadd.f32 %v9741_v59, %v3046_v25 }
 0x42c   : > { %v3129_v48 = vpack.c.bf16 %v3112_v1, %v3111_v29  ;;  %v3081_v11 = vadd.f32 %v9741_v59, %v3045_v14 }
 0x42d   : > { %v3114_v18 = vmax.f32 %v3082_v34, 0.0 }
 0x42e   : > { %7031 = vmatprep.mubr.bf16.mxu1 %v3129_v48  ;;  %v3113_v30 = vmax.f32 %v3081_v11, 0.0 }
 0x430   : > { %v3130_v62 = vpack.c.bf16 %v3114_v18, %v3113_v30 }
 0x433   : > { %7032 = vmatmul.mubr.bf16.gmra.mrb[76].mxu1 %v3130_v62 }
 0x4cd   : > { %v7005_v55 = vpop.f32.mrb[48].mxu1 }
 0x4ce   : > { %v9847_v26 = vadd.f32 %v7005_v55, %v9844_v3  ;;  %v3233_v38 = vpop.f32.mrb[49].mxu1 }
 0x4cf   : > { %v9850_v5 = vadd.f32 %v3233_v38, %v9844_v3  ;;  %v7006_v59 = vpop.f32.mrb[50].mxu1 }
 0x4d0   : > { %v9853_v51 = vadd.f32 %v7006_v59, %v9844_v3  ;;  %3364 = vadd.xlane.f32.xlu0 %v9847_v26  ;;  %v3236_v33 = vpop.f32.mrb[51].mxu1 }
 0x4d1   : > { %v9857_v17 = vadd.f32 %v3236_v33, %v9844_v3 }
 0x4d2   : > { %3366 = vadd.xlane.f32.xlu1 %v9853_v51 }
 0x4d4   : > { %3360 = vadd.xlane.f32.xlu0 %v9850_v5 }
 0x4d6   : > { %v7009_v45 = vpop.f32.mrb[52].mxu1  ;;  %3362 = vadd.xlane.f32.xlu1 %v9857_v17 }
 0x4d7   : > { %v9863_v57 = vadd.f32 %v7009_v45, %v9844_v3  ;;  %v3249_v32 = vpop.f32.mrb[53].mxu1 }
 0x4d8   : > { %v9866_v0 = vadd.f32 %v3249_v32, %v9844_v3  ;;  %v7010_v36 = vpop.f32.mrb[54].mxu1 }
 0x4d9   : > { %v9869_v60 = vadd.f32 %v7010_v36, %v9844_v3  ;;  %3372 = vadd.xlane.f32.xlu0 %v9863_v57  ;;  %v3252_v21 = vpop.f32.mrb[55].mxu1 }
 0x4da   : > { %v9873_v61 = vadd.f32 %v3252_v21, %v9844_v3 }
 0x4db   : > { %3374 = vadd.xlane.f32.xlu1 %v9869_v60 }
 0x4dd   : > { %3368 = vadd.xlane.f32.xlu0 %v9866_v0 }
 0x4de   : > { %v7013_v42 = vpop.f32.mrb[56].mxu1 }
 0x4df   : > { %v9878_v56 = vadd.f32 %v7013_v42, %v9844_v3  ;;  %3370 = vadd.xlane.f32.xlu1 %v9873_v61  ;;  %v3265_v6 = vpop.f32.mrb[57].mxu1 }
 0x4e0   : > { %v9882_v31 = vadd.f32 %v3265_v6, %v9844_v3  ;;  %v7014_v8 = vpop.f32.mrb[58].mxu1 }
 0x4e1   : > { %v9885_v2 = vadd.f32 %v7014_v8, %v9844_v3  ;;  %3380 = vadd.xlane.f32.xlu0 %v9878_v56  ;;  %v3268_v58 = vpop.f32.mrb[59].mxu1 }
 0x4e2   : > { %v9889_v27 = vadd.f32 %v3268_v58, %v9844_v3 }
 0x4e3   : > { %3382 = vadd.xlane.f32.xlu1 %v9885_v2 }
 0x4e5   : > { %3376 = vadd.xlane.f32.xlu0 %v9882_v31 }
 0x4e6   : > { %v7017_v53 = vpop.f32.mrb[60].mxu1 }
 0x4e7   : > { %v9894_v35 = vadd.f32 %v7017_v53, %v9844_v3  ;;  %3378 = vadd.xlane.f32.xlu1 %v9889_v27  ;;  %v3281_v22 = vpop.f32.mrb[61].mxu1 }
 0x4e8   : > { %v9898_v50 = vadd.f32 %v3281_v22, %v9844_v3  ;;  %v7018_v39 = vpop.f32.mrb[62].mxu1 }
 0x4e9   : > { %v9901_v24 = vadd.f32 %v7018_v39, %v9844_v3  ;;  %v3284_v12 = vpop.f32.mrb[63].mxu1 }
 0x4ea   : > { %v9904_v63 = vadd.f32 %v3284_v12, %v9844_v3 }
 0x4ee   : > { %v7021_v52 = vpop.f32.mrb[64].mxu1 }
 0x4ef   : > { %v9907_v15 = vadd.f32 %v7021_v52, %v9844_v3  ;;  %v3297_v9 = vpop.f32.mrb[65].mxu1 }
 0x4f0   : > { %v9910_v4 = vadd.f32 %v3297_v9, %v9844_v3  ;;  %v7022_v49 = vpop.f32.mrb[66].mxu1 }
 0x4f1   : > { %v9913_v47 = vadd.f32 %v7022_v49, %v9844_v3  ;;  %3396 = vadd.xlane.f32.xlu0 %v9907_v15  ;;  %v3300_v19 = vpop.f32.mrb[67].mxu1 }
 0x4f2   : > { %v9917_v20 = vadd.f32 %v3300_v19, %v9844_v3 }
 0x4f3   : > { %3398 = vadd.xlane.f32.xlu1 %v9913_v47 }
 0x4f5   : > { %3392 = vadd.xlane.f32.xlu0 %v9910_v4 }
 0x4f6   : > { %v7025_v13 = vpop.f32.mrb[68].mxu1 }
 0x4f7   : > { %v9922_v10 = vadd.f32 %v7025_v13, %v9844_v3  ;;  %3394 = vadd.xlane.f32.xlu1 %v9917_v20  ;;  %v3313_v1 = vpop.f32.mrb[69].mxu1 }
 0x4f8   : > { %v9926_v25 = vadd.f32 %v3313_v1, %v9844_v3  ;;  %v7026_v29 = vpop.f32.mrb[70].mxu1 }
 0x4f9   : > { %v9929_v14 = vadd.f32 %v7026_v29, %v9844_v3  ;;  %3404 = vadd.xlane.f32.xlu0 %v9922_v10  ;;  %v3316_v34 = vpop.f32.mrb[71].mxu1 }
 0x4fa   : > { %v9933_v48 = vadd.f32 %v3316_v34, %v9844_v3 }
 0x4fb   : > { %3406 = vadd.xlane.f32.xlu1 %v9929_v14 }
 0x4fd   : > { %3400 = vadd.xlane.f32.xlu0 %v9926_v25 }
 0x4fe   : > { %v7029_v11 = vpop.f32.mrb[72].mxu1 }
 0x4ff   : > { %v9938_v18 = vadd.f32 %v7029_v11, %v9844_v3  ;;  %3402 = vadd.xlane.f32.xlu1 %v9933_v48  ;;  %v3329_v30 = vpop.f32.mrb[73].mxu1 }
 0x500   : > { %v9942_v62 = vadd.f32 %v3329_v30, %v9844_v3  ;;  %v7030_v55 = vpop.f32.mrb[74].mxu1 }
 0x501   : > { %v9945_v38 = vadd.f32 %v7030_v55, %v9844_v3  ;;  %3412 = vadd.xlane.f32.xlu0 %v9938_v18  ;;  %v3332_v59 = vpop.f32.mrb[75].mxu1 }
 0x502   : > { %v9949_v33 = vadd.f32 %v3332_v59, %v9844_v3 }
 0x503   : > { %3414 = vadd.xlane.f32.xlu1 %v9945_v38 }
 0x505   : > { %3408 = vadd.xlane.f32.xlu0 %v9942_v62 }
 0x506   : > { %v7033_v45 = vpop.f32.mrb[76].mxu1 }
 0x507   : > { %v9954_v32 = vadd.f32 %v7033_v45, %v9844_v3  ;;  %3410 = vadd.xlane.f32.xlu1 %v9949_v33  ;;  %v3345_v36 = vpop.f32.mrb[77].mxu1 }
 0x508   : > { %v9958_v21 = vadd.f32 %v3345_v36, %v9844_v3  ;;  %v7034_v42 = vpop.f32.mrb[78].mxu1 }
 0x509   : > { %v9961_v6 = vadd.f32 %v7034_v42, %v9844_v3  ;;  %3384 = vadd.xlane.f32.xlu0 %v9898_v50  ;;  %v3348_v8 = vpop.f32.mrb[79].mxu1 }
 0x50a   : > { %v9965_v58 = vadd.f32 %v3348_v8, %v9844_v3 }
 0x50b   : > { %3386 = vadd.xlane.f32.xlu1 %v9904_v63 }
 0x50d   : > { %3416 = vadd.xlane.f32.xlu0 %v9958_v21 }
 0x50f   : > { %3418 = vadd.xlane.f32.xlu1 %v9965_v58 }
 0x511   : > { %3420 = vadd.xlane.f32.xlu0 %v9954_v32 }
 0x513   : > { %3422 = vadd.xlane.f32.xlu1 %v9961_v6 }
 0x515   : > { %3388 = vadd.xlane.f32.xlu0 %v9894_v35 }
 0x517   : > { %3390 = vadd.xlane.f32.xlu1 %v9901_v24 }
 0x55d   : > { %v3365_v53 = vpop.xlane.xlu0 %3364 }
 0x55e   : > { %v3426_v22 = vmul.f32 0.0078125, %v3365_v53 }
 0x55f   : > { %v3367_v39 = vpop.xlane.xlu1 %3366 }
 0x560   : > { %v9975_v3 = vsub.f32 %v9847_v26, %v3426_v22  ;;  %v3427_v12 = vmul.f32 0.0078125, %v3367_v39 }
 0x561   : > { %v3361_v52 = vpop.xlane.xlu0 %3360 }
 0x562   : > { %v9978_v9 = vsub.f32 %v9853_v51, %v3427_v12  ;;  %v3424_v49 = vmul.f32 0.0078125, %v3361_v52  ;;  %v3490_v19 = vmul.f32 %v9975_v3, %v9975_v3 }
 0x563   : > { %v3363_v13 = vpop.xlane.xlu1 %3362 }
 0x564   : > { %v9983_v1 = vsub.f32 %v9850_v5, %v3424_v49  ;;  %v3425_v29 = vmul.f32 0.0078125, %v3363_v13  ;;  %3524 = vadd.xlane.f32.xlu0 %v3490_v19  ;;  %v3491_v34 = vmul.f32 %v9978_v9, %v9978_v9 }
 0x566   : > { %v9988_v26 = vsub.f32 %v9857_v17, %v3425_v29  ;;  %v3373_v11 = vpop.xlane.xlu0 %3372  ;;  %3526 = vadd.xlane.f32.xlu1 %v3491_v34  ;;  %v3488_v51 = vmul.f32 %v9983_v1, %v9983_v1  ;;  %v7422_v34 = vld [vmem:[%s8188_s24] sm:$0xff]  }
 0x567   : > { %v3430_v30 = vmul.f32 0.0078125, %v3373_v11  ;;  %7035 = vmatprep.subr.bf16.mxu1 %v7422_v34 }
 0x568   : > { %v3375_v55 = vpop.xlane.xlu1 %3374  ;;  %3520 = vadd.xlane.f32.xlu0 %v3488_v51  ;;  %v3489_v5 = vmul.f32 %v9988_v26, %v9988_v26  ;;  %7036 = vmatpush3.bf16.msra.mxu1 %v7422_v34 }
 0x569   : > { %v9995_v59 = vsub.f32 %v9863_v57, %v3430_v30  ;;  %v3431_v45 = vmul.f32 0.0078125, %v3375_v55 }
 0x56a   : > { %v3369_v36 = vpop.xlane.xlu0 %3368  ;;  %3522 = vadd.xlane.f32.xlu1 %v3489_v5 }
 0x56b   : > { %v9998_v17 = vsub.f32 %v9869_v60, %v3431_v45  ;;  %v3428_v42 = vmul.f32 0.0078125, %v3369_v36  ;;  %v3494_v8 = vmul.f32 %v9995_v59, %v9995_v59 }
 0x56c   : > { %v3371_v53 = vpop.xlane.xlu1 %3370 }
 0x56d   : > { %v10003_v22 = vsub.f32 %v9866_v0, %v3428_v42  ;;  %v3429_v39 = vmul.f32 0.0078125, %v3371_v53  ;;  %3532 = vadd.xlane.f32.xlu0 %v3494_v8  ;;  %v3495_v57 = vmul.f32 %v9998_v17, %v9998_v17  ;;  %v7424_v8 = vld [vmem:[%s8188_s24 + $0x10] sm:$0xff]   ;;  %v7425_v53 = vld [vmem:[%s8188_s24 + $0x18] sm:$0xff]  }
 0x56e   : > { %v3381_v12 = vpop.xlane.xlu0 %3380 }
 0x56f   : > { %v10008_v52 = vsub.f32 %v9873_v61, %v3429_v39  ;;  %v3434_v60 = vmul.f32 0.0078125, %v3381_v12  ;;  %3534 = vadd.xlane.f32.xlu1 %v3495_v57  ;;  %v3492_v49 = vmul.f32 %v10003_v22, %v10003_v22 }
 0x570   : > { %v3383_v19 = vpop.xlane.xlu1 %3382 }
 0x571   : > { %v10013_v13 = vsub.f32 %v9878_v56, %v3434_v60  ;;  %v3435_v0 = vmul.f32 0.0078125, %v3383_v19  ;;  %3528 = vadd.xlane.f32.xlu0 %v3492_v49  ;;  %v3493_v29 = vmul.f32 %v10008_v52, %v10008_v52  ;;  %v7426_v19 = vld [vmem:[%s8188_s24 + $0x20] sm:$0xff]  }
 0x572   : > { %v3377_v11 = vpop.xlane.xlu0 %3376 }
 0x573   : > { %v10019_v61 = vsub.f32 %v9885_v2, %v3435_v0  ;;  %v3432_v51 = vmul.f32 0.0078125, %v3377_v11  ;;  %3530 = vadd.xlane.f32.xlu1 %v3493_v29  ;;  %v3498_v30 = vmul.f32 %v10013_v13, %v10013_v13  ;;  %v7423_v2 = vld [vmem:[%s8188_s24 + $0x8] sm:$0xff]  }
 0x574   : > { %v3379_v56 = vpop.xlane.xlu1 %3378  ;;  %7037 = vmatprep.subr.bf16.mxu1 %v7423_v2 }
 0x575   : > { %v10024_v55 = vsub.f32 %v9882_v31, %v3432_v51  ;;  %v3433_v5 = vmul.f32 0.0078125, %v3379_v56  ;;  %3540 = vadd.xlane.f32.xlu0 %v3498_v30  ;;  %v3499_v45 = vmul.f32 %v10019_v61, %v10019_v61  ;;  %7038 = vmatpush3.bf16.msra.mxu1 %v7423_v2 }
 0x576   : > { %7039 = vmatprep.subr.bf16.mxu1 %v7424_v8 }
 0x577   : > { %v10030_v36 = vsub.f32 %v9889_v27, %v3433_v5  ;;  %3542 = vadd.xlane.f32.xlu1 %v3499_v45  ;;  %v3496_v42 = vmul.f32 %v10024_v55, %v10024_v55  ;;  %v7427_v5 = vld [vmem:[%s8188_s24 + $0x28] sm:$0xff]  }
 0x579   : > { %3536 = vadd.xlane.f32.xlu0 %v3496_v42  ;;  %v3497_v31 = vmul.f32 %v10030_v36, %v10030_v36  ;;  %7040 = vmatpush3.bf16.msra.mxu1 %v7424_v8 }
 0x57a   : > { %7041 = vmatprep.subr.bf16.mxu1 %v7425_v53 }
 0x57b   : > { %3538 = vadd.xlane.f32.xlu1 %v3497_v31 }
 0x57d   : > { %7042 = vmatpush3.bf16.msra.mxu1 %v7425_v53 }
 0x57e   : > { %v3397_v39 = vpop.xlane.xlu0 %3396  ;;  %7043 = vmatprep.subr.bf16.mxu1 %v7426_v19 }
 0x57f   : > { %v3442_v57 = vmul.f32 0.0078125, %v3397_v39 }
 0x580   : > { %v3399_v27 = vpop.xlane.xlu1 %3398 }
 0x581   : > { %v10039_v12 = vsub.f32 %v9907_v15, %v3442_v57  ;;  %v3443_v60 = vmul.f32 0.0078125, %v3399_v27  ;;  %7044 = vmatpush3.bf16.msra.mxu1 %v7426_v19 }
 0x582   : > { %v3393_v49 = vpop.xlane.xlu0 %3392  ;;  %7045 = vmatprep.subr.bf16.mxu1 %v7427_v5 }
 0x583   : > { %v10043_v0 = vsub.f32 %v9913_v47, %v3443_v60  ;;  %v3440_v29 = vmul.f32 0.0078125, %v3393_v49  ;;  %v3506_v34 = vmul.f32 %v10039_v12, %v10039_v12 }
 0x584   : > { %v3395_v11 = vpop.xlane.xlu1 %3394 }
 0x585   : > { %v10048_v51 = vsub.f32 %v9910_v4, %v3440_v29  ;;  %v3441_v30 = vmul.f32 0.0078125, %v3395_v11  ;;  %3556 = vadd.xlane.f32.xlu0 %v3506_v34  ;;  %v3507_v15 = vmul.f32 %v10043_v0, %v10043_v0  ;;  %7046 = vmatpush3.bf16.msra.mxu1 %v7427_v5  ;;  %v7429_v29 = vld [vmem:[%s8188_s24 + $0x38] sm:$0xff]  }
 0x586   : > { %v3405_v56 = vpop.xlane.xlu0 %3404 }
 0x587   : > { %v10054_v47 = vsub.f32 %v9917_v20, %v3441_v30  ;;  %v3446_v45 = vmul.f32 0.0078125, %v3405_v56  ;;  %3558 = vadd.xlane.f32.xlu1 %v3507_v15  ;;  %v3504_v2 = vmul.f32 %v10048_v51, %v10048_v51  ;;  %v7428_v20 = vld [vmem:[%s8188_s24 + $0x30] sm:$0xff]   ;;  %s11442_s24 = scalar_lea.vmem [#allocation8], %s8161_s4 }
 0x588   : > { %v3407_v42 = vpop.xlane.xlu1 %3406  ;;  %7047 = vmatprep.subr.bf16.mxu1 %v7428_v20  ;;  %s11444_s26 = smov %s11442_s24 }
 0x589   : > { %v10059_v4 = vsub.f32 %v9922_v10, %v3446_v45  ;;  %v3447_v31 = vmul.f32 0.0078125, %v3407_v42  ;;  %3552 = vadd.xlane.f32.xlu0 %v3504_v2  ;;  %v3505_v8 = vmul.f32 %v10054_v47, %v10054_v47  ;;  %7048 = vmatpush3.bf16.msra.mxu1 %v7428_v20 }
 0x58a   : > { %v3401_v53 = vpop.xlane.xlu0 %3400  ;;  %7049 = vmatprep.subr.bf16.mxu1 %v7429_v29 }
 0x58b   : > { %v10065_v39 = vsub.f32 %v9929_v14, %v3447_v31  ;;  %v3444_v57 = vmul.f32 0.0078125, %v3401_v53  ;;  %3554 = vadd.xlane.f32.xlu1 %v3505_v8  ;;  %v3510_v27 = vmul.f32 %v10059_v4, %v10059_v4 }
 0x58c   : > { %v3403_v60 = vpop.xlane.xlu1 %3402 }
 0x58d   : > { %v10070_v10 = vsub.f32 %v9926_v25, %v3444_v57  ;;  %v3445_v49 = vmul.f32 0.0078125, %v3403_v60  ;;  %3564 = vadd.xlane.f32.xlu0 %v3510_v27  ;;  %v3511_v19 = vmul.f32 %v10065_v39, %v10065_v39  ;;  %7050 = vmatpush3.bf16.msra.mxu1 %v7429_v29 }
 0x58e   : > { %v3413_v34 = vpop.xlane.xlu0 %3412 }
 0x58f   : > { %v10076_v14 = vsub.f32 %v9933_v48, %v3445_v49  ;;  %v3450_v11 = vmul.f32 0.0078125, %v3413_v34  ;;  %3566 = vadd.xlane.f32.xlu1 %v3511_v19  ;;  %v3508_v30 = vmul.f32 %v10070_v10, %v10070_v10 }
 0x590   : > { %v3415_v15 = vpop.xlane.xlu1 %3414 }
 0x591   : > { %v10081_v25 = vsub.f32 %v9938_v18, %v3450_v11  ;;  %v3451_v56 = vmul.f32 0.0078125, %v3415_v15  ;;  %3560 = vadd.xlane.f32.xlu0 %v3508_v30  ;;  %v3509_v5 = vmul.f32 %v10076_v14, %v10076_v14 }
 0x592   : > { %v3409_v45 = vpop.xlane.xlu0 %3408 }
 0x593   : > { %v10086_v48 = vsub.f32 %v9945_v38, %v3451_v56  ;;  %v3448_v2 = vmul.f32 0.0078125, %v3409_v45  ;;  %3562 = vadd.xlane.f32.xlu1 %v3509_v5  ;;  %v3514_v42 = vmul.f32 %v10081_v25, %v10081_v25 }
 0x594   : > { %v3411_v31 = vpop.xlane.xlu1 %3410 }
 0x595   : > { %v10091_v8 = vsub.f32 %v9942_v62, %v3448_v2  ;;  %v3449_v18 = vmul.f32 0.0078125, %v3411_v31  ;;  %3572 = vadd.xlane.f32.xlu0 %v3514_v42  ;;  %v3515_v53 = vmul.f32 %v10086_v48, %v10086_v48 }
 0x596   : > { %v3385_v20 = vpop.xlane.xlu0 %3384 }
 0x597   : > { %v10096_v57 = vsub.f32 %v9949_v33, %v3449_v18  ;;  %v3436_v38 = vmul.f32 0.0078125, %v3385_v20  ;;  %3574 = vadd.xlane.f32.xlu1 %v3515_v53  ;;  %v3512_v27 = vmul.f32 %v10091_v8, %v10091_v8 }
 0x598   : > { %v3387_v60 = vpop.xlane.xlu1 %3386 }
 0x599   : > { %v10101_v49 = vsub.f32 %v9898_v50, %v3436_v38  ;;  %v3437_v62 = vmul.f32 0.0078125, %v3387_v60  ;;  %3568 = vadd.xlane.f32.xlu0 %v3512_v27  ;;  %v3513_v19 = vmul.f32 %v10096_v57, %v10096_v57 }
 0x59a   : > { %v3417_v29 = vpop.xlane.xlu0 %3416 }
 0x59b   : > { %v10106_v34 = vsub.f32 %v9904_v63, %v3437_v62  ;;  %v3452_v33 = vmul.f32 0.0078125, %v3417_v29  ;;  %3570 = vadd.xlane.f32.xlu1 %v3513_v19  ;;  %v3500_v11 = vmul.f32 %v10101_v49, %v10101_v49 }
 0x59c   : > { %v3419_v30 = vpop.xlane.xlu1 %3418 }
 0x59d   : > { %v10111_v15 = vsub.f32 %v9958_v21, %v3452_v33  ;;  %v3453_v50 = vmul.f32 0.0078125, %v3419_v30  ;;  %3544 = vadd.xlane.f32.xlu0 %v3500_v11  ;;  %v3501_v56 = vmul.f32 %v10106_v34, %v10106_v34  ;;  %v10142_v33 = vld [vmem:[#allocation4 + $0x8] sm:$0xff] }
 0x59e   : > { %v3421_v5 = vpop.xlane.xlu0 %3420  ;;  %5023 = vmatprep.mubr.f32.mxu0 %v10142_v33 }
 0x59f   : > { %v10116_v45 = vsub.f32 %v9965_v58, %v3453_v50  ;;  %v3454_v63 = vmul.f32 0.0078125, %v3421_v5  ;;  %3546 = vadd.xlane.f32.xlu1 %v3501_v56  ;;  %v3516_v2 = vmul.f32 %v10111_v15, %v10111_v15 }
 0x5a0   : > { %v3423_v42 = vpop.xlane.xlu1 %3422 }
 0x5a1   : > { %v10121_v31 = vsub.f32 %v9954_v32, %v3454_v63  ;;  %v3455_v21 = vmul.f32 0.0078125, %v3423_v42  ;;  %3576 = vadd.xlane.f32.xlu0 %v3516_v2  ;;  %v3517_v18 = vmul.f32 %v10116_v45, %v10116_v45 }
 0x5a2   : > { %v3389_v53 = vpop.xlane.xlu0 %3388 }
 0x5a3   : > { %v10126_v20 = vsub.f32 %v9961_v6, %v3455_v21  ;;  %v3438_v58 = vmul.f32 0.0078125, %v3389_v53  ;;  %3578 = vadd.xlane.f32.xlu1 %v3517_v18  ;;  %v3518_v38 = vmul.f32 %v10121_v31, %v10121_v31 }
 0x5a4   : > { %v3391_v27 = vpop.xlane.xlu1 %3390 }
 0x5a5   : > { %v10131_v60 = vsub.f32 %v9894_v35, %v3438_v58  ;;  %v3439_v32 = vmul.f32 0.0078125, %v3391_v27  ;;  %3580 = vadd.xlane.f32.xlu0 %v3518_v38  ;;  %v3519_v62 = vmul.f32 %v10126_v20, %v10126_v20 }
 0x5a7   : > { %v10136_v19 = vsub.f32 %v9901_v24, %v3439_v32  ;;  %3582 = vadd.xlane.f32.xlu1 %v3519_v62  ;;  %v3502_v6 = vmul.f32 %v10131_v60, %v10131_v60  ;;  %v11329_v62 = vsub.s32 5, %v11431_v7 }
 0x5a9   : > { %3548 = vadd.xlane.f32.xlu0 %v3502_v6  ;;  %v3503_v29 = vmul.f32 %v10136_v19, %v10136_v19 }
 0x5ab   : > { %3550 = vadd.xlane.f32.xlu1 %v3503_v29 }
 0x5f1   : > { %v3525_v35 = vpop.xlane.xlu0 %3524 }
 0x5f2   : > { %v3586_v11 = vmul.f32 0.0078125, %v3525_v35 }
 0x5f3   : > { %v3527_v30 = vpop.xlane.xlu1 %3526 }
 0x5f4   : > { %v3618_v50 = vadd.f32 1e-05, %v3586_v11  ;;  %v3587_v56 = vmul.f32 0.0078125, %v3527_v30 }
 0x5f5   : > { %v3521_v24 = vpop.xlane.xlu0 %3520 }
 0x5f6   : > { %7582 = vrsqrt.f32 %v3618_v50  ;;  %v3619_v5 = vadd.f32 1e-05, %v3587_v56  ;;  %v3584_v63 = vmul.f32 0.0078125, %v3521_v24 }
 0x5f7   : > { %v3523_v2 = vpop.xlane.xlu1 %3522 }
 0x5f8   : > { %7584 = vrsqrt.f32 %v3619_v5  ;;  %v3616_v42 = vadd.f32 1e-05, %v3584_v63  ;;  %v3585_v21 = vmul.f32 0.0078125, %v3523_v2  ;;  %v7746_v5 = vld [vmem:[%s8208_s17] sm:$0x7f] }
 0x5f9   : > { %v10149_v63 = vrot.slane %v7746_v5, %v11329_v62 }
 0x5fa   : > { %7586 = vrsqrt.f32 %v3616_v42  ;;  %v3617_v18 = vadd.f32 1e-05, %v3585_v21  ;;  %v3533_v53 = vpop.xlane.xlu0 %3532 }
 0x5fb   : > { %v3590_v58 = vmul.f32 0.0078125, %v3533_v53 }
 0x5fc   : > { %7588 = vrsqrt.f32 %v3617_v18  ;;  %v3535_v38 = vpop.xlane.xlu1 %3534 }
 0x5fd   : > { %v3622_v27 = vadd.f32 1e-05, %v3590_v58  ;;  %v3591_v32 = vmul.f32 0.0078125, %v3535_v38 }
 0x5fe   : > { %v3529_v6 = vpop.xlane.xlu0 %3528 }
 0x5ff   : > { %7590 = vrsqrt.f32 %v3622_v27  ;;  %v3623_v29 = vadd.f32 1e-05, %v3591_v32  ;;  %v3588_v35 = vmul.f32 0.0078125, %v3529_v6 }
 0x600   : > { %v7583_v11 = vpop.eup %7582  ;;  %v3531_v30 = vpop.xlane.xlu1 %3530 }
 0x601   : > { %7592 = vrsqrt.f32 %v3623_v29  ;;  %v3620_v50 = vadd.f32 1e-05, %v3588_v35  ;;  %v3589_v56 = vmul.f32 0.0078125, %v3531_v30  ;;  %v3682_v2 = vmul.f32 %v7583_v11, %v9975_v3 }
 0x602   : > { %v7585_v24 = vpop.eup %7584  ;;  %v3541_v42 = vpop.xlane.xlu0 %3540 }
 0x603   : > { %v3683_v21 = vmul.f32 %v7585_v24, %v9978_v9  ;;  %7594 = vrsqrt.f32 %v3620_v50  ;;  %v3621_v18 = vadd.f32 1e-05, %v3589_v56  ;;  %v3594_v58 = vmul.f32 0.0078125, %v3541_v42  ;;  %v11436_v24 = vld [vmem:[#allocation35_spill] sm:$0xff] }
 0x604   : > { %v7587_v53 = vpop.eup %7586  ;;  %v3543_v38 = vpop.xlane.xlu1 %3542  ;;  %v3718_v35 = vmul.f32 %v10149_v63, %v3682_v2 }
 0x605   : > { %v3719_v27 = vmul.f32 %v10149_v63, %v3683_v21  ;;  %7596 = vrsqrt.f32 %v3621_v18  ;;  %v3595_v32 = vmul.f32 0.0078125, %v3543_v38  ;;  %v3680_v6 = vmul.f32 %v7587_v53, %v9983_v1 }
 0x606   : > { %v7589_v29 = vpop.eup %7588  ;;  %v3626_v30 = vadd.f32 1e-05, %v3594_v58  ;;  %v3537_v5 = vpop.xlane.xlu0 %3536  ;;  %v3754_v53 = vadd.f32 %v11436_v24, %v3718_v35 }
 0x607   : > { %v3627_v3 = vadd.f32 1e-05, %v3595_v32  ;;  %v3592_v11 = vmul.f32 0.0078125, %v3537_v5  ;;  %v3681_v9 = vmul.f32 %v7589_v29, %v9988_v26  ;;  %v3716_v50 = vmul.f32 %v10149_v63, %v3680_v6 }
 0x608   : > { %7598 = vrsqrt.f32 %v3626_v30  ;;  %v3539_v56 = vpop.xlane.xlu1 %3538  ;;  %v3755_v42 = vadd.f32 %v11436_v24, %v3719_v27 }
 0x609   : > { %v7591_v21 = vpop.eup %7590  ;;  %7600 = vrsqrt.f32 %v3627_v3  ;;  %v3624_v18 = vadd.f32 1e-05, %v3592_v11  ;;  %v3593_v38 = vmul.f32 0.0078125, %v3539_v56  ;;  %v3717_v1 = vmul.f32 %v10149_v63, %v3681_v9 }
 0x60a   : > { %v3752_v2 = vadd.f32 %v11436_v24, %v3716_v50  ;;  %v3686_v58 = vmul.f32 %v7591_v21, %v9995_v59  ;;  %v3787_v29 = vmax.f32 %v3755_v42, 0.0  ;;  %v3786_v9 = vmax.f32 %v3754_v53, 0.0 }
 0x60b   : > { %v7593_v32 = vpop.eup %7592  ;;  %7602 = vrsqrt.f32 %v3624_v18  ;;  %v3625_v26 = vadd.f32 1e-05, %v3593_v38  ;;  %v3753_v6 = vadd.f32 %v11436_v24, %v3717_v1 }
 0x60c   : > { %v3687_v27 = vmul.f32 %v7593_v32, %v9998_v17  ;;  %v3784_v5 = vmax.f32 %v3752_v2, 0.0  ;;  %v3722_v11 = vmul.f32 %v10149_v63, %v3686_v58  ;;  %v10170_v21 = vpack.c.bf16 %v3787_v29, %v3786_v9 }
 0x60d   : > { %v7595_v30 = vpop.eup %7594  ;;  %7604 = vrsqrt.f32 %v3625_v26  ;;  %v3785_v3 = vmax.f32 %v3753_v6, 0.0 }
 0x60e   : > { %v3684_v50 = vmul.f32 %v7595_v30, %v10003_v22  ;;  %v3723_v35 = vmul.f32 %v10149_v63, %v3687_v27  ;;  %v3758_v38 = vadd.f32 %v11436_v24, %v3722_v11 }
 0x60f   : > { %v7597_v59 = vpop.eup %7596  ;;  %v10168_v56 = vpack.c.bf16 %v3785_v3, %v3784_v5 }
 0x610   : > { %v3685_v42 = vmul.f32 %v7597_v59, %v10008_v52  ;;  %v3720_v17 = vmul.f32 %v10149_v63, %v3684_v50  ;;  %v3759_v18 = vadd.f32 %v11436_v24, %v3723_v35  ;;  %v3790_v11 = vmax.f32 %v3758_v38, 0.0 }
 0x611   : > { %7051 = vmatprep.mubr.bf16.mxu1 %v10168_v56 }
 0x612   : > { %v7599_v1 = vpop.eup %7598  ;;  %v3557_v2 = vpop.xlane.xlu0 %3556  ;;  %7052 = vmatmul.mubr.bf16.vlgmr.msra.gmra.mrb[80].mxu1 %v10170_v21  ;;  %v3721_v22 = vmul.f32 %v10149_v63, %v3685_v42  ;;  %v3756_v53 = vadd.f32 %v11436_v24, %v3720_v17  ;;  %v3791_v29 = vmax.f32 %v3759_v18, 0.0 }
 0x613   : > { %v7601_v58 = vpop.eup %7600  ;;  %v3602_v32 = vmul.f32 0.0078125, %v3557_v2  ;;  %v3690_v52 = vmul.f32 %v7599_v1, %v10013_v13 }
 0x614   : > { %v3559_v26 = vpop.xlane.xlu1 %3558  ;;  %v3757_v6 = vadd.f32 %v11436_v24, %v3721_v22  ;;  %v3691_v27 = vmul.f32 %v7601_v58, %v10019_v61  ;;  %v3788_v50 = vmax.f32 %v3756_v53, 0.0  ;;  %v10188_v61 = vpack.c.bf16 %v3791_v29, %v3790_v11 }
 0x615   : > { %v7603_v30 = vpop.eup %7602  ;;  %v3634_v5 = vadd.f32 1e-05, %v3602_v32  ;;  %v3603_v3 = vmul.f32 0.0078125, %v3559_v26  ;;  %v3726_v2 = vmul.f32 %v10149_v63, %v3690_v52 }
 0x616   : > { %v3553_v9 = vpop.xlane.xlu0 %3552  ;;  %v3789_v35 = vmax.f32 %v3757_v6, 0.0  ;;  %v3688_v59 = vmul.f32 %v7603_v30, %v10024_v55  ;;  %v3727_v42 = vmul.f32 %v10149_v63, %v3691_v27 }
 0x617   : > { %v7605_v17 = vpop.eup %7604  ;;  %7606 = vrsqrt.f32 %v3634_v5  ;;  %v3635_v13 = vadd.f32 1e-05, %v3603_v3  ;;  %v3600_v1 = vmul.f32 0.0078125, %v3553_v9 }
 0x618   : > { %v3555_v18 = vpop.xlane.xlu1 %3554  ;;  %v10186_v22 = vpack.c.bf16 %v3789_v35, %v3788_v50  ;;  %v3689_v38 = vmul.f32 %v7605_v17, %v10030_v36  ;;  %v3724_v53 = vmul.f32 %v10149_v63, %v3688_v59  ;;  %v3763_v32 = vadd.f32 %v11436_v24, %v3727_v42 }
 0x619   : > { %7608 = vrsqrt.f32 %v3635_v13  ;;  %v3632_v58 = vadd.f32 1e-05, %v3600_v1  ;;  %v3601_v55 = vmul.f32 0.0078125, %v3555_v18  ;;  %v3762_v36 = vadd.f32 %v11436_v24, %v3726_v2 }
 0x61a   : > { %7055 = vmatprep.mubr.bf16.mxu1 %v10186_v22  ;;  %v3565_v26 = vpop.xlane.xlu0 %3564  ;;  %v3725_v6 = vmul.f32 %v10149_v63, %v3689_v38  ;;  %v3760_v52 = vadd.f32 %v11436_v24, %v3724_v53  ;;  %v3795_v9 = vmax.f32 %v3763_v32, 0.0 }
 0x61b   : > { %7610 = vrsqrt.f32 %v3632_v58  ;;  %v3633_v27 = vadd.f32 1e-05, %v3601_v55  ;;  %v3606_v29 = vmul.f32 0.0078125, %v3565_v26  ;;  %7056 = vmatmul.mubr.bf16.gmra.mrb[84].mxu1 %v10188_v61  ;;  %v3794_v13 = vmax.f32 %v3762_v36, 0.0 }
 0x61c   : > { %v3567_v30 = vpop.xlane.xlu1 %3566  ;;  %v3761_v5 = vadd.f32 %v11436_v24, %v3725_v6  ;;  %v3792_v35 = vmax.f32 %v3760_v52, 0.0 }
 0x61d   : > { %7612 = vrsqrt.f32 %v3633_v27  ;;  %v3638_v3 = vadd.f32 1e-05, %v3606_v29  ;;  %v3607_v11 = vmul.f32 0.0078125, %v3567_v30  ;;  %v10201_v58 = vpack.c.bf16 %v3795_v9, %v3794_v13 }
 0x61e   : > { %v3561_v50 = vpop.xlane.xlu0 %3560  ;;  %v3793_v59 = vmax.f32 %v3761_v5, 0.0 }
 0x61f   : > { %7614 = vrsqrt.f32 %v3638_v3  ;;  %v3639_v42 = vadd.f32 1e-05, %v3607_v11  ;;  %v3604_v17 = vmul.f32 0.0078125, %v3561_v50 }
 0x620   : > { %v3563_v1 = vpop.xlane.xlu1 %3562  ;;  %v10199_v18 = vpack.c.bf16 %v3793_v59, %v3792_v35 }
 0x621   : > { %v7607_v38 = vpop.eup %7606  ;;  %7616 = vrsqrt.f32 %v3639_v42  ;;  %v3636_v2 = vadd.f32 1e-05, %v3604_v17  ;;  %v3605_v53 = vmul.f32 0.0078125, %v3563_v1 }
 0x622   : > { %7059 = vmatprep.mubr.bf16.mxu1 %v10199_v18  ;;  %v3573_v55 = vpop.xlane.xlu0 %3572  ;;  %v3698_v52 = vmul.f32 %v7607_v38, %v10039_v12 }
 0x623   : > { %v7609_v32 = vpop.eup %7608  ;;  %7618 = vrsqrt.f32 %v3636_v2  ;;  %v3637_v26 = vadd.f32 1e-05, %v3605_v53  ;;  %v3610_v6 = vmul.f32 0.0078125, %v3573_v55  ;;  %7060 = vmatmul.mubr.bf16.gmra.mrb[88].mxu1 %v10201_v58 }
 0x624   : > { %v3575_v27 = vpop.xlane.xlu1 %3574  ;;  %v3699_v29 = vmul.f32 %v7609_v32, %v10043_v0  ;;  %v3734_v42 = vmul.f32 %v10149_v63, %v3698_v52 }
 0x625   : > { %v7611_v36 = vpop.eup %7610  ;;  %7620 = vrsqrt.f32 %v3637_v26  ;;  %v3642_v30 = vadd.f32 1e-05, %v3610_v6  ;;  %v3611_v5 = vmul.f32 0.0078125, %v3575_v27 }
 0x626   : > { %v3569_v3 = vpop.xlane.xlu0 %3568  ;;  %v3696_v11 = vmul.f32 %v7611_v36, %v10048_v51  ;;  %v3735_v9 = vmul.f32 %v10149_v63, %v3699_v29  ;;  %v3770_v52 = vadd.f32 %v11436_v24, %v3734_v42 }
 0x627   : > { %v7613_v50 = vpop.eup %7612  ;;  %7622 = vrsqrt.f32 %v3642_v30  ;;  %v3643_v35 = vadd.f32 1e-05, %v3611_v5  ;;  %v3608_v59 = vmul.f32 0.0078125, %v3569_v3 }
 0x628   : > { %v3571_v17 = vpop.xlane.xlu1 %3570  ;;  %v3697_v12 = vmul.f32 %v7613_v50, %v10054_v47  ;;  %v3732_v0 = vmul.f32 %v10149_v63, %v3696_v11  ;;  %v3771_v2 = vadd.f32 %v11436_v24, %v3735_v9 }
 0x629   : > { %v7615_v13 = vpop.eup %7614  ;;  %7624 = vrsqrt.f32 %v3643_v35  ;;  %v3640_v1 = vadd.f32 1e-05, %v3608_v59  ;;  %v3609_v38 = vmul.f32 0.0078125, %v3571_v17 }
 0x62a   : > { %v3545_v51 = vpop.xlane.xlu0 %3544  ;;  %v3733_v53 = vmul.f32 %v10149_v63, %v3697_v12  ;;  %v3768_v55 = vadd.f32 %v11436_v24, %v3732_v0  ;;  %v3702_v29 = vmul.f32 %v7615_v13, %v10059_v4  ;;  %v3803_v11 = vmax.f32 %v3771_v2, 0.0 }
 0x62b   : > { %v7617_v32 = vpop.eup %7616  ;;  %7626 = vrsqrt.f32 %v3640_v1  ;;  %v3641_v26 = vadd.f32 1e-05, %v3609_v38  ;;  %v3596_v6 = vmul.f32 0.0078125, %v3545_v51  ;;  %v3802_v1 = vmax.f32 %v3770_v52, 0.0 }
 0x62c   : > { %v3547_v47 = vpop.xlane.xlu1 %3546  ;;  %v3769_v27 = vadd.f32 %v11436_v24, %v3733_v53  ;;  %v3703_v36 = vmul.f32 %v7617_v32, %v10065_v39  ;;  %v3800_v50 = vmax.f32 %v3768_v55, 0.0  ;;  %v3738_v2 = vmul.f32 %v10149_v63, %v3702_v29 }
 0x62d   : > { %v7619_v30 = vpop.eup %7618  ;;  %7628 = vrsqrt.f32 %v3641_v26  ;;  %v3628_v5 = vadd.f32 1e-05, %v3596_v6  ;;  %v3597_v3 = vmul.f32 0.0078125, %v3547_v47  ;;  %v10228_v26 = vpack.c.bf16 %v3803_v11, %v3802_v1 }
 0x62e   : > { %v3577_v9 = vpop.xlane.xlu0 %3576  ;;  %v3801_v35 = vmax.f32 %v3769_v27, 0.0  ;;  %v3700_v59 = vmul.f32 %v7619_v30, %v10070_v10  ;;  %v3739_v17 = vmul.f32 %v10149_v63, %v3703_v36 }
 0x62f   : > { %v7621_v42 = vpop.eup %7620  ;;  %7630 = vrsqrt.f32 %v3628_v5  ;;  %v3629_v12 = vadd.f32 1e-05, %v3597_v3  ;;  %v3612_v0 = vmul.f32 0.0078125, %v3577_v9  ;;  %v3774_v5 = vadd.f32 %v11436_v24, %v3738_v2 }
 0x630   : > { %v3579_v4 = vpop.xlane.xlu1 %3578  ;;  %v10221_v13 = vpack.c.bf16 %v3801_v35, %v3800_v50  ;;  %v3701_v39 = vmul.f32 %v7621_v42, %v10076_v14  ;;  %v3736_v38 = vmul.f32 %v10149_v63, %v3700_v59  ;;  %v3775_v55 = vadd.f32 %v11436_v24, %v3739_v17 }
 0x631   : > { %v7623_v51 = vpop.eup %7622  ;;  %7632 = vrsqrt.f32 %v3629_v12  ;;  %v3644_v53 = vadd.f32 1e-05, %v3612_v0  ;;  %v3613_v10 = vmul.f32 0.0078125, %v3579_v4 }
 0x632   : > { %7220 = vmatprep.subr.bf16.mxu0 %v10221_v13  ;;  %v3581_v32 = vpop.xlane.xlu0 %3580  ;;  %v3737_v6 = vmul.f32 %v10149_v63, %v3701_v39  ;;  %v3772_v52 = vadd.f32 %v11436_v24, %v3736_v38  ;;  %v3706_v29 = vmul.f32 %v7623_v51, %v10081_v25  ;;  %v3807_v35 = vmax.f32 %v3775_v55, 0.0 }
 0x633   : > { %v7625_v14 = vpop.eup %7624  ;;  %7634 = vrsqrt.f32 %v3644_v53  ;;  %v3645_v47 = vadd.f32 1e-05, %v3613_v10  ;;  %v3614_v27 = vmul.f32 0.0078125, %v3581_v32  ;;  %7222 = vmatpush3.bf16.msra.mxu0 %v10168_v56  ;;  %v3806_v38 = vmax.f32 %v3774_v5, 0.0 }
 0x634   : > { %v3583_v36 = vpop.xlane.xlu1 %3582  ;;  %7224 = vmatprep.subr.bf16.mxu0 %v10228_v26  ;;  %v3773_v30 = vadd.f32 %v11436_v24, %v3737_v6  ;;  %v3707_v3 = vmul.f32 %v7625_v14, %v10086_v48  ;;  %v3804_v17 = vmax.f32 %v3772_v52, 0.0  ;;  %v3742_v48 = vmul.f32 %v10149_v63, %v3706_v29 }
 0x635   : > { %v7627_v11 = vpop.eup %7626  ;;  %7636 = vrsqrt.f32 %v3645_v47  ;;  %v3646_v9 = vadd.f32 1e-05, %v3614_v27  ;;  %v3615_v50 = vmul.f32 0.0078125, %v3583_v36  ;;  %v10248_v32 = vpack.c.bf16 %v3807_v35, %v3806_v38 }
 0x636   : > { %v3549_v59 = vpop.xlane.xlu0 %3548  ;;  %v3805_v42 = vmax.f32 %v3773_v30, 0.0  ;;  %v3704_v56 = vmul.f32 %v7627_v11, %v10091_v8  ;;  %v3743_v25 = vmul.f32 %v10149_v63, %v3707_v3  ;;  %v3778_v47 = vadd.f32 %v11436_v24, %v3742_v48 }
 0x637   : > { %v7629_v12 = vpop.eup %7628  ;;  %7638 = vrsqrt.f32 %v3646_v9  ;;  %v3647_v0 = vadd.f32 1e-05, %v3615_v50  ;;  %v3598_v1 = vmul.f32 0.0078125, %v3549_v59  ;;  %7226 = vmatpush3.bf16.msra.mxu0 %v10170_v21 }
 0x638   : > { %v3551_v4 = vpop.xlane.xlu1 %3550  ;;  %v10242_v39 = vpack.c.bf16 %v3805_v42, %v3804_v17  ;;  %v3705_v2 = vmul.f32 %v7629_v12, %v10096_v57  ;;  %v3740_v51 = vmul.f32 %v10149_v63, %v3704_v56  ;;  %v3779_v55 = vadd.f32 %v11436_v24, %v3743_v25 }
 0x639   : > { %v7631_v53 = vpop.eup %7630  ;;  %7640 = vrsqrt.f32 %v3647_v0  ;;  %v3630_v8 = vadd.f32 1e-05, %v3598_v1  ;;  %v3599_v10 = vmul.f32 0.0078125, %v3551_v4  ;;  %v3810_v50 = vmax.f32 %v3778_v47, 0.0 }
 0x63a   : > { %7228 = vmatprep.subr.bf16.mxu0 %v10242_v39  ;;  %v3741_v21 = vmul.f32 %v10149_v63, %v3705_v2  ;;  %v3776_v6 = vadd.f32 %v11436_v24, %v3740_v51  ;;  %v3692_v52 = vmul.f32 %v7631_v53, %v10101_v49  ;;  %v3811_v30 = vmax.f32 %v3779_v55, 0.0 }
 0x63b   : > { %v7633_v14 = vpop.eup %7632  ;;  %7642 = vrsqrt.f32 %v3630_v8  ;;  %v3631_v57 = vadd.f32 1e-05, %v3599_v10  ;;  %7230 = vmatpush3.bf16.msra.mxu0 %v10186_v22 }
 0x63c   : > { %7232 = vmatprep.subr.bf16.mxu0 %v10248_v32  ;;  %v3777_v27 = vadd.f32 %v11436_v24, %v3741_v21  ;;  %v3693_v29 = vmul.f32 %v7633_v14, %v10106_v34  ;;  %v3728_v5 = vmul.f32 %v10149_v63, %v3692_v52  ;;  %v3808_v3 = vmax.f32 %v3776_v6, 0.0 }
 0x63d   : > { %v7635_v36 = vpop.eup %7634  ;;  %7644 = vrsqrt.f32 %v3631_v57  ;;  %v10268_v25 = vpack.c.bf16 %v3811_v30, %v3810_v50  ;;  %v4956_v50 = vld [vmem:[#allocation4 + $0x68] sm:$0xff] }
 0x63e   : > { %v3809_v49 = vmax.f32 %v3777_v27, 0.0  ;;  %v3729_v11 = vmul.f32 %v10149_v63, %v3693_v29  ;;  %v3708_v9 = vmul.f32 %v7635_v36, %v10111_v15  ;;  %v3764_v35 = vadd.f32 %v11436_v24, %v3728_v5  ;;  %v4946_v5 = vld [vmem:[#allocation4 + $0x18] sm:$0xff] }
 0x63f   : > { %v7637_v22 = vpop.eup %7636  ;;  %7234 = vmatpush3.bf16.msra.mxu0 %v10188_v61 }
 0x640   : > { %v10263_v59 = vpack.c.bf16 %v3809_v49, %v3808_v3  ;;  %v3765_v34 = vadd.f32 %v11436_v24, %v3729_v11  ;;  %v3709_v17 = vmul.f32 %v7637_v22, %v10116_v45  ;;  %v3744_v42 = vmul.f32 %v10149_v63, %v3708_v9  ;;  %v4945_v3 = vld [vmem:[#allocation4 + $0x10] sm:$0xff]  ;;  %v4947_v49 = vld [vmem:[#allocation4 + $0x20] sm:$0xff]  ;;  %v4952_v9 = vld [vmem:[#allocation4 + $0x48] sm:$0xff] }
 0x641   : > { %v7639_v56 = vpop.eup %7638  ;;  %v3796_v12 = vmax.f32 %v3764_v35, 0.0  ;;  %v4949_v11 = vld [vmem:[#allocation4 + $0x30] sm:$0xff]  ;;  %v4954_v22 = vld [vmem:[#allocation4 + $0x58] sm:$0xff] }
 0x642   : > { %7236 = vmatprep.subr.bf16.mxu0 %v10263_v59  ;;  %v3797_v15 = vmax.f32 %v3765_v34, 0.0  ;;  %v3745_v61 = vmul.f32 %v10149_v63, %v3709_v17  ;;  %v3780_v0 = vadd.f32 %v11436_v24, %v3744_v42  ;;  %v3710_v1 = vmul.f32 %v7639_v56, %v10121_v31  ;;  %v4958_v35 = vld [vmem:[#allocation4 + $0x78] sm:$0xff]  ;;  %v7431_v34 = vld [vmem:[%s8198_s21 + $0x8] sm:$0xff]   ;;  %v7432_v17 = vld [vmem:[%s8198_s21 + $0x10] sm:$0xff]  }
 0x643   : > { %v7641_v48 = vpop.eup %7640  ;;  %7238 = vmatpush3.bf16.msra.mxu0 %v10199_v18  ;;  %v7433_v42 = vld [vmem:[%s8198_s21 + $0x18] sm:$0xff]   ;;  %v7434_v56 = vld [vmem:[%s8198_s21 + $0x20] sm:$0xff]  }
 0x644   : > { %7240 = vmatprep.subr.bf16.mxu0 %v10268_v25  ;;  %v3822_v45 = vpack.c.bf16 %v3797_v15, %v3796_v12  ;;  %v3781_v4 = vadd.f32 %v11436_v24, %v3745_v61  ;;  %v3711_v38 = vmul.f32 %v7641_v48, %v10126_v20  ;;  %v3746_v51 = vmul.f32 %v10149_v63, %v3710_v1  ;;  %v7437_v12 = vld [vmem:[%s8198_s21 + $0x38] sm:$0xff]   ;;  %v10305_v15 = vld [vmem:[%s8193_s16] sm:$0xff]  }
 0x645   : > { %v7643_v2 = vpop.eup %7642  ;;  %v3812_v53 = vmax.f32 %v3780_v0, 0.0  ;;  %v10309_v61 = vld [vmem:[%s8213_s18] sm:$0x1f] }
 0x646   : > { %7063 = vmatprep.mubr.bf16.mxu1 %v3822_v45  ;;  %v3813_v8 = vmax.f32 %v3781_v4, 0.0  ;;  %v3747_v10 = vmul.f32 %v10149_v63, %v3711_v38  ;;  %v3694_v31 = vmul.f32 %v7643_v2, %v10131_v60  ;;  %v3782_v18 = vadd.f32 %v11436_v24, %v3746_v51 }
 0x647   : > { %v7645_v55 = vpop.eup %7644  ;;  %7242 = vmatpush3.bf16.msra.mxu0 %v10201_v58  ;;  %v10313_v0 = vrot.slane %v10309_v61, %v9087_v16 }
 0x648   : > { %v3830_v21 = vpack.c.bf16 %v3813_v8, %v3812_v53  ;;  %v3783_v6 = vadd.f32 %v11436_v24, %v3747_v10  ;;  %v3695_v20 = vmul.f32 %v7645_v55, %v10136_v19  ;;  %v3730_v52 = vmul.f32 %v10149_v63, %v3694_v31  ;;  %v4943_v19 = vld [vmem:[#allocation4] sm:$0xff] }
 0x649   : > { %v3814_v14 = vmax.f32 %v3782_v18, 0.0 }
 0x64a   : > { %7244 = vmatprep.subr.bf16.mxu0 %v3830_v21  ;;  %v3815_v57 = vmax.f32 %v3783_v6, 0.0  ;;  %v3731_v47 = vmul.f32 %v10149_v63, %v3695_v20  ;;  %v3766_v27 = vadd.f32 %v11436_v24, %v3730_v52  ;;  %v4948_v63 = vld [vmem:[#allocation4 + $0x28] sm:$0xff] }
 0x64b   : > { %7246 = vmatpush3.bf16.msra.mxu0 %v3822_v45 }
 0x64c   : > { %v3831_v60 = vpack.c.bf16 %v3815_v57, %v3814_v14  ;;  %v3767_v58 = vadd.f32 %v11436_v24, %v3731_v47  ;;  %v3798_v29 = vmax.f32 %v3766_v27, 0.0  ;;  %v4950_v24 = vld [vmem:[#allocation4 + $0x38] sm:$0xff] }
 0x64e   : > { %7248 = vmatprep.subr.bf16.mxu0 %v3831_v60  ;;  %v3799_v36 = vmax.f32 %v3767_v58, 0.0 }
 0x650   : > { %v3823_v30 = vpack.c.bf16 %v3799_v36, %v3798_v29 }
 0x652   : > { %7064 = vmatmul.mubr.bf16.gmra.mrb[92].mxu1 %v3823_v30  ;;  %7250 = vmatpush3.bf16.msra.mxu0 %v3823_v30 }
 0x653   : > { %7067 = vmatprep.mubr.bf16.mxu1 %v10221_v13  ;;  %v4951_v13 = vld [vmem:[#allocation4 + $0x40] sm:$0xff] }
 0x655   : > { %5024 = vmatmul.mubr.f32.vlgmr.msra.gmra.mrb[64].mxu0 %v4943_v19 }
 0x656   : > { %5028 = vmatprep.mubr.f32.mxu0 %v4946_v5 }
 0x659   : > { %5029 = vmatmul.mubr.f32.gmra.mrb[66].mxu0 %v4945_v3 }
 0x65a   : > { %7068 = vmatmul.mubr.bf16.gmra.mrb[96].mxu1 %v10228_v26  ;;  %5033 = vmatprep.mubr.f32.mxu0 %v4948_v63  ;;  %v4953_v26 = vld [vmem:[#allocation4 + $0x50] sm:$0xff] }
 0x65b   : > { %7071 = vmatprep.mubr.bf16.mxu1 %v10242_v39  ;;  %v4955_v39 = vld [vmem:[#allocation4 + $0x60] sm:$0xff] }
 0x65d   : > { %5034 = vmatmul.mubr.f32.gmra.mrb[68].mxu0 %v4947_v49 }
 0x65e   : > { %5038 = vmatprep.mubr.f32.mxu0 %v4950_v24 }
 0x661   : > { %5039 = vmatmul.mubr.f32.gmra.mrb[70].mxu0 %v4949_v11 }
 0x662   : > { %7072 = vmatmul.mubr.bf16.gmra.mrb[100].mxu1 %v10248_v32  ;;  %5043 = vmatprep.mubr.f32.mxu0 %v4952_v9  ;;  %v4957_v32 = vld [vmem:[#allocation4 + $0x70] sm:$0xff] }
 0x663   : > { %7075 = vmatprep.mubr.bf16.mxu1 %v10263_v59  ;;  %v7430_v59 = vld [vmem:[%s8198_s21] sm:$0xff]  }
 0x664   : > { %7083 = vmatprep.subr.bf16.mxu0 %v7430_v59 }
 0x665   : > { %5044 = vmatmul.mubr.f32.gmra.mrb[72].mxu0 %v4951_v13 }
 0x666   : > { %5048 = vmatprep.mubr.f32.mxu0 %v4954_v22  ;;  %7084 = vmatpush3.bf16.msra.mxu0 %v7430_v59 }
 0x667   : > { %7085 = vmatprep.subr.bf16.mxu0 %v7431_v34 }
 0x669   : > { %5049 = vmatmul.mubr.f32.gmra.mrb[74].mxu0 %v4953_v26 }
 0x66a   : > { %7076 = vmatmul.mubr.bf16.gmra.mrb[104].mxu1 %v10268_v25  ;;  %5053 = vmatprep.mubr.f32.mxu0 %v4956_v50  ;;  %v7436_v25 = vld [vmem:[%s8198_s21 + $0x30] sm:$0xff]  }
 0x66b   : > { %7079 = vmatprep.mubr.bf16.mxu1 %v3830_v21  ;;  %7086 = vmatpush3.bf16.msra.mxu0 %v7431_v34 }
 0x66c   : > { %7087 = vmatprep.subr.bf16.mxu0 %v7432_v17 }
 0x66d   : > { %5054 = vmatmul.mubr.f32.gmra.mrb[76].mxu0 %v4955_v39 }
 0x66e   : > { %5058 = vmatprep.mubr.f32.mxu0 %v4958_v35 }
 0x66f   : > { %7088 = vmatpush3.bf16.msra.mxu0 %v7432_v17 }
 0x670   : > { %7089 = vmatprep.subr.bf16.mxu0 %v7433_v42 }
 0x671   : > { %5059 = vmatmul.mubr.f32.gmra.mrb[78].mxu0 %v4957_v32 }
 0x672   : > { %7080 = vmatmul.mubr.bf16.gmra.mrb[108].mxu1 %v3831_v60 }
 0x673   : > { %5128 = vmatprep.mubr.f32.mxu1 %v10142_v33  ;;  %7090 = vmatpush3.bf16.msra.mxu0 %v7433_v42  ;;  %v7435_v33 = vld [vmem:[%s8198_s21 + $0x28] sm:$0xff]   ;;  %s11471_s21 = sld [smem:[#allocation68_spill]] }
 0x674   : > { %7091 = vmatprep.subr.bf16.mxu0 %v7434_v56 }
 0x677   : > { %7092 = vmatpush3.bf16.msra.mxu0 %v7434_v56 }
 0x678   : > { %7093 = vmatprep.subr.bf16.mxu0 %v7435_v33 }
 0x67b   : > { %7094 = vmatpush3.bf16.msra.mxu0 %v7435_v33 }
 0x67c   : > { %7095 = vmatprep.subr.bf16.mxu0 %v7436_v25 }
 0x67f   : > { %7096 = vmatpush3.bf16.msra.mxu0 %v7436_v25 }
 0x680   : > { %7097 = vmatprep.subr.bf16.mxu0 %v7437_v12 }
 0x683   : > { %7098 = vmatpush3.bf16.msra.mxu0 %v7437_v12 }
 0x684   : > { %7107 = vmatprep.subr.bf16.mxu0 %v10305_v15 }
 0x6e5   : > { %v7053_v1 = vpop.f32.mrb[80].mxu1 }
 0x6e6   : > { %v10316_v48 = vadd.f32 %v7053_v1, %v10313_v0  ;;  %v3934_v45 = vpop.f32.mrb[81].mxu1 }
 0x6e7   : > { %v7054_v4 = vpop.f32.mrb[82].mxu1  ;;  %v10319_v38 = vadd.f32 %v3934_v45, %v10313_v0 }
 0x6e8   : > { %v10322_v2 = vadd.f32 %v7054_v4, %v10313_v0  ;;  %v3937_v51 = vpop.f32.mrb[83].mxu1  ;;  %v4068_v53 = vsel %vm4061_vm7, %v10316_v48, 0.0 }
 0x6e9   : > { %4069 = vadd.xlane.f32.xlu0 %v4068_v53  ;;  %v10327_v8 = vadd.f32 %v3937_v51, %v10313_v0  ;;  %v4062_v31 = vsel %vm4061_vm7, %v10319_v38, 0.0 }
 0x6ea   : > { %v4071_v10 = vsel %vm4061_vm7, %v10322_v2, 0.0 }
 0x6eb   : > { %4072 = vadd.xlane.f32.xlu1 %v4071_v10  ;;  %v4065_v18 = vsel %vm4061_vm7, %v10327_v8, 0.0 }
 0x6ed   : > { %4063 = vadd.xlane.f32.xlu0 %v4062_v31 }
 0x6ee   : > { %v7057_v55 = vpop.f32.mrb[84].mxu1 }
 0x6ef   : > { %v10336_v21 = vadd.f32 %v7057_v55, %v10313_v0  ;;  %v3950_v6 = vpop.f32.mrb[85].mxu1  ;;  %4066 = vadd.xlane.f32.xlu1 %v4065_v18 }
 0x6f0   : > { %v7058_v20 = vpop.f32.mrb[86].mxu1  ;;  %v10339_v52 = vadd.f32 %v3950_v6, %v10313_v0 }
 0x6f1   : > { %v10342_v14 = vadd.f32 %v7058_v20, %v10313_v0  ;;  %v3953_v57 = vpop.f32.mrb[87].mxu1  ;;  %v4080_v47 = vsel %vm4061_vm7, %v10336_v21, 0.0 }
 0x6f2   : > { %4081 = vadd.xlane.f32.xlu0 %v4080_v47  ;;  %v10347_v27 = vadd.f32 %v3953_v57, %v10313_v0  ;;  %v4074_v58 = vsel %vm4061_vm7, %v10339_v52, 0.0 }
 0x6f3   : > { %v4083_v60 = vsel %vm4061_vm7, %v10342_v14, 0.0 }
 0x6f4   : > { %4084 = vadd.xlane.f32.xlu1 %v4083_v60  ;;  %v4077_v19 = vsel %vm4061_vm7, %v10347_v27, 0.0 }
 0x6f6   : > { %4075 = vadd.xlane.f32.xlu0 %v4074_v58  ;;  %v7061_v29 = vpop.f32.mrb[88].mxu1 }
 0x6f7   : > { %v10354_v36 = vadd.f32 %v7061_v29, %v10313_v0  ;;  %v3966_v30 = vpop.f32.mrb[89].mxu1 }
 0x6f8   : > { %4078 = vadd.xlane.f32.xlu1 %v4077_v19  ;;  %v7062_v5 = vpop.f32.mrb[90].mxu1  ;;  %v10359_v3 = vadd.f32 %v3966_v30, %v10313_v0 }
 0x6f9   : > { %v10362_v63 = vadd.f32 %v7062_v5, %v10313_v0  ;;  %v3969_v49 = vpop.f32.mrb[91].mxu1  ;;  %v4092_v24 = vsel %vm4061_vm7, %v10354_v36, 0.0 }
 0x6fa   : > { %4093 = vadd.xlane.f32.xlu0 %v4092_v24  ;;  %v10367_v11 = vadd.f32 %v3969_v49, %v10313_v0  ;;  %v4086_v13 = vsel %vm4061_vm7, %v10359_v3, 0.0 }
 0x6fb   : > { %v4095_v9 = vsel %vm4061_vm7, %v10362_v63, 0.0 }
 0x6fc   : > { %4096 = vadd.xlane.f32.xlu1 %v4095_v9  ;;  %v4089_v22 = vsel %vm4061_vm7, %v10367_v11, 0.0 }
 0x6fe   : > { %4087 = vadd.xlane.f32.xlu0 %v4086_v13 }
 0x700   : > { %4090 = vadd.xlane.f32.xlu1 %v4089_v22 }
 0x725   : > { %v7065_v26 = vpop.f32.mrb[92].mxu1 }
 0x726   : > { %v10376_v50 = vadd.f32 %v7065_v26, %v10313_v0  ;;  %v3982_v39 = vpop.f32.mrb[93].mxu1 }
 0x727   : > { %v7066_v35 = vpop.f32.mrb[94].mxu1  ;;  %v10379_v32 = vadd.f32 %v3982_v39, %v10313_v0 }
 0x728   : > { %v10382_v59 = vadd.f32 %v7066_v35, %v10313_v0  ;;  %v3985_v34 = vpop.f32.mrb[95].mxu1  ;;  %v4104_v17 = vsel %vm4061_vm7, %v10376_v50, 0.0  ;;  %v6567_v42 = vpop.f32.mrb[64].mxu0 }
 0x729   : > { %4105 = vadd.xlane.f32.xlu0 %v4104_v17  ;;  %v6568_v56 = vpop.f32.mrb[65].mxu0  ;;  %v10387_v33 = vadd.f32 %v3985_v34, %v10313_v0  ;;  %v4098_v1 = vsel %vm4061_vm7, %v10379_v32, 0.0 }
 0x72a   : > { %v4107_v25 = vsel %vm4061_vm7, %v10382_v59, 0.0  ;;  %v6569_v12 = vadd.f32 %v6568_v56, %v6567_v42 }
 0x72b   : > { %4108 = vadd.xlane.f32.xlu1 %v4107_v25  ;;  %v4101_v31 = vsel %vm4061_vm7, %v10387_v33, 0.0 }
 0x72c   : > { %v6570_v45 = vpop.f32.mrb[66].mxu0 }
 0x72d   : > { %v7069_v4 = vpop.f32.mrb[96].mxu1  ;;  %4099 = vadd.xlane.f32.xlu0 %v4098_v1  ;;  %v6571_v51 = vpop.f32.mrb[67].mxu0  ;;  %v7439_v1 = vld [vmem:[%s8193_s16 + $0x8] sm:$0xff]  }
 0x72e   : > { %v10394_v53 = vadd.f32 %v7069_v4, %v10313_v0  ;;  %v3998_v10 = vpop.f32.mrb[97].mxu1  ;;  %v6572_v55 = vadd.f32 %v6571_v51, %v6570_v45 }
 0x72f   : > { %v7070_v18 = vpop.f32.mrb[98].mxu1  ;;  %4102 = vadd.xlane.f32.xlu1 %v4101_v31  ;;  %v10399_v6 = vadd.f32 %v3998_v10, %v10313_v0 }
 0x730   : > { %v10402_v20 = vadd.f32 %v7070_v18, %v10313_v0  ;;  %v4001_v57 = vpop.f32.mrb[99].mxu1  ;;  %v5241_v47 = vpack.c.bf16 %v6572_v55, %v6569_v12  ;;  %v4116_v60 = vsel %vm4061_vm7, %v10394_v53, 0.0  ;;  %v6573_v58 = vpop.f32.mrb[68].mxu0  ;;  %v7440_v18 = vld [vmem:[%s8193_s16 + $0x10] sm:$0xff]  }
 0x731   : > { %4117 = vadd.xlane.f32.xlu0 %v4116_v60  ;;  %v6574_v29 = vpop.f32.mrb[69].mxu0  ;;  %v10407_v30 = vadd.f32 %v4001_v57, %v10313_v0  ;;  %v4110_v24 = vsel %vm4061_vm7, %v10399_v6, 0.0 }
 0x732   : > { %v6575_v19 = vadd.f32 %v6574_v29, %v6573_v58  ;;  %v4119_v5 = vsel %vm4061_vm7, %v10402_v20, 0.0  ;;  %7099 = vmatprep.mubr.bf16.mxu0 %v5241_v47 }
 0x733   : > { %4120 = vadd.xlane.f32.xlu1 %v4119_v5  ;;  %v4113_v35 = vsel %vm4061_vm7, %v10407_v30, 0.0 }
 0x734   : > { %v6576_v49 = vpop.f32.mrb[70].mxu0 }
 0x735   : > { %v7073_v9 = vpop.f32.mrb[100].mxu1  ;;  %v6577_v13 = vpop.f32.mrb[71].mxu0  ;;  %4111 = vadd.xlane.f32.xlu0 %v4110_v24 }
 0x736   : > { %v10414_v22 = vadd.f32 %v7073_v9, %v10313_v0  ;;  %v6578_v26 = vadd.f32 %v6577_v13, %v6576_v49  ;;  %v4014_v39 = vpop.f32.mrb[101].mxu1 }
 0x737   : > { %v7074_v34 = vpop.f32.mrb[102].mxu1  ;;  %4114 = vadd.xlane.f32.xlu1 %v4113_v35  ;;  %v10419_v42 = vadd.f32 %v4014_v39, %v10313_v0 }
 0x738   : > { %v5242_v17 = vpack.c.bf16 %v6578_v26, %v6575_v19  ;;  %v10422_v56 = vadd.f32 %v7074_v34, %v10313_v0  ;;  %v4017_v25 = vpop.f32.mrb[103].mxu1  ;;  %v4128_v12 = vsel %vm4061_vm7, %v10414_v22, 0.0  ;;  %v6579_v45 = vpop.f32.mrb[72].mxu0  ;;  %v7441_v26 = vld [vmem:[%s8193_s16 + $0x18] sm:$0xff]  }
 0x739   : > { %4129 = vadd.xlane.f32.xlu0 %v4128_v12  ;;  %v6580_v4 = vpop.f32.mrb[73].mxu0  ;;  %v10428_v51 = vadd.f32 %v4017_v25, %v10313_v0  ;;  %v4122_v55 = vsel %vm4061_vm7, %v10419_v42, 0.0 }
 0x73a   : > { %7100 = vmatmul.mubr.bf16.vlgmr.msra.gmra.mrb[80].mxu0 %v5242_v17  ;;  %v4131_v10 = vsel %vm4061_vm7, %v10422_v56, 0.0  ;;  %v6581_v31 = vadd.f32 %v6580_v4, %v6579_v45  ;;  %v7442_v45 = vld [vmem:[%s8193_s16 + $0x20] sm:$0xff]  }
 0x73b   : > { %7108 = vmatpush3.bf16.msra.mxu0 %v10305_v15  ;;  %4132 = vadd.xlane.f32.xlu1 %v4131_v10  ;;  %v4125_v19 = vsel %vm4061_vm7, %v10428_v51, 0.0 }
 0x73c   : > { %7109 = vmatprep.subr.bf16.mxu0 %v7439_v1  ;;  %v6582_v57 = vpop.f32.mrb[74].mxu0 }
 0x73d   : > { %v7077_v47 = vpop.f32.mrb[104].mxu1  ;;  %4123 = vadd.xlane.f32.xlu0 %v4122_v55  ;;  %v6583_v60 = vpop.f32.mrb[75].mxu0 }
 0x73e   : > { %v10437_v58 = vadd.f32 %v7077_v47, %v10313_v0  ;;  %v4030_v29 = vpop.f32.mrb[105].mxu1  ;;  %v6584_v5 = vadd.f32 %v6583_v60, %v6582_v57 }
 0x73f   : > { %7110 = vmatpush3.bf16.msra.mxu0 %v7439_v1  ;;  %v7078_v15 = vpop.f32.mrb[106].mxu1  ;;  %4126 = vadd.xlane.f32.xlu1 %v4125_v19  ;;  %v10442_v49 = vadd.f32 %v4030_v29, %v10313_v0 }
 0x740   : > { %v10445_v24 = vadd.f32 %v7078_v15, %v10313_v0  ;;  %v4033_v9 = vpop.f32.mrb[107].mxu1  ;;  %7111 = vmatprep.subr.bf16.mxu0 %v7440_v18  ;;  %v4140_v13 = vsel %vm4061_vm7, %v10437_v58, 0.0  ;;  %v5243_v39 = vpack.c.bf16 %v6584_v5, %v6581_v31  ;;  %v6585_v35 = vpop.f32.mrb[76].mxu0 }
 0x741   : > { %4141 = vadd.xlane.f32.xlu0 %v4140_v13  ;;  %v6586_v34 = vpop.f32.mrb[77].mxu0  ;;  %v10451_v17 = vadd.f32 %v4033_v9, %v10313_v0  ;;  %v4134_v1 = vsel %vm4061_vm7, %v10442_v49, 0.0  ;;  %v7443_v13 = vld [vmem:[%s8193_s16 + $0x28] sm:$0xff]  }
 0x742   : > { %v4143_v25 = vsel %vm4061_vm7, %v10445_v24, 0.0  ;;  %v6587_v12 = vadd.f32 %v6586_v34, %v6585_v35  ;;  %7103 = vmatprep.mubr.bf16.mxu0 %v5243_v39  ;;  %v7444_v34 = vld [vmem:[%s8193_s16 + $0x30] sm:$0xff]  }
 0x743   : > { %7112 = vmatpush3.bf16.msra.mxu0 %v7440_v18  ;;  %4144 = vadd.xlane.f32.xlu1 %v4143_v25  ;;  %v4137_v47 = vsel %vm4061_vm7, %v10451_v17, 0.0  ;;  %v11437_v25 = vld [vmem:[#allocation12_spill] sm:$0xff] }
 0x744   : > { %7113 = vmatprep.subr.bf16.mxu0 %v7441_v26  ;;  %v6588_v4 = vpop.f32.mrb[78].mxu0 }
 0x745   : > { %v7081_v10 = vpop.f32.mrb[108].mxu1  ;;  %4135 = vadd.xlane.f32.xlu0 %v4134_v1  ;;  %v6589_v31 = vpop.f32.mrb[79].mxu0  ;;  %v11438_v1 = vld [vmem:[#allocation13_spill] sm:$0xff] }
 0x746   : > { %v10459_v55 = vadd.f32 %v7081_v10, %v10313_v0  ;;  %v4046_v57 = vpop.f32.mrb[109].mxu1  ;;  %v6590_v60 = vadd.f32 %v6589_v31, %v6588_v4  ;;  %v11440_v4 = vld [vmem:[#allocation15_spill] sm:$0xff] }
 0x747   : > { %7114 = vmatpush3.bf16.msra.mxu0 %v7441_v26  ;;  %v7082_v18 = vpop.f32.mrb[110].mxu1  ;;  %4138 = vadd.xlane.f32.xlu1 %v4137_v47  ;;  %v10464_v29 = vadd.f32 %v4046_v57, %v10313_v0 }
 0x748   : > { %v10467_v19 = vadd.f32 %v7082_v18, %v10313_v0  ;;  %v4049_v5 = vpop.f32.mrb[111].mxu1  ;;  %7115 = vmatprep.subr.bf16.mxu0 %v7442_v45  ;;  %v4152_v15 = vsel %vm4061_vm7, %v10459_v55, 0.0  ;;  %v5244_v9 = vpack.c.bf16 %v6590_v60, %v6587_v12 }
 0x749   : > { %4153 = vadd.xlane.f32.xlu0 %v4152_v15  ;;  %v10473_v26 = vadd.f32 %v4049_v5, %v10313_v0  ;;  %v4146_v35 = vsel %vm4061_vm7, %v10464_v29, 0.0  ;;  %v7445_v0 = vld [vmem:[%s8193_s16 + $0x38] sm:$0xff]  }
 0x74a   : > { %v4155_v39 = vsel %vm4061_vm7, %v10467_v19, 0.0  ;;  %7104 = vmatmul.mubr.bf16.gmra.mrb[84].mxu0 %v5244_v9 }
 0x74b   : > { %7116 = vmatpush3.bf16.msra.mxu0 %v7442_v45  ;;  %4156 = vadd.xlane.f32.xlu1 %v4155_v39  ;;  %v4149_v12 = vsel %vm4061_vm7, %v10473_v26, 0.0  ;;  %v11439_v45 = vld [vmem:[#allocation14_spill] sm:$0xff] }
 0x74c   : > { %7117 = vmatprep.subr.bf16.mxu0 %v7443_v13  ;;  %7123 = vmatprep.mubr.bf16.mxu0 %v11437_v25 }
 0x74d   : > { %4147 = vadd.xlane.f32.xlu0 %v4146_v35 }
 0x74f   : > { %7118 = vmatpush3.bf16.msra.mxu0 %v7443_v13  ;;  %4150 = vadd.xlane.f32.xlu1 %v4149_v12 }
 0x750   : > { %7119 = vmatprep.subr.bf16.mxu0 %v7444_v34 }
 0x753   : > { %7120 = vmatpush3.bf16.msra.mxu0 %v7444_v34 }
 0x754   : > { %7121 = vmatprep.subr.bf16.mxu0 %v7445_v0 }
 0x757   : > { %7122 = vmatpush3.bf16.msra.mxu0 %v7445_v0 }
 0x75a   : > { %7124 = vmatmul.mubr.bf16.vlgmr.msra.gmra.mrb[80].mxu0 %v11438_v1 }
 0x75b   : > { %7127 = vmatprep.mubr.bf16.mxu0 %v11439_v45 }
 0x762   : > { %7128 = vmatmul.mubr.bf16.gmra.mrb[84].mxu0 %v11440_v4 }
 0x776   : > { %v4070_v10 = vpop.xlane.xlu0 %4069 }
 0x777   : > { %v4161_v31 = vmul.f32 0.0625, %v4070_v10 }
 0x778   : > { %v4073_v57 = vpop.xlane.xlu1 %4072 }
 0x779   : > { %v10488_v47 = vsub.f32 %v10316_v48, %v4161_v31  ;;  %v4162_v60 = vmul.f32 0.0625, %v4073_v57 }
 0x77a   : > { %v4064_v18 = vpop.xlane.xlu0 %4063 }
 0x77b   : > { %v10491_v5 = vsub.f32 %v10322_v2, %v4162_v60  ;;  %v4159_v15 = vmul.f32 0.0625, %v4064_v18  ;;  %v4225_v9 = vmul.f32 %v10488_v47, %v10488_v47 }
 0x77c   : > { %v4067_v13 = vpop.xlane.xlu1 %4066 }
 0x77d   : > { %v10496_v39 = vsub.f32 %v10319_v38, %v4159_v15  ;;  %v4160_v35 = vmul.f32 0.0625, %v4067_v13  ;;  %v4261_v34 = vsel %vm4061_vm7, %v4225_v9, 0.0  ;;  %v4226_v48 = vmul.f32 %v10491_v5, %v10491_v5 }
 0x77e   : > { %4262 = vadd.xlane.f32.xlu0 %v4261_v34 }
 0x77f   : > { %v10502_v25 = vsub.f32 %v10327_v8, %v4160_v35  ;;  %v4082_v2 = vpop.xlane.xlu0 %4081  ;;  %v4264_v12 = vsel %vm4061_vm7, %v4226_v48, 0.0  ;;  %v4223_v0 = vmul.f32 %v10496_v39, %v10496_v39 }
 0x780   : > { %v4165_v1 = vmul.f32 0.0625, %v4082_v2  ;;  %4265 = vadd.xlane.f32.xlu1 %v4264_v12 }
 0x781   : > { %v4085_v38 = vpop.xlane.xlu1 %4084  ;;  %v4255_v45 = vsel %vm4061_vm7, %v4223_v0, 0.0  ;;  %v4224_v4 = vmul.f32 %v10502_v25, %v10502_v25 }
 0x782   : > { %v10511_v10 = vsub.f32 %v10336_v21, %v4165_v1  ;;  %v4166_v31 = vmul.f32 0.0625, %v4085_v38  ;;  %4256 = vadd.xlane.f32.xlu0 %v4255_v45 }
 0x783   : > { %v4076_v8 = vpop.xlane.xlu0 %4075  ;;  %v4258_v57 = vsel %vm4061_vm7, %v4224_v4, 0.0 }
 0x784   : > { %v10515_v60 = vsub.f32 %v10342_v14, %v4166_v31  ;;  %v4163_v18 = vmul.f32 0.0625, %v4076_v8  ;;  %4259 = vadd.xlane.f32.xlu1 %v4258_v57  ;;  %v4229_v15 = vmul.f32 %v10511_v10, %v10511_v10 }
 0x785   : > { %v4079_v9 = vpop.xlane.xlu1 %4078 }
 0x786   : > { %v10520_v13 = vsub.f32 %v10339_v52, %v4163_v18  ;;  %v4164_v35 = vmul.f32 0.0625, %v4079_v9  ;;  %v4273_v21 = vsel %vm4061_vm7, %v4229_v15, 0.0  ;;  %v4230_v34 = vmul.f32 %v10515_v60, %v10515_v60 }
 0x787   : > { %4274 = vadd.xlane.f32.xlu0 %v4273_v21  ;;  %v4094_v48 = vpop.xlane.xlu0 %4093 }
 0x788   : > { %v10526_v14 = vsub.f32 %v10347_v27, %v4164_v35  ;;  %v4169_v2 = vmul.f32 0.0625, %v4094_v48  ;;  %v4276_v12 = vsel %vm4061_vm7, %v4230_v34, 0.0  ;;  %v4227_v0 = vmul.f32 %v10520_v13, %v10520_v13 }
 0x789   : > { %v4097_v1 = vpop.xlane.xlu1 %4096  ;;  %4277 = vadd.xlane.f32.xlu1 %v4276_v12 }
 0x78a   : > { %v10532_v52 = vsub.f32 %v10354_v36, %v4169_v2  ;;  %v4170_v38 = vmul.f32 0.0625, %v4097_v1  ;;  %v4267_v45 = vsel %vm4061_vm7, %v4227_v0, 0.0  ;;  %v4228_v4 = vmul.f32 %v10526_v14, %v10526_v14 }
 0x78b   : > { %4268 = vadd.xlane.f32.xlu0 %v4267_v45  ;;  %v4088_v27 = vpop.xlane.xlu0 %4087 }
 0x78c   : > { %v10538_v31 = vsub.f32 %v10362_v63, %v4170_v38  ;;  %v4167_v8 = vmul.f32 0.0625, %v4088_v27  ;;  %v4270_v57 = vsel %vm4061_vm7, %v4228_v4, 0.0  ;;  %v4233_v18 = vmul.f32 %v10532_v52, %v10532_v52 }
 0x78d   : > { %v4091_v15 = vpop.xlane.xlu1 %4090  ;;  %4271 = vadd.xlane.f32.xlu1 %v4270_v57 }
 0x78e   : > { %v10544_v36 = vsub.f32 %v10359_v3, %v4167_v8  ;;  %v4168_v9 = vmul.f32 0.0625, %v4091_v15  ;;  %v4285_v35 = vsel %vm4061_vm7, %v4233_v18, 0.0  ;;  %v4234_v21 = vmul.f32 %v10538_v31, %v10538_v31 }
 0x78f   : > { %4286 = vadd.xlane.f32.xlu0 %v4285_v35 }
 0x790   : > { %v10550_v63 = vsub.f32 %v10367_v11, %v4168_v9  ;;  %v4288_v34 = vsel %vm4061_vm7, %v4234_v21, 0.0  ;;  %v4231_v48 = vmul.f32 %v10544_v36, %v10544_v36 }
 0x791   : > { %4289 = vadd.xlane.f32.xlu1 %v4288_v34 }
 0x792   : > { %v4279_v2 = vsel %vm4061_vm7, %v4231_v48, 0.0  ;;  %v4232_v3 = vmul.f32 %v10550_v63, %v10550_v63 }
 0x793   : > { %4280 = vadd.xlane.f32.xlu0 %v4279_v2 }
 0x794   : > { %v4282_v12 = vsel %vm4061_vm7, %v4232_v3, 0.0 }
 0x795   : > { %4283 = vadd.xlane.f32.xlu1 %v4282_v12 }
 0x7b6   : > { %v4106_v0 = vpop.xlane.xlu0 %4105 }
 0x7b7   : > { %v4173_v1 = vmul.f32 0.0625, %v4106_v0 }
 0x7b8   : > { %v4109_v38 = vpop.xlane.xlu1 %4108 }
 0x7b9   : > { %v10560_v11 = vsub.f32 %v10376_v50, %v4173_v1  ;;  %v4174_v45 = vmul.f32 0.0625, %v4109_v38 }
 0x7ba   : > { %v4100_v4 = vpop.xlane.xlu0 %4099 }
 0x7bb   : > { %v10563_v27 = vsub.f32 %v10382_v59, %v4174_v45  ;;  %v4171_v8 = vmul.f32 0.0625, %v4100_v4  ;;  %v4237_v57 = vmul.f32 %v10560_v11, %v10560_v11 }
 0x7bc   : > { %v4103_v18 = vpop.xlane.xlu1 %4102 }
 0x7bd   : > { %v10568_v15 = vsub.f32 %v10379_v32, %v4171_v8  ;;  %v4172_v9 = vmul.f32 0.0625, %v4103_v18  ;;  %v4297_v35 = vsel %vm4061_vm7, %v4237_v57, 0.0  ;;  %v4238_v50 = vmul.f32 %v10563_v27, %v10563_v27 }
 0x7be   : > { %4298 = vadd.xlane.f32.xlu0 %v4297_v35  ;;  %v4118_v21 = vpop.xlane.xlu0 %4117 }
 0x7bf   : > { %v10574_v34 = vsub.f32 %v10387_v33, %v4172_v9  ;;  %v4177_v59 = vmul.f32 0.0625, %v4118_v21  ;;  %v4300_v48 = vsel %vm4061_vm7, %v4238_v50, 0.0  ;;  %v4235_v2 = vmul.f32 %v10568_v15, %v10568_v15 }
 0x7c0   : > { %4301 = vadd.xlane.f32.xlu1 %v4300_v48  ;;  %v4121_v32 = vpop.xlane.xlu1 %4120 }
 0x7c1   : > { %v10580_v3 = vsub.f32 %v10394_v53, %v4177_v59  ;;  %v4178_v12 = vmul.f32 0.0625, %v4121_v32  ;;  %v4291_v0 = vsel %vm4061_vm7, %v4235_v2, 0.0  ;;  %v4236_v1 = vmul.f32 %v10574_v34, %v10574_v34 }
 0x7c2   : > { %4292 = vadd.xlane.f32.xlu0 %v4291_v0  ;;  %v4112_v33 = vpop.xlane.xlu0 %4111 }
 0x7c3   : > { %v10586_v38 = vsub.f32 %v10402_v20, %v4178_v12  ;;  %v4175_v45 = vmul.f32 0.0625, %v4112_v33  ;;  %v4294_v4 = vsel %vm4061_vm7, %v4236_v1, 0.0  ;;  %v4241_v8 = vmul.f32 %v10580_v3, %v10580_v3 }
 0x7c4   : > { %4295 = vadd.xlane.f32.xlu1 %v4294_v4  ;;  %v4115_v53 = vpop.xlane.xlu1 %4114 }
 0x7c5   : > { %v10592_v57 = vsub.f32 %v10399_v6, %v4175_v45  ;;  %v4176_v18 = vmul.f32 0.0625, %v4115_v53  ;;  %v4309_v9 = vsel %vm4061_vm7, %v4241_v8, 0.0  ;;  %v4242_v35 = vmul.f32 %v10586_v38, %v10586_v38 }
 0x7c6   : > { %4310 = vadd.xlane.f32.xlu0 %v4309_v9  ;;  %v4130_v20 = vpop.xlane.xlu0 %4129 }
 0x7c7   : > { %v10598_v50 = vsub.f32 %v10407_v30, %v4176_v18  ;;  %v4181_v21 = vmul.f32 0.0625, %v4130_v20  ;;  %v4312_v59 = vsel %vm4061_vm7, %v4242_v35, 0.0  ;;  %v4239_v48 = vmul.f32 %v10592_v57, %v10592_v57 }
 0x7c8   : > { %4313 = vadd.xlane.f32.xlu1 %v4312_v59  ;;  %v4133_v6 = vpop.xlane.xlu1 %4132 }
 0x7c9   : > { %v10604_v2 = vsub.f32 %v10414_v22, %v4181_v21  ;;  %v4182_v32 = vmul.f32 0.0625, %v4133_v6  ;;  %v4303_v12 = vsel %vm4061_vm7, %v4239_v48, 0.0  ;;  %v4240_v0 = vmul.f32 %v10598_v50, %v10598_v50 }
 0x7ca   : > { %4304 = vadd.xlane.f32.xlu0 %v4303_v12  ;;  %v4124_v30 = vpop.xlane.xlu0 %4123 }
 0x7cb   : > { %v10610_v1 = vsub.f32 %v10422_v56, %v4182_v32  ;;  %v4179_v33 = vmul.f32 0.0625, %v4124_v30  ;;  %v4306_v45 = vsel %vm4061_vm7, %v4240_v0, 0.0  ;;  %v4245_v4 = vmul.f32 %v10604_v2, %v10604_v2 }
 0x7cc   : > { %4307 = vadd.xlane.f32.xlu1 %v4306_v45  ;;  %v4127_v22 = vpop.xlane.xlu1 %4126 }
 0x7cd   : > { %v10616_v8 = vsub.f32 %v10419_v42, %v4179_v33  ;;  %v4180_v53 = vmul.f32 0.0625, %v4127_v22  ;;  %v4321_v18 = vsel %vm4061_vm7, %v4245_v4, 0.0  ;;  %v4246_v9 = vmul.f32 %v10610_v1, %v10610_v1 }
 0x7ce   : > { %4322 = vadd.xlane.f32.xlu0 %v4321_v18  ;;  %v4142_v56 = vpop.xlane.xlu0 %4141 }
 0x7cf   : > { %v10622_v35 = vsub.f32 %v10428_v51, %v4180_v53  ;;  %v4185_v20 = vmul.f32 0.0625, %v4142_v56  ;;  %v4324_v21 = vsel %vm4061_vm7, %v4246_v9, 0.0  ;;  %v4243_v59 = vmul.f32 %v10616_v8, %v10616_v8 }
 0x7d0   : > { %4325 = vadd.xlane.f32.xlu1 %v4324_v21  ;;  %v4145_v42 = vpop.xlane.xlu1 %4144 }
 0x7d1   : > { %v10628_v48 = vsub.f32 %v10437_v58, %v4185_v20  ;;  %v4186_v6 = vmul.f32 0.0625, %v4145_v42  ;;  %v4315_v32 = vsel %vm4061_vm7, %v4243_v59, 0.0  ;;  %v4244_v12 = vmul.f32 %v10622_v35, %v10622_v35 }
 0x7d2   : > { %4316 = vadd.xlane.f32.xlu0 %v4315_v32  ;;  %v4136_v51 = vpop.xlane.xlu0 %4135 }
 0x7d3   : > { %v10634_v0 = vsub.f32 %v10445_v24, %v4186_v6  ;;  %v4183_v30 = vmul.f32 0.0625, %v4136_v51  ;;  %v4318_v33 = vsel %vm4061_vm7, %v4244_v12, 0.0  ;;  %v4249_v45 = vmul.f32 %v10628_v48, %v10628_v48 }
 0x7d4   : > { %4319 = vadd.xlane.f32.xlu1 %v4318_v33  ;;  %v4139_v58 = vpop.xlane.xlu1 %4138 }
 0x7d5   : > { %v10640_v4 = vsub.f32 %v10442_v49, %v4183_v30  ;;  %v4184_v22 = vmul.f32 0.0625, %v4139_v58  ;;  %v4333_v53 = vsel %vm4061_vm7, %v4249_v45, 0.0  ;;  %v4250_v18 = vmul.f32 %v10634_v0, %v10634_v0 }
 0x7d6   : > { %4334 = vadd.xlane.f32.xlu0 %v4333_v53  ;;  %v4154_v24 = vpop.xlane.xlu0 %4153 }
 0x7d7   : > { %v10646_v9 = vsub.f32 %v10451_v17, %v4184_v22  ;;  %v4189_v56 = vmul.f32 0.0625, %v4154_v24  ;;  %v4336_v20 = vsel %vm4061_vm7, %v4250_v18, 0.0  ;;  %v4247_v21 = vmul.f32 %v10640_v4, %v10640_v4 }
 0x7d8   : > { %4337 = vadd.xlane.f32.xlu1 %v4336_v20  ;;  %v4157_v49 = vpop.xlane.xlu1 %4156 }
 0x7d9   : > { %v10652_v59 = vsub.f32 %v10459_v55, %v4189_v56  ;;  %v4190_v42 = vmul.f32 0.0625, %v4157_v49  ;;  %v4327_v6 = vsel %vm4061_vm7, %v4247_v21, 0.0  ;;  %v4248_v32 = vmul.f32 %v10646_v9, %v10646_v9 }
 0x7da   : > { %4328 = vadd.xlane.f32.xlu0 %v4327_v6  ;;  %v4148_v17 = vpop.xlane.xlu0 %4147 }
 0x7db   : > { %v10658_v12 = vsub.f32 %v10467_v19, %v4190_v42  ;;  %v4187_v51 = vmul.f32 0.0625, %v4148_v17  ;;  %v4330_v30 = vsel %vm4061_vm7, %v4248_v32, 0.0  ;;  %v4253_v33 = vmul.f32 %v10652_v59, %v10652_v59 }
 0x7dc   : > { %4331 = vadd.xlane.f32.xlu1 %v4330_v30  ;;  %v4151_v55 = vpop.xlane.xlu1 %4150 }
 0x7dd   : > { %v10664_v45 = vsub.f32 %v10464_v29, %v4187_v51  ;;  %v4188_v58 = vmul.f32 0.0625, %v4151_v55  ;;  %v4345_v22 = vsel %vm4061_vm7, %v4253_v33, 0.0  ;;  %v4254_v53 = vmul.f32 %v10658_v12, %v10658_v12 }
 0x7de   : > { %4346 = vadd.xlane.f32.xlu0 %v4345_v22 }
 0x7df   : > { %v10670_v19 = vsub.f32 %v10473_v26, %v4188_v58  ;;  %v4348_v18 = vsel %vm4061_vm7, %v4254_v53, 0.0  ;;  %v4251_v24 = vmul.f32 %v10664_v45, %v10664_v45 }
 0x7e0   : > { %4349 = vadd.xlane.f32.xlu1 %v4348_v18 }
 0x7e1   : > { %v4339_v56 = vsel %vm4061_vm7, %v4251_v24, 0.0  ;;  %v4252_v29 = vmul.f32 %v10670_v19, %v10670_v19 }
 0x7e2   : > { %4340 = vadd.xlane.f32.xlu0 %v4339_v56 }
 0x7e3   : > { %v4342_v20 = vsel %vm4061_vm7, %v4252_v29, 0.0 }
 0x7e4   : > { %4343 = vadd.xlane.f32.xlu1 %v4342_v20 }
 0x80b   : > { %v4263_v21 = vpop.xlane.xlu0 %4262 }
 0x80c   : > { %v4353_v49 = vmul.f32 0.0625, %v4263_v21 }
 0x80d   : > { %v4266_v42 = vpop.xlane.xlu1 %4265 }
 0x80e   : > { %v4385_v26 = vadd.f32 1e-05, %v4353_v49  ;;  %v4354_v6 = vmul.f32 0.0625, %v4266_v42  ;;  %v10681_v42 = vrot.slane %v10309_v61, %v9727_v23 }
 0x80f   : > { %v4257_v32 = vpop.xlane.xlu0 %4256 }
 0x810   : > { %7646 = vrsqrt.f32 %v4385_v26  ;;  %v4386_v17 = vadd.f32 1e-05, %v4354_v6  ;;  %v4351_v51 = vmul.f32 0.0625, %v4257_v32 }
 0x811   : > { %v4260_v30 = vpop.xlane.xlu1 %4259 }
 0x812   : > { %7648 = vrsqrt.f32 %v4386_v17  ;;  %v4383_v33 = vadd.f32 1e-05, %v4351_v51  ;;  %v4352_v55 = vmul.f32 0.0625, %v4260_v30 }
 0x814   : > { %7650 = vrsqrt.f32 %v4383_v33  ;;  %v4384_v58 = vadd.f32 1e-05, %v4352_v55  ;;  %v4275_v22 = vpop.xlane.xlu0 %4274 }
 0x815   : > { %v4357_v53 = vmul.f32 0.0625, %v4275_v22 }
 0x816   : > { %7652 = vrsqrt.f32 %v4384_v58  ;;  %v4278_v18 = vpop.xlane.xlu1 %4277  ;;  %v11441_v58 = vld [vmem:[#allocation36_spill] sm:$0xff] }
 0x817   : > { %v4389_v24 = vadd.f32 1e-05, %v4357_v53  ;;  %v4358_v56 = vmul.f32 0.0625, %v4278_v18 }
 0x818   : > { %v4269_v29 = vpop.xlane.xlu0 %4268 }
 0x819   : > { %7654 = vrsqrt.f32 %v4389_v24  ;;  %v4390_v20 = vadd.f32 1e-05, %v4358_v56  ;;  %v4355_v21 = vmul.f32 0.0625, %v4269_v29  ;;  %v10688_v56 = vrot.slane %v10309_v61, %v9730_v43 }
 0x81a   : > { %v7647_v49 = vpop.eup %7646  ;;  %v4272_v26 = vpop.xlane.xlu1 %4271 }
 0x81b   : > { %7656 = vrsqrt.f32 %v4390_v20  ;;  %v4387_v6 = vadd.f32 1e-05, %v4355_v21  ;;  %v4356_v32 = vmul.f32 0.0625, %v4272_v26  ;;  %v4449_v17 = vmul.f32 %v7647_v49, %v10488_v47 }
 0x81c   : > { %v7649_v51 = vpop.eup %7648  ;;  %v4287_v30 = vpop.xlane.xlu0 %4286 }
 0x81d   : > { %7658 = vrsqrt.f32 %v4387_v6  ;;  %v4388_v33 = vadd.f32 1e-05, %v4356_v32  ;;  %v4361_v55 = vmul.f32 0.0625, %v4287_v30  ;;  %v4485_v22 = vmul.f32 %v11441_v58, %v4449_v17 }
 0x81e   : > { %v7651_v53 = vpop.eup %7650  ;;  %v4290_v18 = vpop.xlane.xlu1 %4289  ;;  %v4450_v24 = vmul.f32 %v7649_v51, %v10491_v5 }
 0x81f   : > { %7660 = vrsqrt.f32 %v4388_v33  ;;  %v4362_v29 = vmul.f32 0.0625, %v4290_v18  ;;  %v4521_v20 = vadd.f32 %v10681_v42, %v4485_v22  ;;  %v4447_v26 = vmul.f32 %v7651_v53, %v10496_v39 }
 0x820   : > { %v7653_v47 = vpop.eup %7652  ;;  %v4281_v21 = vpop.xlane.xlu0 %4280  ;;  %v4486_v49 = vmul.f32 %v11441_v58, %v4450_v24  ;;  %v4393_v6 = vadd.f32 1e-05, %v4361_v55 }
 0x821   : > { %v4553_v32 = vmax.f32 %v4521_v20, 0.0  ;;  %v4359_v17 = vmul.f32 0.0625, %v4281_v21  ;;  %v4483_v61 = vmul.f32 %v11441_v58, %v4447_v26  ;;  %v4448_v51 = vmul.f32 %v7653_v47, %v10502_v25  ;;  %v10703_v21 = vld [vmem:[%s11442_s24] sm:$0x3f] }
 0x822   : > { %v4284_v30 = vpop.xlane.xlu1 %4283  ;;  %v4522_v5 = vadd.f32 %v10681_v42, %v4486_v49  ;;  %v4394_v18 = vadd.f32 1e-05, %v4362_v29  ;;  %7662 = vrsqrt.f32 %v4393_v6 }
 0x823   : > { %v7655_v33 = vpop.eup %7654  ;;  %v4360_v22 = vmul.f32 0.0625, %v4284_v30  ;;  %v4589_v62 = vmul.f32 %v10688_v56, %v4553_v32  ;;  %v4519_v24 = vadd.f32 %v10681_v42, %v4483_v61  ;;  %v4484_v39 = vmul.f32 %v11441_v58, %v4448_v51 }
 0x824   : > { %v4554_v7 = vmax.f32 %v4522_v5, 0.0  ;;  %v4453_v55 = vmul.f32 %v7655_v33, %v10511_v10  ;;  %v4391_v25 = vadd.f32 1e-05, %v4359_v17  ;;  %7664 = vrsqrt.f32 %v4394_v18 }
 0x825   : > { %v7657_v53 = vpop.eup %7656  ;;  %v4625_v20 = vsel %vm4061_vm7, %v4589_v62, 0.0  ;;  %v4551_v47 = vmax.f32 %v4519_v24, 0.0  ;;  %v4520_v49 = vadd.f32 %v10681_v42, %v4484_v39  ;;  %v4392_v30 = vadd.f32 1e-05, %v4360_v22 }
 0x826   : > { %4626 = vadd.xlane.f32.xlu0 %v4625_v20  ;;  %v4590_v29 = vmul.f32 %v10688_v56, %v4554_v7  ;;  %v4489_v32 = vmul.f32 %v11441_v58, %v4453_v55  ;;  %v4454_v10 = vmul.f32 %v7657_v53, %v10515_v60  ;;  %v10713_v7 = vrot.slane %v10703_v21, %v9087_v16 }
 0x827   : > { %v7659_v26 = vpop.eup %7658  ;;  %v4587_v62 = vmul.f32 %v10688_v56, %v4551_v47  ;;  %v4552_v5 = vmax.f32 %v4520_v49, 0.0  ;;  %7666 = vrsqrt.f32 %v4391_v25 }
 0x828   : > { %v4628_v6 = vsel %vm4061_vm7, %v4590_v29, 0.0  ;;  %v4490_v17 = vmul.f32 %v11441_v58, %v4454_v10  ;;  %v4451_v51 = vmul.f32 %v7659_v26, %v10520_v13  ;;  %v4525_v22 = vadd.f32 %v10681_v42, %v4489_v32 }
 0x829   : > { %v7661_v61 = vpop.eup %7660  ;;  %4629 = vadd.xlane.f32.xlu1 %v4628_v6  ;;  %v4619_v33 = vsel %vm4061_vm7, %v4587_v62, 0.0  ;;  %v4588_v60 = vmul.f32 %v10688_v56, %v4552_v5  ;;  %7668 = vrsqrt.f32 %v4392_v30 }
 0x82a   : > { %v4452_v18 = vmul.f32 %v7661_v61, %v10526_v14  ;;  %4620 = vadd.xlane.f32.xlu0 %v4619_v33  ;;  %v4487_v24 = vmul.f32 %v11441_v58, %v4451_v51  ;;  %v4526_v55 = vadd.f32 %v10681_v42, %v4490_v17  ;;  %v4557_v29 = vmax.f32 %v4525_v22, 0.0 }
 0x82b   : > { %v4622_v16 = vsel %vm4061_vm7, %v4588_v60, 0.0 }
 0x82c   : > { %v4488_v13 = vmul.f32 %v11441_v58, %v4452_v18  ;;  %v7663_v25 = vpop.eup %7662  ;;  %v4523_v47 = vadd.f32 %v10681_v42, %v4487_v24  ;;  %v4558_v10 = vmax.f32 %v4526_v55, 0.0  ;;  %v4593_v62 = vmul.f32 %v10688_v56, %v4557_v29 }
 0x82d   : > { %v7125_v39 = vpop.f32.mrb[80].mxu0  ;;  %4623 = vadd.xlane.f32.xlu1 %v4622_v16  ;;  %v4457_v61 = vmul.f32 %v7663_v25, %v10532_v52 }
 0x82e   : > { %v10726_v53 = vadd.f32 %v7125_v39, %v10713_v7  ;;  %v5456_v20 = vpop.f32.mrb[81].mxu0  ;;  %v7665_v32 = vpop.eup %7664  ;;  %v4524_v30 = vadd.f32 %v10681_v42, %v4488_v13  ;;  %v4555_v5 = vmax.f32 %v4523_v47, 0.0  ;;  %v4594_v60 = vmul.f32 %v10688_v56, %v4558_v10 }
 0x82f   : > { %v7126_v14 = vpop.f32.mrb[82].mxu0  ;;  %v10735_v6 = vadd.f32 %v10713_v7, %v5456_v20  ;;  %v4458_v22 = vmul.f32 %v7665_v32, %v10538_v31  ;;  %v7918_v39 = vmov 0   ;;  %v4637_v52 = vsel %vm4061_vm7, %v4593_v62, 0.0 }
 0x830   : > { %v10730_v49 = vadd.f32 %v7126_v14, %v10713_v7  ;;  %v5459_v26 = vpop.f32.mrb[83].mxu0  ;;  %5503 = vadd.xlane.f32.xlu0 %v10726_v53  ;;  %v4556_v18 = vmax.f32 %v4524_v30, 0.0  ;;  %v4591_v13 = vmul.f32 %v10688_v56, %v4555_v5  ;;  %v4493_v20 = vmul.f32 %v11441_v58, %v4457_v61  ;;  %7396 = vset.pattern.permute.xlu1 %v7918_v39 }
 0x831   : > { %v7667_v17 = vpop.eup %7666  ;;  %v10741_v51 = vadd.f32 %v10713_v7, %v5459_v26  ;;  %7397 = vset.pattern.permute.xlu0 %v7918_v39  ;;  %v4640_v31 = vsel %vm4061_vm7, %v4594_v60, 0.0  ;;  %v4494_v47 = vmul.f32 %v11441_v58, %v4458_v22 }
 0x832   : > { %5505 = vadd.xlane.f32.xlu1 %v10730_v49  ;;  %v4455_v25 = vmul.f32 %v7667_v17, %v10544_v36  ;;  %v4592_v29 = vmul.f32 %v10688_v56, %v4556_v18  ;;  %v4631_v32 = vsel %vm4061_vm7, %v4591_v13, 0.0  ;;  %v4529_v10 = vadd.f32 %v10681_v42, %v4493_v20 }
 0x833   : > { %v7669_v24 = vpop.eup %7668  ;;  %v4530_v62 = vadd.f32 %v10681_v42, %v4494_v47 }
 0x834   : > { %5499 = vadd.xlane.f32.xlu0 %v10735_v6  ;;  %v4456_v26 = vmul.f32 %v7669_v24, %v10550_v63  ;;  %v4491_v30 = vmul.f32 %v11441_v58, %v4455_v25  ;;  %v4634_v36 = vsel %vm4061_vm7, %v4592_v29, 0.0  ;;  %v4561_v17 = vmax.f32 %v4529_v10, 0.0 }
 0x835   : > { %v7129_v33 = vpop.f32.mrb[84].mxu0  ;;  %v4562_v18 = vmax.f32 %v4530_v62, 0.0 }
 0x836   : > { %v5472_v16 = vpop.f32.mrb[85].mxu0  ;;  %5501 = vadd.xlane.f32.xlu1 %v10741_v51  ;;  %v4492_v5 = vmul.f32 %v11441_v58, %v4456_v26  ;;  %v10762_v61 = vadd.f32 %v7129_v33, %v10713_v7  ;;  %v4527_v63 = vadd.f32 %v10681_v42, %v4491_v30  ;;  %v4597_v33 = vmul.f32 %v10688_v56, %v4561_v17 }
 0x837   : > { %v7130_v55 = vpop.f32.mrb[86].mxu0  ;;  %v10771_v24 = vadd.f32 %v10713_v7, %v5472_v16 }
 0x838   : > { %v5475_v14 = vpop.f32.mrb[87].mxu0  ;;  %4638 = vadd.xlane.f32.xlu0 %v4637_v52  ;;  %v10766_v60 = vadd.f32 %v7130_v55, %v10713_v7  ;;  %v4528_v22 = vadd.f32 %v10681_v42, %v4492_v5  ;;  %v4559_v39 = vmax.f32 %v4527_v63, 0.0  ;;  %v4598_v55 = vmul.f32 %v10688_v56, %v4562_v18 }
 0x839   : > { %v10776_v52 = vadd.f32 %v10713_v7, %v5475_v14  ;;  %v4649_v20 = vsel %vm4061_vm7, %v4597_v33, 0.0 }
 0x83a   : > { %4641 = vadd.xlane.f32.xlu1 %v4640_v31  ;;  %v4560_v13 = vmax.f32 %v4528_v22, 0.0  ;;  %v4595_v16 = vmul.f32 %v10688_v56, %v4559_v39  ;;  %v4652_v25 = vsel %vm4061_vm7, %v4598_v55, 0.0 }
 0x83c   : > { %4632 = vadd.xlane.f32.xlu0 %v4631_v32  ;;  %v4596_v31 = vmul.f32 %v10688_v56, %v4560_v13  ;;  %v4643_v7 = vsel %vm4061_vm7, %v4595_v16, 0.0 }
 0x83e   : > { %4635 = vadd.xlane.f32.xlu1 %v4634_v36  ;;  %v4646_v47 = vsel %vm4061_vm7, %v4596_v31, 0.0 }
 0x840   : > { %5511 = vadd.xlane.f32.xlu0 %v10762_v61 }
 0x842   : > { %5513 = vadd.xlane.f32.xlu1 %v10766_v60 }
 0x844   : > { %5507 = vadd.xlane.f32.xlu0 %v10771_v24 }
 0x846   : > { %5509 = vadd.xlane.f32.xlu1 %v10776_v52 }
 0x848   : > { %4650 = vadd.xlane.f32.xlu0 %v4649_v20 }
 0x84a   : > { %4653 = vadd.xlane.f32.xlu1 %v4652_v25 }
 0x84b   : > { %v4299_v14 = vpop.xlane.xlu0 %4298 }
 0x84c   : > { %4644 = vadd.xlane.f32.xlu0 %v4643_v7  ;;  %v4365_v29 = vmul.f32 0.0625, %v4299_v14 }
 0x84d   : > { %v4302_v26 = vpop.xlane.xlu1 %4301 }
 0x84e   : > { %v4397_v32 = vadd.f32 1e-05, %v4365_v29  ;;  %4647 = vadd.xlane.f32.xlu1 %v4646_v47  ;;  %v4366_v10 = vmul.f32 0.0625, %v4302_v26 }
 0x84f   : > { %v4293_v30 = vpop.xlane.xlu0 %4292 }
 0x850   : > { %7670 = vrsqrt.f32 %v4397_v32  ;;  %v4398_v36 = vadd.f32 1e-05, %v4366_v10  ;;  %v4363_v62 = vmul.f32 0.0625, %v4293_v30 }
 0x851   : > { %v4296_v5 = vpop.xlane.xlu1 %4295 }
 0x852   : > { %7672 = vrsqrt.f32 %v4398_v36  ;;  %v4395_v17 = vadd.f32 1e-05, %v4363_v62  ;;  %v4364_v63 = vmul.f32 0.0625, %v4296_v5 }
 0x853   : > { %v4311_v18 = vpop.xlane.xlu0 %4310 }
 0x854   : > { %7674 = vrsqrt.f32 %v4395_v17  ;;  %v4396_v22 = vadd.f32 1e-05, %v4364_v63  ;;  %v4369_v33 = vmul.f32 0.0625, %v4311_v18 }
 0x855   : > { %v4314_v39 = vpop.xlane.xlu1 %4313 }
 0x856   : > { %7676 = vrsqrt.f32 %v4396_v22  ;;  %v4401_v55 = vadd.f32 1e-05, %v4369_v33  ;;  %v4370_v13 = vmul.f32 0.0625, %v4314_v39 }
 0x857   : > { %v4305_v20 = vpop.xlane.xlu0 %4304 }
 0x858   : > { %7678 = vrsqrt.f32 %v4401_v55  ;;  %v4402_v16 = vadd.f32 1e-05, %v4370_v13  ;;  %v4367_v25 = vmul.f32 0.0625, %v4305_v20 }
 0x859   : > { %v4308_v31 = vpop.xlane.xlu1 %4307 }
 0x85a   : > { %v7671_v7 = vpop.eup %7670  ;;  %7680 = vrsqrt.f32 %v4402_v16  ;;  %v4399_v14 = vadd.f32 1e-05, %v4367_v25  ;;  %v4368_v29 = vmul.f32 0.0625, %v4308_v31 }
 0x85b   : > { %v4323_v47 = vpop.xlane.xlu0 %4322  ;;  %v4461_v26 = vmul.f32 %v7671_v7, %v10560_v11 }
 0x85c   : > { %v7673_v32 = vpop.eup %7672  ;;  %7682 = vrsqrt.f32 %v4399_v14  ;;  %v4400_v10 = vadd.f32 1e-05, %v4368_v29  ;;  %v4373_v30 = vmul.f32 0.0625, %v4323_v47 }
 0x85d   : > { %v4326_v36 = vpop.xlane.xlu1 %4325  ;;  %v4497_v62 = vmul.f32 %v11441_v58, %v4461_v26  ;;  %v4462_v5 = vmul.f32 %v7673_v32, %v10563_v27 }
 0x85e   : > { %v7675_v17 = vpop.eup %7674  ;;  %7684 = vrsqrt.f32 %v4400_v10  ;;  %v4405_v63 = vadd.f32 1e-05, %v4373_v30  ;;  %v4374_v18 = vmul.f32 0.0625, %v4326_v36 }
 0x85f   : > { %v4317_v22 = vpop.xlane.xlu0 %4316  ;;  %v4533_v33 = vadd.f32 %v10681_v42, %v4497_v62  ;;  %v4498_v39 = vmul.f32 %v11441_v58, %v4462_v5  ;;  %v4459_v11 = vmul.f32 %v7675_v17, %v10568_v15 }
 0x860   : > { %v7677_v55 = vpop.eup %7676  ;;  %7686 = vrsqrt.f32 %v4405_v63  ;;  %v4406_v13 = vadd.f32 1e-05, %v4374_v18  ;;  %v4371_v20 = vmul.f32 0.0625, %v4317_v22 }
 0x861   : > { %v4320_v16 = vpop.xlane.xlu1 %4319  ;;  %v4565_v25 = vmax.f32 %v4533_v33, 0.0  ;;  %v4534_v31 = vadd.f32 %v10681_v42, %v4498_v39  ;;  %v4495_v27 = vmul.f32 %v11441_v58, %v4459_v11  ;;  %v4460_v7 = vmul.f32 %v7677_v55, %v10574_v34 }
 0x862   : > { %v7679_v14 = vpop.eup %7678  ;;  %7688 = vrsqrt.f32 %v4406_v13  ;;  %v4403_v29 = vadd.f32 1e-05, %v4371_v20  ;;  %v4372_v47 = vmul.f32 0.0625, %v4320_v16 }
 0x863   : > { %v4335_v26 = vpop.xlane.xlu0 %4334  ;;  %v4601_v32 = vmul.f32 %v10688_v56, %v4565_v25  ;;  %v4566_v15 = vmax.f32 %v4534_v31, 0.0  ;;  %v4531_v10 = vadd.f32 %v10681_v42, %v4495_v27  ;;  %v4496_v30 = vmul.f32 %v11441_v58, %v4460_v7 }
 0x864   : > { %v7681_v36 = vpop.eup %7680  ;;  %7690 = vrsqrt.f32 %v4403_v29  ;;  %v4404_v62 = vadd.f32 1e-05, %v4372_v47  ;;  %v4377_v5 = vmul.f32 0.0625, %v4335_v26  ;;  %v4465_v17 = vmul.f32 %v7679_v14, %v10580_v3 }
 0x865   : > { %v4338_v63 = vpop.xlane.xlu1 %4337  ;;  %v4661_v34 = vsel %vm4061_vm7, %v4601_v32, 0.0  ;;  %v4602_v18 = vmul.f32 %v10688_v56, %v4566_v15  ;;  %v4563_v22 = vmax.f32 %v4531_v10, 0.0  ;;  %v4532_v33 = vadd.f32 %v10681_v42, %v4496_v30 }
 0x866   : > { %v7683_v39 = vpop.eup %7682  ;;  %7692 = vrsqrt.f32 %v4404_v62  ;;  %v4409_v11 = vadd.f32 1e-05, %v4377_v5  ;;  %v4378_v55 = vmul.f32 0.0625, %v4338_v63  ;;  %4662 = vadd.xlane.f32.xlu0 %v4661_v34  ;;  %v4501_v13 = vmul.f32 %v11441_v58, %v4465_v17 }
 0x867   : > { %v4329_v20 = vpop.xlane.xlu0 %4328  ;;  %v4664_v16 = vsel %vm4061_vm7, %v4602_v18, 0.0  ;;  %v4599_v3 = vmul.f32 %v10688_v56, %v4563_v22  ;;  %v4564_v25 = vmax.f32 %v4532_v33, 0.0  ;;  %v4466_v31 = vmul.f32 %v7681_v36, %v10586_v38 }
 0x868   : > { %v7685_v27 = vpop.eup %7684  ;;  %7694 = vrsqrt.f32 %v4409_v11  ;;  %v4410_v7 = vadd.f32 1e-05, %v4378_v55  ;;  %v4375_v14 = vmul.f32 0.0625, %v4329_v20  ;;  %4665 = vadd.xlane.f32.xlu1 %v4664_v16  ;;  %v4537_v29 = vadd.f32 %v10681_v42, %v4501_v13 }
 0x869   : > { %v4332_v47 = vpop.xlane.xlu1 %4331  ;;  %v4655_v26 = vsel %vm4061_vm7, %v4599_v3, 0.0  ;;  %v4600_v32 = vmul.f32 %v10688_v56, %v4564_v25  ;;  %v4502_v15 = vmul.f32 %v11441_v58, %v4466_v31  ;;  %v4463_v10 = vmul.f32 %v7683_v39, %v10592_v57 }
 0x86a   : > { %v7687_v30 = vpop.eup %7686  ;;  %7696 = vrsqrt.f32 %v4410_v7  ;;  %v4407_v62 = vadd.f32 1e-05, %v4375_v14  ;;  %v4376_v38 = vmul.f32 0.0625, %v4332_v47  ;;  %4656 = vadd.xlane.f32.xlu0 %v4655_v26  ;;  %v4569_v36 = vmax.f32 %v4537_v29, 0.0 }
 0x86b   : > { %v4347_v5 = vpop.xlane.xlu0 %4346  ;;  %v4658_v17 = vsel %vm4061_vm7, %v4600_v32, 0.0  ;;  %v4538_v63 = vadd.f32 %v10681_v42, %v4502_v15  ;;  %v4499_v34 = vmul.f32 %v11441_v58, %v4463_v10  ;;  %v4464_v18 = vmul.f32 %v7685_v27, %v10598_v50 }
 0x86c   : > { %v7689_v22 = vpop.eup %7688  ;;  %7698 = vrsqrt.f32 %v4407_v62  ;;  %v4408_v33 = vadd.f32 1e-05, %v4376_v38  ;;  %v4381_v11 = vmul.f32 0.0625, %v4347_v5  ;;  %4659 = vadd.xlane.f32.xlu1 %v4658_v17  ;;  %v4605_v57 = vmul.f32 %v10688_v56, %v4569_v36 }
 0x86d   : > { %v4350_v39 = vpop.xlane.xlu1 %4349  ;;  %v4570_v55 = vmax.f32 %v4538_v63, 0.0  ;;  %v4535_v13 = vadd.f32 %v10681_v42, %v4499_v34  ;;  %v4500_v20 = vmul.f32 %v11441_v58, %v4464_v18  ;;  %v4469_v16 = vmul.f32 %v7687_v30, %v10604_v2 }
 0x86e   : > { %v7691_v3 = vpop.eup %7690  ;;  %7700 = vrsqrt.f32 %v4408_v33  ;;  %v4413_v25 = vadd.f32 1e-05, %v4381_v11  ;;  %v4382_v31 = vmul.f32 0.0625, %v4350_v39  ;;  %v4673_v50 = vsel %vm4061_vm7, %v4605_v57, 0.0 }
 0x86f   : > { %4674 = vadd.xlane.f32.xlu0 %v4673_v50  ;;  %v4341_v27 = vpop.xlane.xlu0 %4340  ;;  %v4606_v7 = vmul.f32 %v10688_v56, %v4570_v55  ;;  %v4567_v14 = vmax.f32 %v4535_v13, 0.0  ;;  %v4536_v29 = vadd.f32 %v10681_v42, %v4500_v20  ;;  %v4505_v47 = vmul.f32 %v11441_v58, %v4469_v16 }
 0x870   : > { %v7693_v26 = vpop.eup %7692  ;;  %7702 = vrsqrt.f32 %v4413_v25  ;;  %v4414_v32 = vadd.f32 1e-05, %v4382_v31  ;;  %v4379_v15 = vmul.f32 0.0625, %v4341_v27  ;;  %v4470_v2 = vmul.f32 %v7689_v22, %v10610_v1 }
 0x871   : > { %v4676_v10 = vsel %vm4061_vm7, %v4606_v7, 0.0  ;;  %v4344_v30 = vpop.xlane.xlu1 %4343  ;;  %v4603_v62 = vmul.f32 %v10688_v56, %v4567_v14  ;;  %v4568_v38 = vmax.f32 %v4536_v29, 0.0  ;;  %v4541_v36 = vadd.f32 %v10681_v42, %v4505_v47 }
 0x872   : > { %v7695_v5 = vpop.eup %7694  ;;  %7704 = vrsqrt.f32 %v4414_v32  ;;  %v4411_v17 = vadd.f32 1e-05, %v4379_v15  ;;  %4677 = vadd.xlane.f32.xlu1 %v4676_v10  ;;  %v4380_v63 = vmul.f32 0.0625, %v4344_v30  ;;  %v4506_v34 = vmul.f32 %v11441_v58, %v4470_v2 }
 0x873   : > { %v4667_v18 = vsel %vm4061_vm7, %v4603_v62, 0.0  ;;  %v4604_v33 = vmul.f32 %v10688_v56, %v4568_v38  ;;  %v4573_v1 = vmax.f32 %v4541_v36, 0.0  ;;  %v4467_v22 = vmul.f32 %v7691_v3, %v10616_v8 }
 0x874   : > { %v7697_v11 = vpop.eup %7696  ;;  %7706 = vrsqrt.f32 %v4411_v17  ;;  %v4412_v57 = vadd.f32 1e-05, %v4380_v63  ;;  %4668 = vadd.xlane.f32.xlu0 %v4667_v18  ;;  %v4542_v39 = vadd.f32 %v10681_v42, %v4506_v34  ;;  %v4468_v55 = vmul.f32 %v7693_v26, %v10622_v35 }
 0x875   : > { %v4670_v13 = vsel %vm4061_vm7, %v4604_v33, 0.0  ;;  %v4609_v20 = vmul.f32 %v10688_v56, %v4573_v1  ;;  %v4503_v16 = vmul.f32 %v11441_v58, %v4467_v22  ;;  %v4473_v25 = vmul.f32 %v7695_v5, %v10628_v48 }
 0x876   : > { %v7699_v31 = vpop.eup %7698  ;;  %7708 = vrsqrt.f32 %v4412_v57  ;;  %4671 = vadd.xlane.f32.xlu1 %v4670_v13  ;;  %v4574_v8 = vmax.f32 %v4542_v39, 0.0  ;;  %v4504_v3 = vmul.f32 %v11441_v58, %v4468_v55  ;;  %v4474_v50 = vmul.f32 %v7697_v11, %v10634_v0 }
 0x877   : > { %v4685_v27 = vsel %vm4061_vm7, %v4609_v20, 0.0  ;;  %v4539_v35 = vadd.f32 %v10681_v42, %v4503_v16  ;;  %v4509_v7 = vmul.f32 %v11441_v58, %v4473_v25  ;;  %v4471_v14 = vmul.f32 %v7699_v31, %v10640_v4 }
 0x878   : > { %v7701_v29 = vpop.eup %7700  ;;  %4686 = vadd.xlane.f32.xlu0 %v4685_v27  ;;  %v4610_v48 = vmul.f32 %v10688_v56, %v4574_v8  ;;  %v4540_v47 = vadd.f32 %v10681_v42, %v4504_v3  ;;  %v4510_v26 = vmul.f32 %v11441_v58, %v4474_v50 }
 0x879   : > { %v4571_v32 = vmax.f32 %v4539_v35, 0.0  ;;  %v4545_v15 = vadd.f32 %v10681_v42, %v4509_v7  ;;  %v4507_v0 = vmul.f32 %v11441_v58, %v4471_v14  ;;  %v4472_v2 = vmul.f32 %v7701_v29, %v10646_v9 }
 0x87a   : > { %v7703_v10 = vpop.eup %7702  ;;  %v4688_v30 = vsel %vm4061_vm7, %v4610_v48, 0.0  ;;  %v4572_v62 = vmax.f32 %v4540_v47, 0.0  ;;  %v4546_v4 = vadd.f32 %v10681_v42, %v4510_v26 }
 0x87b   : > { %4689 = vadd.xlane.f32.xlu1 %v4688_v30  ;;  %v4607_v38 = vmul.f32 %v10688_v56, %v4571_v32  ;;  %v4577_v36 = vmax.f32 %v4545_v15, 0.0  ;;  %v4543_v5 = vadd.f32 %v10681_v42, %v4507_v0  ;;  %v4508_v17 = vmul.f32 %v11441_v58, %v4472_v2 }
 0x87c   : > { %v7705_v63 = vpop.eup %7704  ;;  %v4608_v34 = vmul.f32 %v10688_v56, %v4572_v62  ;;  %v4578_v18 = vmax.f32 %v4546_v4, 0.0  ;;  %v4477_v9 = vmul.f32 %v7703_v10, %v10652_v59 }
 0x87d   : > { %v4679_v33 = vsel %vm4061_vm7, %v4607_v38, 0.0  ;;  %v4613_v1 = vmul.f32 %v10688_v56, %v4577_v36  ;;  %v4575_v22 = vmax.f32 %v4543_v5, 0.0  ;;  %v4544_v11 = vadd.f32 %v10681_v42, %v4508_v17 }
 0x87e   : > { %v7707_v57 = vpop.eup %7706  ;;  %4680 = vadd.xlane.f32.xlu0 %v4679_v33  ;;  %v4682_v39 = vsel %vm4061_vm7, %v4608_v34, 0.0  ;;  %v4614_v55 = vmul.f32 %v10688_v56, %v4578_v18  ;;  %v4513_v13 = vmul.f32 %v11441_v58, %v4477_v9  ;;  %v4478_v20 = vmul.f32 %v7705_v63, %v10658_v12 }
 0x87f   : > { %4683 = vadd.xlane.f32.xlu1 %v4682_v39  ;;  %v4697_v59 = vsel %vm4061_vm7, %v4613_v1, 0.0  ;;  %v4611_v16 = vmul.f32 %v10688_v56, %v4575_v22  ;;  %v4576_v25 = vmax.f32 %v4544_v11, 0.0  ;;  %v4475_v31 = vmul.f32 %v7707_v57, %v10664_v45 }
 0x880   : > { %v7709_v8 = vpop.eup %7708  ;;  %v4700_v3 = vsel %vm4061_vm7, %v4614_v55, 0.0  ;;  %v4549_v50 = vadd.f32 %v10681_v42, %v4513_v13  ;;  %v4514_v27 = vmul.f32 %v11441_v58, %v4478_v20 }
 0x881   : > { %v4612_v35 = vmul.f32 %v10688_v56, %v4576_v25  ;;  %v4511_v7 = vmul.f32 %v11441_v58, %v4475_v31  ;;  %v4476_v12 = vmul.f32 %v7709_v8, %v10670_v19  ;;  %v4691_v45 = vsel %vm4061_vm7, %v4611_v16, 0.0 }
 0x882   : > { %4698 = vadd.xlane.f32.xlu0 %v4697_v59  ;;  %v4581_v14 = vmax.f32 %v4549_v50, 0.0  ;;  %v4550_v29 = vadd.f32 %v10681_v42, %v4514_v27 }
 0x883   : > { %4701 = vadd.xlane.f32.xlu1 %v4700_v3  ;;  %v4547_v48 = vadd.f32 %v10681_v42, %v4511_v7  ;;  %v4512_v47 = vmul.f32 %v11441_v58, %v4476_v12  ;;  %v4694_v26 = vsel %vm4061_vm7, %v4612_v35, 0.0 }
 0x884   : > { %v4617_v32 = vmul.f32 %v10688_v56, %v4581_v14  ;;  %v4582_v15 = vmax.f32 %v4550_v29, 0.0 }
 0x885   : > { %v4579_v0 = vmax.f32 %v4547_v48, 0.0  ;;  %v4548_v19 = vadd.f32 %v10681_v42, %v4512_v47  ;;  %v7748_v42 = vld [vmem:[%s8213_s18] sm:$0x1f] }
 0x886   : > { %4692 = vadd.xlane.f32.xlu0 %v4691_v45  ;;  %v4618_v2 = vmul.f32 %v10688_v56, %v4582_v15  ;;  %v4709_v10 = vsel %vm4061_vm7, %v4617_v32, 0.0  ;;  %v10889_v5 = vrot.slane %v7748_v42, %v9840_v28 }
 0x887   : > { %4695 = vadd.xlane.f32.xlu1 %v4694_v26  ;;  %v4615_v30 = vmul.f32 %v10688_v56, %v4579_v0  ;;  %v4580_v62 = vmax.f32 %v4548_v19, 0.0 }
 0x888   : > { %v4712_v58 = vsel %vm4061_vm7, %v4618_v2, 0.0 }
 0x889   : > { %v4616_v4 = vmul.f32 %v10688_v56, %v4580_v62  ;;  %v4703_v38 = vsel %vm4061_vm7, %v4615_v30, 0.0 }
 0x88a   : > { %4710 = vadd.xlane.f32.xlu0 %v4709_v10 }
 0x88b   : > { %4713 = vadd.xlane.f32.xlu1 %v4712_v58  ;;  %v4706_v36 = vsel %vm4061_vm7, %v4616_v4, 0.0 }
 0x88e   : > { %4704 = vadd.xlane.f32.xlu0 %v4703_v38 }
 0x88f   : > { %4707 = vadd.xlane.f32.xlu1 %v4706_v36 }
 0x8b3   : > { %v4627_v17 = vpop.xlane.xlu0 %4626 }
 0x8b4   : > { %v4721_v63 = vadd.f32 %v10889_v5, %v4627_v17 }
 0x8b6   : > { %4763 = vperm.xlu1 %7396, %v4721_v63   ;;  %v4630_v34 = vpop.xlane.xlu1 %4629 }
 0x8b7   : > { %v4621_v18 = vpop.xlane.xlu0 %4620  ;;  %v4722_v9 = vadd.f32 %v10889_v5, %v4630_v34 }
 0x8b8   : > { %v4719_v56 = vadd.f32 %v10889_v5, %v4621_v18 }
 0x8ba   : > { %4753 = vperm.xlu1 %7396, %v4719_v56   ;;  %v4624_v1 = vpop.xlane.xlu1 %4623 }
 0x8bb   : > { %v4720_v57 = vadd.f32 %v10889_v5, %v4624_v1 }
 0x8bd   : > { %v5504_v33 = vpop.xlane.xlu0 %5503 }
 0x8be   : > { %v5517_v22 = vmul.f32 0.0078125, %v5504_v33  ;;  %4768 = vperm.xlu1 %7396, %v4722_v9  }
 0x8bf   : > { %v5506_v59 = vpop.xlane.xlu1 %5505 }
 0x8c0   : > { %v10895_v11 = vsub.f32 %v10726_v53, %v5517_v22  ;;  %v5518_v7 = vmul.f32 0.0078125, %v5506_v59 }
 0x8c1   : > { %v5500_v39 = vpop.xlane.xlu0 %5499 }
 0x8c2   : > { %v5533_v55 = vmul.f32 %v10895_v11, %v10895_v11  ;;  %4758 = vperm.xlu1 %7396, %v4720_v57   ;;  %v5515_v35 = vmul.f32 0.0078125, %v5500_v39  ;;  %v10910_v29 = vsub.f32 %v10730_v49, %v5518_v7 }
 0x8c3   : > { %v5502_v31 = vpop.xlane.xlu1 %5501 }
 0x8c4   : > { %5543 = vadd.xlane.f32.xlu0 %v5533_v55  ;;  %v10907_v12 = vsub.f32 %v10735_v6, %v5515_v35  ;;  %v5534_v26 = vmul.f32 %v10910_v29, %v10910_v29  ;;  %v5516_v32 = vmul.f32 0.0078125, %v5502_v31 }
 0x8c5   : > { %v4639_v13 = vpop.xlane.xlu0 %4638 }
 0x8c6   : > { %v4725_v20 = vadd.f32 %v10889_v5, %v4639_v13  ;;  %v5531_v45 = vmul.f32 %v10907_v12, %v10907_v12  ;;  %v10919_v6 = vsub.f32 %v10741_v51, %v5516_v32 }
 0x8c7   : > { %v4642_v53 = vpop.xlane.xlu1 %4641 }
 0x8c8   : > { %4783 = vperm.xlu1 %7396, %v4725_v20   ;;  %v4726_v8 = vadd.f32 %v10889_v5, %v4642_v53  ;;  %v5532_v49 = vmul.f32 %v10919_v6, %v10919_v6 }
 0x8c9   : > { %v4633_v16 = vpop.xlane.xlu0 %4632 }
 0x8ca   : > { %v4723_v25 = vadd.f32 %v10889_v5, %v4633_v16 }
 0x8cb   : > { %v4636_v3 = vpop.xlane.xlu1 %4635 }
 0x8cc   : > { %4773 = vperm.xlu1 %7396, %v4723_v25   ;;  %v4724_v50 = vadd.f32 %v10889_v5, %v4636_v3 }
 0x8cd   : > { %v10904_v27 = vpop.xlane.xlu0 %5511 }
 0x8cf   : > { %v10914_v48 = vpop.xlane.xlu1 %5513 }
 0x8d1   : > { %v5508_v14 = vpop.xlane.xlu0 %5507 }
 0x8d2   : > { %v5519_v59 = vmul.f32 0.0078125, %v5508_v14 }
 0x8d3   : > { %v5510_v15 = vpop.xlane.xlu1 %5509 }
 0x8d4   : > { %v10936_v31 = vsub.f32 %v10771_v24, %v5519_v59  ;;  %v5520_v32 = vmul.f32 0.0078125, %v5510_v15 }
 0x8d5   : > { %v4651_v47 = vpop.xlane.xlu0 %4650 }
 0x8d6   : > { %v4729_v62 = vadd.f32 %v10889_v5, %v4651_v47  ;;  %v5535_v3 = vmul.f32 %v10936_v31, %v10936_v31 }
 0x8d7   : > { %v4654_v2 = vpop.xlane.xlu1 %4653 }
 0x8d8   : > { %v4730_v63 = vadd.f32 %v10889_v5, %v4654_v2 }
 0x8d9   : > { %v4645_v0 = vpop.xlane.xlu0 %4644 }
 0x8da   : > { %4788 = vperm.xlu0 %7397, %v4726_v8   ;;  %v4727_v38 = vadd.f32 %v10889_v5, %v4645_v0 }
 0x8db   : > { %v4648_v30 = vpop.xlane.xlu1 %4647 }
 0x8de   : > { %4778 = vperm.xlu0 %7397, %v4724_v50  }
 0x8f0   : > { %5539 = vadd.xlane.f32.xlu1 %v5531_v45  ;;  %v4728_v45 = vadd.f32 %v10889_v5, %v4648_v30 }
 0x8f3   : > { %v4663_v19 = vpop.xlane.xlu0 %4662 }
 0x8f4   : > { %5545 = vadd.xlane.f32.xlu1 %v5534_v26  ;;  %v4733_v36 = vadd.f32 %v10889_v5, %v4663_v19 }
 0x8f5   : > { %v4666_v58 = vpop.xlane.xlu1 %4665 }
 0x8f6   : > { %v4734_v24 = vadd.f32 %v10889_v5, %v4666_v58 }
 0x8f7   : > { %v4657_v10 = vpop.xlane.xlu0 %4656 }
 0x8f8   : > { %v4731_v17 = vadd.f32 %v10889_v5, %v4657_v10  ;;  %v5522_v10 = vmul.f32 0.0078125, %v10914_v48 }
 0x8f9   : > { %v4660_v51 = vpop.xlane.xlu1 %4659 }
 0x8fa   : > { %v4732_v26 = vadd.f32 %v10889_v5, %v4660_v51 }
 0x8fc   : > { %v4675_v4 = vpop.xlane.xlu0 %4674 }
 0x8fd   : > { %5541 = vadd.xlane.f32.xlu0 %v5532_v49  ;;  %v4737_v56 = vadd.f32 %v10889_v5, %v4675_v4  ;;  %v10952_v4 = vsub.f32 %v10766_v60, %v5522_v10 }
 0x8ff   : > { %v4678_v34 = vpop.xlane.xlu1 %4677 }
 0x900   : > { %v4738_v9 = vadd.f32 %v10889_v5, %v4678_v34 }
 0x901   : > { %v4669_v42 = vpop.xlane.xlu0 %4668 }
 0x902   : > { %v4735_v49 = vadd.f32 %v10889_v5, %v4669_v42  ;;  %v11443_v42 = vld [vmem:[#allocation34_spill] sm:$0xff] }
 0x903   : > { %v4672_v33 = vpop.xlane.xlu1 %4671  ;;  %v10964_v60 = vrot.slane %v10703_v21, %v11443_v42 }
 0x904   : > { %v4736_v22 = vadd.f32 %v10889_v5, %v4672_v33 }
 0x905   : > { %4803 = vperm.xlu1 %7396, %v4729_v62   ;;  %v4687_v18 = vpop.xlane.xlu0 %4686  ;;  %v10948_v62 = vsub.f32 %v10776_v52, %v5520_v32  ;;  %v5538_v52 = vmul.f32 %v10952_v4, %v10952_v4 }
 0x906   : > { %v4741_v39 = vadd.f32 %v10889_v5, %v4687_v18 }
 0x908   : > { %v4690_v35 = vpop.xlane.xlu1 %4689 }
 0x909   : > { %4793 = vperm.xlu1 %7396, %v4727_v38   ;;  %v4742_v58 = vadd.f32 %v10889_v5, %v4690_v35  ;;  %v5536_v38 = vmul.f32 %v10948_v62, %v10948_v62 }
 0x90b   : > { %v4681_v1 = vpop.xlane.xlu0 %4680 }
 0x90c   : > { %v4739_v55 = vadd.f32 %v10889_v5, %v4681_v1  ;;  %v4684_v7 = vpop.xlane.xlu1 %4683 }
 0x90d   : > { %4823 = vperm.xlu1 %7396, %v4733_v36   ;;  %v4740_v36 = vadd.f32 %v10889_v5, %v4684_v7 }
 0x90f   : > { %v4699_v57 = vpop.xlane.xlu0 %4698 }
 0x910   : > { %v4745_v20 = vadd.f32 %v10889_v5, %v4699_v57  ;;  %v4702_v14 = vpop.xlane.xlu1 %4701 }
 0x911   : > { %4813 = vperm.xlu1 %7396, %v4731_v17   ;;  %v4746_v51 = vadd.f32 %v10889_v5, %v4702_v14 }
 0x913   : > { %4808 = vperm.xlu0 %7397, %v4730_v63   ;;  %v4693_v13 = vpop.xlane.xlu0 %4692 }
 0x914   : > { %v4743_v25 = vadd.f32 %v10889_v5, %v4693_v13  ;;  %v4696_v47 = vpop.xlane.xlu1 %4695 }
 0x915   : > { %4843 = vperm.xlu1 %7396, %v4737_v56   ;;  %v4744_v18 = vadd.f32 %v10889_v5, %v4696_v47 }
 0x917   : > { %v4711_v16 = vpop.xlane.xlu0 %4710 }
 0x918   : > { %v4749_v53 = vadd.f32 %v10889_v5, %v4711_v16  ;;  %v4714_v0 = vpop.xlane.xlu1 %4713 }
 0x919   : > { %4848 = vperm.xlu1 %7396, %v4738_v9   ;;  %v4750_v9 = vadd.f32 %v10889_v5, %v4714_v0 }
 0x91b   : > { %v4705_v8 = vpop.xlane.xlu0 %4704 }
 0x91c   : > { %v4747_v50 = vadd.f32 %v10889_v5, %v4705_v8  ;;  %v4708_v15 = vpop.xlane.xlu1 %4707 }
 0x91d   : > { %4838 = vperm.xlu1 %7396, %v4736_v22   ;;  %v4748_v1 = vadd.f32 %v10889_v5, %v4708_v15 }
 0x921   : > { %4863 = vperm.xlu1 %7396, %v4741_v39  }
 0x925   : > { %4853 = vperm.xlu1 %7396, %v4739_v55  }
 0x929   : > { %4883 = vperm.xlu1 %7396, %v4745_v20   ;;  %v5521_v20 = vmul.f32 0.0078125, %v10904_v27 }
 0x92b   : > { %v10983_v5 = vsub.f32 %v10762_v61, %v5521_v20 }
 0x92d   : > { %4873 = vperm.xlu1 %7396, %v4743_v25   ;;  %v5537_v8 = vmul.f32 %v10983_v5, %v10983_v5 }
 0x931   : > { %4903 = vperm.xlu1 %7396, %v4749_v53  }
 0x932   : > { %5547 = vadd.xlane.f32.xlu0 %v5535_v3 }
 0x935   : > { %4893 = vperm.xlu1 %7396, %v4747_v50   ;;  %v10957_v48 = vpop.permute.xlu1 %4763 }
 0x939   : > { %v10966_v63 = vpop.permute.xlu1 %4753 }
 0x93d   : > { %v10972_v33 = vpop.permute.xlu1 %4768 }
 0x941   : > { %v4759_v21 = vpop.permute.xlu1 %4758 }
 0x942   : > { %v4912_v20 = vmul.f32 %v4759_v21, %v8768_v37  ;;  %v11446_v21 = vld [vmem:[#allocation38_spill] sm:$0xff] }
 0x947   : > { %v10975_v22 = vpop.permute.xlu1 %4783 }
 0x948   : > { %4798 = vperm.xlu0 %7397, %v4728_v45   ;;  %v10991_v45 = vld [vmem:[%s11444_s26] sm:$0x3f] }
 0x949   : > { %v10995_v61 = vrot.slane %v10991_v45, %v9727_v23 }
 0x94b   : > { %v10977_v57 = vpop.permute.xlu1 %4773 }
 0x94c   : > { %4828 = vperm.xlu0 %7397, %v4734_v24  }
 0x950   : > { %4818 = vperm.xlu0 %7397, %v4732_v26  }
 0x951   : > { %v5544_v19 = vpop.xlane.xlu0 %5543 }
 0x952   : > { %v5557_v2 = vmul.f32 0.0078125, %v5544_v19 }
 0x954   : > { %v5565_v30 = vadd.f32 1e-05, %v5557_v2  ;;  %4833 = vperm.xlu0 %7397, %v4735_v49  }
 0x956   : > { %7710 = vrsqrt.f32 %v5565_v30 }
 0x958   : > { %4868 = vperm.xlu0 %7397, %v4742_v58  }
 0x959   : > { %5549 = vadd.xlane.f32.xlu1 %v5536_v38  ;;  %v10979_v55 = vpop.permute.xlu0 %4788 }
 0x95c   : > { %4858 = vperm.xlu0 %7397, %v4740_v36  }
 0x95d   : > { %5553 = vadd.xlane.f32.xlu1 %v5538_v52  ;;  %v4779_v53 = vpop.permute.xlu0 %4778 }
 0x960   : > { %v7711_v17 = vpop.eup %7710  ;;  %4888 = vperm.xlu0 %7397, %v4746_v51  }
 0x961   : > { %v5581_v34 = vmul.f32 %v7711_v17, %v10895_v11 }
 0x963   : > { %v5593_v56 = vmul.f32 %v10964_v60, %v5581_v34 }
 0x964   : > { %4878 = vperm.xlu0 %7397, %v4744_v18  }
 0x965   : > { %v5605_v32 = vadd.f32 %v10995_v61, %v5593_v56 }
 0x968   : > { %4908 = vperm.xlu0 %7397, %v4750_v9  }
 0x96c   : > { %4898 = vperm.xlu0 %7397, %v4748_v1  }
 0x97d   : > { %v5540_v39 = vpop.xlane.xlu1 %5539 }
 0x97e   : > { %v5555_v11 = vmul.f32 0.0078125, %v5540_v39 }
 0x980   : > { %v5563_v13 = vadd.f32 1e-05, %v5555_v11 }
 0x981   : > { %v5546_v59 = vpop.xlane.xlu1 %5545 }
 0x982   : > { %7712 = vrsqrt.f32 %v5563_v13  ;;  %v5558_v16 = vmul.f32 0.0078125, %v5546_v59 }
 0x984   : > { %v5566_v25 = vadd.f32 1e-05, %v5558_v16 }
 0x985   : > { %v11007_v38 = vpop.permute.xlu1 %4803 }
 0x986   : > { %7714 = vrsqrt.f32 %v5566_v25 }
 0x989   : > { %v4794_v52 = vpop.permute.xlu1 %4793 }
 0x98a   : > { %v5542_v3 = vpop.xlane.xlu0 %5541 }
 0x98b   : > { %v5556_v50 = vmul.f32 0.0078125, %v5542_v3  ;;  %5551 = vadd.xlane.f32.xlu0 %v5537_v8  ;;  %v4911_v3 = vmul.f32 %v10966_v63, %v8772_v54  ;;  %v11448_v63 = vld [vmem:[#allocation52_spill] sm:$0xff] }
 0x98c   : > { %v7713_v35 = vpop.eup %7712 }
 0x98d   : > { %v5564_v7 = vadd.f32 1e-05, %v5556_v50  ;;  %v5579_v27 = vmul.f32 %v7713_v35, %v10907_v12  ;;  %v5613_v12 = vmax.f32 %v5605_v32, 0.0  ;;  %v11011_v51 = vpop.permute.xlu1 %4823  ;;  %v11449_v32 = vld [vmem:[#allocation53_spill] sm:$0xff] }
 0x98f   : > { %7716 = vrsqrt.f32 %v5564_v7  ;;  %v5591_v14 = vmul.f32 %v10964_v60, %v5579_v27  ;;  %v11445_v7 = vld [vmem:[#allocation37_spill] sm:$0xff] }
 0x990   : > { %v7715_v24 = vpop.eup %7714  ;;  %v4914_v27 = vmul.f32 %v10972_v33, %v11445_v7 }
 0x991   : > { %v5582_v47 = vmul.f32 %v7715_v24, %v10910_v29  ;;  %v5603_v23 = vadd.f32 %v10995_v61, %v5591_v14  ;;  %v11013_v42 = vpop.permute.xlu1 %4813  ;;  %v7253_v14 = vpack.c.bf16 %v4912_v20, %v4911_v3 }
 0x992   : > { %v4809_v34 = vpop.permute.xlu0 %4808 }
 0x993   : > { %v5594_v26 = vmul.f32 %v10964_v60, %v5582_v47  ;;  %v5611_v29 = vmax.f32 %v5603_v23, 0.0 }
 0x995   : > { %v5606_v0 = vadd.f32 %v10995_v61, %v5594_v26  ;;  %v4844_v17 = vpop.permute.xlu1 %4843 }
 0x996   : > { %v4929_v50 = vmul.f32 %v4844_v17, %v8896_v46 }
 0x997   : > { %v5614_v19 = vmax.f32 %v5606_v0, 0.0 }
 0x999   : > { %v7717_v49 = vpop.eup %7716  ;;  %v11001_v2 = vpack.c.bf16 %v5614_v19, %v5613_v12  ;;  %v11450_v12 = vld [vmem:[#allocation51_spill] sm:$0xff]  ;;  %v11451_v19 = vld [vmem:[#allocation40_spill] sm:$0xff] }
 0x99a   : > { %v5580_v10 = vmul.f32 %v7717_v49, %v10919_v6  ;;  %v4849_v6 = vpop.permute.xlu1 %4848  ;;  %v4915_v49 = vmul.f32 %v10977_v57, %v11451_v19  ;;  %v11455_v57 = vld [vmem:[#allocation43_spill] sm:$0xff]  ;;  %v11467_v19 = vld [vmem:[#allocation48_spill] sm:$0xff] }
 0x99b   : > { %v4930_v16 = vmul.f32 %v4849_v6, %v8892_v41  ;;  %v4913_v41 = vmul.f32 %v10957_v48, %v11446_v21  ;;  %v11454_v6 = vld [vmem:[#allocation42_spill] sm:$0xff] }
 0x99c   : > { %v5592_v30 = vmul.f32 %v10964_v60, %v5580_v10 }
 0x99d   : > { %v7255_v37 = vpack.c.bf16 %v4930_v16, %v4929_v50  ;;  %v11458_v50 = vld [vmem:[#allocation55_spill] sm:$0xff] }
 0x99e   : > { %v5604_v58 = vadd.f32 %v10995_v61, %v5592_v30  ;;  %v4839_v56 = vpop.permute.xlu1 %4838  ;;  %v11452_v30 = vld [vmem:[#allocation54_spill] sm:$0xff] }
 0x99f   : > { %v4928_v25 = vmul.f32 %v4839_v56, %v8878_v44  ;;  %v7257_v44 = vpack.c.bf16 %v4914_v27, %v4913_v41  ;;  %v4917_v56 = vmul.f32 %v10975_v22, %v11454_v6  ;;  %v11460_v27 = vld [vmem:[#allocation58_spill] sm:$0xff]  ;;  %v11461_v22 = vld [vmem:[#allocation45_spill] sm:$0xff] }
 0x9a0   : > { %v5612_v15 = vmax.f32 %v5604_v58, 0.0  ;;  %v11453_v58 = vld [vmem:[#allocation41_spill] sm:$0xff] }
 0x9a2   : > { %v11009_v36 = vpack.c.bf16 %v5612_v15, %v5611_v29  ;;  %v4864_v1 = vpop.permute.xlu1 %4863  ;;  %v4918_v29 = vmul.f32 %v10979_v55, %v11453_v58 }
 0x9a3   : > { %v4933_v23 = vmul.f32 %v4864_v1, %v11452_v30 }
 0x9a6   : > { %v4854_v13 = vpop.permute.xlu1 %4853 }
 0x9a7   : > { %v4931_v46 = vmul.f32 %v4854_v13, %v11448_v63  ;;  %v7265_v13 = vpack.c.bf16 %v4918_v29, %v4917_v56  ;;  %v11463_v63 = vld [vmem:[#allocation47_spill] sm:$0xff] }
 0x9aa   : > { %v4884_v24 = vpop.permute.xlu1 %4883 }
 0x9ae   : > { %v4874_v10 = vpop.permute.xlu1 %4873 }
 0x9b2   : > { %v4904_v20 = vpop.permute.xlu1 %4903 }
 0x9bf   : > { %v11015_v18 = vpop.xlane.xlu0 %5547 }
 0x9c0   : > { %v5559_v56 = vmul.f32 0.0078125, %v11015_v18  ;;  %v7753_v18 = vld [vmem:[#allocation4 + $0x28] sm:$0xff] }
 0x9c7   : > { %v4799_v9 = vpop.permute.xlu0 %4798 }
 0x9cb   : > { %v11017_v39 = vpop.permute.xlu0 %4828 }
 0x9cf   : > { %v4819_v11 = vpop.permute.xlu0 %4818 }
 0x9d3   : > { %v4834_v59 = vpop.permute.xlu0 %4833 }
 0x9d4   : > { %v4927_v8 = vmul.f32 %v4834_v59, %v8882_v40  ;;  %v11447_v40 = vld [vmem:[#allocation39_spill] sm:$0xff]  ;;  %v4920_v59 = vmul.f32 %v4799_v9, %v11455_v57  ;;  %v11462_v9 = vld [vmem:[#allocation46_spill] sm:$0xff] }
 0x9d5   : > { %v4916_v26 = vmul.f32 %v4779_v53, %v11447_v40  ;;  %v4921_v40 = vmul.f32 %v11007_v38, %v11462_v9  ;;  %v7750_v57 = vld [vmem:[#allocation4] sm:$0xff]  ;;  %v7760_v9 = vld [vmem:[#allocation4 + $0x50] sm:$0xff] }
 0x9d6   : > { %v7251_v35 = vpack.c.bf16 %v4928_v25, %v4927_v8  ;;  %v11456_v25 = vld [vmem:[#allocation56_spill] sm:$0xff]  ;;  %v11457_v8 = vld [vmem:[#allocation57_spill] sm:$0xff] }
 0x9d7   : > { %v4869_v47 = vpop.permute.xlu0 %4868  ;;  %v7261_v15 = vpack.c.bf16 %v4916_v26, %v4915_v49  ;;  %v4935_v1 = vmul.f32 %v4874_v10, %v11456_v25  ;;  %v4894_v26 = vpop.permute.xlu1 %4893  ;;  %v4923_v49 = vmul.f32 %v11013_v42, %v11467_v19  ;;  %v11468_v10 = vld [vmem:[#allocation62_spill] sm:$0xff]  ;;  %v7449_v25 = vld [vmem:[%s8203_s1 + $0x18] sm:$0xff]  }
 0x9d8   : > { %7252 = vmatprep.subr.bf16.mxu1 %v7251_v35  ;;  %v4934_v0 = vmul.f32 %v4869_v47, %v11449_v32  ;;  %v11459_v35 = vld [vmem:[#allocation44_spill] sm:$0xff]  ;;  %v4941_v38 = vmul.f32 %v4904_v20, %v11468_v10  ;;  %v7446_v42 = vld [vmem:[%s8203_s1] sm:$0xff]   ;;  %v7447_v20 = vld [vmem:[%s8203_s1 + $0x8] sm:$0xff]  }
 0x9d9   : > { %7254 = vmatpush3.bf16.msra.mxu1 %v7253_v14  ;;  %v4919_v7 = vmul.f32 %v4794_v52, %v11459_v35  ;;  %v4937_v14 = vmul.f32 %v4884_v24, %v11460_v27  ;;  %v11464_v32 = vld [vmem:[#allocation60_spill] sm:$0xff]  ;;  %v11465_v24 = vld [vmem:[#allocation61_spill] sm:$0xff]  ;;  %v7757_v35 = vld [vmem:[#allocation4 + $0x48] sm:$0xff] }
 0x9da   : > { %7256 = vmatprep.subr.bf16.mxu1 %v7255_v37  ;;  %v7263_v17 = vpack.c.bf16 %v4934_v0, %v4933_v23  ;;  %v4922_v37 = vmul.f32 %v4809_v34, %v11461_v22  ;;  %v4939_v0 = vmul.f32 %v4894_v26, %v11464_v32  ;;  %v11466_v34 = vld [vmem:[#allocation59_spill] sm:$0xff]  ;;  %v11469_v23 = vld [vmem:[#allocation49_spill] sm:$0xff] }
 0x9db   : > { %v4859_v54 = vpop.permute.xlu0 %4858  ;;  %v7269_v21 = vpack.c.bf16 %v4920_v59, %v4919_v7  ;;  %v7751_v59 = vld [vmem:[#allocation4 + $0x18] sm:$0xff]  ;;  %v7451_v27 = vld [vmem:[%s8203_s1 + $0x28] sm:$0xff]  }
 0x9dc   : > { %v4932_v33 = vmul.f32 %v4859_v54, %v11450_v12  ;;  %v7273_v54 = vpack.c.bf16 %v4922_v37, %v4921_v40  ;;  %v7759_v22 = vld [vmem:[#allocation4 + $0x58] sm:$0xff]  ;;  %v7761_v26 = vld [vmem:[#allocation4 + $0x68] sm:$0xff] }
 0x9dd   : > { %7258 = vmatpush3.bf16.msra.mxu1 %v7257_v44 }
 0x9de   : > { %v7259_v48 = vpack.c.bf16 %v4932_v33, %v4931_v46  ;;  %v4924_v46 = vmul.f32 %v4819_v11, %v11463_v63 }
 0x9df   : > { %v4889_v53 = vpop.permute.xlu0 %4888 }
 0x9e0   : > { %7260 = vmatprep.subr.bf16.mxu1 %v7259_v48  ;;  %v4938_v3 = vmul.f32 %v4889_v53, %v11457_v8  ;;  %v4926_v48 = vmul.f32 %v11017_v39, %v11469_v23  ;;  %v7277_v11 = vpack.c.bf16 %v4924_v46, %v4923_v49  ;;  %v5567_v39 = vadd.f32 1e-05, %v5559_v56  ;;  %v7755_v8 = vld [vmem:[#allocation4 + $0x38] sm:$0xff]  ;;  %v7762_v46 = vld [vmem:[#allocation4 + $0x60] sm:$0xff] }
 0x9e1   : > { %7262 = vmatpush3.bf16.msra.mxu1 %v7261_v15  ;;  %v11470_v15 = vld [vmem:[#allocation50_spill] sm:$0xff] }
 0x9e2   : > { %7264 = vmatprep.subr.bf16.mxu1 %v7263_v17  ;;  %v7271_v44 = vpack.c.bf16 %v4938_v3, %v4937_v14  ;;  %v4925_v53 = vmul.f32 %v11011_v51, %v11470_v15  ;;  %v7448_v51 = vld [vmem:[%s8203_s1 + $0x10] sm:$0xff]   ;;  %v7450_v3 = vld [vmem:[%s8203_s1 + $0x20] sm:$0xff]  }
 0x9e3   : > { %v4879_v16 = vpop.permute.xlu0 %4878 }
 0x9e4   : > { %v4936_v55 = vmul.f32 %v4879_v16, %v11458_v50  ;;  %v7281_v6 = vpack.c.bf16 %v4926_v48, %v4925_v53  ;;  %v7752_v16 = vld [vmem:[#allocation4 + $0x10] sm:$0xff] }
 0x9e5   : > { %7266 = vmatpush3.bf16.msra.mxu1 %v7265_v13 }
 0x9e6   : > { %v7267_v47 = vpack.c.bf16 %v4936_v55, %v4935_v1  ;;  %v5550_v58 = vpop.xlane.xlu1 %5549  ;;  %v7754_v1 = vld [vmem:[#allocation4 + $0x20] sm:$0xff]  ;;  %v7756_v55 = vld [vmem:[#allocation4 + $0x30] sm:$0xff] }
 0x9e7   : > { %v4909_v41 = vpop.permute.xlu0 %4908  ;;  %v5560_v17 = vmul.f32 0.0078125, %v5550_v58 }
 0x9e8   : > { %7268 = vmatprep.subr.bf16.mxu1 %v7267_v47  ;;  %v4942_v12 = vmul.f32 %v4909_v41, %v11465_v24  ;;  %v7758_v47 = vld [vmem:[#allocation4 + $0x40] sm:$0xff]  ;;  %v7452_v41 = vld [vmem:[%s8203_s1 + $0x30] sm:$0xff]  }
 0x9e9   : > { %7270 = vmatpush3.bf16.msra.mxu1 %v7269_v21  ;;  %v5568_v13 = vadd.f32 1e-05, %v5560_v17  ;;  %v7764_v24 = vld [vmem:[#allocation4 + $0x70] sm:$0xff] }
 0x9ea   : > { %7272 = vmatprep.subr.bf16.mxu1 %v7271_v44  ;;  %v7279_v29 = vpack.c.bf16 %v4942_v12, %v4941_v38  ;;  %v5554_v21 = vpop.xlane.xlu1 %5553 }
 0x9eb   : > { %v4899_v52 = vpop.permute.xlu0 %4898  ;;  %7718 = vrsqrt.f32 %v5568_v13  ;;  %v5562_v40 = vmul.f32 0.0078125, %v5554_v21 }
 0x9ec   : > { %v4940_v33 = vmul.f32 %v4899_v52, %v11466_v34  ;;  %7720 = vrsqrt.f32 %v5567_v39  ;;  %v7763_v52 = vld [vmem:[#allocation4 + $0x78] sm:$0xff] }
 0x9ed   : > { %7274 = vmatpush3.bf16.msra.mxu1 %v7273_v54  ;;  %v7453_v54 = vld [vmem:[%s8203_s1 + $0x38] sm:$0xff]   ;;  %s11472_s1 = smov %s11471_s21 }
 0x9ee   : > { %v7275_v30 = vpack.c.bf16 %v4940_v33, %v4939_v0 }
 0x9f0   : > { %7276 = vmatprep.subr.bf16.mxu1 %v7275_v30 }
 0x9f1   : > { %7278 = vmatpush3.bf16.msra.mxu1 %v7277_v11 }
 0x9f2   : > { %7280 = vmatprep.subr.bf16.mxu1 %v7279_v29 }
 0x9f5   : > { %7282 = vmatpush3.bf16.msra.mxu1 %v7281_v6  ;;  %v7719_v50 = vpop.eup %7718 }
 0x9f6   : > { %7131 = vmatprep.subr.bf16.mxu1 %v7446_v42  ;;  %v7721_v7 = vpop.eup %7720  ;;  %v5584_v14 = vmul.f32 %v7719_v50, %v10948_v62 }
 0x9f7   : > { %v5583_v37 = vmul.f32 %v7721_v7, %v10936_v31  ;;  %v5570_v31 = vadd.f32 1e-05, %v5562_v40 }
 0x9f8   : > { %5129 = vmatmul.mubr.f32.vlgmr.msra.gmra.mrb[112].mxu1 %v7750_v57  ;;  %v5596_v44 = vmul.f32 %v10964_v60, %v5584_v14 }
 0x9f9   : > { %7132 = vmatpush3.bf16.msra.mxu1 %v7446_v42  ;;  %5133 = vmatprep.mubr.f32.mxu1 %v7751_v59  ;;  %v5595_v62 = vmul.f32 %v10964_v60, %v5583_v37  ;;  %7722 = vrsqrt.f32 %v5570_v31  ;;  %v5170_v31 = vld [vmem:[%s11471_s21 + $0x8] sm:$0xff] }
 0x9fa   : > { %7133 = vmatprep.subr.bf16.mxu1 %v7447_v20  ;;  %v5608_v63 = vadd.f32 %v10995_v61, %v5596_v44 }
 0x9fb   : > { %v5607_v32 = vadd.f32 %v10995_v61, %v5595_v62 }
 0x9fc   : > { %5134 = vmatmul.mubr.f32.gmra.mrb[114].mxu1 %v7752_v16  ;;  %v5616_v0 = vmax.f32 %v5608_v63, 0.0 }
 0x9fd   : > { %7134 = vmatpush3.bf16.msra.mxu1 %v7447_v20  ;;  %5138 = vmatprep.mubr.f32.mxu1 %v7753_v18  ;;  %v5615_v12 = vmax.f32 %v5607_v32, 0.0  ;;  %v5169_v32 = vld [vmem:[%s11472_s1] sm:$0xff] }
 0x9fe   : > { %7135 = vmatprep.subr.bf16.mxu1 %v7448_v51 }
 0x9ff   : > { %v5621_v34 = vpack.c.bf16 %v5616_v0, %v5615_v12  ;;  %v5173_v0 = vld [vmem:[%s11472_s1 + $0x20] sm:$0xff]  ;;  %v5174_v12 = vld [vmem:[%s11472_s1 + $0x28] sm:$0xff] }
 0xa00   : > { %5139 = vmatmul.mubr.f32.gmra.mrb[116].mxu1 %v7754_v1 }
 0xa01   : > { %7136 = vmatpush3.bf16.msra.mxu1 %v7448_v51  ;;  %5143 = vmatprep.mubr.f32.mxu1 %v7755_v8 }
 0xa02   : > { %7137 = vmatprep.subr.bf16.mxu1 %v7449_v25 }
 0xa03   : > { %v7723_v10 = vpop.eup %7722 }
 0xa04   : > { %5144 = vmatmul.mubr.f32.gmra.mrb[118].mxu1 %v7756_v55  ;;  %v5586_v38 = vmul.f32 %v7723_v10, %v10952_v4 }
 0xa05   : > { %7138 = vmatpush3.bf16.msra.mxu1 %v7449_v25  ;;  %5148 = vmatprep.mubr.f32.mxu1 %v7757_v35  ;;  %v5642_v35 = vrot.slane %v10991_v45, %v9730_v43 }
 0xa06   : > { %7139 = vmatprep.subr.bf16.mxu1 %v7450_v3  ;;  %v5598_v30 = vmul.f32 %v10964_v60, %v5586_v38 }
 0xa08   : > { %5149 = vmatmul.mubr.f32.gmra.mrb[120].mxu1 %v7758_v47 }
 0xa09   : > { %7140 = vmatpush3.bf16.msra.mxu1 %v7450_v3  ;;  %5153 = vmatprep.mubr.f32.mxu1 %v7759_v22 }
 0xa0a   : > { %7141 = vmatprep.subr.bf16.mxu1 %v7451_v27 }
 0xa0c   : > { %5154 = vmatmul.mubr.f32.gmra.mrb[122].mxu1 %v7760_v9 }
 0xa0d   : > { %7142 = vmatpush3.bf16.msra.mxu1 %v7451_v27  ;;  %5158 = vmatprep.mubr.f32.mxu1 %v7761_v26 }
 0xa0e   : > { %7143 = vmatprep.subr.bf16.mxu1 %v7452_v41 }
 0xa10   : > { %5159 = vmatmul.mubr.f32.gmra.mrb[124].mxu1 %v7762_v46 }
 0xa11   : > { %7144 = vmatpush3.bf16.msra.mxu1 %v7452_v41  ;;  %5163 = vmatprep.mubr.f32.mxu1 %v7763_v52  ;;  %v5171_v52 = vld [vmem:[%s11472_s1 + $0x10] sm:$0xff] }
 0xa12   : > { %7145 = vmatprep.subr.bf16.mxu1 %v7453_v54 }
 0xa14   : > { %5164 = vmatmul.mubr.f32.gmra.mrb[126].mxu1 %v7764_v24  ;;  %v5172_v24 = vld [vmem:[%s11472_s1 + $0x18] sm:$0xff] }
 0xa15   : > { %7146 = vmatpush3.bf16.msra.mxu1 %v7453_v54  ;;  %7147 = vmatprep.mubr.bf16.mxu1 %v11009_v36  ;;  %v5610_v36 = vadd.f32 %v10995_v61, %v5598_v30 }
 0xa17   : > { %v5618_v29 = vmax.f32 %v5610_v36, 0.0 }
 0xa18   : > { %7148 = vmatmul.mubr.bf16.vlgmr.msra.gmra.mrb[128].mxu1 %v11001_v2  ;;  %v5552_v33 = vpop.xlane.xlu0 %5551 }
 0xa19   : > { %v5561_v19 = vmul.f32 0.0078125, %v5552_v33  ;;  %7151 = vmatprep.mubr.bf16.mxu1 %v5621_v34 }
 0xa1b   : > { %v5569_v49 = vadd.f32 1e-05, %v5561_v19 }
 0xa1d   : > { %7724 = vrsqrt.f32 %v5569_v49 }
 0xa27   : > { %v7725_v23 = vpop.eup %7724 }
 0xa28   : > { %v5585_v48 = vmul.f32 %v7725_v23, %v10983_v5 }
 0xa2a   : > { %v5597_v11 = vmul.f32 %v10964_v60, %v5585_v48 }
 0xa2c   : > { %v5609_v58 = vadd.f32 %v10995_v61, %v5597_v11 }
 0xa2e   : > { %v5617_v2 = vmax.f32 %v5609_v58, 0.0 }
 0xa30   : > { %v5622_v15 = vpack.c.bf16 %v5618_v29, %v5617_v2 }
 0xa32   : > { %7152 = vmatmul.mubr.bf16.gmra.mrb[132].mxu1 %v5622_v15 }
 0xacb   : > { %v6623_v53 = vpop.f32.mrb[112].mxu1 }
 0xacc   : > { %v6624_v17 = vpop.f32.mrb[113].mxu1 }
 0xacd   : > { %v11084_v42 = vadd.f32 %v6624_v17, %v6623_v53 }
 0xacf   : > { %v6626_v4 = vpop.f32.mrb[114].mxu1 }
 0xad0   : > { %v6627_v6 = vpop.f32.mrb[115].mxu1 }
 0xad1   : > { %v11086_v56 = vadd.f32 %v6627_v6, %v6626_v4 }
 0xad3   : > { %v6629_v13 = vpop.f32.mrb[116].mxu1 }
 0xad4   : > { %v6630_v5 = vpop.f32.mrb[117].mxu1 }
 0xad5   : > { %v11088_v20 = vadd.f32 %v6630_v5, %v6629_v13 }
 0xad7   : > { %v6632_v60 = vpop.f32.mrb[118].mxu1 }
 0xad8   : > { %v6633_v39 = vpop.f32.mrb[119].mxu1 }
 0xad9   : > { %v11090_v57 = vadd.f32 %v6633_v39, %v6632_v60 }
 0xadb   : > { %v6635_v61 = vpop.f32.mrb[120].mxu1 }
 0xadc   : > { %v6636_v59 = vpop.f32.mrb[121].mxu1 }
 0xadd   : > { %v11092_v51 = vadd.f32 %v6636_v59, %v6635_v61 }
 0xadf   : > { %v6638_v16 = vpop.f32.mrb[122].mxu1 }
 0xae0   : > { %v6639_v18 = vpop.f32.mrb[123].mxu1 }
 0xae1   : > { %v11094_v25 = vadd.f32 %v6639_v18, %v6638_v16 }
 0xae3   : > { %v6641_v1 = vpop.f32.mrb[124].mxu1 }
 0xae4   : > { %v6642_v8 = vpop.f32.mrb[125].mxu1 }
 0xae5   : > { %v11096_v3 = vadd.f32 %v6642_v8, %v6641_v1 }
 0xae7   : > { %v6644_v50 = vpop.f32.mrb[126].mxu1 }
 0xae8   : > { %v6645_v55 = vpop.f32.mrb[127].mxu1 }
 0xae9   : > { %v11100_v7 = vadd.f32 %v6645_v55, %v6644_v50 }
 0xaeb   : > { %v7149_v27 = vpop.f32.mrb[128].mxu1 }
 0xaec   : > { %v5734_v14 = vadd.f32 %v7149_v27, %v5642_v35  ;;  %v5725_v47 = vpop.f32.mrb[129].mxu1 }
 0xaed   : > { %v7150_v22 = vpop.f32.mrb[130].mxu1  ;;  %v5726_v41 = vadd.f32 %v5725_v47, %v5642_v35 }
 0xaee   : > { %v5737_v37 = vadd.f32 %v7150_v22, %v5642_v35  ;;  %5760 = vadd.xlane.f32.xlu0 %v5734_v14  ;;  %v5728_v21 = vpop.f32.mrb[131].mxu1 }
 0xaef   : > { %v5729_v44 = vadd.f32 %v5728_v21, %v5642_v35 }
 0xaf0   : > { %5762 = vadd.xlane.f32.xlu1 %v5737_v37 }
 0xaf2   : > { %5756 = vadd.xlane.f32.xlu0 %v5726_v41 }
 0xaf4   : > { %5758 = vadd.xlane.f32.xlu1 %v5729_v44 }
 0xb05   : > { %v7153_v9 = vpop.f32.mrb[132].mxu1 }
 0xb06   : > { %v5741_v40 = vpop.f32.mrb[133].mxu1  ;;  %v5750_v63 = vadd.f32 %v7153_v9, %v5642_v35 }
 0xb07   : > { %v5742_v26 = vadd.f32 %v5741_v40, %v5642_v35  ;;  %v7154_v62 = vpop.f32.mrb[134].mxu1  ;;  %v7767_v40 = vld [vmem:[#allocation3 + $0x10] sm:$0xff] }
 0xb08   : > { %v5753_v54 = vadd.f32 %v7154_v62, %v5642_v35  ;;  %v5744_v43 = vpop.f32.mrb[135].mxu1 }
 0xb09   : > { %5764 = vadd.xlane.f32.xlu0 %v5742_v26  ;;  %v5745_v46 = vadd.f32 %v5744_v43, %v5642_v35  ;;  %v7768_v43 = vld [vmem:[#allocation3 + $0x18] sm:$0xff] }
 0xb0a   : > { %5770 = vadd.xlane.f32.xlu1 %v5753_v54 }
 0xb0d   : > { %5768 = vadd.xlane.f32.xlu0 %v5750_v63 }
 0xb0e   : > { %5766 = vadd.xlane.f32.xlu1 %v5745_v46 }
 0xb1f   : > { %5184 = vperm.xlu1 %7396, %v5170_v31  }
 0xb23   : > { %5189 = vperm.xlu1 %7396, %v5171_v52   ;;  %5179 = vperm.xlu0 %7397, %v5169_v32  }
 0xb27   : > { %5199 = vperm.xlu1 %7396, %v5173_v0   ;;  %5194 = vperm.xlu0 %7397, %v5172_v24   ;;  %v5176_v0 = vld [vmem:[%s11472_s1 + $0x38] sm:$0xff] }
 0xb2b   : > { %5204 = vperm.xlu0 %7397, %v5174_v12  }
 0xb7b   : > { %v5761_v34 = vpop.xlane.xlu0 %5760 }
 0xb7c   : > { %v5774_v33 = vmul.f32 0.0078125, %v5761_v34 }
 0xb7d   : > { %v5763_v19 = vpop.xlane.xlu1 %5762 }
 0xb7e   : > { %v11120_v49 = vsub.f32 %v5734_v14, %v5774_v33  ;;  %v5775_v10 = vmul.f32 0.0078125, %v5763_v19  ;;  %v7765_v14 = vld [vmem:[#allocation3 + $0x8] sm:$0xff] }
 0xb7f   : > { %v5757_v38 = vpop.xlane.xlu0 %5756 }
 0xb80   : > { %v11122_v30 = vsub.f32 %v5737_v37, %v5775_v10  ;;  %v5772_v23 = vmul.f32 0.0078125, %v5757_v38  ;;  %v5790_v48 = vmul.f32 %v11120_v49, %v11120_v49 }
 0xb81   : > { %v5759_v11 = vpop.xlane.xlu1 %5758 }
 0xb82   : > { %v11126_v36 = vsub.f32 %v5726_v41, %v5772_v23  ;;  %v5773_v58 = vmul.f32 0.0078125, %v5759_v11  ;;  %5800 = vadd.xlane.f32.xlu0 %v5790_v48  ;;  %v5791_v2 = vmul.f32 %v11122_v30, %v11122_v30 }
 0xb84   : > { %v11130_v29 = vsub.f32 %v5729_v44, %v5773_v58  ;;  %5802 = vadd.xlane.f32.xlu1 %v5791_v2  ;;  %v5788_v15 = vmul.f32 %v11126_v36, %v11126_v36  ;;  %v7766_v44 = vld [vmem:[#allocation3] sm:$0xff] }
 0xb86   : > { %5796 = vadd.xlane.f32.xlu0 %v5788_v15  ;;  %v5789_v53 = vmul.f32 %v11130_v29, %v11130_v29  ;;  %v11196_v15 = vrot.slane %v10991_v45, %v9840_v28 }
 0xb88   : > { %5798 = vadd.xlane.f32.xlu1 %v5789_v53 }
 0xb96   : > { %v5765_v17 = vpop.xlane.xlu0 %5764 }
 0xb97   : > { %v5771_v4 = vpop.xlane.xlu1 %5770  ;;  %v5776_v60 = vmul.f32 0.0078125, %v5765_v17  ;;  %v11474_v17 = vld [vmem:[#allocation32_spill] sm:$0xff] }
 0xb98   : > { %v5779_v6 = vmul.f32 0.0078125, %v5771_v4  ;;  %v11475_v4 = vsub.s32 5, %v11474_v17 }
 0xb99   : > { %v11144_v8 = vsub.f32 %v5742_v26, %v5776_v60 }
 0xb9a   : > { %v11136_v13 = vsub.f32 %v5753_v54, %v5779_v6  ;;  %v5769_v5 = vpop.xlane.xlu0 %5768  ;;  %v11201_v6 = vrot.slane %v10991_v45, %v11475_v4 }
 0xb9b   : > { %v5778_v39 = vmul.f32 0.0078125, %v5769_v5  ;;  %v5767_v61 = vpop.xlane.xlu1 %5766  ;;  %v5792_v41 = vmul.f32 %v11144_v8, %v11144_v8 }
 0xb9c   : > { %v5777_v59 = vmul.f32 0.0078125, %v5767_v61  ;;  %v5795_v16 = vmul.f32 %v11136_v13, %v11136_v13 }
 0xb9d   : > { %v11140_v18 = vsub.f32 %v5750_v63, %v5778_v39 }
 0xb9e   : > { %v11142_v1 = vsub.f32 %v5745_v46, %v5777_v59  ;;  %5810 = vadd.xlane.f32.xlu1 %v5795_v16  ;;  %v7769_v46 = vld [vmem:[#allocation3 + $0x20] sm:$0xff] }
 0xb9f   : > { %v5185_v50 = vpop.permute.xlu1 %5184  ;;  %v5794_v55 = vmul.f32 %v11140_v18, %v11140_v18 }
 0xba0   : > { %v5218_v35 = vmul.f32 %v11086_v56, %v5185_v50  ;;  %v5793_v27 = vmul.f32 %v11142_v1, %v11142_v1 }
 0xba1   : > { %5808 = vadd.xlane.f32.xlu0 %v5794_v55 }
 0xba2   : > { %v5885_v47 = vadd.f32 %v7765_v14, %v5218_v35  ;;  %5806 = vadd.xlane.f32.xlu1 %v5793_v27  ;;  %v5180_v22 = vpop.permute.xlu0 %5179  ;;  %v7771_v14 = vld [vmem:[#allocation2 + $0x10] sm:$0xff] }
 0xba3   : > { %v5217_v37 = vmul.f32 %v11084_v42, %v5180_v22  ;;  %v5190_v21 = vpop.permute.xlu1 %5189 }
 0xba4   : > { %5901 = vst.msk [vmem:[#allocation3 + $0x8] sm:$0xff] %vm1819_vm2, %v5885_v47  ;;  %5909 = vst.msk [vmem:[%s11473_s2 + $0x8] sm:$0xff] %vm1819_vm2, %v5885_v47  ;;  %v5219_v56 = vmul.f32 %v11088_v20, %v5190_v21  ;;  %v7772_v21 = vld [vmem:[#allocation2 + $0x18] sm:$0xff] }
 0xba5   : > { %v5884_v9 = vadd.f32 %v7766_v44, %v5217_v37  ;;  %5804 = vadd.xlane.f32.xlu0 %v5792_v41  ;;  %v7773_v44 = vld [vmem:[#allocation2] sm:$0xff] }
 0xba6   : > { %v5886_v26 = vadd.f32 %v7767_v40, %v5219_v56  ;;  %v5195_v62 = vpop.permute.xlu0 %5194 }
 0xba7   : > { %5900 = vst.msk [vmem:[#allocation3] sm:$0xff] %vm1819_vm2, %v5884_v9  ;;  %5908 = vst.msk [vmem:[%s11473_s2] sm:$0xff] %vm1819_vm2, %v5884_v9  ;;  %v5220_v42 = vmul.f32 %v11090_v57, %v5195_v62  ;;  %v5200_v54 = vpop.permute.xlu1 %5199 }
 0xba8   : > { %5902 = vst.msk [vmem:[#allocation3 + $0x10] sm:$0xff] %vm1819_vm2, %v5886_v26  ;;  %5910 = vst.msk [vmem:[%s11473_s2 + $0x10] sm:$0xff] %vm1819_vm2, %v5886_v26  ;;  %v5221_v20 = vmul.f32 %v11092_v51, %v5200_v54  ;;  %v7770_v51 = vld [vmem:[#allocation3 + $0x28] sm:$0xff] }
 0xba9   : > { %v5887_v63 = vadd.f32 %v7768_v43, %v5220_v42 }
 0xbaa   : > { %v5888_v31 = vadd.f32 %v7769_v46, %v5221_v20  ;;  %v5205_v52 = vpop.permute.xlu0 %5204 }
 0xbab   : > { %5903 = vst.msk [vmem:[#allocation3 + $0x18] sm:$0xff] %vm1819_vm2, %v5887_v63  ;;  %5911 = vst.msk [vmem:[%s11473_s2 + $0x18] sm:$0xff] %vm1819_vm2, %v5887_v63  ;;  %v5222_v57 = vmul.f32 %v11094_v25, %v5205_v52  ;;  %v5175_v25 = vld [vmem:[%s11472_s1 + $0x30] sm:$0xff] }
 0xbac   : > { %5904 = vst.msk [vmem:[#allocation3 + $0x20] sm:$0xff] %vm1819_vm2, %v5888_v31  ;;  %5912 = vst.msk [vmem:[%s11473_s2 + $0x20] sm:$0xff] %vm1819_vm2, %v5888_v31 }
 0xbad   : > { %v5889_v32 = vadd.f32 %v7770_v51, %v5222_v57 }
 0xbaf   : > { %5905 = vst.msk [vmem:[#allocation3 + $0x28] sm:$0xff] %vm1819_vm2, %v5889_v32  ;;  %5913 = vst.msk [vmem:[%s11473_s2 + $0x28] sm:$0xff] %vm1819_vm2, %v5889_v32 }
 0xbb3   : > { %5209 = vperm.xlu1 %7396, %v5175_v25  }
 0xbbb   : > { %5214 = vperm.xlu0 %7397, %v5176_v0  }
 0xc0f   : > { %v5801_v24 = vpop.xlane.xlu0 %5800 }
 0xc10   : > { %v5814_v12 = vmul.f32 0.0078125, %v5801_v24  ;;  %v7775_v24 = vld [vmem:[#allocation3 + $0x30] sm:$0xff] }
 0xc11   : > { %v5803_v34 = vpop.xlane.xlu1 %5802 }
 0xc12   : > { %v5822_v33 = vadd.f32 1e-05, %v5814_v12  ;;  %v5815_v19 = vmul.f32 0.0078125, %v5803_v34 }
 0xc13   : > { %v5797_v10 = vpop.xlane.xlu0 %5796 }
 0xc14   : > { %7726 = vrsqrt.f32 %v5822_v33  ;;  %v5823_v38 = vadd.f32 1e-05, %v5815_v19  ;;  %v5812_v23 = vmul.f32 0.0078125, %v5797_v10 }
 0xc15   : > { %v5799_v48 = vpop.xlane.xlu1 %5798 }
 0xc16   : > { %7728 = vrsqrt.f32 %v5823_v38  ;;  %v5820_v11 = vadd.f32 1e-05, %v5812_v23  ;;  %v5813_v58 = vmul.f32 0.0078125, %v5799_v48  ;;  %v7776_v23 = vld [vmem:[#allocation3 + $0x38] sm:$0xff] }
 0xc18   : > { %7730 = vrsqrt.f32 %v5820_v11  ;;  %v5821_v2 = vadd.f32 1e-05, %v5813_v58 }
 0xc1a   : > { %7732 = vrsqrt.f32 %v5821_v2 }
 0xc1e   : > { %v7727_v53 = vpop.eup %7726 }
 0xc1f   : > { %v5838_v5 = vmul.f32 %v7727_v53, %v11120_v49 }
 0xc20   : > { %v7729_v60 = vpop.eup %7728 }
 0xc21   : > { %v5850_v39 = vmul.f32 %v11196_v15, %v5838_v5  ;;  %v5839_v61 = vmul.f32 %v7729_v60, %v11122_v30  ;;  %v7777_v60 = vld [vmem:[#allocation2 + $0x38] sm:$0xff] }
 0xc22   : > { %v7731_v59 = vpop.eup %7730 }
 0xc23   : > { %v5862_v16 = vadd.f32 %v11201_v6, %v5850_v39  ;;  %v5851_v50 = vmul.f32 %v11196_v15, %v5839_v61  ;;  %v5836_v28 = vmul.f32 %v7731_v59, %v11126_v36 }
 0xc24   : > { %v7733_v55 = vpop.eup %7732 }
 0xc25   : > { %v5870_v35 = vmax.f32 %v5862_v16, 0.0  ;;  %v5863_v27 = vadd.f32 %v11201_v6, %v5851_v50  ;;  %v5848_v45 = vmul.f32 %v11196_v15, %v5836_v28  ;;  %v5837_v49 = vmul.f32 %v7733_v55, %v11130_v29  ;;  %v7774_v29 = vld [vmem:[#allocation2 + $0x8] sm:$0xff]  ;;  %v7778_v50 = vld [vmem:[#allocation2 + $0x30] sm:$0xff] }
 0xc27   : > { %v5878_v47 = vadd.f32 %v7771_v14, %v5870_v35  ;;  %v5871_v22 = vmax.f32 %v5863_v27, 0.0  ;;  %v5860_v30 = vadd.f32 %v11201_v6, %v5848_v45  ;;  %v5849_v37 = vmul.f32 %v11196_v15, %v5837_v49  ;;  %v7779_v35 = vld [vmem:[#allocation2 + $0x28] sm:$0xff]  ;;  %v7780_v49 = vld [vmem:[#allocation2 + $0x20] sm:$0xff] }
 0xc29   : > { %5894 = vst [vmem:[#allocation2 + $0x10] sm:$0xff] %v5878_v47  ;;  %v5879_v41 = vadd.f32 %v7772_v21, %v5871_v22  ;;  %v5868_v56 = vmax.f32 %v5860_v30, 0.0  ;;  %v5861_v36 = vadd.f32 %v11201_v6, %v5849_v37 }
 0xc2b   : > { %5895 = vst [vmem:[#allocation2 + $0x18] sm:$0xff] %v5879_v41  ;;  %v5876_v9 = vadd.f32 %v7773_v44, %v5868_v56  ;;  %v5869_v40 = vmax.f32 %v5861_v36, 0.0  ;;  %v5811_v26 = vpop.xlane.xlu1 %5810 }
 0xc2c   : > { %v5819_v62 = vmul.f32 0.0078125, %v5811_v26 }
 0xc2d   : > { %5892 = vst [vmem:[#allocation2] sm:$0xff] %v5876_v9  ;;  %v5877_v42 = vadd.f32 %v7774_v29, %v5869_v40 }
 0xc2e   : > { %v5827_v54 = vadd.f32 1e-05, %v5819_v62  ;;  %v5809_v20 = vpop.xlane.xlu0 %5808 }
 0xc2f   : > { %5893 = vst [vmem:[#allocation2 + $0x8] sm:$0xff] %v5877_v42  ;;  %v5818_v43 = vmul.f32 0.0078125, %v5809_v20  ;;  %v5807_v63 = vpop.xlane.xlu1 %5806 }
 0xc30   : > { %7734 = vrsqrt.f32 %v5827_v54  ;;  %v5817_v46 = vmul.f32 0.0078125, %v5807_v63 }
 0xc31   : > { %v5826_v31 = vadd.f32 1e-05, %v5818_v43 }
 0xc32   : > { %v5825_v52 = vadd.f32 1e-05, %v5817_v46  ;;  %v5805_v57 = vpop.xlane.xlu0 %5804 }
 0xc33   : > { %7736 = vrsqrt.f32 %v5826_v31  ;;  %v5816_v51 = vmul.f32 0.0078125, %v5805_v57  ;;  %v5210_v32 = vpop.permute.xlu1 %5209 }
 0xc34   : > { %7738 = vrsqrt.f32 %v5825_v52  ;;  %v5223_v25 = vmul.f32 %v11096_v3, %v5210_v32 }
 0xc35   : > { %v5824_v0 = vadd.f32 1e-05, %v5816_v51 }
 0xc36   : > { %v5890_v12 = vadd.f32 %v7775_v24, %v5223_v25 }
 0xc37   : > { %7740 = vrsqrt.f32 %v5824_v0 }
 0xc38   : > { %5906 = vst.msk [vmem:[#allocation3 + $0x30] sm:$0xff] %vm1819_vm2, %v5890_v12  ;;  %5914 = vst.msk [vmem:[%s11473_s2 + $0x30] sm:$0xff] %vm1819_vm2, %v5890_v12 }
 0xc3a   : > { %v7735_v34 = vpop.eup %7734  ;;  %v5215_v33 = vpop.permute.xlu0 %5214 }
 0xc3b   : > { %v5843_v19 = vmul.f32 %v7735_v34, %v11136_v13  ;;  %v5224_v10 = vmul.f32 %v11100_v7, %v5215_v33 }
 0xc3d   : > { %v7737_v38 = vpop.eup %7736  ;;  %v5855_v3 = vmul.f32 %v11196_v15, %v5843_v19  ;;  %v5891_v48 = vadd.f32 %v7776_v23, %v5224_v10 }
 0xc3e   : > { %v7739_v11 = vpop.eup %7738  ;;  %v5842_v58 = vmul.f32 %v7737_v38, %v11140_v18 }
 0xc3f   : > { %v5867_v2 = vadd.f32 %v11201_v6, %v5855_v3  ;;  %v5841_v53 = vmul.f32 %v7739_v11, %v11142_v1  ;;  %5907 = vst.msk [vmem:[#allocation3 + $0x38] sm:$0xff] %vm1819_vm2, %v5891_v48  ;;  %5915 = vst.msk [vmem:[%s11473_s2 + $0x38] sm:$0xff] %vm1819_vm2, %v5891_v48 }
 0xc40   : > { %v5854_v7 = vmul.f32 %v11196_v15, %v5842_v58 }
 0xc41   : > { %v7741_v13 = vpop.eup %7740  ;;  %v5875_v17 = vmax.f32 %v5867_v2, 0.0  ;;  %v5853_v4 = vmul.f32 %v11196_v15, %v5841_v53 }
 0xc42   : > { %v5866_v5 = vadd.f32 %v11201_v6, %v5854_v7  ;;  %v5840_v18 = vmul.f32 %v7741_v13, %v11144_v8 }
 0xc43   : > { %v5883_v39 = vadd.f32 %v7777_v60, %v5875_v17  ;;  %v5865_v1 = vadd.f32 %v11201_v6, %v5853_v4 }
 0xc44   : > { %v5874_v61 = vmax.f32 %v5866_v5, 0.0  ;;  %v5852_v59 = vmul.f32 %v11196_v15, %v5840_v18 }
 0xc45   : > { %5899 = vst [vmem:[#allocation2 + $0x38] sm:$0xff] %v5883_v39  ;;  %v5873_v16 = vmax.f32 %v5865_v1, 0.0 }
 0xc46   : > { %v5882_v28 = vadd.f32 %v7778_v50, %v5874_v61  ;;  %v5864_v55 = vadd.f32 %v11201_v6, %v5852_v59 }
 0xc47   : > { %v5881_v27 = vadd.f32 %v7779_v35, %v5873_v16 }
 0xc48   : > { %5898 = vst [vmem:[#allocation2 + $0x30] sm:$0xff] %v5882_v28  ;;  %v5872_v45 = vmax.f32 %v5864_v55, 0.0 }
 0xc49   : > { %5897 = vst [vmem:[#allocation2 + $0x28] sm:$0xff] %v5881_v27 }
 0xc4a   : > { %v5880_v8 = vadd.f32 %v7780_v49, %v5872_v45 }
 0xc4c   : > { %5896 = vst [vmem:[#allocation2 + $0x20] sm:$0xff] %v5880_v8 }
 0xc4d PF: > { %p25_p4 = scmp.ge.s32.totalorder %s8098_s19, 5   ;;  %s11476_s21 = smov %s7901_s22 }
 0xc4e   : > { %s11477_s22 = smov %s7905_s23  ;;  %s11478_s23 = smov %s8107_s20 }
 0xc4f   : > { %s11479_s24 = smov %s8098_s19  ;;  %27 = sbr.rel (!%p25_p4) target bundleno = 16 (0x10), region = 158 }
 0xc56   :  { %5927 = vsyncpa [#allocation5], 1 }
 0xc57   :  { %5929 = vsyncpa [#allocation5 + $0x1], 1 }
 0xc58   :  { %5930 = vsyncpa [#allocation7], 1 }

</bundles_post_ra>
